<compile_context>
chip_gen: v6e
topology: v6e:2x2x1
jax: 0.10.0
libtpu: 0.0.40
codegen_flags: <defaults>
</compile_context>

<pallas_src>
import numpy as np
import jax
import jax.numpy as jnp
from jax import lax
from jax.experimental import pallas as pl
from jax.experimental.pallas import tpu as pltpu


# --------------------------------------------------------------------------- #
# Static layer configuration (mirrors PatchDiscriminate.__init__).
# --------------------------------------------------------------------------- #
def layer_specs(latent_channels):
    lc = latent_channels
    # (cin, cout, kernel, stride, pad)
    return [
        (6,      lc,     7, 1, 3),
        (lc,     2 * lc, 4, 2, 1),
        (2 * lc, 4 * lc, 4, 2, 1),
        (4 * lc, 4 * lc, 4, 2, 1),
        (4 * lc, 4 * lc, 4, 2, 1),
        (4 * lc, 1,      4, 2, 1),
    ]


def build_metas(specs, height, width):
    """Static per-layer geometry for a given input spatial size."""
    metas = []
    h, w = height, width
    for li, (cin, cout, k, s, p) in enumerate(specs):
        hp, wp = h + 2 * p, w + 2 * p
        oh, ow = (hp - k) // s + 1, (wp - k) // s + 1
        ohf = hp - k + 1                      # output rows if the conv ran at stride 1 along H
        p_next = specs[li + 1][4] if li + 1 < len(specs) else 0
        metas.append(dict(cin=cin, cout=cout, k=k, s=s, p=p, hp=hp, wp=wp,
                          oh=oh, ow=ow, ohf=ohf, p_next=p_next,
                          out_w=(ow + 2 * p_next) * cout))
        h, w = oh, ow
    return metas


# --------------------------------------------------------------------------- #
# Host-side weight repacking (done once per weight set).
# Folds im2col along W, the W-stride and the next layer's zero-pad columns into
# per-kernel-row block-Toeplitz matrices  W_i : (Wp*Cin, (OW+2*p_next)*Cout).
# --------------------------------------------------------------------------- #
def pack_weights(params, metas, compute_dtype=jnp.bfloat16):
    packed = []
    for (w, b, k, s, p), m in zip(params, metas):
        wn = np.asarray(w, np.float32)                       # (cout, cin, kh, kw)
        cin, cout, ow, p_n = m['cin'], m['cout'], m['ow'], m['p_next']
        wm = np.zeros((k, m['wp'] * cin, m['out_w']), np.float32)
        for i in range(k):                                   # kernel row
            for o in range(ow):                              # output column
                col0 = (p_n + o) * cout
                for j in range(k):                           # kernel col
                    q = s * o + j                            # padded input column
                    wm[i, q * cin:(q + 1) * cin, col0:col0 + cout] = wn[:, :, i, j].T
        bt = np.zeros((1, m['out_w']), np.float32)
        bt[0, p_n * cout:(p_n + ow) * cout] = np.tile(np.asarray(b, np.float32), ow)
        packed.append((jnp.asarray(wm, compute_dtype), jnp.asarray(bt, jnp.float32)))
    return packed


# --------------------------------------------------------------------------- #
# Fused Pallas kernel: all 6 conv + bias + ELU layers, one image per grid step.
# --------------------------------------------------------------------------- #
def _elu(x):
    # ELU(alpha=1).  expm1 via tanh identity: exact at 0, no cancellation near 0,
    # uses only exp/tanh (guaranteed Mosaic EUP lowerings).
    xn = jnp.minimum(x, 0.0)
    em1 = jnp.tanh(0.5 * xn) * (jnp.exp(xn) + 1.0)
    return jnp.where(x > 0, x, em1)


def make_fused_kernel(metas):
    n_layers = len(metas)

    def kernel(*refs):
        x_ref = refs[0]                               # (hp0, wp0*cin0) padded input, bf16
        wb = refs[1:1 + 2 * n_layers]                 # (W_stack, bias_tile) per layer
        o_ref = refs[1 + 2 * n_layers]                # (oh_last, out_w_last) f32
        act = refs[2 + 2 * n_layers:]                 # padded activations of layers 2..6

        # Padding border rows must be zero every grid step (interior is overwritten).
        for a in act:
            a[...] = jnp.zeros_like(a)

        src = x_ref                                   # current layer's padded input
        for li, m in enumerate(metas):
            w_ref, b_ref = wb[2 * li], wb[2 * li + 1]
            k, s, oh, ohf = m['k'], m['s'], m['oh'], m['ohf']
            p_n = m['p_next']

            # Implicit-GEMM conv: k contiguous row-shifted bf16 matmuls, f32 accumulate.
            acc = jnp.dot(src[0:ohf, :], w_ref[0],
                          preferred_element_type=jnp.float32)
            for i in range(1, k):
                acc = acc + jnp.dot(src[i:i + ohf, :], w_ref[i],
                                    preferred_element_type=jnp.float32)

            # Bias + ELU in f32 (VPU/EUP); zero-pad columns stay exactly zero.
            act_full = _elu(acc + b_ref[...])          # (ohf, out_w)

            dst = act[li] if li + 1 < n_layers else o_ref
            dvals = act_full.astype(dst.dtype)
            if s == 1:
                dst[p_n:p_n + oh, :] = dvals
            else:
                # H-stride: keep rows 0, s, 2s, ...  (static row slices)
                for t in range(oh):
                    dst[p_n + t:p_n + t + 1, :] = dvals[s * t:s * t + 1, :]
            if li + 1 < n_layers:
                src = dst

    return kernel


# --------------------------------------------------------------------------- #
# Wrapper: NCHW glue + single pallas_call.
# --------------------------------------------------------------------------- #
def patch_discriminate_pallas(img, intensity, packed, metas,
                              compute_dtype=jnp.bfloat16):
    n = img.shape[0]
    m0, ml = metas[0], metas[-1]

    x = jnp.concatenate([img, intensity], axis=1)            # (N, 6, H, W)
    x = jnp.transpose(x, (0, 2, 3, 1))                       # NCHW -> NHWC
    p0 = m0['p']
    x = jnp.pad(x, ((0, 0), (p0, p0), (p0, p0), (0, 0)))     # layer-1 zero pad
    x = x.reshape(n, m0['hp'], m0['wp'] * m0['cin']).astype(compute_dtype)

    in_specs = [pl.BlockSpec((None, m0['hp'], m0['wp'] * m0['cin']),
                             lambda b: (b, 0, 0))]
    args = [x]
    for wm, bt in packed:                                    # weights stay VMEM-resident
        in_specs.append(pl.BlockSpec(wm.shape, lambda b: (0, 0, 0)))
        in_specs.append(pl.BlockSpec(bt.shape, lambda b: (0, 0)))
        args += [wm, bt]

    out = pl.pallas_call(
        make_fused_kernel(metas),
        out_shape=jax.ShapeDtypeStruct((n, ml['oh'], ml['out_w']), jnp.float32),
        grid_spec=pltpu.PrefetchScalarGridSpec(
            num_scalar_prefetch=0,
            grid=(n,),
            in_specs=in_specs,
            out_specs=pl.BlockSpec((None, ml['oh'], ml['out_w']),
                                   lambda b: (b, 0, 0)),
            scratch_shapes=[pltpu.VMEM((m['hp'], m['wp'] * m['cin']), compute_dtype)
                            for m in metas[1:]],
        ),
        compiler_params=pltpu.CompilerParams(
            dimension_semantics=("parallel",)),
    )(*args)

    # (N, OH, OW*Cout) -> NCHW
    return out.reshape(n, ml['oh'], ml['ow'], ml['cout']).transpose(0, 3, 1, 2)


# --------------------------------------------------------------------------- #
# Parameter init (deterministic synthetic weights, exact spectral norm).
# --------------------------------------------------------------------------- #
def init_params(key, latent_channels=8):
    params = []
    for (cin, cout, k, s, p) in layer_specs(latent_channels):
        key, wk, bk = jax.random.split(key, 3)
        w = jax.random.normal(wk, (cout, cin, k, k), jnp.float32) * 0.05
        b = jax.random.normal(bk, (cout,), jnp.float32) * 0.01
        sigma = jnp.linalg.norm(w.reshape(cout, -1), ord=2)  # exact spectral norm
        params.append((w / sigma, b, k, s, p))
    return params


# Pure-JAX reference (lax.conv) replicating the kernel's bf16-operand /
# f32-accumulate / f32 bias+ELU / bf16 inter-layer-storage numerics.
def patch_discriminate_ref(img, intensity, params, compute_dtype=jnp.bfloat16):
    x = jnp.concatenate([img, intensity], axis=1)
    x = x.astype(compute_dtype).astype(jnp.float32)
    for li, (w, b, k, s, p) in enumerate(params):
        wq = w.astype(compute_dtype).astype(jnp.float32)
        y = lax.conv_general_dilated(x, wq, (s, s), ((p, p), (p, p)),
                                     dimension_numbers=("NCHW", "OIHW", "NCHW"))
        y = y + b[None, :, None, None]
        y = jnp.where(y > 0, y, jnp.expm1(y))
        x = y if li == len(params) - 1 else y.astype(compute_dtype).astype(jnp.float32)
    return x


# --------------------------------------------------------------------------- #
if __name__ == "__main__":
    key = jax.random.PRNGKey(0)
    k_params, k_img, k_int = jax.random.split(key, 3)

    latent_channels = 8
    N, H, W = 2, 32, 32     # 5 stride-2 layers: 32 -> 16 -> 8 -> 4 -> 2 -> 1

    params = init_params(k_params, latent_channels)
    metas = build_metas(layer_specs(latent_channels), H, W)
    packed = pack_weights(params, metas)            # one-time host-side repack

    img = jax.random.normal(k_img, (N, 3, H, W), jnp.float32)
    intensity = jax.random.normal(k_int, (N, 3, H, W), jnp.float32)

    fwd = jax.jit(lambda a, b, pk: patch_discriminate_pallas(a, b, pk, metas))
    out = jax.block_until_ready(fwd(img, intensity, packed))
    assert out.shape == (N, 1, 1, 1), out.shape

    ref = jax.block_until_ready(patch_discriminate_ref(img, intensity, params))
    assert ref.shape == out.shape
    assert jnp.allclose(out, ref, rtol=2e-3, atol=1e-4), (out, ref)

    print("KERNEL_OK")
</pallas_src>

<mosaic_0001>
module attributes {stable_mosaic.version = 11 : i64} {
  func.func @kernel(%arg0: i32, %arg1: memref<1x38x228xbf16, #tpu.memory_space<vmem>>, %arg2: memref<7x228x272xbf16, #tpu.memory_space<vmem>>, %arg3: memref<1x272xf32, #tpu.memory_space<vmem>>, %arg4: memref<4x272x288xbf16, #tpu.memory_space<vmem>>, %arg5: memref<1x288xf32, #tpu.memory_space<vmem>>, %arg6: memref<4x288x320xbf16, #tpu.memory_space<vmem>>, %arg7: memref<1x320xf32, #tpu.memory_space<vmem>>, %arg8: memref<4x320x192xbf16, #tpu.memory_space<vmem>>, %arg9: memref<1x192xf32, #tpu.memory_space<vmem>>, %arg10: memref<4x192x128xbf16, #tpu.memory_space<vmem>>, %arg11: memref<1x128xf32, #tpu.memory_space<vmem>>, %arg12: memref<4x128x1xbf16, #tpu.memory_space<vmem>>, %arg13: memref<1x1xf32, #tpu.memory_space<vmem>>, %arg14: memref<1x1x1xf32, #tpu.memory_space<vmem>>, %arg15: memref<34x272xbf16, #tpu.memory_space<vmem>>, %arg16: memref<18x288xbf16, #tpu.memory_space<vmem>>, %arg17: memref<10x320xbf16, #tpu.memory_space<vmem>>, %arg18: memref<6x192xbf16, #tpu.memory_space<vmem>>, %arg19: memref<4x128xbf16, #tpu.memory_space<vmem>>) attributes {dimension_semantics = [#tpu.dimension_semantics<parallel>], iteration_bounds = array<i64: 2>, scalar_prefetch = 0 : i64, scratch_operands = 5 : i64, tpu.core_type = #tpu.core_type<tc>, window_params = [{transform_indices = @transform_0, window_bounds = array<i64: 1, 38, 228>}, {pipeline_mode = #tpu.pipeline_mode<synchronous>, transform_indices = @transform_1, window_bounds = array<i64: 7, 228, 272>}, {pipeline_mode = #tpu.pipeline_mode<synchronous>, transform_indices = @transform_2, window_bounds = array<i64: 1, 272>}, {pipeline_mode = #tpu.pipeline_mode<synchronous>, transform_indices = @transform_3, window_bounds = array<i64: 4, 272, 288>}, {pipeline_mode = #tpu.pipeline_mode<synchronous>, transform_indices = @transform_4, window_bounds = array<i64: 1, 288>}, {pipeline_mode = #tpu.pipeline_mode<synchronous>, transform_indices = @transform_5, window_bounds = array<i64: 4, 288, 320>}, {pipeline_mode = #tpu.pipeline_mode<synchronous>, transform_indices = @transform_6, window_bounds = array<i64: 1, 320>}, {pipeline_mode = #tpu.pipeline_mode<synchronous>, transform_indices = @transform_7, window_bounds = array<i64: 4, 320, 192>}, {pipeline_mode = #tpu.pipeline_mode<synchronous>, transform_indices = @transform_8, window_bounds = array<i64: 1, 192>}, {pipeline_mode = #tpu.pipeline_mode<synchronous>, transform_indices = @transform_9, window_bounds = array<i64: 4, 192, 128>}, {pipeline_mode = #tpu.pipeline_mode<synchronous>, transform_indices = @transform_10, window_bounds = array<i64: 1, 128>}, {pipeline_mode = #tpu.pipeline_mode<synchronous>, transform_indices = @transform_11, window_bounds = array<i64: 4, 128, 1>}, {pipeline_mode = #tpu.pipeline_mode<synchronous>, transform_indices = @transform_12, window_bounds = array<i64: 1, 1>}, {transform_indices = @transform_13, window_bounds = array<i64: 1, 1, 1>}]} {
    %cst = arith.constant 0.000000e+00 : bf16
    %0 = vector.broadcast %cst : bf16 to vector<34x272xbf16>
    %c0 = arith.constant 0 : index
    %c0_0 = arith.constant 0 : index
    %1 = vector.load %arg15[%c0, %c0_0] : memref<34x272xbf16, #tpu.memory_space<vmem>>, vector<34x272xbf16>
    tpu.vector_store %arg15[%c0, %c0_0], %0 {strides = array<i32>} : memref<34x272xbf16, #tpu.memory_space<vmem>>, vector<34x272xbf16>,
    %cst_1 = arith.constant 0.000000e+00 : bf16
    %2 = vector.broadcast %cst_1 : bf16 to vector<18x288xbf16>
    %c0_2 = arith.constant 0 : index
    %c0_3 = arith.constant 0 : index
    %3 = vector.load %arg16[%c0_2, %c0_3] : memref<18x288xbf16, #tpu.memory_space<vmem>>, vector<18x288xbf16>
    tpu.vector_store %arg16[%c0_2, %c0_3], %2 {strides = array<i32>} : memref<18x288xbf16, #tpu.memory_space<vmem>>, vector<18x288xbf16>,
    %cst_4 = arith.constant 0.000000e+00 : bf16
    %4 = vector.broadcast %cst_4 : bf16 to vector<10x320xbf16>
    %c0_5 = arith.constant 0 : index
    %c0_6 = arith.constant 0 : index
    %5 = vector.load %arg17[%c0_5, %c0_6] : memref<10x320xbf16, #tpu.memory_space<vmem>>, vector<10x320xbf16>
    tpu.vector_store %arg17[%c0_5, %c0_6], %4 {strides = array<i32>} : memref<10x320xbf16, #tpu.memory_space<vmem>>, vector<10x320xbf16>,
    %cst_7 = arith.constant 0.000000e+00 : bf16
    %6 = vector.broadcast %cst_7 : bf16 to vector<6x192xbf16>
    %c0_8 = arith.constant 0 : index
    %c0_9 = arith.constant 0 : index
    %7 = vector.load %arg18[%c0_8, %c0_9] : memref<6x192xbf16, #tpu.memory_space<vmem>>, vector<6x192xbf16>
    tpu.vector_store %arg18[%c0_8, %c0_9], %6 {strides = array<i32>} : memref<6x192xbf16, #tpu.memory_space<vmem>>, vector<6x192xbf16>,
    %cst_10 = arith.constant 0.000000e+00 : bf16
    %8 = vector.broadcast %cst_10 : bf16 to vector<4x128xbf16>
    %c0_11 = arith.constant 0 : index
    %c0_12 = arith.constant 0 : index
    %9 = vector.load %arg19[%c0_11, %c0_12] : memref<4x128xbf16, #tpu.memory_space<vmem>>, vector<4x128xbf16>
    tpu.vector_store %arg19[%c0_11, %c0_12], %8 {strides = array<i32>} : memref<4x128xbf16, #tpu.memory_space<vmem>>, vector<4x128xbf16>,
    %c0_13 = arith.constant 0 : index
    %c0_14 = arith.constant 0 : index
    %c0_15 = arith.constant 0 : index
    %10 = vector.load %arg1[%c0_13, %c0_14, %c0_15] : memref<1x38x228xbf16, #tpu.memory_space<vmem>>, vector<1x32x228xbf16>
    %11 = vector.shape_cast %10 : vector<1x32x228xbf16> to vector<32x228xbf16>
    %c0_16 = arith.constant 0 : index
    %c0_17 = arith.constant 0 : index
    %c0_18 = arith.constant 0 : index
    %12 = vector.load %arg2[%c0_16, %c0_17, %c0_18] : memref<7x228x272xbf16, #tpu.memory_space<vmem>>, vector<1x228x272xbf16>
    %13 = vector.shape_cast %12 : vector<1x228x272xbf16> to vector<228x272xbf16>
    %cst_19 = arith.constant dense<0.000000e+00> : vector<32x272xf32>
    %14 = tpu.matmul %11, %13, %cst_19 {dimension_numbers = #tpu.dot_dimension_numbers<[1], [0], [0], [1], [0, 0, 1, 1], [], []>} : vector<32x228xbf16>, vector<228x272xbf16>, vector<32x272xf32> -> vector<32x272xf32>
    %c0_20 = arith.constant 0 : index
    %c1 = arith.constant 1 : index
    %c0_21 = arith.constant 0 : index
    %15 = vector.load %arg1[%c0_20, %c1, %c0_21] : memref<1x38x228xbf16, #tpu.memory_space<vmem>>, vector<1x32x228xbf16>
    %16 = vector.shape_cast %15 : vector<1x32x228xbf16> to vector<32x228xbf16>
    %c1_22 = arith.constant 1 : index
    %c0_23 = arith.constant 0 : index
    %c0_24 = arith.constant 0 : index
    %17 = vector.load %arg2[%c1_22, %c0_23, %c0_24] : memref<7x228x272xbf16, #tpu.memory_space<vmem>>, vector<1x228x272xbf16>
    %18 = vector.shape_cast %17 : vector<1x228x272xbf16> to vector<228x272xbf16>
    %cst_25 = arith.constant dense<0.000000e+00> : vector<32x272xf32>
    %19 = tpu.matmul %16, %18, %cst_25 {dimension_numbers = #tpu.dot_dimension_numbers<[1], [0], [0], [1], [0, 0, 1, 1], [], []>} : vector<32x228xbf16>, vector<228x272xbf16>, vector<32x272xf32> -> vector<32x272xf32>
    %20 = arith.addf %14, %19 : vector<32x272xf32>
    %c0_26 = arith.constant 0 : index
    %c2 = arith.constant 2 : index
    %c0_27 = arith.constant 0 : index
    %21 = vector.load %arg1[%c0_26, %c2, %c0_27] : memref<1x38x228xbf16, #tpu.memory_space<vmem>>, vector<1x32x228xbf16>
    %22 = vector.shape_cast %21 : vector<1x32x228xbf16> to vector<32x228xbf16>
    %c2_28 = arith.constant 2 : index
    %c0_29 = arith.constant 0 : index
    %c0_30 = arith.constant 0 : index
    %23 = vector.load %arg2[%c2_28, %c0_29, %c0_30] : memref<7x228x272xbf16, #tpu.memory_space<vmem>>, vector<1x228x272xbf16>
    %24 = vector.shape_cast %23 : vector<1x228x272xbf16> to vector<228x272xbf16>
    %cst_31 = arith.constant dense<0.000000e+00> : vector<32x272xf32>
    %25 = tpu.matmul %22, %24, %cst_31 {dimension_numbers = #tpu.dot_dimension_numbers<[1], [0], [0], [1], [0, 0, 1, 1], [], []>} : vector<32x228xbf16>, vector<228x272xbf16>, vector<32x272xf32> -> vector<32x272xf32>
    %26 = arith.addf %20, %25 : vector<32x272xf32>
    %c0_32 = arith.constant 0 : index
    %c3 = arith.constant 3 : index
    %c0_33 = arith.constant 0 : index
    %27 = vector.load %arg1[%c0_32, %c3, %c0_33] : memref<1x38x228xbf16, #tpu.memory_space<vmem>>, vector<1x32x228xbf16>
    %28 = vector.shape_cast %27 : vector<1x32x228xbf16> to vector<32x228xbf16>
    %c3_34 = arith.constant 3 : index
    %c0_35 = arith.constant 0 : index
    %c0_36 = arith.constant 0 : index
    %29 = vector.load %arg2[%c3_34, %c0_35, %c0_36] : memref<7x228x272xbf16, #tpu.memory_space<vmem>>, vector<1x228x272xbf16>
    %30 = vector.shape_cast %29 : vector<1x228x272xbf16> to vector<228x272xbf16>
    %cst_37 = arith.constant dense<0.000000e+00> : vector<32x272xf32>
    %31 = tpu.matmul %28, %30, %cst_37 {dimension_numbers = #tpu.dot_dimension_numbers<[1], [0], [0], [1], [0, 0, 1, 1], [], []>} : vector<32x228xbf16>, vector<228x272xbf16>, vector<32x272xf32> -> vector<32x272xf32>
    %32 = arith.addf %26, %31 : vector<32x272xf32>
    %c0_38 = arith.constant 0 : index
    %c4 = arith.constant 4 : index
    %c0_39 = arith.constant 0 : index
    %33 = vector.load %arg1[%c0_38, %c4, %c0_39] : memref<1x38x228xbf16, #tpu.memory_space<vmem>>, vector<1x32x228xbf16>
    %34 = vector.shape_cast %33 : vector<1x32x228xbf16> to vector<32x228xbf16>
    %c4_40 = arith.constant 4 : index
    %c0_41 = arith.constant 0 : index
    %c0_42 = arith.constant 0 : index
    %35 = vector.load %arg2[%c4_40, %c0_41, %c0_42] : memref<7x228x272xbf16, #tpu.memory_space<vmem>>, vector<1x228x272xbf16>
    %36 = vector.shape_cast %35 : vector<1x228x272xbf16> to vector<228x272xbf16>
    %cst_43 = arith.constant dense<0.000000e+00> : vector<32x272xf32>
    %37 = tpu.matmul %34, %36, %cst_43 {dimension_numbers = #tpu.dot_dimension_numbers<[1], [0], [0], [1], [0, 0, 1, 1], [], []>} : vector<32x228xbf16>, vector<228x272xbf16>, vector<32x272xf32> -> vector<32x272xf32>
    %38 = arith.addf %32, %37 : vector<32x272xf32>
    %c0_44 = arith.constant 0 : index
    %c5 = arith.constant 5 : index
    %c0_45 = arith.constant 0 : index
    %39 = vector.load %arg1[%c0_44, %c5, %c0_45] : memref<1x38x228xbf16, #tpu.memory_space<vmem>>, vector<1x32x228xbf16>
    %40 = vector.shape_cast %39 : vector<1x32x228xbf16> to vector<32x228xbf16>
    %c5_46 = arith.constant 5 : index
    %c0_47 = arith.constant 0 : index
    %c0_48 = arith.constant 0 : index
    %41 = vector.load %arg2[%c5_46, %c0_47, %c0_48] : memref<7x228x272xbf16, #tpu.memory_space<vmem>>, vector<1x228x272xbf16>
    %42 = vector.shape_cast %41 : vector<1x228x272xbf16> to vector<228x272xbf16>
    %cst_49 = arith.constant dense<0.000000e+00> : vector<32x272xf32>
    %43 = tpu.matmul %40, %42, %cst_49 {dimension_numbers = #tpu.dot_dimension_numbers<[1], [0], [0], [1], [0, 0, 1, 1], [], []>} : vector<32x228xbf16>, vector<228x272xbf16>, vector<32x272xf32> -> vector<32x272xf32>
    %44 = arith.addf %38, %43 : vector<32x272xf32>
    %c0_50 = arith.constant 0 : index
    %c6 = arith.constant 6 : index
    %c0_51 = arith.constant 0 : index
    %45 = vector.load %arg1[%c0_50, %c6, %c0_51] : memref<1x38x228xbf16, #tpu.memory_space<vmem>>, vector<1x32x228xbf16>
    %46 = vector.shape_cast %45 : vector<1x32x228xbf16> to vector<32x228xbf16>
    %c6_52 = arith.constant 6 : index
    %c0_53 = arith.constant 0 : index
    %c0_54 = arith.constant 0 : index
    %47 = vector.load %arg2[%c6_52, %c0_53, %c0_54] : memref<7x228x272xbf16, #tpu.memory_space<vmem>>, vector<1x228x272xbf16>
    %48 = vector.shape_cast %47 : vector<1x228x272xbf16> to vector<228x272xbf16>
    %cst_55 = arith.constant dense<0.000000e+00> : vector<32x272xf32>
    %49 = tpu.matmul %46, %48, %cst_55 {dimension_numbers = #tpu.dot_dimension_numbers<[1], [0], [0], [1], [0, 0, 1, 1], [], []>} : vector<32x228xbf16>, vector<228x272xbf16>, vector<32x272xf32> -> vector<32x272xf32>
    %50 = arith.addf %44, %49 : vector<32x272xf32>
    %c0_56 = arith.constant 0 : index
    %c0_57 = arith.constant 0 : index
    %51 = vector.load %arg3[%c0_56, %c0_57] : memref<1x272xf32, #tpu.memory_space<vmem>>, vector<1x272xf32>
    %52 = vector.broadcast %51 : vector<1x272xf32> to vector<32x272xf32>
    %53 = arith.addf %50, %52 : vector<32x272xf32>
    %cst_58 = arith.constant 0.000000e+00 : f32
    %54 = vector.broadcast %cst_58 : f32 to vector<32x272xf32>
    %55 = arith.minimumf %53, %54 : vector<32x272xf32>
    %cst_59 = arith.constant 5.000000e-01 : f32
    %56 = vector.broadcast %cst_59 : f32 to vector<32x272xf32>
    %57 = arith.mulf %56, %55 : vector<32x272xf32>
    %58 = math.tanh %57 : vector<32x272xf32>
    %59 = math.exp %55 : vector<32x272xf32>
    %cst_60 = arith.constant 1.000000e+00 : f32
    %60 = vector.broadcast %cst_60 : f32 to vector<32x272xf32>
    %61 = arith.addf %59, %60 : vector<32x272xf32>
    %62 = arith.mulf %58, %61 : vector<32x272xf32>
    %cst_61 = arith.constant 0.000000e+00 : f32
    %63 = vector.broadcast %cst_61 : f32 to vector<32x272xf32>
    %64 = arith.cmpf ogt, %53, %63 : vector<32x272xf32>
    %65 = arith.select %64, %53, %62 : vector<32x272xi1>, vector<32x272xf32>
    %66 = arith.truncf %65 : vector<32x272xf32> to vector<32x272xbf16>
    %c1_62 = arith.constant 1 : index
    %c0_63 = arith.constant 0 : index
    %67 = vector.load %arg15[%c1_62, %c0_63] : memref<34x272xbf16, #tpu.memory_space<vmem>>, vector<32x272xbf16>
    tpu.vector_store %arg15[%c1_62, %c0_63], %66 {strides = array<i32>} : memref<34x272xbf16, #tpu.memory_space<vmem>>, vector<32x272xbf16>,
    %c0_64 = arith.constant 0 : index
    %c0_65 = arith.constant 0 : index
    %68 = vector.load %arg15[%c0_64, %c0_65] : memref<34x272xbf16, #tpu.memory_space<vmem>>, vector<31x272xbf16>
    %c0_66 = arith.constant 0 : index
    %c0_67 = arith.constant 0 : index
    %c0_68 = arith.constant 0 : index
    %69 = vector.load %arg4[%c0_66, %c0_67, %c0_68] : memref<4x272x288xbf16, #tpu.memory_space<vmem>>, vector<1x272x288xbf16>
    %70 = vector.shape_cast %69 : vector<1x272x288xbf16> to vector<272x288xbf16>
    %cst_69 = arith.constant dense<0.000000e+00> : vector<31x288xf32>
    %71 = tpu.matmul %68, %70, %cst_69 {dimension_numbers = #tpu.dot_dimension_numbers<[1], [0], [0], [1], [0, 0, 1, 1], [], []>} : vector<31x272xbf16>, vector<272x288xbf16>, vector<31x288xf32> -> vector<31x288xf32>
    %c1_70 = arith.constant 1 : index
    %c0_71 = arith.constant 0 : index
    %72 = vector.load %arg15[%c1_70, %c0_71] : memref<34x272xbf16, #tpu.memory_space<vmem>>, vector<31x272xbf16>
    %c1_72 = arith.constant 1 : index
    %c0_73 = arith.constant 0 : index
    %c0_74 = arith.constant 0 : index
    %73 = vector.load %arg4[%c1_72, %c0_73, %c0_74] : memref<4x272x288xbf16, #tpu.memory_space<vmem>>, vector<1x272x288xbf16>
    %74 = vector.shape_cast %73 : vector<1x272x288xbf16> to vector<272x288xbf16>
    %cst_75 = arith.constant dense<0.000000e+00> : vector<31x288xf32>
    %75 = tpu.matmul %72, %74, %cst_75 {dimension_numbers = #tpu.dot_dimension_numbers<[1], [0], [0], [1], [0, 0, 1, 1], [], []>} : vector<31x272xbf16>, vector<272x288xbf16>, vector<31x288xf32> -> vector<31x288xf32>
    %76 = arith.addf %71, %75 : vector<31x288xf32>
    %c2_76 = arith.constant 2 : index
    %c0_77 = arith.constant 0 : index
    %77 = vector.load %arg15[%c2_76, %c0_77] : memref<34x272xbf16, #tpu.memory_space<vmem>>, vector<31x272xbf16>
    %c2_78 = arith.constant 2 : index
    %c0_79 = arith.constant 0 : index
    %c0_80 = arith.constant 0 : index
    %78 = vector.load %arg4[%c2_78, %c0_79, %c0_80] : memref<4x272x288xbf16, #tpu.memory_space<vmem>>, vector<1x272x288xbf16>
    %79 = vector.shape_cast %78 : vector<1x272x288xbf16> to vector<272x288xbf16>
    %cst_81 = arith.constant dense<0.000000e+00> : vector<31x288xf32>
    %80 = tpu.matmul %77, %79, %cst_81 {dimension_numbers = #tpu.dot_dimension_numbers<[1], [0], [0], [1], [0, 0, 1, 1], [], []>} : vector<31x272xbf16>, vector<272x288xbf16>, vector<31x288xf32> -> vector<31x288xf32>
    %81 = arith.addf %76, %80 : vector<31x288xf32>
    %c3_82 = arith.constant 3 : index
    %c0_83 = arith.constant 0 : index
    %82 = vector.load %arg15[%c3_82, %c0_83] : memref<34x272xbf16, #tpu.memory_space<vmem>>, vector<31x272xbf16>
    %c3_84 = arith.constant 3 : index
    %c0_85 = arith.constant 0 : index
    %c0_86 = arith.constant 0 : index
    %83 = vector.load %arg4[%c3_84, %c0_85, %c0_86] : memref<4x272x288xbf16, #tpu.memory_space<vmem>>, vector<1x272x288xbf16>
    %84 = vector.shape_cast %83 : vector<1x272x288xbf16> to vector<272x288xbf16>
    %cst_87 = arith.constant dense<0.000000e+00> : vector<31x288xf32>
    %85 = tpu.matmul %82, %84, %cst_87 {dimension_numbers = #tpu.dot_dimension_numbers<[1], [0], [0], [1], [0, 0, 1, 1], [], []>} : vector<31x272xbf16>, vector<272x288xbf16>, vector<31x288xf32> -> vector<31x288xf32>
    %86 = arith.addf %81, %85 : vector<31x288xf32>
    %c0_88 = arith.constant 0 : index
    %c0_89 = arith.constant 0 : index
    %87 = vector.load %arg5[%c0_88, %c0_89] : memref<1x288xf32, #tpu.memory_space<vmem>>, vector<1x288xf32>
    %88 = vector.broadcast %87 : vector<1x288xf32> to vector<31x288xf32>
    %89 = arith.addf %86, %88 : vector<31x288xf32>
    %cst_90 = arith.constant 0.000000e+00 : f32
    %90 = vector.broadcast %cst_90 : f32 to vector<31x288xf32>
    %91 = arith.minimumf %89, %90 : vector<31x288xf32>
    %cst_91 = arith.constant 5.000000e-01 : f32
    %92 = vector.broadcast %cst_91 : f32 to vector<31x288xf32>
    %93 = arith.mulf %92, %91 : vector<31x288xf32>
    %94 = math.tanh %93 : vector<31x288xf32>
    %95 = math.exp %91 : vector<31x288xf32>
    %cst_92 = arith.constant 1.000000e+00 : f32
    %96 = vector.broadcast %cst_92 : f32 to vector<31x288xf32>
    %97 = arith.addf %95, %96 : vector<31x288xf32>
    %98 = arith.mulf %94, %97 : vector<31x288xf32>
    %cst_93 = arith.constant 0.000000e+00 : f32
    %99 = vector.broadcast %cst_93 : f32 to vector<31x288xf32>
    %100 = arith.cmpf ogt, %89, %99 : vector<31x288xf32>
    %101 = arith.select %100, %89, %98 : vector<31x288xi1>, vector<31x288xf32>
    %102 = arith.truncf %101 : vector<31x288xf32> to vector<31x288xbf16>
    %103 = vector.extract_strided_slice %102 {offsets = [0, 0], sizes = [1, 288], strides = [1, 1]} : vector<31x288xbf16> to vector<1x288xbf16>
    %c1_94 = arith.constant 1 : index
    %c0_95 = arith.constant 0 : index
    %104 = vector.load %arg16[%c1_94, %c0_95] : memref<18x288xbf16, #tpu.memory_space<vmem>>, vector<1x288xbf16>
    tpu.vector_store %arg16[%c1_94, %c0_95], %103 {strides = array<i32>} : memref<18x288xbf16, #tpu.memory_space<vmem>>, vector<1x288xbf16>,
    %105 = vector.extract_strided_slice %102 {offsets = [2, 0], sizes = [1, 288], strides = [1, 1]} : vector<31x288xbf16> to vector<1x288xbf16>
    %c2_96 = arith.constant 2 : index
    %c0_97 = arith.constant 0 : index
    %106 = vector.load %arg16[%c2_96, %c0_97] : memref<18x288xbf16, #tpu.memory_space<vmem>>, vector<1x288xbf16>
    tpu.vector_store %arg16[%c2_96, %c0_97], %105 {strides = array<i32>} : memref<18x288xbf16, #tpu.memory_space<vmem>>, vector<1x288xbf16>,
    %107 = vector.extract_strided_slice %102 {offsets = [4, 0], sizes = [1, 288], strides = [1, 1]} : vector<31x288xbf16> to vector<1x288xbf16>
    %c3_98 = arith.constant 3 : index
    %c0_99 = arith.constant 0 : index
    %108 = vector.load %arg16[%c3_98, %c0_99] : memref<18x288xbf16, #tpu.memory_space<vmem>>, vector<1x288xbf16>
    tpu.vector_store %arg16[%c3_98, %c0_99], %107 {strides = array<i32>} : memref<18x288xbf16, #tpu.memory_space<vmem>>, vector<1x288xbf16>,
    %109 = vector.extract_strided_slice %102 {offsets = [6, 0], sizes = [1, 288], strides = [1, 1]} : vector<31x288xbf16> to vector<1x288xbf16>
    %c4_100 = arith.constant 4 : index
    %c0_101 = arith.constant 0 : index
    %110 = vector.load %arg16[%c4_100, %c0_101] : memref<18x288xbf16, #tpu.memory_space<vmem>>, vector<1x288xbf16>
    tpu.vector_store %arg16[%c4_100, %c0_101], %109 {strides = array<i32>} : memref<18x288xbf16, #tpu.memory_space<vmem>>, vector<1x288xbf16>,
    %111 = vector.extract_strided_slice %102 {offsets = [8, 0], sizes = [1, 288], strides = [1, 1]} : vector<31x288xbf16> to vector<1x288xbf16>
    %c5_102 = arith.constant 5 : index
    %c0_103 = arith.constant 0 : index
    %112 = vector.load %arg16[%c5_102, %c0_103] : memref<18x288xbf16, #tpu.memory_space<vmem>>, vector<1x288xbf16>
    tpu.vector_store %arg16[%c5_102, %c0_103], %111 {strides = array<i32>} : memref<18x288xbf16, #tpu.memory_space<vmem>>, vector<1x288xbf16>,
    %113 = vector.extract_strided_slice %102 {offsets = [10, 0], sizes = [1, 288], strides = [1, 1]} : vector<31x288xbf16> to vector<1x288xbf16>
    %c6_104 = arith.constant 6 : index
    %c0_105 = arith.constant 0 : index
    %114 = vector.load %arg16[%c6_104, %c0_105] : memref<18x288xbf16, #tpu.memory_space<vmem>>, vector<1x288xbf16>
    tpu.vector_store %arg16[%c6_104, %c0_105], %113 {strides = array<i32>} : memref<18x288xbf16, #tpu.memory_space<vmem>>, vector<1x288xbf16>,
    %115 = vector.extract_strided_slice %102 {offsets = [12, 0], sizes = [1, 288], strides = [1, 1]} : vector<31x288xbf16> to vector<1x288xbf16>
    %c7 = arith.constant 7 : index
    %c0_106 = arith.constant 0 : index
    %116 = vector.load %arg16[%c7, %c0_106] : memref<18x288xbf16, #tpu.memory_space<vmem>>, vector<1x288xbf16>
    tpu.vector_store %arg16[%c7, %c0_106], %115 {strides = array<i32>} : memref<18x288xbf16, #tpu.memory_space<vmem>>, vector<1x288xbf16>,
    %117 = vector.extract_strided_slice %102 {offsets = [14, 0], sizes = [1, 288], strides = [1, 1]} : vector<31x288xbf16> to vector<1x288xbf16>
    %c8 = arith.constant 8 : index
    %c0_107 = arith.constant 0 : index
    %118 = vector.load %arg16[%c8, %c0_107] : memref<18x288xbf16, #tpu.memory_space<vmem>>, vector<1x288xbf16>
    tpu.vector_store %arg16[%c8, %c0_107], %117 {strides = array<i32>} : memref<18x288xbf16, #tpu.memory_space<vmem>>, vector<1x288xbf16>,
    %119 = vector.extract_strided_slice %102 {offsets = [16, 0], sizes = [1, 288], strides = [1, 1]} : vector<31x288xbf16> to vector<1x288xbf16>
    %c9 = arith.constant 9 : index
    %c0_108 = arith.constant 0 : index
    %120 = vector.load %arg16[%c9, %c0_108] : memref<18x288xbf16, #tpu.memory_space<vmem>>, vector<1x288xbf16>
    tpu.vector_store %arg16[%c9, %c0_108], %119 {strides = array<i32>} : memref<18x288xbf16, #tpu.memory_space<vmem>>, vector<1x288xbf16>,
    %121 = vector.extract_strided_slice %102 {offsets = [18, 0], sizes = [1, 288], strides = [1, 1]} : vector<31x288xbf16> to vector<1x288xbf16>
    %c10 = arith.constant 10 : index
    %c0_109 = arith.constant 0 : index
    %122 = vector.load %arg16[%c10, %c0_109] : memref<18x288xbf16, #tpu.memory_space<vmem>>, vector<1x288xbf16>
    tpu.vector_store %arg16[%c10, %c0_109], %121 {strides = array<i32>} : memref<18x288xbf16, #tpu.memory_space<vmem>>, vector<1x288xbf16>,
    %123 = vector.extract_strided_slice %102 {offsets = [20, 0], sizes = [1, 288], strides = [1, 1]} : vector<31x288xbf16> to vector<1x288xbf16>
    %c11 = arith.constant 11 : index
    %c0_110 = arith.constant 0 : index
    %124 = vector.load %arg16[%c11, %c0_110] : memref<18x288xbf16, #tpu.memory_space<vmem>>, vector<1x288xbf16>
    tpu.vector_store %arg16[%c11, %c0_110], %123 {strides = array<i32>} : memref<18x288xbf16, #tpu.memory_space<vmem>>, vector<1x288xbf16>,
    %125 = vector.extract_strided_slice %102 {offsets = [22, 0], sizes = [1, 288], strides = [1, 1]} : vector<31x288xbf16> to vector<1x288xbf16>
    %c12 = arith.constant 12 : index
    %c0_111 = arith.constant 0 : index
    %126 = vector.load %arg16[%c12, %c0_111] : memref<18x288xbf16, #tpu.memory_space<vmem>>, vector<1x288xbf16>
    tpu.vector_store %arg16[%c12, %c0_111], %125 {strides = array<i32>} : memref<18x288xbf16, #tpu.memory_space<vmem>>, vector<1x288xbf16>,
    %127 = vector.extract_strided_slice %102 {offsets = [24, 0], sizes = [1, 288], strides = [1, 1]} : vector<31x288xbf16> to vector<1x288xbf16>
    %c13 = arith.constant 13 : index
    %c0_112 = arith.constant 0 : index
    %128 = vector.load %arg16[%c13, %c0_112] : memref<18x288xbf16, #tpu.memory_space<vmem>>, vector<1x288xbf16>
    tpu.vector_store %arg16[%c13, %c0_112], %127 {strides = array<i32>} : memref<18x288xbf16, #tpu.memory_space<vmem>>, vector<1x288xbf16>,
    %129 = vector.extract_strided_slice %102 {offsets = [26, 0], sizes = [1, 288], strides = [1, 1]} : vector<31x288xbf16> to vector<1x288xbf16>
    %c14 = arith.constant 14 : index
    %c0_113 = arith.constant 0 : index
    %130 = vector.load %arg16[%c14, %c0_113] : memref<18x288xbf16, #tpu.memory_space<vmem>>, vector<1x288xbf16>
    tpu.vector_store %arg16[%c14, %c0_113], %129 {strides = array<i32>} : memref<18x288xbf16, #tpu.memory_space<vmem>>, vector<1x288xbf16>,
    %131 = vector.extract_strided_slice %102 {offsets = [28, 0], sizes = [1, 288], strides = [1, 1]} : vector<31x288xbf16> to vector<1x288xbf16>
    %c15 = arith.constant 15 : index
    %c0_114 = arith.constant 0 : index
    %132 = vector.load %arg16[%c15, %c0_114] : memref<18x288xbf16, #tpu.memory_space<vmem>>, vector<1x288xbf16>
    tpu.vector_store %arg16[%c15, %c0_114], %131 {strides = array<i32>} : memref<18x288xbf16, #tpu.memory_space<vmem>>, vector<1x288xbf16>,
    %133 = vector.extract_strided_slice %102 {offsets = [30, 0], sizes = [1, 288], strides = [1, 1]} : vector<31x288xbf16> to vector<1x288xbf16>
    %c16 = arith.constant 16 : index
    %c0_115 = arith.constant 0 : index
    %134 = vector.load %arg16[%c16, %c0_115] : memref<18x288xbf16, #tpu.memory_space<vmem>>, vector<1x288xbf16>
    tpu.vector_store %arg16[%c16, %c0_115], %133 {strides = array<i32>} : memref<18x288xbf16, #tpu.memory_space<vmem>>, vector<1x288xbf16>,
    %c0_116 = arith.constant 0 : index
    %c0_117 = arith.constant 0 : index
    %135 = vector.load %arg16[%c0_116, %c0_117] : memref<18x288xbf16, #tpu.memory_space<vmem>>, vector<15x288xbf16>
    %c0_118 = arith.constant 0 : index
    %c0_119 = arith.constant 0 : index
    %c0_120 = arith.constant 0 : index
    %136 = vector.load %arg6[%c0_118, %c0_119, %c0_120] : memref<4x288x320xbf16, #tpu.memory_space<vmem>>, vector<1x288x320xbf16>
    %137 = vector.shape_cast %136 : vector<1x288x320xbf16> to vector<288x320xbf16>
    %cst_121 = arith.constant dense<0.000000e+00> : vector<15x320xf32>
    %138 = tpu.matmul %135, %137, %cst_121 {dimension_numbers = #tpu.dot_dimension_numbers<[1], [0], [0], [1], [0, 0, 1, 1], [], []>} : vector<15x288xbf16>, vector<288x320xbf16>, vector<15x320xf32> -> vector<15x320xf32>
    %c1_122 = arith.constant 1 : index
    %c0_123 = arith.constant 0 : index
    %139 = vector.load %arg16[%c1_122, %c0_123] : memref<18x288xbf16, #tpu.memory_space<vmem>>, vector<15x288xbf16>
    %c1_124 = arith.constant 1 : index
    %c0_125 = arith.constant 0 : index
    %c0_126 = arith.constant 0 : index
    %140 = vector.load %arg6[%c1_124, %c0_125, %c0_126] : memref<4x288x320xbf16, #tpu.memory_space<vmem>>, vector<1x288x320xbf16>
    %141 = vector.shape_cast %140 : vector<1x288x320xbf16> to vector<288x320xbf16>
    %cst_127 = arith.constant dense<0.000000e+00> : vector<15x320xf32>
    %142 = tpu.matmul %139, %141, %cst_127 {dimension_numbers = #tpu.dot_dimension_numbers<[1], [0], [0], [1], [0, 0, 1, 1], [], []>} : vector<15x288xbf16>, vector<288x320xbf16>, vector<15x320xf32> -> vector<15x320xf32>
    %143 = arith.addf %138, %142 : vector<15x320xf32>
    %c2_128 = arith.constant 2 : index
    %c0_129 = arith.constant 0 : index
    %144 = vector.load %arg16[%c2_128, %c0_129] : memref<18x288xbf16, #tpu.memory_space<vmem>>, vector<15x288xbf16>
    %c2_130 = arith.constant 2 : index
    %c0_131 = arith.constant 0 : index
    %c0_132 = arith.constant 0 : index
    %145 = vector.load %arg6[%c2_130, %c0_131, %c0_132] : memref<4x288x320xbf16, #tpu.memory_space<vmem>>, vector<1x288x320xbf16>
    %146 = vector.shape_cast %145 : vector<1x288x320xbf16> to vector<288x320xbf16>
    %cst_133 = arith.constant dense<0.000000e+00> : vector<15x320xf32>
    %147 = tpu.matmul %144, %146, %cst_133 {dimension_numbers = #tpu.dot_dimension_numbers<[1], [0], [0], [1], [0, 0, 1, 1], [], []>} : vector<15x288xbf16>, vector<288x320xbf16>, vector<15x320xf32> -> vector<15x320xf32>
    %148 = arith.addf %143, %147 : vector<15x320xf32>
    %c3_134 = arith.constant 3 : index
    %c0_135 = arith.constant 0 : index
    %149 = vector.load %arg16[%c3_134, %c0_135] : memref<18x288xbf16, #tpu.memory_space<vmem>>, vector<15x288xbf16>
    %c3_136 = arith.constant 3 : index
    %c0_137 = arith.constant 0 : index
    %c0_138 = arith.constant 0 : index
    %150 = vector.load %arg6[%c3_136, %c0_137, %c0_138] : memref<4x288x320xbf16, #tpu.memory_space<vmem>>, vector<1x288x320xbf16>
    %151 = vector.shape_cast %150 : vector<1x288x320xbf16> to vector<288x320xbf16>
    %cst_139 = arith.constant dense<0.000000e+00> : vector<15x320xf32>
    %152 = tpu.matmul %149, %151, %cst_139 {dimension_numbers = #tpu.dot_dimension_numbers<[1], [0], [0], [1], [0, 0, 1, 1], [], []>} : vector<15x288xbf16>, vector<288x320xbf16>, vector<15x320xf32> -> vector<15x320xf32>
    %153 = arith.addf %148, %152 : vector<15x320xf32>
    %c0_140 = arith.constant 0 : index
    %c0_141 = arith.constant 0 : index
    %154 = vector.load %arg7[%c0_140, %c0_141] : memref<1x320xf32, #tpu.memory_space<vmem>>, vector<1x320xf32>
    %155 = vector.broadcast %154 : vector<1x320xf32> to vector<15x320xf32>
    %156 = arith.addf %153, %155 : vector<15x320xf32>
    %cst_142 = arith.constant 0.000000e+00 : f32
    %157 = vector.broadcast %cst_142 : f32 to vector<15x320xf32>
    %158 = arith.minimumf %156, %157 : vector<15x320xf32>
    %cst_143 = arith.constant 5.000000e-01 : f32
    %159 = vector.broadcast %cst_143 : f32 to vector<15x320xf32>
    %160 = arith.mulf %159, %158 : vector<15x320xf32>
    %161 = math.tanh %160 : vector<15x320xf32>
    %162 = math.exp %158 : vector<15x320xf32>
    %cst_144 = arith.constant 1.000000e+00 : f32
    %163 = vector.broadcast %cst_144 : f32 to vector<15x320xf32>
    %164 = arith.addf %162, %163 : vector<15x320xf32>
    %165 = arith.mulf %161, %164 : vector<15x320xf32>
    %cst_145 = arith.constant 0.000000e+00 : f32
    %166 = vector.broadcast %cst_145 : f32 to vector<15x320xf32>
    %167 = arith.cmpf ogt, %156, %166 : vector<15x320xf32>
    %168 = arith.select %167, %156, %165 : vector<15x320xi1>, vector<15x320xf32>
    %169 = arith.truncf %168 : vector<15x320xf32> to vector<15x320xbf16>
    %170 = vector.extract_strided_slice %169 {offsets = [0, 0], sizes = [1, 320], strides = [1, 1]} : vector<15x320xbf16> to vector<1x320xbf16>
    %c1_146 = arith.constant 1 : index
    %c0_147 = arith.constant 0 : index
    %171 = vector.load %arg17[%c1_146, %c0_147] : memref<10x320xbf16, #tpu.memory_space<vmem>>, vector<1x320xbf16>
    tpu.vector_store %arg17[%c1_146, %c0_147], %170 {strides = array<i32>} : memref<10x320xbf16, #tpu.memory_space<vmem>>, vector<1x320xbf16>,
    %172 = vector.extract_strided_slice %169 {offsets = [2, 0], sizes = [1, 320], strides = [1, 1]} : vector<15x320xbf16> to vector<1x320xbf16>
    %c2_148 = arith.constant 2 : index
    %c0_149 = arith.constant 0 : index
    %173 = vector.load %arg17[%c2_148, %c0_149] : memref<10x320xbf16, #tpu.memory_space<vmem>>, vector<1x320xbf16>
    tpu.vector_store %arg17[%c2_148, %c0_149], %172 {strides = array<i32>} : memref<10x320xbf16, #tpu.memory_space<vmem>>, vector<1x320xbf16>,
    %174 = vector.extract_strided_slice %169 {offsets = [4, 0], sizes = [1, 320], strides = [1, 1]} : vector<15x320xbf16> to vector<1x320xbf16>
    %c3_150 = arith.constant 3 : index
    %c0_151 = arith.constant 0 : index
    %175 = vector.load %arg17[%c3_150, %c0_151] : memref<10x320xbf16, #tpu.memory_space<vmem>>, vector<1x320xbf16>
    tpu.vector_store %arg17[%c3_150, %c0_151], %174 {strides = array<i32>} : memref<10x320xbf16, #tpu.memory_space<vmem>>, vector<1x320xbf16>,
    %176 = vector.extract_strided_slice %169 {offsets = [6, 0], sizes = [1, 320], strides = [1, 1]} : vector<15x320xbf16> to vector<1x320xbf16>
    %c4_152 = arith.constant 4 : index
    %c0_153 = arith.constant 0 : index
    %177 = vector.load %arg17[%c4_152, %c0_153] : memref<10x320xbf16, #tpu.memory_space<vmem>>, vector<1x320xbf16>
    tpu.vector_store %arg17[%c4_152, %c0_153], %176 {strides = array<i32>} : memref<10x320xbf16, #tpu.memory_space<vmem>>, vector<1x320xbf16>,
    %178 = vector.extract_strided_slice %169 {offsets = [8, 0], sizes = [1, 320], strides = [1, 1]} : vector<15x320xbf16> to vector<1x320xbf16>
    %c5_154 = arith.constant 5 : index
    %c0_155 = arith.constant 0 : index
    %179 = vector.load %arg17[%c5_154, %c0_155] : memref<10x320xbf16, #tpu.memory_space<vmem>>, vector<1x320xbf16>
    tpu.vector_store %arg17[%c5_154, %c0_155], %178 {strides = array<i32>} : memref<10x320xbf16, #tpu.memory_space<vmem>>, vector<1x320xbf16>,
    %180 = vector.extract_strided_slice %169 {offsets = [10, 0], sizes = [1, 320], strides = [1, 1]} : vector<15x320xbf16> to vector<1x320xbf16>
    %c6_156 = arith.constant 6 : index
    %c0_157 = arith.constant 0 : index
    %181 = vector.load %arg17[%c6_156, %c0_157] : memref<10x320xbf16, #tpu.memory_space<vmem>>, vector<1x320xbf16>
    tpu.vector_store %arg17[%c6_156, %c0_157], %180 {strides = array<i32>} : memref<10x320xbf16, #tpu.memory_space<vmem>>, vector<1x320xbf16>,
    %182 = vector.extract_strided_slice %169 {offsets = [12, 0], sizes = [1, 320], strides = [1, 1]} : vector<15x320xbf16> to vector<1x320xbf16>
    %c7_158 = arith.constant 7 : index
    %c0_159 = arith.constant 0 : index
    %183 = vector.load %arg17[%c7_158, %c0_159] : memref<10x320xbf16, #tpu.memory_space<vmem>>, vector<1x320xbf16>
    tpu.vector_store %arg17[%c7_158, %c0_159], %182 {strides = array<i32>} : memref<10x320xbf16, #tpu.memory_space<vmem>>, vector<1x320xbf16>,
    %184 = vector.extract_strided_slice %169 {offsets = [14, 0], sizes = [1, 320], strides = [1, 1]} : vector<15x320xbf16> to vector<1x320xbf16>
    %c8_160 = arith.constant 8 : index
    %c0_161 = arith.constant 0 : index
    %185 = vector.load %arg17[%c8_160, %c0_161] : memref<10x320xbf16, #tpu.memory_space<vmem>>, vector<1x320xbf16>
    tpu.vector_store %arg17[%c8_160, %c0_161], %184 {strides = array<i32>} : memref<10x320xbf16, #tpu.memory_space<vmem>>, vector<1x320xbf16>,
    %c0_162 = arith.constant 0 : index
    %c0_163 = arith.constant 0 : index
    %186 = vector.load %arg17[%c0_162, %c0_163] : memref<10x320xbf16, #tpu.memory_space<vmem>>, vector<7x320xbf16>
    %c0_164 = arith.constant 0 : index
    %c0_165 = arith.constant 0 : index
    %c0_166 = arith.constant 0 : index
    %187 = vector.load %arg8[%c0_164, %c0_165, %c0_166] : memref<4x320x192xbf16, #tpu.memory_space<vmem>>, vector<1x320x192xbf16>
    %188 = vector.shape_cast %187 : vector<1x320x192xbf16> to vector<320x192xbf16>
    %cst_167 = arith.constant dense<0.000000e+00> : vector<7x192xf32>
    %189 = tpu.matmul %186, %188, %cst_167 {dimension_numbers = #tpu.dot_dimension_numbers<[1], [0], [0], [1], [0, 0, 1, 1], [], []>} : vector<7x320xbf16>, vector<320x192xbf16>, vector<7x192xf32> -> vector<7x192xf32>
    %c1_168 = arith.constant 1 : index
    %c0_169 = arith.constant 0 : index
    %190 = vector.load %arg17[%c1_168, %c0_169] : memref<10x320xbf16, #tpu.memory_space<vmem>>, vector<7x320xbf16>
    %c1_170 = arith.constant 1 : index
    %c0_171 = arith.constant 0 : index
    %c0_172 = arith.constant 0 : index
    %191 = vector.load %arg8[%c1_170, %c0_171, %c0_172] : memref<4x320x192xbf16, #tpu.memory_space<vmem>>, vector<1x320x192xbf16>
    %192 = vector.shape_cast %191 : vector<1x320x192xbf16> to vector<320x192xbf16>
    %cst_173 = arith.constant dense<0.000000e+00> : vector<7x192xf32>
    %193 = tpu.matmul %190, %192, %cst_173 {dimension_numbers = #tpu.dot_dimension_numbers<[1], [0], [0], [1], [0, 0, 1, 1], [], []>} : vector<7x320xbf16>, vector<320x192xbf16>, vector<7x192xf32> -> vector<7x192xf32>
    %194 = arith.addf %189, %193 : vector<7x192xf32>
    %c2_174 = arith.constant 2 : index
    %c0_175 = arith.constant 0 : index
    %195 = vector.load %arg17[%c2_174, %c0_175] : memref<10x320xbf16, #tpu.memory_space<vmem>>, vector<7x320xbf16>
    %c2_176 = arith.constant 2 : index
    %c0_177 = arith.constant 0 : index
    %c0_178 = arith.constant 0 : index
    %196 = vector.load %arg8[%c2_176, %c0_177, %c0_178] : memref<4x320x192xbf16, #tpu.memory_space<vmem>>, vector<1x320x192xbf16>
    %197 = vector.shape_cast %196 : vector<1x320x192xbf16> to vector<320x192xbf16>
    %cst_179 = arith.constant dense<0.000000e+00> : vector<7x192xf32>
    %198 = tpu.matmul %195, %197, %cst_179 {dimension_numbers = #tpu.dot_dimension_numbers<[1], [0], [0], [1], [0, 0, 1, 1], [], []>} : vector<7x320xbf16>, vector<320x192xbf16>, vector<7x192xf32> -> vector<7x192xf32>
    %199 = arith.addf %194, %198 : vector<7x192xf32>
    %c3_180 = arith.constant 3 : index
    %c0_181 = arith.constant 0 : index
    %200 = vector.load %arg17[%c3_180, %c0_181] : memref<10x320xbf16, #tpu.memory_space<vmem>>, vector<7x320xbf16>
    %c3_182 = arith.constant 3 : index
    %c0_183 = arith.constant 0 : index
    %c0_184 = arith.constant 0 : index
    %201 = vector.load %arg8[%c3_182, %c0_183, %c0_184] : memref<4x320x192xbf16, #tpu.memory_space<vmem>>, vector<1x320x192xbf16>
    %202 = vector.shape_cast %201 : vector<1x320x192xbf16> to vector<320x192xbf16>
    %cst_185 = arith.constant dense<0.000000e+00> : vector<7x192xf32>
    %203 = tpu.matmul %200, %202, %cst_185 {dimension_numbers = #tpu.dot_dimension_numbers<[1], [0], [0], [1], [0, 0, 1, 1], [], []>} : vector<7x320xbf16>, vector<320x192xbf16>, vector<7x192xf32> -> vector<7x192xf32>
    %204 = arith.addf %199, %203 : vector<7x192xf32>
    %c0_186 = arith.constant 0 : index
    %c0_187 = arith.constant 0 : index
    %205 = vector.load %arg9[%c0_186, %c0_187] : memref<1x192xf32, #tpu.memory_space<vmem>>, vector<1x192xf32>
    %206 = vector.broadcast %205 : vector<1x192xf32> to vector<7x192xf32>
    %207 = arith.addf %204, %206 : vector<7x192xf32>
    %cst_188 = arith.constant 0.000000e+00 : f32
    %208 = vector.broadcast %cst_188 : f32 to vector<7x192xf32>
    %209 = arith.minimumf %207, %208 : vector<7x192xf32>
    %cst_189 = arith.constant 5.000000e-01 : f32
    %210 = vector.broadcast %cst_189 : f32 to vector<7x192xf32>
    %211 = arith.mulf %210, %209 : vector<7x192xf32>
    %212 = math.tanh %211 : vector<7x192xf32>
    %213 = math.exp %209 : vector<7x192xf32>
    %cst_190 = arith.constant 1.000000e+00 : f32
    %214 = vector.broadcast %cst_190 : f32 to vector<7x192xf32>
    %215 = arith.addf %213, %214 : vector<7x192xf32>
    %216 = arith.mulf %212, %215 : vector<7x192xf32>
    %cst_191 = arith.constant 0.000000e+00 : f32
    %217 = vector.broadcast %cst_191 : f32 to vector<7x192xf32>
    %218 = arith.cmpf ogt, %207, %217 : vector<7x192xf32>
    %219 = arith.select %218, %207, %216 : vector<7x192xi1>, vector<7x192xf32>
    %220 = arith.truncf %219 : vector<7x192xf32> to vector<7x192xbf16>
    %221 = vector.extract_strided_slice %220 {offsets = [0, 0], sizes = [1, 192], strides = [1, 1]} : vector<7x192xbf16> to vector<1x192xbf16>
    %c1_192 = arith.constant 1 : index
    %c0_193 = arith.constant 0 : index
    %222 = vector.load %arg18[%c1_192, %c0_193] : memref<6x192xbf16, #tpu.memory_space<vmem>>, vector<1x192xbf16>
    tpu.vector_store %arg18[%c1_192, %c0_193], %221 {strides = array<i32>} : memref<6x192xbf16, #tpu.memory_space<vmem>>, vector<1x192xbf16>,
    %223 = vector.extract_strided_slice %220 {offsets = [2, 0], sizes = [1, 192], strides = [1, 1]} : vector<7x192xbf16> to vector<1x192xbf16>
    %c2_194 = arith.constant 2 : index
    %c0_195 = arith.constant 0 : index
    %224 = vector.load %arg18[%c2_194, %c0_195] : memref<6x192xbf16, #tpu.memory_space<vmem>>, vector<1x192xbf16>
    tpu.vector_store %arg18[%c2_194, %c0_195], %223 {strides = array<i32>} : memref<6x192xbf16, #tpu.memory_space<vmem>>, vector<1x192xbf16>,
    %225 = vector.extract_strided_slice %220 {offsets = [4, 0], sizes = [1, 192], strides = [1, 1]} : vector<7x192xbf16> to vector<1x192xbf16>
    %c3_196 = arith.constant 3 : index
    %c0_197 = arith.constant 0 : index
    %226 = vector.load %arg18[%c3_196, %c0_197] : memref<6x192xbf16, #tpu.memory_space<vmem>>, vector<1x192xbf16>
    tpu.vector_store %arg18[%c3_196, %c0_197], %225 {strides = array<i32>} : memref<6x192xbf16, #tpu.memory_space<vmem>>, vector<1x192xbf16>,
    %227 = vector.extract_strided_slice %220 {offsets = [6, 0], sizes = [1, 192], strides = [1, 1]} : vector<7x192xbf16> to vector<1x192xbf16>
    %c4_198 = arith.constant 4 : index
    %c0_199 = arith.constant 0 : index
    %228 = vector.load %arg18[%c4_198, %c0_199] : memref<6x192xbf16, #tpu.memory_space<vmem>>, vector<1x192xbf16>
    tpu.vector_store %arg18[%c4_198, %c0_199], %227 {strides = array<i32>} : memref<6x192xbf16, #tpu.memory_space<vmem>>, vector<1x192xbf16>,
    %c0_200 = arith.constant 0 : index
    %c0_201 = arith.constant 0 : index
    %229 = vector.load %arg18[%c0_200, %c0_201] : memref<6x192xbf16, #tpu.memory_space<vmem>>, vector<3x192xbf16>
    %c0_202 = arith.constant 0 : index
    %c0_203 = arith.constant 0 : index
    %c0_204 = arith.constant 0 : index
    %230 = vector.load %arg10[%c0_202, %c0_203, %c0_204] : memref<4x192x128xbf16, #tpu.memory_space<vmem>>, vector<1x192x128xbf16>
    %231 = vector.shape_cast %230 : vector<1x192x128xbf16> to vector<192x128xbf16>
    %cst_205 = arith.constant dense<0.000000e+00> : vector<3x128xf32>
    %232 = tpu.matmul %229, %231, %cst_205 {dimension_numbers = #tpu.dot_dimension_numbers<[1], [0], [0], [1], [0, 0, 1, 1], [], []>} : vector<3x192xbf16>, vector<192x128xbf16>, vector<3x128xf32> -> vector<3x128xf32>
    %c1_206 = arith.constant 1 : index
    %c0_207 = arith.constant 0 : index
    %233 = vector.load %arg18[%c1_206, %c0_207] : memref<6x192xbf16, #tpu.memory_space<vmem>>, vector<3x192xbf16>
    %c1_208 = arith.constant 1 : index
    %c0_209 = arith.constant 0 : index
    %c0_210 = arith.constant 0 : index
    %234 = vector.load %arg10[%c1_208, %c0_209, %c0_210] : memref<4x192x128xbf16, #tpu.memory_space<vmem>>, vector<1x192x128xbf16>
    %235 = vector.shape_cast %234 : vector<1x192x128xbf16> to vector<192x128xbf16>
    %cst_211 = arith.constant dense<0.000000e+00> : vector<3x128xf32>
    %236 = tpu.matmul %233, %235, %cst_211 {dimension_numbers = #tpu.dot_dimension_numbers<[1], [0], [0], [1], [0, 0, 1, 1], [], []>} : vector<3x192xbf16>, vector<192x128xbf16>, vector<3x128xf32> -> vector<3x128xf32>
    %237 = arith.addf %232, %236 : vector<3x128xf32>
    %c2_212 = arith.constant 2 : index
    %c0_213 = arith.constant 0 : index
    %238 = vector.load %arg18[%c2_212, %c0_213] : memref<6x192xbf16, #tpu.memory_space<vmem>>, vector<3x192xbf16>
    %c2_214 = arith.constant 2 : index
    %c0_215 = arith.constant 0 : index
    %c0_216 = arith.constant 0 : index
    %239 = vector.load %arg10[%c2_214, %c0_215, %c0_216] : memref<4x192x128xbf16, #tpu.memory_space<vmem>>, vector<1x192x128xbf16>
    %240 = vector.shape_cast %239 : vector<1x192x128xbf16> to vector<192x128xbf16>
    %cst_217 = arith.constant dense<0.000000e+00> : vector<3x128xf32>
    %241 = tpu.matmul %238, %240, %cst_217 {dimension_numbers = #tpu.dot_dimension_numbers<[1], [0], [0], [1], [0, 0, 1, 1], [], []>} : vector<3x192xbf16>, vector<192x128xbf16>, vector<3x128xf32> -> vector<3x128xf32>
    %242 = arith.addf %237, %241 : vector<3x128xf32>
    %c3_218 = arith.constant 3 : index
    %c0_219 = arith.constant 0 : index
    %243 = vector.load %arg18[%c3_218, %c0_219] : memref<6x192xbf16, #tpu.memory_space<vmem>>, vector<3x192xbf16>
    %c3_220 = arith.constant 3 : index
    %c0_221 = arith.constant 0 : index
    %c0_222 = arith.constant 0 : index
    %244 = vector.load %arg10[%c3_220, %c0_221, %c0_222] : memref<4x192x128xbf16, #tpu.memory_space<vmem>>, vector<1x192x128xbf16>
    %245 = vector.shape_cast %244 : vector<1x192x128xbf16> to vector<192x128xbf16>
    %cst_223 = arith.constant dense<0.000000e+00> : vector<3x128xf32>
    %246 = tpu.matmul %243, %245, %cst_223 {dimension_numbers = #tpu.dot_dimension_numbers<[1], [0], [0], [1], [0, 0, 1, 1], [], []>} : vector<3x192xbf16>, vector<192x128xbf16>, vector<3x128xf32> -> vector<3x128xf32>
    %247 = arith.addf %242, %246 : vector<3x128xf32>
    %c0_224 = arith.constant 0 : index
    %c0_225 = arith.constant 0 : index
    %248 = vector.load %arg11[%c0_224, %c0_225] : memref<1x128xf32, #tpu.memory_space<vmem>>, vector<1x128xf32>
    %249 = vector.broadcast %248 : vector<1x128xf32> to vector<3x128xf32>
    %250 = arith.addf %247, %249 : vector<3x128xf32>
    %cst_226 = arith.constant 0.000000e+00 : f32
    %251 = vector.broadcast %cst_226 : f32 to vector<3x128xf32>
    %252 = arith.minimumf %250, %251 : vector<3x128xf32>
    %cst_227 = arith.constant 5.000000e-01 : f32
    %253 = vector.broadcast %cst_227 : f32 to vector<3x128xf32>
    %254 = arith.mulf %253, %252 : vector<3x128xf32>
    %255 = math.tanh %254 : vector<3x128xf32>
    %256 = math.exp %252 : vector<3x128xf32>
    %cst_228 = arith.constant 1.000000e+00 : f32
    %257 = vector.broadcast %cst_228 : f32 to vector<3x128xf32>
    %258 = arith.addf %256, %257 : vector<3x128xf32>
    %259 = arith.mulf %255, %258 : vector<3x128xf32>
    %cst_229 = arith.constant 0.000000e+00 : f32
    %260 = vector.broadcast %cst_229 : f32 to vector<3x128xf32>
    %261 = arith.cmpf ogt, %250, %260 : vector<3x128xf32>
    %262 = arith.select %261, %250, %259 : vector<3x128xi1>, vector<3x128xf32>
    %263 = arith.truncf %262 : vector<3x128xf32> to vector<3x128xbf16>
    %264 = vector.extract_strided_slice %263 {offsets = [0, 0], sizes = [1, 128], strides = [1, 1]} : vector<3x128xbf16> to vector<1x128xbf16>
    %c1_230 = arith.constant 1 : index
    %c0_231 = arith.constant 0 : index
    %265 = vector.load %arg19[%c1_230, %c0_231] : memref<4x128xbf16, #tpu.memory_space<vmem>>, vector<1x128xbf16>
    tpu.vector_store %arg19[%c1_230, %c0_231], %264 {strides = array<i32>} : memref<4x128xbf16, #tpu.memory_space<vmem>>, vector<1x128xbf16>,
    %266 = vector.extract_strided_slice %263 {offsets = [2, 0], sizes = [1, 128], strides = [1, 1]} : vector<3x128xbf16> to vector<1x128xbf16>
    %c2_232 = arith.constant 2 : index
    %c0_233 = arith.constant 0 : index
    %267 = vector.load %arg19[%c2_232, %c0_233] : memref<4x128xbf16, #tpu.memory_space<vmem>>, vector<1x128xbf16>
    tpu.vector_store %arg19[%c2_232, %c0_233], %266 {strides = array<i32>} : memref<4x128xbf16, #tpu.memory_space<vmem>>, vector<1x128xbf16>,
    %c0_234 = arith.constant 0 : index
    %c0_235 = arith.constant 0 : index
    %268 = vector.load %arg19[%c0_234, %c0_235] : memref<4x128xbf16, #tpu.memory_space<vmem>>, vector<1x128xbf16>
    %c0_236 = arith.constant 0 : index
    %c0_237 = arith.constant 0 : index
    %c0_238 = arith.constant 0 : index
    %269 = vector.load %arg12[%c0_236, %c0_237, %c0_238] : memref<4x128x1xbf16, #tpu.memory_space<vmem>>, vector<1x128x1xbf16>
    %270 = vector.shape_cast %269 : vector<1x128x1xbf16> to vector<128x1xbf16>
    %cst_239 = arith.constant dense<0.000000e+00> : vector<1x1xf32>
    %271 = tpu.matmul %268, %270, %cst_239 {dimension_numbers = #tpu.dot_dimension_numbers<[1], [0], [0], [1], [0, 0, 1, 1], [], []>} : vector<1x128xbf16>, vector<128x1xbf16>, vector<1x1xf32> -> vector<1x1xf32>
    %c1_240 = arith.constant 1 : index
    %c0_241 = arith.constant 0 : index
    %272 = vector.load %arg19[%c1_240, %c0_241] : memref<4x128xbf16, #tpu.memory_space<vmem>>, vector<1x128xbf16>
    %c1_242 = arith.constant 1 : index
    %c0_243 = arith.constant 0 : index
    %c0_244 = arith.constant 0 : index
    %273 = vector.load %arg12[%c1_242, %c0_243, %c0_244] : memref<4x128x1xbf16, #tpu.memory_space<vmem>>, vector<1x128x1xbf16>
    %274 = vector.shape_cast %273 : vector<1x128x1xbf16> to vector<128x1xbf16>
    %cst_245 = arith.constant dense<0.000000e+00> : vector<1x1xf32>
    %275 = tpu.matmul %272, %274, %cst_245 {dimension_numbers = #tpu.dot_dimension_numbers<[1], [0], [0], [1], [0, 0, 1, 1], [], []>} : vector<1x128xbf16>, vector<128x1xbf16>, vector<1x1xf32> -> vector<1x1xf32>
    %276 = arith.addf %271, %275 : vector<1x1xf32>
    %c2_246 = arith.constant 2 : index
    %c0_247 = arith.constant 0 : index
    %277 = vector.load %arg19[%c2_246, %c0_247] : memref<4x128xbf16, #tpu.memory_space<vmem>>, vector<1x128xbf16>
    %c2_248 = arith.constant 2 : index
    %c0_249 = arith.constant 0 : index
    %c0_250 = arith.constant 0 : index
    %278 = vector.load %arg12[%c2_248, %c0_249, %c0_250] : memref<4x128x1xbf16, #tpu.memory_space<vmem>>, vector<1x128x1xbf16>
    %279 = vector.shape_cast %278 : vector<1x128x1xbf16> to vector<128x1xbf16>
    %cst_251 = arith.constant dense<0.000000e+00> : vector<1x1xf32>
    %280 = tpu.matmul %277, %279, %cst_251 {dimension_numbers = #tpu.dot_dimension_numbers<[1], [0], [0], [1], [0, 0, 1, 1], [], []>} : vector<1x128xbf16>, vector<128x1xbf16>, vector<1x1xf32> -> vector<1x1xf32>
    %281 = arith.addf %276, %280 : vector<1x1xf32>
    %c3_252 = arith.constant 3 : index
    %c0_253 = arith.constant 0 : index
    %282 = vector.load %arg19[%c3_252, %c0_253] : memref<4x128xbf16, #tpu.memory_space<vmem>>, vector<1x128xbf16>
    %c3_254 = arith.constant 3 : index
    %c0_255 = arith.constant 0 : index
    %c0_256 = arith.constant 0 : index
    %283 = vector.load %arg12[%c3_254, %c0_255, %c0_256] : memref<4x128x1xbf16, #tpu.memory_space<vmem>>, vector<1x128x1xbf16>
    %284 = vector.shape_cast %283 : vector<1x128x1xbf16> to vector<128x1xbf16>
    %cst_257 = arith.constant dense<0.000000e+00> : vector<1x1xf32>
    %285 = tpu.matmul %282, %284, %cst_257 {dimension_numbers = #tpu.dot_dimension_numbers<[1], [0], [0], [1], [0, 0, 1, 1], [], []>} : vector<1x128xbf16>, vector<128x1xbf16>, vector<1x1xf32> -> vector<1x1xf32>
    %286 = arith.addf %281, %285 : vector<1x1xf32>
    %c0_258 = arith.constant 0 : index
    %c0_259 = arith.constant 0 : index
    %287 = vector.load %arg13[%c0_258, %c0_259] : memref<1x1xf32, #tpu.memory_space<vmem>>, vector<1x1xf32>
    %288 = arith.addf %286, %287 : vector<1x1xf32>
    %cst_260 = arith.constant 0.000000e+00 : f32
    %289 = vector.broadcast %cst_260 : f32 to vector<1x1xf32>
    %290 = arith.minimumf %288, %289 : vector<1x1xf32>
    %cst_261 = arith.constant 5.000000e-01 : f32
    %291 = vector.broadcast %cst_261 : f32 to vector<1x1xf32>
    %292 = arith.mulf %291, %290 : vector<1x1xf32>
    %293 = math.tanh %292 : vector<1x1xf32>
    %294 = math.exp %290 : vector<1x1xf32>
    %cst_262 = arith.constant 1.000000e+00 : f32
    %295 = vector.broadcast %cst_262 : f32 to vector<1x1xf32>
    %296 = arith.addf %294, %295 : vector<1x1xf32>
    %297 = arith.mulf %293, %296 : vector<1x1xf32>
    %cst_263 = arith.constant 0.000000e+00 : f32
    %298 = vector.broadcast %cst_263 : f32 to vector<1x1xf32>
    %299 = arith.cmpf ogt, %288, %298 : vector<1x1xf32>
    %300 = arith.select %299, %288, %297 : vector<1x1xi1>, vector<1x1xf32>
    %c0_264 = arith.constant 0 : index
    %c0_265 = arith.constant 0 : index
    %c0_266 = arith.constant 0 : index
    %301 = vector.load %arg14[%c0_264, %c0_265, %c0_266] : memref<1x1x1xf32, #tpu.memory_space<vmem>>, vector<1x1x1xf32>
    %302 = vector.shape_cast %301 : vector<1x1x1xf32> to vector<1x1xf32>
    %303 = vector.shape_cast %300 : vector<1x1xf32> to vector<1x1x1xf32>
    tpu.vector_store %arg14[%c0_264, %c0_265, %c0_266], %303 {strides = array<i32>} : memref<1x1x1xf32, #tpu.memory_space<vmem>>, vector<1x1x1xf32>,
    return
  }
  func.func @transform_0(%arg0: i32) -> (i32, i32, i32) {
    %c0_i32 = arith.constant 0 : i32
    %c0_i32_0 = arith.constant 0 : i32
    %c0_i32_1 = arith.constant 0 : i32
    return %arg0, %c0_i32, %c0_i32_0 : i32, i32, i32
  }
  func.func @transform_1(%arg0: i32) -> (i32, i32, i32) {
    %c0_i32 = arith.constant 0 : i32
    %c0_i32_0 = arith.constant 0 : i32
    %c0_i32_1 = arith.constant 0 : i32
    %c0_i32_2 = arith.constant 0 : i32
    return %c0_i32, %c0_i32_0, %c0_i32_1 : i32, i32, i32
  }
  func.func @transform_2(%arg0: i32) -> (i32, i32) {
    %c0_i32 = arith.constant 0 : i32
    %c0_i32_0 = arith.constant 0 : i32
    %c0_i32_1 = arith.constant 0 : i32
    return %c0_i32, %c0_i32_0 : i32, i32
  }
  func.func @transform_3(%arg0: i32) -> (i32, i32, i32) {
    %c0_i32 = arith.constant 0 : i32
    %c0_i32_0 = arith.constant 0 : i32
    %c0_i32_1 = arith.constant 0 : i32
    %c0_i32_2 = arith.constant 0 : i32
    return %c0_i32, %c0_i32_0, %c0_i32_1 : i32, i32, i32
  }
  func.func @transform_4(%arg0: i32) -> (i32, i32) {
    %c0_i32 = arith.constant 0 : i32
    %c0_i32_0 = arith.constant 0 : i32
    %c0_i32_1 = arith.constant 0 : i32
    return %c0_i32, %c0_i32_0 : i32, i32
  }
  func.func @transform_5(%arg0: i32) -> (i32, i32, i32) {
    %c0_i32 = arith.constant 0 : i32
    %c0_i32_0 = arith.constant 0 : i32
    %c0_i32_1 = arith.constant 0 : i32
    %c0_i32_2 = arith.constant 0 : i32
    return %c0_i32, %c0_i32_0, %c0_i32_1 : i32, i32, i32
  }
  func.func @transform_6(%arg0: i32) -> (i32, i32) {
    %c0_i32 = arith.constant 0 : i32
    %c0_i32_0 = arith.constant 0 : i32
    %c0_i32_1 = arith.constant 0 : i32
    return %c0_i32, %c0_i32_0 : i32, i32
  }
  func.func @transform_7(%arg0: i32) -> (i32, i32, i32) {
    %c0_i32 = arith.constant 0 : i32
    %c0_i32_0 = arith.constant 0 : i32
    %c0_i32_1 = arith.constant 0 : i32
    %c0_i32_2 = arith.constant 0 : i32
    return %c0_i32, %c0_i32_0, %c0_i32_1 : i32, i32, i32
  }
  func.func @transform_8(%arg0: i32) -> (i32, i32) {
    %c0_i32 = arith.constant 0 : i32
    %c0_i32_0 = arith.constant 0 : i32
    %c0_i32_1 = arith.constant 0 : i32
    return %c0_i32, %c0_i32_0 : i32, i32
  }
  func.func @transform_9(%arg0: i32) -> (i32, i32, i32) {
    %c0_i32 = arith.constant 0 : i32
    %c0_i32_0 = arith.constant 0 : i32
    %c0_i32_1 = arith.constant 0 : i32
    %c0_i32_2 = arith.constant 0 : i32
    return %c0_i32, %c0_i32_0, %c0_i32_1 : i32, i32, i32
  }
  func.func @transform_10(%arg0: i32) -> (i32, i32) {
    %c0_i32 = arith.constant 0 : i32
    %c0_i32_0 = arith.constant 0 : i32
    %c0_i32_1 = arith.constant 0 : i32
    return %c0_i32, %c0_i32_0 : i32, i32
  }
  func.func @transform_11(%arg0: i32) -> (i32, i32, i32) {
    %c0_i32 = arith.constant 0 : i32
    %c0_i32_0 = arith.constant 0 : i32
    %c0_i32_1 = arith.constant 0 : i32
    %c0_i32_2 = arith.constant 0 : i32
    return %c0_i32, %c0_i32_0, %c0_i32_1 : i32, i32, i32
  }
  func.func @transform_12(%arg0: i32) -> (i32, i32) {
    %c0_i32 = arith.constant 0 : i32
    %c0_i32_0 = arith.constant 0 : i32
    %c0_i32_1 = arith.constant 0 : i32
    return %c0_i32, %c0_i32_0 : i32, i32
  }
  func.func @transform_13(%arg0: i32) -> (i32, i32, i32) {
    %c0_i32 = arith.constant 0 : i32
    %c0_i32_0 = arith.constant 0 : i32
    %c0_i32_1 = arith.constant 0 : i32
    return %arg0, %c0_i32, %c0_i32_0 : i32, i32, i32
  }
}

</mosaic_0001>

<bundles_post_ra>
// kernel: _lambda_.1
= control target key start
LH: loop header
LB: loop body
LE: loop exit
PB: predicated region body
PF: predicated region fallthrough
CT: control target
= control target key end

     0   :  { %s16019_s27 = smov 0   ;;  %s20822_s0 = inlined_call_operand.vmem [shape: bf16[2,38,228], index: 0, kind: input, shape index: {}]   ;;  %s20823_s1 = inlined_call_operand.vmem [shape: bf16[7,228,272], index: 1, kind: input, shape index: {}]   ;;  %s20824_s2 = inlined_call_operand.vmem [shape: f32[1,272], index: 2, kind: input, shape index: {}]   ;;  %s20825_s3 = inlined_call_operand.vmem [shape: bf16[4,272,288], index: 3, kind: input, shape index: {}]   ;;  %s20826_s4 = inlined_call_operand.vmem [shape: f32[1,288], index: 4, kind: input, shape index: {}]   ;;  %s20827_s5 = inlined_call_operand.vmem [shape: bf16[4,288,320], index: 5, kind: input, shape index: {}]   ;;  %s20828_s6 = inlined_call_operand.vmem [shape: f32[1,320], index: 6, kind: input, shape index: {}]   ;;  %s20829_s7 = inlined_call_operand.vmem [shape: bf16[4,320,192], index: 7, kind: input, shape index: {}]   ;;  %s20830_s8 = inlined_call_operand.vmem [shape: f32[1,192], index: 8, kind: input, shape index: {}]   ;;  %s20831_s9 = inlined_call_operand.vmem [shape: bf16[4,192,128], index: 9, kind: input, shape index: {}]   ;;  %s20832_s10 = inlined_call_operand.vmem [shape: f32[1,128], index: 10, kind: input, shape index: {}]   ;;  %s20833_s11 = inlined_call_operand.vmem [shape: bf16[4,128,1], index: 11, kind: input, shape index: {}]   ;;  %s20834_s12 = inlined_call_operand.<no memory space> [shape: f32[1,1], index: 12, kind: input, shape index: {}]   ;;  %s20835_s13 = inlined_call_operand.vmem [shape: f32[2,1,1], index: 13, kind: output, shape index: {}]  }
   0x1   :  { %v18_v0 = vstv %s20834_s12 }
   0x2   :  { %19 = vst [vmem:[#allocation7] sm:$0x1] %v18_v0 }
   0x3 LB: > { %s11863_s28 = sadd.s32 4294967295, %s15940_s27   ;;  %p11867_p0 = scmp.ge.s32.totalorder %s15940_s27, 1  ;;  %s15940_s27 = sphi %s16019_s27, %s25_s27  }
   0x4   : > { %p389_p1 = scmp.lt.s32.totalorder %s15940_s27, 3 }
   0x6   : > { %p390_p2 = pnand %p11867_p0, %p389_p1 }
   0x8   : > { %393 = sbr.rel (%p390_p2) target bundleno = 2548 (0x9f4), region = 72 }
   0xd   : > { %v14445_v1 = vld [vmem:[%s20823_s1 + $0x208] ss:$12 sps:$4 sm:$0xff]   ;;  %v15942_v2 = vmov 0   ;;  %v14447_v3 = vld [vmem:[%s20823_s1 + $0x20c] ss:$12 sps:$4 sm:$0xff]   ;;  %p431_p3 = scmp.lt.s32.totalorder %s11863_s28, 1 }
   0xe   : > { %959 = vmatprep.subr.bf16.mxu1 %v15942_v2  ;;  %449 = vst [vmem:[#allocation2 + $0x30] sm:$0x11] %v15942_v2  ;;  %452 = vst [vmem:[#allocation3] sm:$0xff] %v15942_v2  ;;  %906 = vmatprep.subr.bf16.mxu0 %v14445_v1  ;;  %v14448_v4 = vld [vmem:[%s20823_s1 + $0x204] ss:$12 sps:$4 sm:$0xff]   ;;  %vm896_vm0 = vcmask 1041408  }
   0xf   : > { %455 = vst [vmem:[#allocation3 + $0xc] sm:$0xff] %v15942_v2  ;;  %457 = vst [vmem:[#allocation3 + $0x18] sm:$0x11] %v15942_v2  ;;  %960 = vmatpush1.bf16.msra.mxu1 %v14447_v3  ;;  %v14449_v5 = vld [vmem:[%s20823_s1 + $0x1f0] ss:$12 sps:$4 sm:$0xff]   ;;  %907 = vmatpush1.bf16.msra.mxu0 %v14448_v4  ;;  %s21026_s28 = smov (!%p431_p3, %s11863_s28), 1 }
  0x10   : > { %460 = vst [vmem:[#allocation4] sm:$0xff] %v15942_v2  ;;  %463 = vst [vmem:[#allocation4 + $0xc] sm:$0x11] %v15942_v2  ;;  %961 = vmatprep.subr.bf16.mxu1 %v15942_v2  ;;  %v14451_v6 = vld [vmem:[%s20823_s1 + $0x1f4] ss:$12 sps:$4 sm:$0xff]   ;;  %908 = vmatprep.subr.bf16.mxu0 %v14449_v5  ;;  %s14432_s12 = smul.u32 40, %s21026_s28  ;;  %s438_s15 = scalar_lea.vmem %s20835_s13, %s21026_s28 }
  0x11   : > { %470 = vst [vmem:[#allocation6] sm:$0x3] %v15942_v2  ;;  %v14452_v7 = vld [vmem:[%s20823_s1 + $0x1ec] ss:$12 sps:$4 sm:$0xff]   ;;  %v14455_v9 = vld [vmem:[%s20823_s1 + $0x1dc] ss:$12 sps:$4 sm:$0xff]  }
  0x12   : > { %v14453_v8 = vld [vmem:[%s20823_s1 + $0x1d8] ss:$12 sps:$4 sm:$0xff]   ;;  %v14456_v10 = vld [vmem:[%s20823_s1 + $0x1d4] ss:$12 sps:$4 sm:$0xff]   ;;  %v14460_v13 = vld [vmem:[%s20823_s1 + $0x1bc] ss:$12 sps:$4 sm:$0xff]   ;;  %s16130_s18 = scalar_lea.vmem %s20822_s0, %s14432_s12 }
  0x13   : > { %962 = vmatpush1.bf16.msra.mxu1 %v14451_v6  ;;  %909 = vmatpush1.bf16.msra.mxu0 %v14452_v7  ;;  %v14457_v11 = vld [vmem:[%s20823_s1 + $0x1c0] ss:$12 sps:$4 sm:$0xff]   ;;  %v14459_v12 = vld [vmem:[%s20823_s1 + $0x1c4] ss:$12 sps:$4 sm:$0xff]   ;;  %v14461_v14 = vld [vmem:[%s20823_s1 + $0x1a8] ss:$12 sps:$4 sm:$0xff]  }
  0x14   : > { %963 = vmatprep.subr.bf16.mxu1 %v15942_v2  ;;  %910 = vmatprep.subr.bf16.mxu0 %v14453_v8  ;;  %v14463_v15 = vld [vmem:[%s20823_s1 + $0x1ac] ss:$12 sps:$4 sm:$0xff]   ;;  %v14464_v16 = vld [vmem:[%s20823_s1 + $0x1a4] ss:$12 sps:$4 sm:$0xff]   ;;  %v14467_v18 = vld [vmem:[%s20823_s1 + $0x194] ss:$12 sps:$4 sm:$0xff]  }
  0x15   : > { %v14465_v17 = vld [vmem:[%s20823_s1 + $0x190] ss:$12 sps:$4 sm:$0xff]   ;;  %v14468_v19 = vld [vmem:[%s20823_s1 + $0x18c] ss:$12 sps:$4 sm:$0xff]   ;;  %v14472_v22 = vld [vmem:[%s20823_s1 + $0x174] ss:$12 sps:$4 sm:$0xff]  }
  0x16   : > { %v14469_v20 = vld [vmem:[%s20823_s1 + $0x178] ss:$12 sps:$4 sm:$0xff]   ;;  %v14471_v21 = vld [vmem:[%s20823_s1 + $0x17c] ss:$12 sps:$4 sm:$0xff]   ;;  %v14473_v23 = vld [vmem:[%s20823_s1 + $0x160] ss:$12 sps:$4 sm:$0xff]  }
  0x17   : > { %964 = vmatpush1.bf16.msra.mxu1 %v14455_v9  ;;  %911 = vmatpush1.bf16.msra.mxu0 %v14456_v10  ;;  %v14475_v24 = vld [vmem:[%s20823_s1 + $0x164] ss:$12 sps:$4 sm:$0xff]   ;;  %v14478_v26 = vld [vmem:[%s20823_s1 + $0x2b4] ss:$0 sps:$4 sm:$0x33]   ;;  %v16141_v34 = vld [vmem:[%s16130_s18 + $0x8] sm:$0xff] }
  0x18   : > { %965 = vmatprep.subr.bf16.mxu1 %v15942_v2  ;;  %912 = vmatprep.subr.bf16.mxu0 %v14457_v11  ;;  %v11925_v25 = vld [vmem:[%s20823_s1 + $0x2ac] sm:$0x33]  ;;  %v14476_v27 = vld [vmem:[%s20823_s1 + $0x15c] ss:$12 sps:$4 sm:$0xff]   ;;  %v904_v30 = vsel %vm896_vm0, %v14478_v26, 0  ;;  %v471_v33 = vld [vmem:[%s16130_s18] sm:$0xff] }
  0x19   : > { %v11976_v28 = vcombine.high %v11925_v25, %v11925_v25  ;;  %v11975_v29 = vcombine.low %v11925_v25, %v11925_v25  ;;  %v14480_v32 = vld [vmem:[%s20823_s1 + $0x298] ss:$12 sps:$4 sm:$0xff]   ;;  %v14482_v35 = vld [vmem:[%s20823_s1 + $0x29c] ss:$12 sps:$4 sm:$0xff]   ;;  %v16147_v36 = vcombine.high %v471_v33, %v16141_v34  ;;  %v14483_v38 = vld [vmem:[%s20823_s1 + $0x294] ss:$12 sps:$4 sm:$0xff]   ;;  %v16182_v51 = vcombine.low %v471_v33, %v16141_v34 }
  0x1a   : > { %v16150_v37 = vld [vmem:[%s16130_s18 + $0x14] ss:$8 sps:$4 sm:$0xff]   ;;  %v14484_v39 = vld [vmem:[%s20823_s1 + $0x280] ss:$12 sps:$4 sm:$0xff]   ;;  %v14486_v43 = vld [vmem:[%s20823_s1 + $0x284] ss:$12 sps:$4 sm:$0xff]  }
  0x1b   : > { %966 = vmatpush1.bf16.msra.mxu1 %v14459_v12  ;;  %913 = vmatpush1.bf16.msra.mxu0 %v14460_v13  ;;  %v898_v31 = vsel %vm896_vm0, %v11975_v29, 0  ;;  %v628_v40 = vshrl.u32 %v16147_v36, 16  ;;  %v630_v41 = vshll.u32 %v16147_v36, 16  ;;  %v16162_v42 = vshll.u32 %v16150_v37, 16  ;;  %v14487_v46 = vld [vmem:[%s20823_s1 + $0x27c] ss:$12 sps:$4 sm:$0xff]  }
  0x1c   : > { %967 = vmatprep.subr.bf16.mxu1 %v15942_v2  ;;  %914 = vmatprep.subr.bf16.mxu0 %v14461_v14  ;;  %vm20842_vm1 = vsmask.f32 7424  ;;  %v14488_v47 = vld [vmem:[%s20823_s1 + $0x268] ss:$12 sps:$4 sm:$0xff]   ;;  %vm889_vm2 = vcmask 818176   ;;  %v618_v56 = vshll.u32 %v16182_v51, 16 }
  0x1d   : > { %v632_v44 = vrot.slane %v630_v41, 1  ;;  %v637_v45 = vrot.slane %v16162_v42, 1  ;;  %v14490_v49 = vld [vmem:[%s20823_s1 + $0x26c] ss:$12 sps:$4 sm:$0xff]   ;;  %v14491_v52 = vld [vmem:[%s20823_s1 + $0x264] ss:$12 sps:$4 sm:$0xff]  }
  0x1e   : > { %v14492_v53 = vld [vmem:[%s20823_s1 + $0x250] ss:$12 sps:$4 sm:$0xff]   ;;  %v14494_v54 = vld [vmem:[%s20823_s1 + $0x254] ss:$12 sps:$4 sm:$0xff]   ;;  %v14495_v57 = vld [vmem:[%s20823_s1 + $0x24c] ss:$12 sps:$4 sm:$0xff]  }
  0x1f   : > { %968 = vmatpush1.bf16.msra.mxu1 %v14463_v15  ;;  %915 = vmatpush1.bf16.msra.mxu0 %v14464_v16  ;;  %v633_v48 = vor.u32 %v632_v44, %v628_v40  ;;  %v16197_v55 = vld [vmem:[%s16130_s18 + $0x10] ss:$8 sps:$4 sm:$0xff]   ;;  %v14498_v59 = vld [vmem:[%s20823_s1 + $0x23c] ss:$12 sps:$4 sm:$0xff]   ;;  %v616_v60 = vshrl.u32 %v16182_v51, 16  ;;  %v620_v61 = vrot.slane %v618_v56, 1 }
  0x20   : > { %969 = vmatprep.subr.bf16.mxu1 %v15942_v2  ;;  %916 = vmatprep.subr.bf16.mxu0 %v14465_v17  ;;  %v14496_v58 = vld [vmem:[%s20823_s1 + $0x238] ss:$12 sps:$4 sm:$0xff]   ;;  %v16212_v62 = vshll.u32 %v16197_v55, 16  ;;  %v14499_v63 = vld [vmem:[%s20823_s1 + $0x234] ss:$12 sps:$4 sm:$0xff]   ;;  %v16250_v13 = vshrl.u32 %v16150_v37, 16 }
  0x21   : > { %v638_v50 = vsel %vm20842_vm1, %v633_v48, %v637_v45  ;;  %v14500_v0 = vld [vmem:[%s20823_s1 + $0x220] ss:$12 sps:$4 sm:$0xff]   ;;  %v14502_v1 = vld [vmem:[%s20823_s1 + $0x224] ss:$12 sps:$4 sm:$0xff]   ;;  %v621_v3 = vor.u32 %v620_v61, %v616_v60  ;;  %v14503_v5 = vld [vmem:[%s20823_s1 + $0x21c] ss:$12 sps:$4 sm:$0xff]  }
  0x22   : > { %11981 = vmatprep.mubr.msk.bf16.mxu1 %vm889_vm2, %v638_v50  ;;  %11979 = vmatprep.mubr.msk.bf16.mxu0 %vm889_vm2, %v638_v50  ;;  %v625_v4 = vrot.slane %v16212_v62, 1  ;;  %v14511_v6 = vld [vmem:[%s20823_s1 + $0xac] ss:$12 sps:$4 sm:$0xff]   ;;  %v14512_v8 = vld [vmem:[%s20823_s1 + $0xb0] ss:$12 sps:$4 sm:$0xff]   ;;  %v16253_v14 = vshrl.u32 %v16197_v55, 16 }
  0x23   : > { %970 = vmatpush1.bf16.msra.mxu1 %v14467_v18  ;;  %917 = vmatpush1.bf16.msra.mxu0 %v14468_v19  ;;  %v14509_v9 = vld [vmem:[%s20823_s1 + $0xa8] ss:$12 sps:$4 sm:$0xff]   ;;  %v14513_v11 = vld [vmem:[%s20823_s1 + $0x90] ss:$12 sps:$4 sm:$0xff]   ;;  %v14516_v12 = vld [vmem:[%s20823_s1 + $0x98] ss:$12 sps:$4 sm:$0xff]   ;;  %v649_v19 = vor.u32 %v16250_v13, %v637_v45 }
  0x24   : > { %971 = vmatprep.subr.bf16.mxu1 %v15942_v2  ;;  %918 = vmatprep.subr.bf16.mxu0 %v14469_v20  ;;  %v626_v7 = vsel %vm20842_vm1, %v621_v3, %v625_v4  ;;  %v14515_v10 = vld [vmem:[%s20823_s1 + $0x94] ss:$12 sps:$4 sm:$0xff]   ;;  %v14519_v16 = vld [vmem:[%s20823_s1 + $0x7c] ss:$12 sps:$4 sm:$0xff]   ;;  %v14523_v25 = vld [vmem:[%s20823_s1 + $0x64] ss:$12 sps:$4 sm:$0xff]  }
  0x25   : > { %v533_v15 = vld [vmem:[%s16130_s18 + $0x20] sm:$0x11]  ;;  %v14528_v33 = vld [vmem:[%s20823_s1 + $0x50] ss:$12 sps:$4 sm:$0xff]   ;;  %v14554_v61 = vld [vmem:[%s20823_s1 + $0x10c] ss:$12 sps:$4 sm:$0xff]  }
  0x26   : > { %v16260_v17 = vcombine.high %v533_v15, %v533_v15  ;;  %v16262_v18 = vcombine.low %v533_v15, %v533_v15  ;;  %v14520_v20 = vld [vmem:[%s20823_s1 + $0x80] ss:$12 sps:$4 sm:$0xff]   ;;  %v14529_v40 = vld [vmem:[%s20823_s1 + $0x30] ss:$12 sps:$4 sm:$0xff]   ;;  %v14561_v3 = vld [vmem:[%s20823_s1 + $0xf8] ss:$12 sps:$4 sm:$0xff]  }
  0x27   : > { %972 = vmatpush1.bf16.msra.mxu1 %v14471_v21  ;;  %919 = vmatpush1.bf16.msra.mxu0 %v14472_v22  ;;  %v641_v22 = vor.u32 %v16253_v14, %v625_v4  ;;  %v14535_v41 = vld [vmem:[%s20823_s1 + $0x1c] ss:$12 sps:$4 sm:$0xff]   ;;  %v14539_v44 = vld [vmem:[%s20823_s1 + $0x4] ss:$12 sps:$4 sm:$0xff]   ;;  %v14547_v56 = vld [vmem:[%s20823_s1 + $0x140] ss:$12 sps:$4 sm:$0xff]  }
  0x28   : > { %973 = vmatprep.subr.bf16.mxu1 %v15942_v2  ;;  %920 = vmatprep.subr.bf16.mxu0 %v14473_v23  ;;  %v651_v21 = vshll.u32 %v16260_v17, 16  ;;  %v643_v23 = vshll.u32 %v16262_v18, 16  ;;  %v531_v45 = vld [vmem:[%s20823_s1 + $0x150] sm:$0x33]  ;;  %v14548_v60 = vld [vmem:[%s20823_s1 + $0x120] ss:$12 sps:$4 sm:$0xff]  }
  0x29   : > { %v14542_v48 = vld [vmem:[%s20823_s1 + $0x158] ss:$0 sps:$4 sm:$0x33]   ;;  %v12025_v50 = vcombine.low %v531_v45, %v531_v45  ;;  %v14558_v4 = vld [vmem:[%s20823_s1 + $0xf0] ss:$12 sps:$4 sm:$0xff]   ;;  %vm20841_vm3 = vcmask 1046528  }
  0x2a   : > { %v653_v26 = vrot.slane %v651_v21, 1  ;;  %v16412_v15 = vld [vmem:[%s16130_s18] sm:$0xee]  ;;  %v14577_v21 = vld [vmem:[%s20823_s1 + $0x350] ss:$12 sps:$4 sm:$0xff]   ;;  %vm2332_vm5 = vcmask 1045504  }
  0x2b   : > { %974 = vmatpush1.bf16.msra.mxu1 %v14475_v24  ;;  %921 = vmatpush1.bf16.msra.mxu0 %v14476_v27  ;;  %v14517_v24 = vld [vmem:[%s20823_s1 + $0x78] ss:$12 sps:$4 sm:$0xff]   ;;  %v645_v27 = vrot.slane %v643_v23, 1  ;;  %v1427_v23 = vrot.slane %v16150_v37, 1  ;;  %vm20843_vm4 = vsmask.f32 6400 }
  0x2c   : > { %977 = vmatprep.subr.bf16.mxu1 %v15942_v2  ;;  %11978 = vmatprep.subr.msk.bf16.mxu0 %vm896_vm0, %v11976_v28  ;;  %v14524_v28 = vld [vmem:[%s20823_s1 + $0x68] ss:$12 sps:$4 sm:$0xff]   ;;  %v654_v29 = vsel %vm20842_vm1, %v649_v19, %v653_v26  ;;  %v14576_v19 = vld [vmem:[%s20823_s1 + $0x34c] ss:$12 sps:$4 sm:$0xff]   ;;  %vm20836_vm6 = vsmask.f32 5376 }
  0x2d   : > { %v14584_v26 = vld [vmem:[%s20823_s1 + $0x31c] ss:$12 sps:$4 sm:$0xff]   ;;  %vm3242_vm7 = vcmask 1044480   ;;  %vm441_vm8 = vcmask 125952   ;;  %vm450_vm9 = vcmask 122880   ;;  %vm3868_vm11 = vcmask 1043456  }
  0x2e   : > { %vm20848_vm10 = vsmask.f32 7938  ;;  %vm3871_vm12 = vcmask 1047556   ;;  %vm20837_vm13 = vsmask.f32 7954 }
  0x2f   : > { %978 = vmatpush2.bf16.msra.mxu1 %v904_v30  ;;  %925 = vmatpush2.bf16.msra.mxu0 %v898_v31  ;;  %v646_v30 = vsel %vm20842_vm1, %v641_v22, %v645_v27  ;;  %v14521_v31 = vld [vmem:[%s20823_s1 + $0x60] ss:$12 sps:$4 sm:$0xff]   ;;  %v14574_v22 = vld [vmem:[%s20823_s1 + $0x348] ss:$12 sps:$4 sm:$0xff]  }
  0x30   : > { %979 = vmatprep.subr.bf16.mxu1 %v15942_v2  ;;  %926 = vmatprep.subr.bf16.mxu0 %v14480_v32  ;;  %v14527_v32 = vld [vmem:[%s20823_s1 + $0x4c] ss:$12 sps:$4 sm:$0xff]  }
  0x33   : > { %980 = vmatpush2.bf16.msra.mxu1 %v14482_v35  ;;  %927 = vmatpush2.bf16.msra.mxu0 %v14483_v38  ;;  %v14525_v35 = vld [vmem:[%s20823_s1 + $0x48] ss:$12 sps:$4 sm:$0xff]  }
  0x34   : > { %981 = vmatprep.subr.bf16.mxu1 %v15942_v2  ;;  %928 = vmatprep.subr.bf16.mxu0 %v14484_v39  ;;  %v14531_v38 = vld [vmem:[%s20823_s1 + $0x34] ss:$12 sps:$4 sm:$0xff]   ;;  %v14532_v39 = vld [vmem:[%s20823_s1 + $0x38] ss:$12 sps:$4 sm:$0xff]  }
  0x37   : > { %982 = vmatpush2.bf16.msra.mxu1 %v14486_v43  ;;  %929 = vmatpush2.bf16.msra.mxu0 %v14487_v46  ;;  %v14533_v43 = vld [vmem:[%s20823_s1 + $0x18] ss:$12 sps:$4 sm:$0xff]   ;;  %v14540_v46 = vld [vmem:[%s20823_s1 + $0x8] ss:$12 sps:$4 sm:$0xff]  }
  0x38   : > { %983 = vmatprep.subr.bf16.mxu1 %v15942_v2  ;;  %930 = vmatprep.subr.bf16.mxu0 %v14488_v47  ;;  %v14537_v47 = vld [vmem:[%s20823_s1] ss:$12 sps:$4 sm:$0xff]  }
  0x3b   : > { %984 = vmatpush2.bf16.msra.mxu1 %v14490_v49  ;;  %931 = vmatpush2.bf16.msra.mxu0 %v14491_v52  ;;  %v12026_v49 = vcombine.high %v531_v45, %v531_v45  ;;  %v1253_v52 = vsel %vm896_vm0, %v14542_v48, 0  ;;  %v14598_v45 = vld [vmem:[%s20823_s1 + $0x2b8] ss:$12 sps:$4 sm:$0xff]  }
  0x3c   : > { %985 = vmatprep.subr.bf16.mxu1 %v15942_v2  ;;  %932 = vmatprep.subr.bf16.mxu0 %v14492_v53  ;;  %v1247_v53 = vsel %vm896_vm0, %v12025_v50, 0 }
  0x3f   : > { %986 = vmatpush2.bf16.msra.mxu1 %v14494_v54  ;;  %933 = vmatpush2.bf16.msra.mxu0 %v14495_v57  ;;  %v14546_v54 = vld [vmem:[%s20823_s1 + $0x13c] ss:$12 sps:$4 sm:$0xff]   ;;  %v14544_v57 = vld [vmem:[%s20823_s1 + $0x138] ss:$12 sps:$4 sm:$0xff]  }
  0x40   : > { %987 = vmatprep.subr.bf16.mxu1 %v15942_v2  ;;  %934 = vmatprep.subr.bf16.mxu0 %v14496_v58  ;;  %v14550_v58 = vld [vmem:[%s20823_s1 + $0x124] ss:$12 sps:$4 sm:$0xff]  }
  0x43   : > { %988 = vmatpush2.bf16.msra.mxu1 %v14498_v59  ;;  %935 = vmatpush2.bf16.msra.mxu0 %v14499_v63  ;;  %v14551_v59 = vld [vmem:[%s20823_s1 + $0x128] ss:$12 sps:$4 sm:$0xff]   ;;  %v14555_v63 = vld [vmem:[%s20823_s1 + $0x110] ss:$12 sps:$4 sm:$0xff]  }
  0x44   : > { %989 = vmatprep.subr.bf16.mxu1 %v15942_v2  ;;  %936 = vmatprep.subr.bf16.mxu0 %v14500_v0  ;;  %v14552_v0 = vld [vmem:[%s20823_s1 + $0x108] ss:$12 sps:$4 sm:$0xff]  }
  0x47   : > { %990 = vmatpush2.bf16.msra.mxu1 %v14502_v1  ;;  %937 = vmatpush2.bf16.msra.mxu0 %v14503_v5  ;;  %v14560_v1 = vld [vmem:[%s20823_s1 + $0xf4] ss:$12 sps:$4 sm:$0xff]   ;;  %v14564_v5 = vld [vmem:[%s20823_s1 + $0xdc] ss:$12 sps:$4 sm:$0xff]  }
  0x48   : > { %1308 = vmatprep.subr.bf16.mxu1 %v15942_v2  ;;  %1255 = vmatprep.subr.bf16.mxu0 %v14511_v6  ;;  %v14565_v6 = vld [vmem:[%s20823_s1 + $0xe0] ss:$12 sps:$4 sm:$0xff]  }
  0x4a   : > { %992 = vmatmul.mubr.bf16.vlgmr.msra.gmra.mxu1 %v626_v7  ;;  %939 = vmatmul.mubr.bf16.vlgmr.msra.gmra.mxu0 %v626_v7  ;;  %v14562_v7 = vld [vmem:[%s20823_s1 + $0xd8] ss:$12 sps:$4 sm:$0xff]  }
  0x4b   : > { %1309 = vmatpush1.bf16.msra.mxu1 %v14512_v8  ;;  %1256 = vmatpush1.bf16.msra.mxu0 %v14509_v9  ;;  %v14568_v8 = vld [vmem:[%s20823_s1 + $0xc4] ss:$12 sps:$4 sm:$0xff]   ;;  %v14569_v9 = vld [vmem:[%s20823_s1 + $0xc8] ss:$12 sps:$4 sm:$0xff]  }
  0x4c   : > { %1310 = vmatprep.subr.bf16.mxu1 %v15942_v2  ;;  %1257 = vmatprep.subr.bf16.mxu0 %v14515_v10  ;;  %v14566_v10 = vld [vmem:[%s20823_s1 + $0xc0] ss:$12 sps:$4 sm:$0xff]  }
  0x4d   : > { %11982 = vmatprep.mubr.msk.bf16.mxu1 %vm889_vm2, %v654_v29  ;;  %11980 = vmatprep.mubr.msk.bf16.mxu0 %vm889_vm2, %v654_v29  ;;  %v14582_v29 = vld [vmem:[%s20823_s1 + $0x318] ss:$12 sps:$4 sm:$0xff]  }
  0x4f   : > { %1311 = vmatpush1.bf16.msra.mxu1 %v14516_v12  ;;  %1258 = vmatpush1.bf16.msra.mxu0 %v14513_v11  ;;  %v14572_v11 = vld [vmem:[%s20823_s1 + $0x364] ss:$12 sps:$4 sm:$0xff]   ;;  %v14573_v12 = vld [vmem:[%s20823_s1 + $0x368] ss:$12 sps:$4 sm:$0xff]  }
  0x50   : > { %1312 = vmatprep.subr.bf16.mxu1 %v15942_v2  ;;  %1259 = vmatprep.subr.bf16.mxu0 %v14519_v16  ;;  %v14570_v16 = vld [vmem:[%s20823_s1 + $0x360] ss:$12 sps:$4 sm:$0xff]  }
  0x52   : > { %1000 = vmatmul.mubr.bf16.gmra.mxu1 %v646_v30  ;;  %949 = vmatmul.mubr.bf16.gmra.mxu0 %v646_v30  ;;  %v14588_v30 = vld [vmem:[%s20823_s1 + $0x304] ss:$12 sps:$4 sm:$0xff]  }
  0x53   : > { %1313 = vmatpush1.bf16.msra.mxu1 %v14520_v20  ;;  %1260 = vmatpush1.bf16.msra.mxu0 %v14517_v24  ;;  %v16424_v20 = vcombine.high %v16412_v15, %v16141_v34  ;;  %v14580_v34 = vld [vmem:[%s20823_s1 + $0x334] ss:$12 sps:$4 sm:$0xff]   ;;  %v14581_v24 = vld [vmem:[%s20823_s1 + $0x338] ss:$12 sps:$4 sm:$0xff]  }
  0x54   : > { %1314 = vmatprep.subr.bf16.mxu1 %v15942_v2  ;;  %1261 = vmatprep.subr.bf16.mxu0 %v14523_v25  ;;  %v14578_v25 = vld [vmem:[%s20823_s1 + $0x330] ss:$12 sps:$4 sm:$0xff]  }
  0x55   : > { %12031 = vmatprep.mubr.msk.bf16.mxu1 %vm889_vm2, %v16147_v36  ;;  %12029 = vmatprep.mubr.msk.bf16.mxu0 %vm889_vm2, %v16147_v36  ;;  %v14536_v36 = vld [vmem:[%s20823_s1 + $0x20] ss:$12 sps:$4 sm:$0xff]  }
  0x57   : > { %1315 = vmatpush1.bf16.msra.mxu1 %v14524_v28  ;;  %1262 = vmatpush1.bf16.msra.mxu0 %v14521_v31  ;;  %v16461_v28 = vld [vmem:[#allocation3] sm:$0xff]  ;;  %v14589_v31 = vld [vmem:[%s20823_s1 + $0x308] ss:$12 sps:$4 sm:$0xff]  }
  0x58   : > { %1316 = vmatprep.subr.bf16.mxu1 %v15942_v2  ;;  %1263 = vmatprep.subr.bf16.mxu0 %v14527_v32  ;;  %v14586_v32 = vld [vmem:[%s20823_s1 + $0x300] ss:$12 sps:$4 sm:$0xff]  }
  0x5b   : > { %1317 = vmatpush1.bf16.msra.mxu1 %v14528_v33  ;;  %1264 = vmatpush1.bf16.msra.mxu0 %v14525_v35  ;;  %v14592_v33 = vld [vmem:[%s20823_s1 + $0x2ec] ss:$12 sps:$4 sm:$0xff]   ;;  %v14593_v35 = vld [vmem:[%s20823_s1 + $0x2f0] ss:$12 sps:$4 sm:$0xff]  }
  0x5c   : > { %1318 = vmatprep.subr.bf16.mxu1 %v15942_v2  ;;  %1265 = vmatprep.subr.bf16.mxu0 %v14531_v38  ;;  %v14590_v38 = vld [vmem:[%s20823_s1 + $0x2e8] ss:$12 sps:$4 sm:$0xff]  }
  0x5f   : > { %1319 = vmatpush1.bf16.msra.mxu1 %v14532_v39  ;;  %1266 = vmatpush1.bf16.msra.mxu0 %v14529_v40  ;;  %v14596_v39 = vld [vmem:[%s20823_s1 + $0x2d4] ss:$12 sps:$4 sm:$0xff]   ;;  %v14597_v40 = vld [vmem:[%s20823_s1 + $0x2d8] ss:$12 sps:$4 sm:$0xff]  }
  0x60   : > { %1320 = vmatprep.subr.bf16.mxu1 %v15942_v2  ;;  %1267 = vmatprep.subr.bf16.mxu0 %v14535_v41  ;;  %v14594_v41 = vld [vmem:[%s20823_s1 + $0x2d0] ss:$12 sps:$4 sm:$0xff]  }
  0x63   : > { %1321 = vmatpush1.bf16.msra.mxu1 %v14536_v36  ;;  %1268 = vmatpush1.bf16.msra.mxu0 %v14533_v43  ;;  %v14600_v36 = vld [vmem:[%s20823_s1 + $0x2bc] ss:$12 sps:$4 sm:$0xff]  }
  0x64   : > { %1322 = vmatprep.subr.bf16.mxu1 %v15942_v2  ;;  %1269 = vmatprep.subr.bf16.mxu0 %v14539_v44  ;;  %v12089_v43 = vld [vmem:[%s20823_s1 + $0x408] sm:$0x33] }
  0x65   : > { %v14601_v44 = vld [vmem:[%s20823_s1 + $0x2c0] ss:$12 sps:$4 sm:$0xff]   ;;  %v12135_v48 = vcombine.low %v12089_v43, %v12089_v43 }
  0x67   : > { %1323 = vmatpush1.bf16.msra.mxu1 %v14540_v46  ;;  %1270 = vmatpush1.bf16.msra.mxu0 %v14537_v47  ;;  %v14603_v46 = vld [vmem:[%s20823_s1 + $0x410] ss:$0 sps:$4 sm:$0x33]   ;;  %v12136_v47 = vcombine.high %v12089_v43, %v12089_v43  ;;  %v1674_v50 = vsel %vm896_vm0, %v12135_v48, 0  ;;  %v14653_v43 = vld [vmem:[%s20823_s1 + $0x448] ss:$12 sps:$4 sm:$0xff]  }
  0x68   : > { %1326 = vmatprep.subr.bf16.mxu1 %v15942_v2  ;;  %12028 = vmatprep.subr.msk.bf16.mxu0 %vm896_vm0, %v12026_v49  ;;  %v1680_v49 = vsel %vm896_vm0, %v14603_v46, 0  ;;  %v14657_v46 = vld [vmem:[%s20823_s1 + $0x430] ss:$12 sps:$4 sm:$0xff]   ;;  %v14655_v48 = vld [vmem:[%s20823_s1 + $0x42c] ss:$12 sps:$4 sm:$0xff]  }
  0x6b   : > { %1327 = vmatpush2.bf16.msra.mxu1 %v1253_v52  ;;  %1274 = vmatpush2.bf16.msra.mxu0 %v1247_v53  ;;  %v14607_v52 = vld [vmem:[%s20823_s1 + $0x3f4] ss:$12 sps:$4 sm:$0xff]   ;;  %v14608_v53 = vld [vmem:[%s20823_s1 + $0x3f8] ss:$12 sps:$4 sm:$0xff]  }
  0x6c   : > { %1328 = vmatprep.subr.bf16.mxu1 %v15942_v2  ;;  %1275 = vmatprep.subr.bf16.mxu0 %v14546_v54  ;;  %v14605_v54 = vld [vmem:[%s20823_s1 + $0x3f0] ss:$12 sps:$4 sm:$0xff]  }
  0x6f   : > { %1329 = vmatpush2.bf16.msra.mxu1 %v14547_v56  ;;  %1276 = vmatpush2.bf16.msra.mxu0 %v14544_v57  ;;  %v14611_v56 = vld [vmem:[%s20823_s1 + $0x3dc] ss:$12 sps:$4 sm:$0xff]   ;;  %v14612_v57 = vld [vmem:[%s20823_s1 + $0x3e0] ss:$12 sps:$4 sm:$0xff]  }
  0x70   : > { %1330 = vmatprep.subr.bf16.mxu1 %v15942_v2  ;;  %1277 = vmatprep.subr.bf16.mxu0 %v14550_v58  ;;  %v14609_v58 = vld [vmem:[%s20823_s1 + $0x3d8] ss:$12 sps:$4 sm:$0xff]  }
  0x73   : > { %1331 = vmatpush2.bf16.msra.mxu1 %v14551_v59  ;;  %1278 = vmatpush2.bf16.msra.mxu0 %v14548_v60  ;;  %v14615_v59 = vld [vmem:[%s20823_s1 + $0x3c4] ss:$12 sps:$4 sm:$0xff]   ;;  %v14616_v60 = vld [vmem:[%s20823_s1 + $0x3c8] ss:$12 sps:$4 sm:$0xff]  }
  0x74   : > { %1332 = vmatprep.subr.bf16.mxu1 %v15942_v2  ;;  %1279 = vmatprep.subr.bf16.mxu0 %v14554_v61  ;;  %v14613_v61 = vld [vmem:[%s20823_s1 + $0x3c0] ss:$12 sps:$4 sm:$0xff]  }
  0x77   : > { %1333 = vmatpush2.bf16.msra.mxu1 %v14555_v63  ;;  %1280 = vmatpush2.bf16.msra.mxu0 %v14552_v0  ;;  %v14619_v63 = vld [vmem:[%s20823_s1 + $0x3ac] ss:$12 sps:$4 sm:$0xff]   ;;  %v14620_v0 = vld [vmem:[%s20823_s1 + $0x3b0] ss:$12 sps:$4 sm:$0xff]  }
  0x78   : > { %1334 = vmatprep.subr.bf16.mxu1 %v15942_v2  ;;  %1281 = vmatprep.subr.bf16.mxu0 %v14560_v1  ;;  %v14617_v1 = vld [vmem:[%s20823_s1 + $0x3a8] ss:$12 sps:$4 sm:$0xff]  }
  0x7b   : > { %1335 = vmatpush2.bf16.msra.mxu1 %v14561_v3  ;;  %1282 = vmatpush2.bf16.msra.mxu0 %v14558_v4  ;;  %v14623_v3 = vld [vmem:[%s20823_s1 + $0x394] ss:$12 sps:$4 sm:$0xff]   ;;  %v14624_v4 = vld [vmem:[%s20823_s1 + $0x398] ss:$12 sps:$4 sm:$0xff]  }
  0x7c   : > { %1336 = vmatprep.subr.bf16.mxu1 %v15942_v2  ;;  %1283 = vmatprep.subr.bf16.mxu0 %v14564_v5  ;;  %v16566_v5 = vld [vmem:[%s16130_s18 + $0x8] sm:$0xff] }
  0x7f   : > { %1337 = vmatpush2.bf16.msra.mxu1 %v14565_v6  ;;  %1284 = vmatpush2.bf16.msra.mxu0 %v14562_v7  ;;  %v16570_v6 = vcombine.low %v16412_v15, %v16566_v5  ;;  %v14621_v7 = vld [vmem:[%s20823_s1 + $0x390] ss:$12 sps:$4 sm:$0xff]   ;;  %v14633_v15 = vld [vmem:[%s20823_s1 + $0x4c0] ss:$12 sps:$4 sm:$0xff]  }
  0x80   : > { %1338 = vmatprep.subr.bf16.mxu1 %v15942_v2  ;;  %1285 = vmatprep.subr.bf16.mxu0 %v14568_v8  ;;  %v14627_v8 = vld [vmem:[%s20823_s1 + $0x37c] ss:$12 sps:$4 sm:$0xff]  }
  0x83   : > { %1339 = vmatpush2.bf16.msra.mxu1 %v14569_v9  ;;  %1286 = vmatpush2.bf16.msra.mxu0 %v14566_v10  ;;  %v14628_v9 = vld [vmem:[%s20823_s1 + $0x380] ss:$12 sps:$4 sm:$0xff]   ;;  %v1423_v10 = vrot.slane %v16570_v6, 1 }
  0x84   : > { %1735 = vmatprep.subr.bf16.mxu1 %v15942_v2  ;;  %1682 = vmatprep.subr.bf16.mxu0 %v14572_v11  ;;  %v1424_v11 = vrot.slane %v16197_v55, 1 }
  0x86   : > { %1341 = vmatmul.mubr.bf16.vlgmr.msra.gmra.mxu1 %v16182_v51  ;;  %1288 = vmatmul.mubr.bf16.vlgmr.msra.gmra.mxu0 %v16182_v51  ;;  %v1426_v51 = vrot.slane %v16424_v20, 1 }
  0x87   : > { %1736 = vmatpush1.bf16.msra.mxu1 %v14573_v12  ;;  %1683 = vmatpush1.bf16.msra.mxu0 %v14570_v16  ;;  %v14625_v12 = vld [vmem:[%s20823_s1 + $0x378] ss:$12 sps:$4 sm:$0xff]   ;;  %v1431_v16 = vrot.slane %v16260_v17, 1  ;;  %v14637_v17 = vld [vmem:[%s20823_s1 + $0x4a8] ss:$12 sps:$4 sm:$0xff]  }
  0x88   : > { %1737 = vmatprep.subr.bf16.mxu1 %v15942_v2  ;;  %1684 = vmatprep.subr.bf16.mxu0 %v14576_v19  ;;  %v1428_v27 = vsel %vm20841_vm3, %v1426_v51, %v1427_v23  ;;  %v1875_v19 = vshrl.u32 %v16424_v20, 16 }
  0x89   : > { %12032 = vmatprep.mubr.msk.bf16.mxu1 %vm889_vm2, %v16150_v37  ;;  %12030 = vmatprep.mubr.msk.bf16.mxu0 %vm889_vm2, %v16150_v37  ;;  %v1432_v51 = vsel %vm20841_vm3, %v1427_v23, %v1431_v16  ;;  %v14641_v37 = vld [vmem:[%s20823_s1 + $0x490] ss:$12 sps:$4 sm:$0xff]   ;;  %v14639_v23 = vld [vmem:[%s20823_s1 + $0x48c] ss:$12 sps:$4 sm:$0xff]  }
  0x8b   : > { %1738 = vmatpush1.bf16.msra.mxu1 %v14577_v21  ;;  %1685 = vmatpush1.bf16.msra.mxu0 %v14574_v22  ;;  %v1878_v21 = vshll.u32 %v16424_v20, 16  ;;  %v14631_v22 = vld [vmem:[%s20823_s1 + $0x4bc] ss:$12 sps:$4 sm:$0xff]   ;;  %v14638_v20 = vld [vmem:[%s20823_s1 + $0x4ac] ss:$12 sps:$4 sm:$0xff]  }
  0x8c   : > { %1739 = vmatprep.subr.bf16.mxu1 %v15942_v2  ;;  %1686 = vmatprep.subr.bf16.mxu0 %v14580_v34  ;;  %v14585_v2 = vld [vmem:[%s20823_s1 + $0x320] ss:$12 sps:$4 sm:$0xff]   ;;  %v14634_v34 = vld [vmem:[%s20823_s1 + $0x4c4] ss:$12 sps:$4 sm:$0xff]  }
  0x8e   : > { %1349 = vmatmul.mubr.bf16.gmra.mxu1 %v16197_v55  ;;  %1298 = vmatmul.mubr.bf16.gmra.mxu0 %v16197_v55  ;;  %v1425_v55 = vsel %vm20841_vm3, %v1423_v10, %v1424_v11  ;;  %v14680_v10 = vld [vmem:[%s20823_s1 + $0x508] ss:$12 sps:$4 sm:$0xff]  }
  0x8f   : > { %1740 = vmatpush1.bf16.msra.mxu1 %v14581_v24  ;;  %1687 = vmatpush1.bf16.msra.mxu0 %v14578_v25  ;;  %v14635_v24 = vld [vmem:[%s20823_s1 + $0x4a4] ss:$12 sps:$4 sm:$0xff]   ;;  %v1877_v25 = vrot.slane %v1875_v19, 1 }
  0x90   : > { %1741 = vmatprep.subr.bf16.mxu1 %v16461_v28  ;;  %1688 = vmatprep.subr.bf16.mxu0 %v14584_v26  ;;  %v1880_v26 = vrot.slane %v1878_v21, 2  ;;  %v14678_v19 = vld [vmem:[%s20823_s1 + $0x504] ss:$12 sps:$4 sm:$0xff]  }
  0x91   : > { %12141 = vmatprep.mubr.msk.bf16.mxu1 %vm889_vm2, %v1428_v27  ;;  %12139 = vmatprep.mubr.msk.bf16.mxu0 %vm889_vm2, %v1428_v27  ;;  %v1882_v27 = vrot.slane %v16250_v13, 1  ;;  %v14684_v21 = vld [vmem:[%s20823_s1 + $0x4f0] ss:$12 sps:$4 sm:$0xff]  }
  0x93   : > { %1742 = vmatpush1.bf16.msra.mxu1 %v14585_v2  ;;  %1689 = vmatpush1.bf16.msra.mxu0 %v14582_v29  ;;  %v1883_v2 = vrot.slane %v16162_v42, 2  ;;  %v1429_v29 = vrot.slane %v16262_v18, 1  ;;  %v14642_v18 = vld [vmem:[%s20823_s1 + $0x494] ss:$12 sps:$4 sm:$0xff]  }
  0x94   : > { %1743 = vmatprep.subr.bf16.mxu1 %v16461_v28  ;;  %1690 = vmatprep.subr.bf16.mxu0 %v14588_v30  ;;  %v1881_v30 = vor.u32 %v1880_v26, %v1877_v25  ;;  %v14688_v26 = vld [vmem:[%s20823_s1 + $0x4d8] ss:$12 sps:$4 sm:$0xff]  }
  0x97   : > { %1744 = vmatpush1.bf16.msra.mxu1 %v14589_v31  ;;  %1691 = vmatpush1.bf16.msra.mxu0 %v14586_v32  ;;  %v16629_v31 = vor.u32 %v1883_v2, %v1882_v27  ;;  %v1430_v32 = vsel %vm20841_vm3, %v1424_v11, %v1429_v29  ;;  %v14681_v11 = vld [vmem:[%s20823_s1 + $0x50c] ss:$12 sps:$4 sm:$0xff]   ;;  %v14689_v27 = vld [vmem:[%s20823_s1 + $0x4dc] ss:$12 sps:$4 sm:$0xff]  }
  0x98   : > { %1745 = vmatprep.subr.bf16.mxu1 %v16461_v28  ;;  %1692 = vmatprep.subr.bf16.mxu0 %v14592_v33  ;;  %v14645_v33 = vld [vmem:[%s20823_s1 + $0x478] ss:$12 sps:$4 sm:$0xff]  }
  0x9b   : > { %1746 = vmatpush1.bf16.msra.mxu1 %v14593_v35  ;;  %1693 = vmatpush1.bf16.msra.mxu0 %v14590_v38  ;;  %v14643_v35 = vld [vmem:[%s20823_s1 + $0x474] ss:$12 sps:$4 sm:$0xff]   ;;  %v14646_v38 = vld [vmem:[%s20823_s1 + $0x47c] ss:$12 sps:$4 sm:$0xff]  }
  0x9c   : > { %1747 = vmatprep.subr.bf16.mxu1 %v16461_v28  ;;  %1694 = vmatprep.subr.bf16.mxu0 %v14596_v39  ;;  %v1885_v39 = vsel %vm20843_vm4, %v1881_v30, %v16629_v31 }
  0x9f   : > { %1748 = vmatpush1.bf16.msra.mxu1 %v14597_v40  ;;  %1695 = vmatpush1.bf16.msra.mxu0 %v14594_v41  ;;  %v14649_v40 = vld [vmem:[%s20823_s1 + $0x460] ss:$12 sps:$4 sm:$0xff]   ;;  %v14647_v41 = vld [vmem:[%s20823_s1 + $0x45c] ss:$12 sps:$4 sm:$0xff]  }
  0xa0   : > { %1749 = vmatprep.subr.bf16.mxu1 %v16461_v28  ;;  %1696 = vmatprep.subr.bf16.mxu0 %v14600_v36  ;;  %v14650_v36 = vld [vmem:[%s20823_s1 + $0x464] ss:$12 sps:$4 sm:$0xff]  }
  0xa3   : > { %1750 = vmatpush1.bf16.msra.mxu1 %v14601_v44  ;;  %1697 = vmatpush1.bf16.msra.mxu0 %v14598_v45  ;;  %v14654_v44 = vld [vmem:[%s20823_s1 + $0x44c] ss:$12 sps:$4 sm:$0xff]   ;;  %v14651_v45 = vld [vmem:[%s20823_s1 + $0x444] ss:$12 sps:$4 sm:$0xff]  }
  0xa4   : > { %1753 = vmatprep.subr.bf16.mxu1 %v16461_v28  ;;  %12138 = vmatprep.subr.msk.bf16.mxu0 %vm896_vm0, %v12136_v47  ;;  %v14658_v47 = vld [vmem:[%s20823_s1 + $0x434] ss:$12 sps:$4 sm:$0xff]  }
  0xa7   : > { %1754 = vmatpush2.bf16.msra.mxu1 %v1680_v49  ;;  %1701 = vmatpush2.bf16.msra.mxu0 %v1674_v50  ;;  %v14661_v49 = vld [vmem:[%s20823_s1 + $0x418] ss:$12 sps:$4 sm:$0xff]  }
  0xa8   : > { %1755 = vmatprep.subr.bf16.mxu1 %v16461_v28  ;;  %1702 = vmatprep.subr.bf16.mxu0 %v14607_v52  ;;  %v12199_v50 = vld [vmem:[%s20823_s1 + $0x564] sm:$0x33] }
  0xa9   : > { %v14662_v52 = vld [vmem:[%s20823_s1 + $0x41c] ss:$12 sps:$4 sm:$0xff]  }
  0xab   : > { %1756 = vmatpush2.bf16.msra.mxu1 %v14608_v53  ;;  %1703 = vmatpush2.bf16.msra.mxu0 %v14605_v54  ;;  %v14659_v53 = vld [vmem:[%s20823_s1 + $0x414] ss:$12 sps:$4 sm:$0xff]   ;;  %v14664_v54 = vld [vmem:[%s20823_s1 + $0x56c] ss:$0 sps:$4 sm:$0x33]  }
  0xac   : > { %1757 = vmatprep.subr.bf16.mxu1 %v16461_v28  ;;  %1704 = vmatprep.subr.bf16.mxu0 %v14611_v56  ;;  %v12246_v56 = vcombine.high %v12199_v50, %v12199_v50 }
  0xaf   : > { %1758 = vmatpush2.bf16.msra.mxu1 %v14612_v57  ;;  %1705 = vmatpush2.bf16.msra.mxu0 %v14609_v58  ;;  %v12245_v57 = vcombine.low %v12199_v50, %v12199_v50  ;;  %v2151_v58 = vsel %vm896_vm0, %v14664_v54, 0  ;;  %v14702_v50 = vld [vmem:[%s20823_s1 + $0x5ec] ss:$12 sps:$4 sm:$0xff]  }
  0xb0   : > { %1759 = vmatprep.subr.bf16.mxu1 %v16461_v28  ;;  %1706 = vmatprep.subr.bf16.mxu0 %v14615_v59  ;;  %v14668_v59 = vld [vmem:[%s20823_s1 + $0x550] ss:$12 sps:$4 sm:$0xff]  }
  0xb3   : > { %1760 = vmatpush2.bf16.msra.mxu1 %v14616_v60  ;;  %1707 = vmatpush2.bf16.msra.mxu0 %v14613_v61  ;;  %v2145_v60 = vsel %vm896_vm0, %v12245_v57, 0  ;;  %v14669_v61 = vld [vmem:[%s20823_s1 + $0x554] ss:$12 sps:$4 sm:$0xff]  }
  0xb4   : > { %1761 = vmatprep.subr.bf16.mxu1 %v16461_v28  ;;  %1708 = vmatprep.subr.bf16.mxu0 %v14619_v63  ;;  %v14666_v63 = vld [vmem:[%s20823_s1 + $0x54c] ss:$12 sps:$4 sm:$0xff]   ;;  %v14706_v57 = vld [vmem:[%s20823_s1 + $0x5d4] ss:$12 sps:$4 sm:$0xff]  }
  0xb7   : > { %1762 = vmatpush2.bf16.msra.mxu1 %v14620_v0  ;;  %1709 = vmatpush2.bf16.msra.mxu0 %v14617_v1  ;;  %v14672_v0 = vld [vmem:[%s20823_s1 + $0x538] ss:$12 sps:$4 sm:$0xff]   ;;  %v14673_v1 = vld [vmem:[%s20823_s1 + $0x53c] ss:$12 sps:$4 sm:$0xff]  }
  0xb8   : > { %1763 = vmatprep.subr.bf16.mxu1 %v16461_v28  ;;  %1710 = vmatprep.subr.bf16.mxu0 %v14623_v3  ;;  %v14670_v3 = vld [vmem:[%s20823_s1 + $0x534] ss:$12 sps:$4 sm:$0xff]  }
  0xbb   : > { %1764 = vmatpush2.bf16.msra.mxu1 %v14624_v4  ;;  %1711 = vmatpush2.bf16.msra.mxu0 %v14621_v7  ;;  %v14676_v4 = vld [vmem:[%s20823_s1 + $0x520] ss:$12 sps:$4 sm:$0xff]   ;;  %v14677_v7 = vld [vmem:[%s20823_s1 + $0x524] ss:$12 sps:$4 sm:$0xff]  }
  0xbc   : > { %1765 = vmatprep.subr.bf16.mxu1 %v16461_v28  ;;  %1712 = vmatprep.subr.bf16.mxu0 %v14627_v8  ;;  %v1796_v8 = vld [vmem:[%s16130_s18 + $0x20] sm:$0x33] }
  0xbd   : > { %v16736_v16 = vcombine.high %v1796_v8, %v1796_v8  ;;  %v16755_v25 = vcombine.low %v1796_v8, %v1796_v8  ;;  %v14712_v8 = vld [vmem:[%s20823_s1 + $0x5a0] ss:$12 sps:$4 sm:$0xff]  }
  0xbf   : > { %1766 = vmatpush2.bf16.msra.mxu1 %v14628_v9  ;;  %1713 = vmatpush2.bf16.msra.mxu0 %v14625_v12  ;;  %v14674_v9 = vld [vmem:[%s20823_s1 + $0x51c] ss:$12 sps:$4 sm:$0xff]   ;;  %v1863_v12 = vshrl.u32 %v16570_v6, 16  ;;  %v1890_v30 = vshll.u32 %v16755_v25, 16 }
  0xc0   : > { %2206 = vmatprep.subr.bf16.mxu1 %v16461_v28  ;;  %2153 = vmatprep.subr.bf16.mxu0 %v14633_v15  ;;  %v1866_v15 = vshll.u32 %v16570_v6, 16  ;;  %v14682_v6 = vld [vmem:[%s20823_s1 + $0x4ec] ss:$12 sps:$4 sm:$0xff]  }
  0xc2   : > { %1768 = vmatmul.mubr.bf16.vlgmr.msra.gmra.mxu1 %v1425_v55  ;;  %1715 = vmatmul.mubr.bf16.vlgmr.msra.gmra.mxu0 %v1425_v55  ;;  %v1865_v55 = vrot.slane %v1863_v12, 1  ;;  %v14716_v12 = vld [vmem:[%s20823_s1 + $0x588] ss:$12 sps:$4 sm:$0xff]  }
  0xc3   : > { %2207 = vmatpush1.bf16.msra.mxu1 %v14634_v34  ;;  %2154 = vmatpush1.bf16.msra.mxu0 %v14631_v22  ;;  %v1868_v22 = vrot.slane %v1866_v15, 2  ;;  %v1896_v34 = vshrl.u32 %v16736_v16, 16  ;;  %v14719_v15 = vld [vmem:[%s20823_s1 + $0x590] ss:$12 sps:$4 sm:$0xff]  }
  0xc4   : > { %2208 = vmatprep.subr.bf16.mxu1 %v16461_v28  ;;  %2155 = vmatprep.subr.bf16.mxu0 %v14637_v17  ;;  %v1899_v17 = vshll.u32 %v16736_v16, 16 }
  0xc5   : > { %12142 = vmatprep.mubr.msk.bf16.mxu1 %vm889_vm2, %v1432_v51  ;;  %12140 = vmatprep.mubr.msk.bf16.mxu0 %vm889_vm2, %v1432_v51  ;;  %v1870_v51 = vrot.slane %v16253_v14, 1  ;;  %v1898_v2 = vrot.slane %v1896_v34, 1  ;;  %v14725_v34 = vld [vmem:[%s20823_s1 + $0x6c8] ss:$0 sps:$4 sm:$0x33]  }
  0xc6   : > { %v1901_v29 = vrot.slane %v1899_v17, 2 }
  0xc7   : > { %2209 = vmatpush1.bf16.msra.mxu1 %v14638_v20  ;;  %2156 = vmatpush1.bf16.msra.mxu0 %v14635_v24  ;;  %v14685_v20 = vld [vmem:[%s20823_s1 + $0x4f4] ss:$12 sps:$4 sm:$0xff]   ;;  %v1871_v24 = vrot.slane %v16212_v62, 2 }
  0xc8   : > { %2210 = vmatprep.subr.bf16.mxu1 %v16461_v28  ;;  %2157 = vmatprep.subr.bf16.mxu0 %v14641_v37  ;;  %v1869_v37 = vor.u32 %v1868_v22, %v1865_v55  ;;  %v14723_v55 = vld [vmem:[%s20823_s1 + $0x578] ss:$12 sps:$4 sm:$0xff]   ;;  %v14720_v22 = vld [vmem:[%s20823_s1 + $0x570] ss:$12 sps:$4 sm:$0xff]  }
  0xca   : > { %1776 = vmatmul.mubr.bf16.gmra.mxu1 %v1430_v32  ;;  %1725 = vmatmul.mubr.bf16.gmra.mxu0 %v1430_v32  ;;  %v14686_v32 = vld [vmem:[%s20823_s1 + $0x4d4] ss:$12 sps:$4 sm:$0xff]  }
  0xcb   : > { %2211 = vmatpush1.bf16.msra.mxu1 %v14642_v18  ;;  %2158 = vmatpush1.bf16.msra.mxu0 %v14639_v23  ;;  %v1872_v23 = vor.u32 %v1871_v24, %v1870_v51  ;;  %v1887_v18 = vshrl.u32 %v16755_v25, 16 }
  0xcc   : > { %2212 = vmatprep.subr.bf16.mxu1 %v16461_v28  ;;  %2159 = vmatprep.subr.bf16.mxu0 %v14645_v33  ;;  %v14692_v33 = vld [vmem:[%s20823_s1 + $0x61c] ss:$12 sps:$4 sm:$0xff]  }
  0xcd   : > { %12251 = vmatprep.mubr.msk.bf16.mxu1 %vm889_vm2, %v1885_v39  ;;  %12249 = vmatprep.mubr.msk.bf16.mxu0 %vm889_vm2, %v1885_v39  ;;  %v14690_v39 = vld [vmem:[%s20823_s1 + $0x618] ss:$12 sps:$4 sm:$0xff]  }
  0xcf   : > { %2213 = vmatpush1.bf16.msra.mxu1 %v14646_v38  ;;  %2160 = vmatpush1.bf16.msra.mxu0 %v14643_v35  ;;  %v14693_v35 = vld [vmem:[%s20823_s1 + $0x620] ss:$12 sps:$4 sm:$0xff]  }
  0xd0   : > { %2214 = vmatprep.subr.bf16.mxu1 %v16461_v28  ;;  %2161 = vmatprep.subr.bf16.mxu0 %v14649_v40  ;;  %v16777_v38 = vld [vmem:[%s16130_s18] sm:$0xcc]  ;;  %v1902_v40 = vor.u32 %v1901_v29, %v1898_v2 }
  0xd3   : > { %2215 = vmatpush1.bf16.msra.mxu1 %v14650_v36  ;;  %2162 = vmatpush1.bf16.msra.mxu0 %v14647_v41  ;;  %v1873_v41 = vsel %vm20843_vm4, %v1869_v37, %v1872_v23  ;;  %v1889_v36 = vrot.slane %v1887_v18, 1  ;;  %v14730_v37 = vld [vmem:[%s20823_s1 + $0x6b0] ss:$12 sps:$4 sm:$0xff]   ;;  %v14733_v18 = vld [vmem:[%s20823_s1 + $0x694] ss:$12 sps:$4 sm:$0xff]  }
  0xd4   : > { %2216 = vmatprep.subr.bf16.mxu1 %v16461_v28  ;;  %2163 = vmatprep.subr.bf16.mxu0 %v14653_v43  ;;  %v1892_v43 = vrot.slane %v1890_v30, 2  ;;  %v14734_v30 = vld [vmem:[%s20823_s1 + $0x698] ss:$12 sps:$4 sm:$0xff]  }
  0xd7   : > { %2217 = vmatpush1.bf16.msra.mxu1 %v14654_v44  ;;  %2164 = vmatpush1.bf16.msra.mxu0 %v14651_v45  ;;  %v14696_v44 = vld [vmem:[%s20823_s1 + $0x604] ss:$12 sps:$4 sm:$0xff]   ;;  %v14694_v45 = vld [vmem:[%s20823_s1 + $0x600] ss:$12 sps:$4 sm:$0xff]  }
  0xd8   : > { %2218 = vmatprep.subr.bf16.mxu1 %v16461_v28  ;;  %2165 = vmatprep.subr.bf16.mxu0 %v14657_v46  ;;  %v14697_v46 = vld [vmem:[%s20823_s1 + $0x608] ss:$12 sps:$4 sm:$0xff]  }
  0xdb   : > { %2219 = vmatpush1.bf16.msra.mxu1 %v14658_v47  ;;  %2166 = vmatpush1.bf16.msra.mxu0 %v14655_v48  ;;  %v1903_v47 = vsel %vm20843_vm4, %v16629_v31, %v1902_v40  ;;  %v16797_v48 = vcombine.high %v16777_v38, %v16566_v5  ;;  %v14703_v31 = vld [vmem:[%s20823_s1 + $0x5f0] ss:$12 sps:$4 sm:$0xff]   ;;  %v14700_v5 = vld [vmem:[%s20823_s1 + $0x5e8] ss:$12 sps:$4 sm:$0xff]  }
  0xdc   : > { %2220 = vmatprep.subr.bf16.mxu1 %v16461_v28  ;;  %2167 = vmatprep.subr.bf16.mxu0 %v14661_v49  ;;  %v1893_v49 = vor.u32 %v1892_v43, %v1889_v36  ;;  %v16929_v36 = vld [vmem:[%s16130_s18 + $0x8] sm:$0xff] }
  0xdd   : > { %v16933_v43 = vcombine.low %v16777_v38, %v16929_v36  ;;  %v14746_v38 = vld [vmem:[%s20823_s1 + $0x650] ss:$12 sps:$4 sm:$0xff]  }
  0xdf   : > { %2221 = vmatpush1.bf16.msra.mxu1 %v14662_v52  ;;  %2168 = vmatpush1.bf16.msra.mxu0 %v14659_v53  ;;  %v2336_v52 = vrot.slane %v16797_v48, 2  ;;  %v16813_v53 = vld [vmem:[%s16130_s18 + $0x14] ss:$8 sps:$4 sm:$0xff]  }
  0xe0   : > { %2224 = vmatprep.subr.bf16.mxu1 %v16461_v28  ;;  %12248 = vmatprep.subr.msk.bf16.mxu0 %vm896_vm0, %v12246_v56  ;;  %v2337_v54 = vrot.slane %v16813_v53, 2  ;;  %v1894_v56 = vsel %vm20843_vm4, %v1872_v23, %v1893_v49  ;;  %v14727_v23 = vld [vmem:[%s20823_s1 + $0x6a8] ss:$12 sps:$4 sm:$0xff]  }
  0xe1   : > { %v14743_v49 = vld [vmem:[%s20823_s1 + $0x648] ss:$12 sps:$4 sm:$0xff]  }
  0xe3   : > { %2225 = vmatpush2.bf16.msra.mxu1 %v2151_v58  ;;  %2172 = vmatpush2.bf16.msra.mxu0 %v2145_v60  ;;  %v14704_v58 = vld [vmem:[%s20823_s1 + $0x5d0] ss:$12 sps:$4 sm:$0xff]   ;;  %v2338_v60 = vsel %vm2332_vm5, %v2336_v52, %v2337_v54  ;;  %v14749_v52 = vld [vmem:[%s20823_s1 + $0x634] ss:$12 sps:$4 sm:$0xff]  }
  0xe4   : > { %2226 = vmatprep.subr.bf16.mxu1 %v16461_v28  ;;  %2173 = vmatprep.subr.bf16.mxu0 %v14668_v59  ;;  %v14707_v59 = vld [vmem:[%s20823_s1 + $0x5d8] ss:$12 sps:$4 sm:$0xff]  }
  0xe7   : > { %2227 = vmatpush2.bf16.msra.mxu1 %v14669_v61  ;;  %2174 = vmatpush2.bf16.msra.mxu0 %v14666_v63  ;;  %v14710_v61 = vld [vmem:[%s20823_s1 + $0x5bc] ss:$12 sps:$4 sm:$0xff]  }
  0xe8   : > { %2228 = vmatprep.subr.bf16.mxu1 %v16461_v28  ;;  %2175 = vmatprep.subr.bf16.mxu0 %v14672_v0  ;;  %v14708_v0 = vld [vmem:[%s20823_s1 + $0x5b8] ss:$12 sps:$4 sm:$0xff]  }
  0xeb   : > { %2229 = vmatpush2.bf16.msra.mxu1 %v14673_v1  ;;  %2176 = vmatpush2.bf16.msra.mxu0 %v14670_v3  ;;  %v14711_v1 = vld [vmem:[%s20823_s1 + $0x5c0] ss:$12 sps:$4 sm:$0xff]  }
  0xec   : > { %2230 = vmatprep.subr.bf16.mxu1 %v16461_v28  ;;  %2177 = vmatprep.subr.bf16.mxu0 %v14676_v4  ;;  %v14714_v4 = vld [vmem:[%s20823_s1 + $0x5a4] ss:$12 sps:$4 sm:$0xff]  }
  0xef   : > { %2231 = vmatpush2.bf16.msra.mxu1 %v14677_v7  ;;  %2178 = vmatpush2.bf16.msra.mxu0 %v14674_v9  ;;  %v14715_v9 = vld [vmem:[%s20823_s1 + $0x5a8] ss:$12 sps:$4 sm:$0xff]  }
  0xf0   : > { %2232 = vmatprep.subr.bf16.mxu1 %v16461_v28  ;;  %2179 = vmatprep.subr.bf16.mxu0 %v14680_v10 }
  0xf3   : > { %2233 = vmatpush2.bf16.msra.mxu1 %v14681_v11  ;;  %2180 = vmatpush2.bf16.msra.mxu0 %v14678_v19  ;;  %v14718_v11 = vld [vmem:[%s20823_s1 + $0x58c] ss:$12 sps:$4 sm:$0xff]   ;;  %v14722_v19 = vld [vmem:[%s20823_s1 + $0x574] ss:$12 sps:$4 sm:$0xff]  }
  0xf4   : > { %2234 = vmatprep.subr.bf16.mxu1 %v16461_v28  ;;  %2181 = vmatprep.subr.bf16.mxu0 %v14684_v21  ;;  %v12309_v21 = vld [vmem:[%s20823_s1 + $0x6c0] sm:$0x33] }
  0xf5   : > { %v12355_v51 = vcombine.low %v12309_v21, %v12309_v21 }
  0xf7   : > { %2235 = vmatpush2.bf16.msra.mxu1 %v14685_v20  ;;  %2182 = vmatpush2.bf16.msra.mxu0 %v14682_v6  ;;  %v12356_v20 = vcombine.high %v12309_v21, %v12309_v21  ;;  %v2584_v29 = vsel %vm896_vm0, %v12355_v51, 0  ;;  %v2793_v21 = vrot.slane %v16162_v42, 3  ;;  %v14761_v42 = vld [vmem:[%s20823_s1 + $0x744] ss:$12 sps:$4 sm:$0xff]   ;;  %v14768_v51 = vld [vmem:[%s20823_s1 + $0x734] ss:$12 sps:$4 sm:$0xff]  }
  0xf8   : > { %2236 = vmatprep.subr.bf16.mxu1 %v16461_v28  ;;  %2183 = vmatprep.subr.bf16.mxu0 %v14688_v26  ;;  %v2590_v26 = vsel %vm896_vm0, %v14725_v34, 0 }
  0xfb   : > { %2237 = vmatpush2.bf16.msra.mxu1 %v14689_v27  ;;  %2184 = vmatpush2.bf16.msra.mxu0 %v14686_v32  ;;  %v14729_v27 = vld [vmem:[%s20823_s1 + $0x6ac] ss:$12 sps:$4 sm:$0xff]   ;;  %v14731_v32 = vld [vmem:[%s20823_s1 + $0x690] ss:$12 sps:$4 sm:$0xff]  }
  0xfc   : > { %2645 = vmatprep.subr.bf16.mxu1 %v16461_v28  ;;  %2592 = vmatprep.subr.bf16.mxu0 %v14692_v33  ;;  %v14737_v33 = vld [vmem:[%s20823_s1 + $0x67c] ss:$12 sps:$4 sm:$0xff]  }
  0xfe   : > { %2239 = vmatmul.mubr.bf16.vlgmr.msra.gmra.mxu1 %v1873_v41  ;;  %2186 = vmatmul.mubr.bf16.vlgmr.msra.gmra.mxu0 %v1873_v41  ;;  %v14741_v41 = vld [vmem:[%s20823_s1 + $0x664] ss:$12 sps:$4 sm:$0xff]  }
  0xff   : > { %2646 = vmatpush1.bf16.msra.mxu1 %v14693_v35  ;;  %2593 = vmatpush1.bf16.msra.mxu0 %v14690_v39  ;;  %v14738_v35 = vld [vmem:[%s20823_s1 + $0x680] ss:$12 sps:$4 sm:$0xff]   ;;  %v14735_v39 = vld [vmem:[%s20823_s1 + $0x678] ss:$12 sps:$4 sm:$0xff]  }
 0x100   : > { %2647 = vmatprep.subr.bf16.mxu1 %v16461_v28  ;;  %2594 = vmatprep.subr.bf16.mxu0 %v14696_v44  ;;  %v14742_v44 = vld [vmem:[%s20823_s1 + $0x668] ss:$12 sps:$4 sm:$0xff]  }
 0x101   : > { %12252 = vmatprep.mubr.msk.bf16.mxu1 %vm889_vm2, %v1903_v47  ;;  %12250 = vmatprep.mubr.msk.bf16.mxu0 %vm889_vm2, %v1903_v47 }
 0x103   : > { %2648 = vmatpush1.bf16.msra.mxu1 %v14697_v46  ;;  %2595 = vmatpush1.bf16.msra.mxu0 %v14694_v45  ;;  %v14739_v45 = vld [vmem:[%s20823_s1 + $0x660] ss:$12 sps:$4 sm:$0xff]  }
 0x104   : > { %2649 = vmatprep.subr.bf16.mxu1 %v16461_v28  ;;  %2596 = vmatprep.subr.bf16.mxu0 %v14702_v50  ;;  %v16830_v28 = vld [vmem:[#allocation3] sm:$0xff]  ;;  %v14745_v46 = vld [vmem:[%s20823_s1 + $0x64c] ss:$12 sps:$4 sm:$0xff]   ;;  %v2333_v50 = vrot.slane %v16933_v43, 2 }
 0x106   : > { %2247 = vmatmul.mubr.bf16.gmra.mxu1 %v1894_v56  ;;  %2196 = vmatmul.mubr.bf16.gmra.mxu0 %v1894_v56  ;;  %v2341_v56 = vrot.slane %v16736_v16, 2  ;;  %v14755_v16 = vld [vmem:[%s20823_s1 + $0x778] ss:$12 sps:$4 sm:$0xff]  }
 0x107   : > { %2650 = vmatpush1.bf16.msra.mxu1 %v14703_v31  ;;  %2597 = vmatpush1.bf16.msra.mxu0 %v14700_v5  ;;  %v15926_v31 = vld [vmem:[%s16130_s18 + $0x10] ss:$8 sps:$4 sm:$0xff]  }
 0x108   : > { %2651 = vmatprep.subr.bf16.mxu1 %v16830_v28  ;;  %2598 = vmatprep.subr.bf16.mxu0 %v14706_v57  ;;  %v2334_v5 = vrot.slane %v15926_v31, 2  ;;  %v2339_v57 = vrot.slane %v16755_v25, 2  ;;  %v2788_v25 = vshll.u32 %v16797_v48, 16 }
 0x109   : > { %12361 = vmatprep.mubr.msk.bf16.mxu1 %vm889_vm2, %v2338_v60  ;;  %12359 = vmatprep.mubr.msk.bf16.mxu0 %vm889_vm2, %v2338_v60  ;;  %v14750_v60 = vld [vmem:[%s20823_s1 + $0x638] ss:$12 sps:$4 sm:$0xff]  }
 0x10a   : > { %v16837_v63 = vpop.f32.mrf.mxu1  ;;  %v16923_v40 = vpop.f32.mrf.mxu0  ;;  %v2340_v34 = vsel %vm2332_vm5, %v2334_v5, %v2339_v57 }
 0x10b   : > { %2652 = vmatpush1.bf16.msra.mxu1 %v14707_v59  ;;  %2599 = vmatpush1.bf16.msra.mxu0 %v14704_v58  ;;  %v2785_v58 = vshrl.u32 %v16797_v48, 16  ;;  %v14759_v48 = vld [vmem:[%s20823_s1 + $0x760] ss:$12 sps:$4 sm:$0xff]  }
 0x10c   : > { %v995_v3 = vpop.f32.mrf.mxu1  ;;  %2653 = vmatprep.subr.bf16.mxu1 %v16830_v28  ;;  %2600 = vmatprep.subr.bf16.mxu0 %v14710_v61  ;;  %v16945_v47 = vpop.f32.mrf.mxu0  ;;  %v14747_v61 = vld [vmem:[%s20823_s1 + $0x630] ss:$12 sps:$4 sm:$0xff]  }
 0x10d   : > { %v14756_v3 = vld [vmem:[%s20823_s1 + $0x77c] ss:$12 sps:$4 sm:$0xff]  }
 0x10e   : > { %v16850_v7 = vpop.f32.mrf.mxu1  ;;  %v16962_v59 = vpop.f32.mrf.mxu0 }
 0x10f   : > { %2654 = vmatpush1.bf16.msra.mxu1 %v14711_v1  ;;  %2601 = vmatpush1.bf16.msra.mxu0 %v14708_v0  ;;  %v2787_v0 = vrot.slane %v2785_v58, 2  ;;  %v14783_v58 = vld [vmem:[%s20823_s1 + $0x6d0] ss:$12 sps:$4 sm:$0xff]  }
 0x110   : > { %v998_v10 = vpop.f32.mrf.mxu1  ;;  %2655 = vmatprep.subr.bf16.mxu1 %v16830_v28  ;;  %2602 = vmatprep.subr.bf16.mxu0 %v14714_v4  ;;  %v16975_v1 = vpop.f32.mrf.mxu0  ;;  %v14753_v4 = vld [vmem:[%s20823_s1 + $0x774] ss:$12 sps:$4 sm:$0xff]  }
 0x111   : > { %v2790_v10 = vrot.slane %v2788_v25, 3 }
 0x112   : > { %v16878_v6 = vpop.f32.mrf.mxu1 }
 0x113   : > { %2656 = vmatpush1.bf16.msra.mxu1 %v14715_v9  ;;  %2603 = vmatpush1.bf16.msra.mxu0 %v14712_v8  ;;  %v2335_v8 = vsel %vm2332_vm5, %v2333_v50, %v2334_v5  ;;  %v16984_v9 = vpop.f32.mrf.mxu0  ;;  %v2791_v53 = vor.u32 %v2790_v10, %v2787_v0 }
 0x114   : > { %2657 = vmatprep.subr.bf16.mxu1 %v16830_v28  ;;  %2604 = vmatprep.subr.bf16.mxu0 %v14718_v11  ;;  %v1003_v17 = vpop.f32.mrf.mxu1  ;;  %v14760_v11 = vld [vmem:[%s20823_s1 + $0x764] ss:$12 sps:$4 sm:$0xff]  }
 0x116   : > { %v16887_v24 = vpop.f32.mrf.mxu1 }
 0x117   : > { %2658 = vmatpush1.bf16.msra.mxu1 %v14719_v15  ;;  %2605 = vmatpush1.bf16.msra.mxu0 %v14716_v12  ;;  %v14757_v12 = vld [vmem:[%s20823_s1 + $0x75c] ss:$12 sps:$4 sm:$0xff]   ;;  %v2342_v15 = vsel %vm2332_vm5, %v2337_v54, %v2341_v56  ;;  %vm3786_vm5 = vsmask.f32 4368 }
 0x118   : > { %2659 = vmatprep.subr.bf16.mxu1 %v16830_v28  ;;  %2606 = vmatprep.subr.bf16.mxu0 %v14722_v19  ;;  %v1006_v2 = vpop.f32.mrf.mxu1  ;;  %v2792_v19 = vrot.slane %v16250_v13, 2  ;;  %v14764_v13 = vld [vmem:[%s20823_s1 + $0x74c] ss:$12 sps:$4 sm:$0xff]  }
 0x11a   : > { %v17015_v54 = vor.u32 %v2793_v21, %v2792_v19  ;;  %v14791_v21 = vld [vmem:[%s20823_s1 + $0x80c] ss:$12 sps:$4 sm:$0xff]  }
 0x11b   : > { %2660 = vmatpush1.bf16.msra.mxu1 %v14723_v55  ;;  %2607 = vmatpush1.bf16.msra.mxu0 %v14720_v22  ;;  %v17001_v55 = vpop.f32.mrf.mxu0  ;;  %v14763_v22 = vld [vmem:[%s20823_s1 + $0x748] ss:$12 sps:$4 sm:$0xff]  }
 0x11c   : > { %2663 = vmatprep.subr.bf16.mxu1 %v16830_v28  ;;  %12358 = vmatprep.subr.msk.bf16.mxu0 %vm896_vm0, %v12356_v20  ;;  %v14767_v20 = vld [vmem:[%s20823_s1 + $0x730] ss:$12 sps:$4 sm:$0xff]  }
 0x11d   : > { %v17018_v17 = vpop.f32.mrf.mxu0 }
 0x11f   : > { %2664 = vmatpush2.bf16.msra.mxu1 %v2590_v26  ;;  %2611 = vmatpush2.bf16.msra.mxu0 %v2584_v29  ;;  %v14765_v26 = vld [vmem:[%s20823_s1 + $0x72c] ss:$12 sps:$4 sm:$0xff]   ;;  %v17032_v2 = vpop.f32.mrf.mxu0 }
 0x120   : > { %2665 = vmatprep.subr.bf16.mxu1 %v16830_v28  ;;  %2612 = vmatprep.subr.bf16.mxu0 %v14729_v27  ;;  %v2795_v27 = vsel %vm20836_vm6, %v2791_v53, %v17015_v54  ;;  %v14771_v29 = vld [vmem:[%s20823_s1 + $0x718] ss:$12 sps:$4 sm:$0xff]  }
 0x121   : > { %v14798_v53 = vld [vmem:[%s20823_s1 + $0x7d8] ss:$12 sps:$4 sm:$0xff]  }
 0x123   : > { %2666 = vmatpush2.bf16.msra.mxu1 %v14730_v37  ;;  %2613 = vmatpush2.bf16.msra.mxu0 %v14727_v23  ;;  %v14772_v37 = vld [vmem:[%s20823_s1 + $0x71c] ss:$12 sps:$4 sm:$0xff]  }
 0x124   : > { %2667 = vmatprep.subr.bf16.mxu1 %v16830_v28  ;;  %2614 = vmatprep.subr.bf16.mxu0 %v14733_v18  ;;  %v14769_v18 = vld [vmem:[%s20823_s1 + $0x714] ss:$12 sps:$4 sm:$0xff]  }
 0x127   : > { %2668 = vmatpush2.bf16.msra.mxu1 %v14734_v30  ;;  %2615 = vmatpush2.bf16.msra.mxu0 %v14731_v32 }
 0x128   : > { %2669 = vmatprep.subr.bf16.mxu1 %v16830_v28  ;;  %2616 = vmatprep.subr.bf16.mxu0 %v14737_v33  ;;  %v14775_v33 = vld [vmem:[%s20823_s1 + $0x700] ss:$12 sps:$4 sm:$0xff]  }
 0x12b   : > { %2670 = vmatpush2.bf16.msra.mxu1 %v14738_v35  ;;  %2617 = vmatpush2.bf16.msra.mxu0 %v14735_v39 }
 0x12c   : > { %2671 = vmatprep.subr.bf16.mxu1 %v16830_v28  ;;  %2618 = vmatprep.subr.bf16.mxu0 %v14741_v41 }
 0x12f   : > { %2672 = vmatpush2.bf16.msra.mxu1 %v14742_v44  ;;  %2619 = vmatpush2.bf16.msra.mxu0 %v14739_v45 }
 0x130   : > { %2673 = vmatprep.subr.bf16.mxu1 %v16830_v28  ;;  %2620 = vmatprep.subr.bf16.mxu0 %v14745_v46  ;;  %v14773_v46 = vld [vmem:[%s20823_s1 + $0x6fc] ss:$12 sps:$4 sm:$0xff]  }
 0x133   : > { %2674 = vmatpush2.bf16.msra.mxu1 %v14746_v38  ;;  %2621 = vmatpush2.bf16.msra.mxu0 %v14743_v49  ;;  %v14779_v49 = vld [vmem:[%s20823_s1 + $0x6e8] ss:$12 sps:$4 sm:$0xff]  }
 0x134   : > { %2675 = vmatprep.subr.bf16.mxu1 %v16830_v28  ;;  %2622 = vmatprep.subr.bf16.mxu0 %v14749_v52  ;;  %v14777_v52 = vld [vmem:[%s20823_s1 + $0x6e4] ss:$12 sps:$4 sm:$0xff]  }
 0x137   : > { %2676 = vmatpush2.bf16.msra.mxu1 %v14750_v60  ;;  %2623 = vmatpush2.bf16.msra.mxu0 %v14747_v61  ;;  %v12419_v61 = vld [vmem:[%s20823_s1 + $0x81c] sm:$0x33] }
 0x138   : > { %3116 = vmatprep.subr.bf16.mxu1 %v16830_v28  ;;  %3063 = vmatprep.subr.bf16.mxu0 %v14755_v16  ;;  %v14784_v16 = vld [vmem:[%s20823_s1 + $0x6d4] ss:$12 sps:$4 sm:$0xff]  }
 0x13a   : > { %2678 = vmatmul.mubr.bf16.vlgmr.msra.gmra.mxu1 %v2335_v8  ;;  %2625 = vmatmul.mubr.bf16.vlgmr.msra.gmra.mxu0 %v2335_v8 }
 0x13b   : > { %3117 = vmatpush1.bf16.msra.mxu1 %v14756_v3  ;;  %3064 = vmatpush1.bf16.msra.mxu0 %v14753_v4  ;;  %v14781_v3 = vld [vmem:[%s20823_s1 + $0x6cc] ss:$12 sps:$4 sm:$0xff]   ;;  %v14786_v4 = vld [vmem:[%s20823_s1 + $0x824] ss:$0 sps:$4 sm:$0x33]  }
 0x13c   : > { %3118 = vmatprep.subr.bf16.mxu1 %v16830_v28  ;;  %3065 = vmatprep.subr.bf16.mxu0 %v14759_v48 }
 0x13d   : > { %12362 = vmatprep.mubr.msk.bf16.mxu1 %vm889_vm2, %v2342_v15  ;;  %12360 = vmatprep.mubr.msk.bf16.mxu0 %vm889_vm2, %v2342_v15  ;;  %v14790_v15 = vld [vmem:[%s20823_s1 + $0x808] ss:$12 sps:$4 sm:$0xff]  }
 0x13f   : > { %3119 = vmatpush1.bf16.msra.mxu1 %v14760_v11  ;;  %3066 = vmatpush1.bf16.msra.mxu0 %v14757_v12  ;;  %v12466_v11 = vcombine.high %v12419_v61, %v12419_v61  ;;  %v12465_v12 = vcombine.low %v12419_v61, %v12419_v61  ;;  %v17198_v61 = vld [vmem:[%s16130_s18] sm:$0x88] }
 0x140   : > { %3120 = vmatprep.subr.bf16.mxu1 %v16830_v28  ;;  %3067 = vmatprep.subr.bf16.mxu0 %v14763_v22  ;;  %v14794_v22 = vld [vmem:[%s20823_s1 + $0x7f0] ss:$12 sps:$4 sm:$0xff]  }
 0x141   : > { %v3055_v19 = vsel %vm896_vm0, %v12465_v12, 0  ;;  %v12532_v12 = vcombine.high %v17198_v61, %v16929_v36  ;;  %v14825_v36 = vld [vmem:[%s20823_s1 + $0x8a8] ss:$12 sps:$4 sm:$0xff]  }
 0x142   : > { %2686 = vmatmul.mubr.bf16.gmra.mxu1 %v2340_v34  ;;  %2635 = vmatmul.mubr.bf16.gmra.mxu0 %v2340_v34  ;;  %v2706_v34 = vld [vmem:[%s16130_s18 + $0x20] sm:$0x77] }
 0x143   : > { %3121 = vmatpush1.bf16.msra.mxu1 %v14764_v13  ;;  %3068 = vmatpush1.bf16.msra.mxu0 %v14761_v42  ;;  %v14795_v13 = vld [vmem:[%s20823_s1 + $0x7f4] ss:$12 sps:$4 sm:$0xff]   ;;  %v14792_v42 = vld [vmem:[%s20823_s1 + $0x7ec] ss:$12 sps:$4 sm:$0xff]  }
 0x144   : > { %3122 = vmatprep.subr.bf16.mxu1 %v16830_v28  ;;  %3069 = vmatprep.subr.bf16.mxu0 %v14767_v20  ;;  %v14796_v20 = vld [vmem:[%s20823_s1 + $0x7d4] ss:$12 sps:$4 sm:$0xff]  }
 0x145   : > { %12471 = vmatprep.mubr.msk.bf16.mxu1 %vm889_vm2, %v2795_v27  ;;  %12469 = vmatprep.mubr.msk.bf16.mxu0 %vm889_vm2, %v2795_v27  ;;  %v2776_v27 = vshll.u32 %v16933_v43, 16 }
 0x146   : > { %v1342_v23 = vpop.f32.mrf.mxu1  ;;  %v1289_v32 = vpop.f32.mrf.mxu0 }
 0x147   : > { %v17047_v30 = vadd.f32 %v1342_v23, %v16837_v63  ;;  %3123 = vmatpush1.bf16.msra.mxu1 %v14768_v51  ;;  %v17053_v35 = vadd.f32 %v1289_v32, %v16923_v40  ;;  %3070 = vmatpush1.bf16.msra.mxu0 %v14765_v26  ;;  %v14776_v63 = vld [vmem:[%s20823_s1 + $0x704] ss:$12 sps:$4 sm:$0xff]   ;;  %v2773_v51 = vshrl.u32 %v16933_v43, 16  ;;  %v14802_v26 = vld [vmem:[%s20823_s1 + $0x7c0] ss:$12 sps:$4 sm:$0xff]   ;;  %v2778_v32 = vrot.slane %v2776_v27, 3 }
 0x148   : > { %v1344_v39 = vpop.f32.mrf.mxu1  ;;  %3124 = vmatprep.subr.bf16.mxu1 %v16830_v28  ;;  %v1291_v41 = vpop.f32.mrf.mxu0  ;;  %3071 = vmatprep.subr.bf16.mxu0 %v14771_v29  ;;  %v14803_v29 = vld [vmem:[%s20823_s1 + $0x7c4] ss:$12 sps:$4 sm:$0xff]   ;;  %v14800_v23 = vld [vmem:[%s20823_s1 + $0x7bc] ss:$12 sps:$4 sm:$0xff]  }
 0x149   : > { %v17060_v44 = vadd.f32 %v1291_v41, %v16945_v47  ;;  %v14806_v43 = vld [vmem:[%s20823_s1 + $0x7a8] ss:$12 sps:$4 sm:$0xff]   ;;  %v17168_v39 = vcombine.low %v2706_v34, %v2706_v34  ;;  %v14807_v41 = vld [vmem:[%s20823_s1 + $0x7ac] ss:$12 sps:$4 sm:$0xff]  }
 0x14a   : > { %v1345_v45 = vpop.f32.mrf.mxu1  ;;  %v1293_v38 = vpop.f32.mrf.mxu0  ;;  %v14833_v27 = vld [vmem:[%s20823_s1 + $0x878] ss:$12 sps:$4 sm:$0xff]  }
 0x14b   : > { %v17066_v40 = vadd.f32 %v1345_v45, %v16850_v7  ;;  %3125 = vmatpush1.bf16.msra.mxu1 %v14772_v37  ;;  %v17072_v50 = vadd.f32 %v1293_v38, %v16962_v59  ;;  %3072 = vmatpush1.bf16.msra.mxu0 %v14769_v18  ;;  %v14780_v7 = vld [vmem:[%s20823_s1 + $0x6ec] ss:$12 sps:$4 sm:$0xff]   ;;  %v17158_v37 = vcombine.high %v2706_v34, %v2706_v34  ;;  %v2775_v18 = vrot.slane %v2773_v51, 2  ;;  %v14804_v45 = vld [vmem:[%s20823_s1 + $0x7a4] ss:$12 sps:$4 sm:$0xff]   ;;  %v17182_v38 = vld [vmem:[#allocation3] sm:$0xff] }
 0x14c   : > { %v1347_v31 = vpop.f32.mrf.mxu1  ;;  %3126 = vmatprep.subr.bf16.mxu1 %v16830_v28  ;;  %v17075_v47 = vpop.f32.mrf.mxu0  ;;  %3073 = vmatprep.subr.bf16.mxu0 %v14775_v33  ;;  %v2780_v33 = vrot.slane %v16253_v14, 2  ;;  %v14810_v14 = vld [vmem:[%s20823_s1 + $0x790] ss:$12 sps:$4 sm:$0xff]   ;;  %v14832_v51 = vld [vmem:[%s20823_s1 + $0x874] ss:$12 sps:$4 sm:$0xff]  }
 0x14d   : > { %v14811_v31 = vld [vmem:[%s20823_s1 + $0x794] ss:$12 sps:$4 sm:$0xff]   ;;  %v14829_v34 = vld [vmem:[%s20823_s1 + $0x890] ss:$12 sps:$4 sm:$0xff]   ;;  %442 = vst.msk [vmem:[#allocation2 + $0x8] sm:$0xf] %vm441_vm8, %v17182_v38 }
 0x14e   : > { %v1350_v5 = vpop.f32.mrf.mxu1  ;;  %v1299_v57 = vpop.f32.mrf.mxu0  ;;  %444 = vst.msk [vmem:[#allocation2 + $0x14] sm:$0xf] %vm441_vm8, %v17182_v38  ;;  %446 = vst.msk [vmem:[#allocation2 + $0x20] sm:$0xf] %vm441_vm8, %v17182_v38 }
 0x14f   : > { %v17084_v56 = vadd.f32 %v1350_v5, %v16878_v6  ;;  %3127 = vmatpush1.bf16.msra.mxu1 %v14776_v63  ;;  %3074 = vmatpush1.bf16.msra.mxu0 %v14773_v46  ;;  %v17091_v60 = vadd.f32 %v1299_v57, %v16984_v9  ;;  %v2806_v63 = vshrl.u32 %v17158_v37, 16  ;;  %v2809_v46 = vshll.u32 %v17158_v37, 16  ;;  %v14808_v5 = vld [vmem:[%s20823_s1 + $0x78c] ss:$12 sps:$4 sm:$0xff]   ;;  %448 = vst.msk [vmem:[#allocation2 + $0x2c] sm:$0xf] %vm441_vm8, %v17182_v38 }
 0x150   : > { %v1352_v59 = vpop.f32.mrf.mxu1  ;;  %3128 = vmatprep.subr.bf16.mxu1 %v16830_v28  ;;  %3075 = vmatprep.subr.bf16.mxu0 %v14779_v49  ;;  %v1301_v6 = vpop.f32.mrf.mxu0  ;;  %v2797_v49 = vshrl.u32 %v17168_v39, 16 }
 0x151   : > { %v17100_v0 = vadd.f32 %v1301_v6, %v17001_v55  ;;  %v14788_v55 = vld [vmem:[%s20823_s1 + $0x804] ss:$12 sps:$4 sm:$0xff]   ;;  %v2800_v59 = vshll.u32 %v17168_v39, 16 }
 0x152   : > { %v1353_v25 = vpop.f32.mrf.mxu1  ;;  %v1303_v9 = vpop.f32.mrf.mxu0  ;;  %v14815_v6 = vld [vmem:[%s20823_s1 + $0x8d8] ss:$12 sps:$4 sm:$0xff]  }
 0x153   : > { %v17109_v8 = vadd.f32 %v1353_v25, %v16887_v24  ;;  %3129 = vmatpush1.bf16.msra.mxu1 %v14780_v7  ;;  %3076 = vmatpush1.bf16.msra.mxu0 %v14777_v52  ;;  %v17113_v48 = vadd.f32 %v1303_v9, %v17018_v17  ;;  %v3061_v24 = vsel %vm896_vm0, %v14786_v4, 0  ;;  %v14799_v17 = vld [vmem:[%s20823_s1 + $0x7dc] ss:$12 sps:$4 sm:$0xff]   ;;  %v2808_v7 = vrot.slane %v2806_v63, 2  ;;  %v14837_v63 = vld [vmem:[%s20823_s1 + $0x860] ss:$12 sps:$4 sm:$0xff]  }
 0x154   : > { %3130 = vmatprep.subr.bf16.mxu1 %v16830_v28  ;;  %v1355_v10 = vpop.f32.mrf.mxu1  ;;  %3077 = vmatprep.subr.bf16.mxu0 %v14783_v58  ;;  %v2811_v52 = vrot.slane %v2809_v46, 3  ;;  %v14814_v58 = vld [vmem:[%s20823_s1 + $0x8d4] ss:$12 sps:$4 sm:$0xff]   ;;  %v14818_v9 = vld [vmem:[%s20823_s1 + $0x8bc] ss:$12 sps:$4 sm:$0xff]  }
 0x155   : > { %v2802_v10 = vrot.slane %v2800_v59, 3  ;;  %v12529_v59 = vld [vmem:[%s20823_s1 + $0x978] sm:$0x33] }
 0x156   : > { %v2812_v25 = vor.u32 %v2811_v52, %v2808_v7  ;;  %v14841_v7 = vld [vmem:[%s20823_s1 + $0x848] ss:$12 sps:$4 sm:$0xff]  }
 0x157   : > { %3131 = vmatpush1.bf16.msra.mxu1 %v14784_v16  ;;  %3078 = vmatpush1.bf16.msra.mxu0 %v14781_v3  ;;  %v14812_v16 = vld [vmem:[%s20823_s1 + $0x8d0] ss:$12 sps:$4 sm:$0xff]   ;;  %v2799_v3 = vrot.slane %v2797_v49, 2 }
 0x158   : > { %3134 = vmatprep.subr.bf16.mxu1 %v16830_v28  ;;  %12468 = vmatprep.subr.msk.bf16.mxu0 %vm896_vm0, %v12466_v11  ;;  %v14819_v11 = vld [vmem:[%s20823_s1 + $0x8c0] ss:$12 sps:$4 sm:$0xff]  }
 0x15b   : > { %3135 = vmatpush2.bf16.msra.mxu1 %v3061_v24  ;;  %3082 = vmatpush2.bf16.msra.mxu0 %v3055_v19  ;;  %v2813_v24 = vsel %vm20836_vm6, %v17015_v54, %v2812_v25  ;;  %v2803_v19 = vor.u32 %v2802_v10, %v2799_v3  ;;  %v14842_v25 = vld [vmem:[%s20823_s1 + $0x828] ss:$12 sps:$4 sm:$0xff]   ;;  %v14847_v3 = vld [vmem:[%s20823_s1 + $0x980] ss:$0 sps:$4 sm:$0x33]  }
 0x15c   : > { %3136 = vmatprep.subr.bf16.mxu1 %v16830_v28  ;;  %3083 = vmatprep.subr.bf16.mxu0 %v14790_v15  ;;  %v14816_v15 = vld [vmem:[%s20823_s1 + $0x8b8] ss:$12 sps:$4 sm:$0xff]  }
 0x15f   : > { %3137 = vmatpush2.bf16.msra.mxu1 %v14791_v21  ;;  %3084 = vmatpush2.bf16.msra.mxu0 %v14788_v55  ;;  %v14824_v21 = vld [vmem:[%s20823_s1 + $0x8a4] ss:$12 sps:$4 sm:$0xff]   ;;  %v3246_v55 = vrot.slane %v12532_v12, 3  ;;  %v12576_v12 = vcombine.high %v12529_v59, %v12529_v59 }
 0x160   : > { %3138 = vmatprep.subr.bf16.mxu1 %v16830_v28  ;;  %3085 = vmatprep.subr.bf16.mxu0 %v14794_v22  ;;  %v17230_v22 = vld [vmem:[%s16130_s18 + $0x14] ss:$8 sps:$4 sm:$0xff]  }
 0x161   : > { %v3247_v54 = vrot.slane %v17230_v22, 3 }
 0x163   : > { %3139 = vmatpush2.bf16.msra.mxu1 %v14795_v13  ;;  %3086 = vmatpush2.bf16.msra.mxu0 %v14792_v42  ;;  %v14822_v13 = vld [vmem:[%s20823_s1 + $0x8a0] ss:$12 sps:$4 sm:$0xff]  }
 0x164   : > { %3140 = vmatprep.subr.bf16.mxu1 %v16830_v28  ;;  %3087 = vmatprep.subr.bf16.mxu0 %v14798_v53  ;;  %v14828_v53 = vld [vmem:[%s20823_s1 + $0x88c] ss:$12 sps:$4 sm:$0xff]  }
 0x167   : > { %3141 = vmatpush2.bf16.msra.mxu1 %v14799_v17  ;;  %3088 = vmatpush2.bf16.msra.mxu0 %v14796_v20  ;;  %v14826_v17 = vld [vmem:[%s20823_s1 + $0x888] ss:$12 sps:$4 sm:$0xff]   ;;  %v3248_v20 = vsel %vm3242_vm7, %v3246_v55, %v3247_v54  ;;  %v14856_v55 = vld [vmem:[%s20823_s1 + $0x950] ss:$12 sps:$4 sm:$0xff]  }
 0x168   : > { %3142 = vmatprep.subr.bf16.mxu1 %v16830_v28  ;;  %3089 = vmatprep.subr.bf16.mxu0 %v14802_v26  ;;  %v2781_v28 = vrot.slane %v16212_v62, 3  ;;  %v2779_v62 = vor.u32 %v2778_v32, %v2775_v18  ;;  %v17255_v26 = vpop.f32.mrf.mxu0  ;;  %v14836_v32 = vld [vmem:[%s20823_s1 + $0x85c] ss:$12 sps:$4 sm:$0xff]  }
 0x16a   : > { %v2782_v57 = vor.u32 %v2781_v28, %v2780_v33  ;;  %v14840_v28 = vld [vmem:[%s20823_s1 + $0x844] ss:$12 sps:$4 sm:$0xff]  }
 0x16b   : > { %3143 = vmatpush2.bf16.msra.mxu1 %v14803_v29  ;;  %3090 = vmatpush2.bf16.msra.mxu0 %v14800_v23  ;;  %v14830_v23 = vld [vmem:[%s20823_s1 + $0x870] ss:$12 sps:$4 sm:$0xff]  }
 0x16c   : > { %3144 = vmatprep.subr.bf16.mxu1 %v17182_v38  ;;  %3091 = vmatprep.subr.bf16.mxu0 %v14806_v43  ;;  %v2783_v4 = vsel %vm20836_vm6, %v2779_v62, %v2782_v57  ;;  %v2804_v42 = vsel %vm20836_vm6, %v2782_v57, %v2803_v19  ;;  %v14844_v57 = vld [vmem:[%s20823_s1 + $0x82c] ss:$12 sps:$4 sm:$0xff]   ;;  %v14852_v19 = vld [vmem:[%s20823_s1 + $0x968] ss:$12 sps:$4 sm:$0xff]  }
 0x16f   : > { %3145 = vmatpush2.bf16.msra.mxu1 %v14807_v41  ;;  %3092 = vmatpush2.bf16.msra.mxu0 %v14804_v45  ;;  %v14834_v45 = vld [vmem:[%s20823_s1 + $0x858] ss:$12 sps:$4 sm:$0xff]  }
 0x170   : > { %3146 = vmatprep.subr.bf16.mxu1 %v17182_v38  ;;  %3093 = vmatprep.subr.bf16.mxu0 %v14810_v14 }
 0x173   : > { %3147 = vmatpush2.bf16.msra.mxu1 %v14811_v31  ;;  %3094 = vmatpush2.bf16.msra.mxu0 %v14808_v5  ;;  %v14838_v5 = vld [vmem:[%s20823_s1 + $0x840] ss:$12 sps:$4 sm:$0xff]  }
 0x174   : > { %3555 = vmatprep.subr.bf16.mxu1 %v17182_v38  ;;  %3502 = vmatprep.subr.bf16.mxu0 %v14814_v58 }
 0x176   : > { %3149 = vmatmul.mubr.bf16.vlgmr.msra.gmra.mxu1 %v2783_v4  ;;  %3096 = vmatmul.mubr.bf16.vlgmr.msra.gmra.mxu0 %v2783_v4 }
 0x177   : > { %3556 = vmatpush1.bf16.msra.mxu1 %v14815_v6  ;;  %3503 = vmatpush1.bf16.msra.mxu0 %v14812_v16 }
 0x178   : > { %3557 = vmatprep.subr.bf16.mxu1 %v17182_v38  ;;  %3504 = vmatprep.subr.bf16.mxu0 %v14818_v9 }
 0x179   : > { %12472 = vmatprep.mubr.msk.bf16.mxu1 %vm889_vm2, %v2813_v24  ;;  %12470 = vmatprep.mubr.msk.bf16.mxu0 %vm889_vm2, %v2813_v24  ;;  %v14851_v24 = vld [vmem:[%s20823_s1 + $0x964] ss:$12 sps:$4 sm:$0xff]  }
 0x17b   : > { %3558 = vmatpush1.bf16.msra.mxu1 %v14819_v11  ;;  %3505 = vmatpush1.bf16.msra.mxu0 %v14816_v15  ;;  %v12575_v15 = vcombine.low %v12529_v59, %v12529_v59 }
 0x17c   : > { %3559 = vmatprep.subr.bf16.mxu1 %v17182_v38  ;;  %3506 = vmatprep.subr.bf16.mxu0 %v14824_v21  ;;  %v14849_v21 = vld [vmem:[%s20823_s1 + $0x960] ss:$12 sps:$4 sm:$0xff]  }
 0x17e   : > { %3157 = vmatmul.mubr.bf16.gmra.mxu1 %v2804_v42  ;;  %3106 = vmatmul.mubr.bf16.gmra.mxu0 %v2804_v42  ;;  %v14859_v42 = vld [vmem:[%s20823_s1 + $0x934] ss:$12 sps:$4 sm:$0xff]  }
 0x17f   : > { %3560 = vmatpush1.bf16.msra.mxu1 %v14825_v36  ;;  %3507 = vmatpush1.bf16.msra.mxu0 %v14822_v13  ;;  %v14855_v36 = vld [vmem:[%s20823_s1 + $0x94c] ss:$12 sps:$4 sm:$0xff]   ;;  %v14853_v13 = vld [vmem:[%s20823_s1 + $0x948] ss:$12 sps:$4 sm:$0xff]  }
 0x180   : > { %3561 = vmatprep.subr.bf16.mxu1 %v17182_v38  ;;  %3508 = vmatprep.subr.bf16.mxu0 %v14828_v53  ;;  %v14860_v53 = vld [vmem:[%s20823_s1 + $0x938] ss:$12 sps:$4 sm:$0xff]  }
 0x181   : > { %12581 = vmatprep.mubr.msk.bf16.mxu1 %vm889_vm2, %v3248_v20  ;;  %12579 = vmatprep.mubr.msk.bf16.mxu0 %vm889_vm2, %v3248_v20  ;;  %v14864_v20 = vld [vmem:[%s20823_s1 + $0x920] ss:$12 sps:$4 sm:$0xff]  }
 0x182   : > { %v1769_v29 = vpop.f32.mrf.mxu1  ;;  %v17268_v43 = vpop.f32.mrf.mxu0 }
 0x183   : > { %v17266_v18 = vadd.f32 %v1769_v29, %v17047_v30  ;;  %3562 = vmatpush1.bf16.msra.mxu1 %v14829_v34  ;;  %3509 = vmatpush1.bf16.msra.mxu0 %v14826_v17  ;;  %v14857_v34 = vld [vmem:[%s20823_s1 + $0x930] ss:$12 sps:$4 sm:$0xff]   ;;  %v14868_v29 = vld [vmem:[%s20823_s1 + $0x908] ss:$12 sps:$4 sm:$0xff]  }
 0x184   : > { %v1771_v33 = vpop.f32.mrf.mxu1  ;;  %3563 = vmatprep.subr.bf16.mxu1 %v17182_v38  ;;  %v17274_v41 = vpop.f32.mrf.mxu0  ;;  %3510 = vmatprep.subr.bf16.mxu0 %v14832_v51  ;;  %v14863_v17 = vld [vmem:[%s20823_s1 + $0x91c] ss:$12 sps:$4 sm:$0xff]   ;;  %v14861_v51 = vld [vmem:[%s20823_s1 + $0x918] ss:$12 sps:$4 sm:$0xff]  }
 0x185   : > { %v14865_v33 = vld [vmem:[%s20823_s1 + $0x900] ss:$12 sps:$4 sm:$0xff]  }
 0x186   : > { %v1772_v30 = vpop.f32.mrf.mxu1  ;;  %v17285_v14 = vpop.f32.mrf.mxu0 }
 0x187   : > { %v17283_v46 = vadd.f32 %v1772_v30, %v17066_v40  ;;  %3564 = vmatpush1.bf16.msra.mxu1 %v14833_v27  ;;  %3511 = vmatpush1.bf16.msra.mxu0 %v14830_v23  ;;  %v14867_v27 = vld [vmem:[%s20823_s1 + $0x904] ss:$12 sps:$4 sm:$0xff]   ;;  %v15929_v23 = vld [vmem:[%s16130_s18 + $0x8] sm:$0xff] }
 0x188   : > { %v1774_v49 = vpop.f32.mrf.mxu1  ;;  %3565 = vmatprep.subr.bf16.mxu1 %v17182_v38  ;;  %v17291_v31 = vpop.f32.mrf.mxu0  ;;  %3512 = vmatprep.subr.bf16.mxu0 %v14836_v32  ;;  %v12531_v32 = vcombine.low %v17198_v61, %v15929_v23  ;;  %v14872_v30 = vld [vmem:[%s20823_s1 + $0x8f0] ss:$12 sps:$4 sm:$0xff]   ;;  %v14869_v61 = vld [vmem:[%s20823_s1 + $0x8e8] ss:$12 sps:$4 sm:$0xff]   ;;  %v14892_v23 = vld [vmem:[%s20825_s3 + $0x1cc] ss:$12 sps:$4 sm:$0xff]  }
 0x18a   : > { %v1777_v40 = vpop.f32.mrf.mxu1  ;;  %v17302_v62 = vpop.f32.mrf.mxu0 }
 0x18b   : > { %v17300_v52 = vadd.f32 %v1777_v40, %v17084_v56  ;;  %3566 = vmatpush1.bf16.msra.mxu1 %v14837_v63  ;;  %3513 = vmatpush1.bf16.msra.mxu0 %v14834_v45  ;;  %v14845_v56 = vld [vmem:[%s20823_s1 + $0x830] ss:$12 sps:$4 sm:$0xff]   ;;  %v14871_v63 = vld [vmem:[%s20823_s1 + $0x8ec] ss:$12 sps:$4 sm:$0xff]   ;;  %v3243_v45 = vrot.slane %v12531_v32, 3 }
 0x18c   : > { %v1779_v58 = vpop.f32.mrf.mxu1  ;;  %3567 = vmatprep.subr.bf16.mxu1 %v17182_v38  ;;  %v17311_v6 = vpop.f32.mrf.mxu0  ;;  %3514 = vmatprep.subr.bf16.mxu0 %v14840_v28  ;;  %v15930_v28 = vld [vmem:[%s16130_s18 + $0x10] ss:$8 sps:$4 sm:$0xff]   ;;  %v14890_v32 = vld [vmem:[%s20825_s3 + $0x1c8] ss:$12 sps:$4 sm:$0xff]  }
 0x18d   : > { %v3244_v49 = vrot.slane %v15930_v28, 3  ;;  %v14899_v28 = vld [vmem:[%s20825_s3 + $0x300] ss:$12 sps:$4 sm:$0xff]  }
 0x18e   : > { %v1780_v16 = vpop.f32.mrf.mxu1  ;;  %v1730_v9 = vpop.f32.mrf.mxu0 }
 0x18f   : > { %v17323_v4 = vadd.f32 %v1780_v16, %v17109_v8  ;;  %3568 = vmatpush1.bf16.msra.mxu1 %v14841_v7  ;;  %v17326_v10 = vadd.f32 %v1730_v9, %v17113_v48  ;;  %3515 = vmatpush1.bf16.msra.mxu0 %v14838_v5  ;;  %v3500_v8 = vsel %vm896_vm0, %v14847_v3, 0  ;;  %v3494_v48 = vsel %vm896_vm0, %v12575_v15, 0 }
 0x190   : > { %3569 = vmatprep.subr.bf16.mxu1 %v17182_v38  ;;  %v1782_v11 = vpop.f32.mrf.mxu1  ;;  %3516 = vmatprep.subr.bf16.mxu0 %v14844_v57  ;;  %v3251_v7 = vrot.slane %v17158_v37, 3  ;;  %v3245_v40 = vsel %vm3242_vm7, %v3243_v45, %v3244_v49  ;;  %v3249_v57 = vrot.slane %v17168_v39, 3  ;;  %v14896_v45 = vld [vmem:[%s20825_s3 + $0x198] ss:$12 sps:$4 sm:$0xff]  }
 0x191   : > { %v14875_v11 = vld [vmem:[%s20825_s3 + $0x240] ss:$12 sps:$4 sm:$0xff]  }
 0x192   : > { %v3252_v5 = vsel %vm3242_vm7, %v3247_v54, %v3251_v7  ;;  %v3250_v37 = vsel %vm3242_vm7, %v3244_v49, %v3249_v57  ;;  %v17480_v49 = vpop.f32.mrf.mxu0  ;;  %v14904_v7 = vld [vmem:[%s20825_s3 + $0x2ec] ss:$12 sps:$4 sm:$0xff]   ;;  %v14907_v57 = vld [vmem:[%s20825_s3 + $0x2d4] ss:$12 sps:$4 sm:$0xff]  }
 0x193   : > { %3570 = vmatpush1.bf16.msra.mxu1 %v14845_v56  ;;  %3517 = vmatpush1.bf16.msra.mxu0 %v14842_v25 }
 0x194   : > { %3573 = vmatprep.subr.bf16.mxu1 %v17182_v38  ;;  %12578 = vmatprep.subr.msk.bf16.mxu0 %vm896_vm0, %v12576_v12  ;;  %v14880_v12 = vld [vmem:[%s20825_s3 + $0x22c] ss:$12 sps:$4 sm:$0xff]  }
 0x197   : > { %3574 = vmatpush2.bf16.msra.mxu1 %v3500_v8  ;;  %3521 = vmatpush2.bf16.msra.mxu0 %v3494_v48  ;;  %v14881_v48 = vld [vmem:[%s20825_s3 + $0x210] ss:$12 sps:$4 sm:$0xff]  }
 0x198   : > { %3575 = vmatprep.subr.bf16.mxu1 %v17182_v38  ;;  %3522 = vmatprep.subr.bf16.mxu0 %v14851_v24  ;;  %v14883_v24 = vld [vmem:[%s20825_s3 + $0x214] ss:$12 sps:$4 sm:$0xff]  }
 0x19b   : > { %3576 = vmatpush2.bf16.msra.mxu1 %v14852_v19  ;;  %3523 = vmatpush2.bf16.msra.mxu0 %v14849_v21 }
 0x19c   : > { %3577 = vmatprep.subr.bf16.mxu1 %v17182_v38  ;;  %3524 = vmatprep.subr.bf16.mxu0 %v14855_v36 }
 0x19f   : > { %3578 = vmatpush2.bf16.msra.mxu1 %v14856_v55  ;;  %3525 = vmatpush2.bf16.msra.mxu0 %v14853_v13  ;;  %v14886_v55 = vld [vmem:[%s20825_s3 + $0x1fc] ss:$12 sps:$4 sm:$0xff]   ;;  %v14884_v13 = vld [vmem:[%s20825_s3 + $0x1f8] ss:$12 sps:$4 sm:$0xff]  }
 0x1a0   : > { %3579 = vmatprep.subr.bf16.mxu1 %v17182_v38  ;;  %3526 = vmatprep.subr.bf16.mxu0 %v14859_v42 }
 0x1a3   : > { %3580 = vmatpush2.bf16.msra.mxu1 %v14860_v53  ;;  %3527 = vmatpush2.bf16.msra.mxu0 %v14857_v34 }
 0x1a4   : > { %3581 = vmatprep.subr.bf16.mxu1 %v17182_v38  ;;  %3528 = vmatprep.subr.bf16.mxu0 %v14863_v17  ;;  %v14889_v17 = vld [vmem:[%s20825_s3 + $0x1e4] ss:$12 sps:$4 sm:$0xff]  }
 0x1a7   : > { %3582 = vmatpush2.bf16.msra.mxu1 %v14864_v20  ;;  %3529 = vmatpush2.bf16.msra.mxu0 %v14861_v51  ;;  %v14887_v20 = vld [vmem:[%s20825_s3 + $0x1e0] ss:$12 sps:$4 sm:$0xff]  }
 0x1a8   : > { %3583 = vmatprep.subr.bf16.mxu1 %v17182_v38  ;;  %3530 = vmatprep.subr.bf16.mxu0 %v14867_v27 }
 0x1ab   : > { %3584 = vmatpush2.bf16.msra.mxu1 %v14868_v29  ;;  %3531 = vmatpush2.bf16.msra.mxu0 %v14865_v33  ;;  %v14895_v33 = vld [vmem:[%s20825_s3 + $0x1b4] ss:$12 sps:$4 sm:$0xff]  }
 0x1ac   : > { %3585 = vmatprep.subr.bf16.mxu1 %v17182_v38  ;;  %3532 = vmatprep.subr.bf16.mxu0 %v14871_v63  ;;  %v14893_v63 = vld [vmem:[%s20825_s3 + $0x1b0] ss:$12 sps:$4 sm:$0xff]  }
 0x1af   : > { %3586 = vmatpush2.bf16.msra.mxu1 %v14872_v30  ;;  %3533 = vmatpush2.bf16.msra.mxu0 %v14869_v61  ;;  %v14898_v30 = vld [vmem:[%s20825_s3 + $0x19c] ss:$12 sps:$4 sm:$0xff]   ;;  %v14901_v61 = vld [vmem:[%s20825_s3 + $0x304] ss:$12 sps:$4 sm:$0xff]  }
 0x1b2   : > { %3588 = vmatmul.mubr.bf16.vlgmr.msra.gmra.mxu1 %v3245_v40  ;;  %3535 = vmatmul.mubr.bf16.vlgmr.msra.gmra.mxu0 %v3245_v40 }
 0x1b3   : > { %12582 = vmatprep.mubr.msk.bf16.mxu1 %vm889_vm2, %v3252_v5  ;;  %12580 = vmatprep.mubr.msk.bf16.mxu0 %vm889_vm2, %v3252_v5  ;;  %v14902_v5 = vld [vmem:[%s20825_s3 + $0x2e8] ss:$12 sps:$4 sm:$0xff]   ;;  %vm20847_vm2 = vsmask.f32 256 }
 0x1ba   : > { %3596 = vmatmul.mubr.bf16.gmra.mxu1 %v3250_v37  ;;  %3545 = vmatmul.mubr.bf16.gmra.mxu0 %v3250_v37 }
 0x1bb   : > { %4487 = vmatprep.mubr.bf16.mxu1 %v17182_v38  ;;  %v14878_v38 = vld [vmem:[%s20825_s3 + $0x228] ss:$12 sps:$4 sm:$0xff]  }
 0x1be   : > { %v2240_v58 = vpop.f32.mrf.mxu1  ;;  %v17485_v40 = vpop.f32.mrf.mxu0 }
 0x1bf   : > { %v2257_v59 = vadd.f32 %v2240_v58, %v17266_v18  ;;  %v14905_v58 = vld [vmem:[%s20825_s3 + $0x2d0] ss:$12 sps:$4 sm:$0xff]  }
 0x1c0   : > { %v2242_v22 = vpop.f32.mrf.mxu1  ;;  %v17493_v37 = vpop.f32.mrf.mxu0 }
 0x1c2   : > { %v2243_v56 = vpop.f32.mrf.mxu1  ;;  %v17501_v22 = vpop.f32.mrf.mxu0 }
 0x1c3   : > { %v2260_v54 = vadd.f32 %v2243_v56, %v17283_v46  ;;  %v14908_v56 = vld [vmem:[%s20825_s3 + $0x2b8] ss:$12 sps:$4 sm:$0xff]  }
 0x1c4   : > { %v2245_v16 = vpop.f32.mrf.mxu1 }
 0x1c5   : > { %v14916_v16 = vld [vmem:[%s20825_s3 + $0x2a4] ss:$12 sps:$4 sm:$0xff]  }
 0x1c6   : > { %v2248_v25 = vpop.f32.mrf.mxu1 }
 0x1c7   : > { %v2263_v39 = vadd.f32 %v2248_v25, %v17300_v52  ;;  %v14877_v52 = vld [vmem:[%s20825_s3 + $0x244] ss:$12 sps:$4 sm:$0xff]   ;;  %v17513_v25 = vpop.f32.mrf.mxu0 }
 0x1c8   : > { %v2250_v18 = vpop.f32.mrf.mxu1  ;;  %4402 = vmatprep.subr.bf16.mxu0 %v14877_v52 }
 0x1c9   : > { %4403 = vmatpush1.bf16.msra.mxu0 %v14875_v11  ;;  %v14919_v18 = vld [vmem:[%s20825_s3 + $0x28c] ss:$12 sps:$4 sm:$0xff]   ;;  %v14920_v11 = vld [vmem:[%s20825_s3 + $0x270] ss:$12 sps:$4 sm:$0xff]  }
 0x1ca   : > { %v2251_v3 = vpop.f32.mrf.mxu1  ;;  %4404 = vmatprep.subr.bf16.mxu0 %v14880_v12  ;;  %v14911_v12 = vld [vmem:[%s20825_s3 + $0x318] ss:$12 sps:$4 sm:$0xff]  }
 0x1cb   : > { %v2266_v46 = vadd.f32 %v2251_v3, %v17323_v4  ;;  %v17521_v3 = vpop.f32.mrf.mxu0 }
 0x1cc   : > { %v2253_v9 = vpop.f32.mrf.mxu1 }
 0x1cd   : > { %4405 = vmatpush1.bf16.msra.mxu0 %v14878_v38  ;;  %v14922_v9 = vld [vmem:[%s20825_s3 + $0x274] ss:$12 sps:$4 sm:$0xff]   ;;  %v17529_v52 = vpop.f32.mrf.mxu0  ;;  %v14913_v38 = vld [vmem:[%s20825_s3 + $0x31c] ss:$12 sps:$4 sm:$0xff]  }
 0x1ce   : > { %4406 = vmatprep.subr.bf16.mxu0 %v14883_v24  ;;  %v14925_v24 = vld [vmem:[%s20825_s3 + $0x25c] ss:$12 sps:$4 sm:$0xff]   ;;  %4469 = vmatprep.subr.bf16.mxu1 %v14913_v38  ;;  %v3616_v38 = vld [vmem:[%s20824_s2] sm:$0x7] }
 0x1cf   : > { %4470 = vmatpush1.bf16.msra.mxu1 %v14911_v12 }
 0x1d1   : > { %4407 = vmatpush1.bf16.msra.mxu0 %v14881_v48  ;;  %v17549_v48 = vpop.f32.mrf.mxu0 }
 0x1d2   : > { %4408 = vmatprep.subr.bf16.mxu0 %v14886_v55 }
 0x1d5   : > { %4409 = vmatpush1.bf16.msra.mxu0 %v14884_v13 }
 0x1d6   : > { %4410 = vmatprep.subr.bf16.mxu0 %v14889_v17 }
 0x1d9   : > { %4411 = vmatpush1.bf16.msra.mxu0 %v14887_v20 }
 0x1da   : > { %4412 = vmatprep.subr.bf16.mxu0 %v14892_v23 }
 0x1dd   : > { %4413 = vmatpush1.bf16.msra.mxu0 %v14890_v32 }
 0x1de   : > { %4414 = vmatprep.subr.bf16.mxu0 %v14895_v33 }
 0x1e1   : > { %4415 = vmatpush1.bf16.msra.mxu0 %v14893_v63 }
 0x1e2   : > { %4416 = vmatprep.subr.bf16.mxu0 %v14898_v30 }
 0x1e5   : > { %4417 = vmatpush1.bf16.msra.mxu0 %v14896_v45 }
 0x1e6   : > { %4418 = vmatprep.subr.bf16.mxu0 %v14901_v61 }
 0x1e9   : > { %4419 = vmatpush2.bf16.msra.mxu0 %v14899_v28 }
 0x1ea   : > { %4420 = vmatprep.subr.bf16.mxu0 %v14904_v7 }
 0x1ed   : > { %4421 = vmatpush2.bf16.msra.mxu0 %v14902_v5 }
 0x1ee   : > { %4422 = vmatprep.subr.bf16.mxu0 %v14907_v57 }
 0x1f1   : > { %4423 = vmatpush2.bf16.msra.mxu0 %v14905_v58 }
 0x1fa   : > { %v2679_v4 = vpop.f32.mrf.mxu1 }
 0x1fb   : > { %v17430_v15 = vadd.f32 %v2679_v4, %v2257_v59  ;;  %v14910_v59 = vld [vmem:[%s20825_s3 + $0x2bc] ss:$12 sps:$4 sm:$0xff]   ;;  %v14923_v4 = vld [vmem:[%s20825_s3 + $0x258] ss:$12 sps:$4 sm:$0xff]  }
 0x1fc   : > { %v2681_v8 = vpop.f32.mrf.mxu1  ;;  %4424 = vmatprep.subr.bf16.mxu0 %v14910_v59 }
 0x1fd   : > { %4425 = vmatpush2.bf16.msra.mxu0 %v14908_v56  ;;  %v14926_v8 = vld [vmem:[%s20825_s3 + $0x308] ss:$12 sps:$4 sm:$0xff]  }
 0x1fe   : > { %v2682_v19 = vpop.f32.mrf.mxu1  ;;  %4426 = vmatprep.subr.bf16.mxu0 %v14916_v16  ;;  %14036 = vmatprep.subr.bf16.mxu1 %v14926_v8  ;;  %v3618_v16 = vlaneseq }
 0x1ff   : > { %v17438_v21 = vadd.f32 %v2682_v19, %v2260_v54  ;;  %v17506_v54 = vld [vmem:[#allocation3] sm:$0xff]  ;;  %v17551_v19 = vpop.f32.mrf.mxu0 }
 0x200   : > { %v2684_v36 = vpop.f32.mrf.mxu1  ;;  %451 = vst.msk [vmem:[#allocation2 + $0x38] sm:$0x1] %vm450_vm9, %v17506_v54 }
 0x201   : > { %v14933_v36 = vld [vmem:[%s20825_s3 + $0xac] ss:$12 sps:$4 sm:$0xff]   ;;  %v2626_v13 = vpop.f32.mrf.mxu0 }
 0x202   : > { %v2687_v42 = vpop.f32.mrf.mxu1 }
 0x203   : > { %v17446_v53 = vadd.f32 %v2687_v42, %v2263_v39  ;;  %v14914_v39 = vld [vmem:[%s20825_s3 + $0x2a0] ss:$12 sps:$4 sm:$0xff]   ;;  %v2628_v17 = vpop.f32.mrf.mxu0 }
 0x204   : > { %v2689_v34 = vpop.f32.mrf.mxu1  ;;  %4427 = vmatpush2.bf16.msra.mxu0 %v14914_v39 }
 0x205   : > { %4428 = vmatprep.subr.bf16.mxu0 %v14919_v18  ;;  %v1784_v18 = vadd.f32 %v17268_v43, %v17053_v35  ;;  %v1296_v35 = vadd.f32 %v17075_v47, %v16975_v1  ;;  %v1787_v43 = vadd.f32 %v17285_v14, %v17072_v50 }
 0x206   : > { %v2690_v51 = vpop.f32.mrf.mxu1 }
 0x207   : > { %v17454_v27 = vadd.f32 %v2690_v51, %v2266_v46  ;;  %v14917_v46 = vld [vmem:[%s20825_s3 + $0x288] ss:$12 sps:$4 sm:$0xff]   ;;  %v2255_v12 = vadd.f32 %v17485_v40, %v1784_v18  ;;  %v1788_v40 = vadd.f32 %v17291_v31, %v1296_v35  ;;  %v2258_v50 = vadd.f32 %v17501_v22, %v1787_v43 }
 0x208   : > { %v2692_v29 = vpop.f32.mrf.mxu1  ;;  %4429 = vmatpush2.bf16.msra.mxu0 %v14917_v46  ;;  %v2264_v18 = vadd.f32 %v17549_v48, %v17326_v10 }
 0x209   : > { %4430 = vmatprep.subr.bf16.mxu0 %v14922_v9  ;;  %v2630_v29 = vpop.f32.mrf.mxu0  ;;  %v2694_v8 = vadd.f32 %v2626_v13, %v2255_v12 }
 0x20b   : > { %v2632_v33 = vpop.f32.mrf.mxu0 }
 0x20c   : > { %4431 = vmatpush2.bf16.msra.mxu0 %v14920_v11  ;;  %v1785_v11 = vadd.f32 %v17274_v41, %v17060_v44  ;;  %v1306_v41 = vadd.f32 %v17255_v26, %v17032_v2  ;;  %v1790_v2 = vadd.f32 %v17302_v62, %v17091_v60  ;;  %v1791_v26 = vadd.f32 %v17311_v6, %v17100_v0 }
 0x20d   : > { %4432 = vmatprep.subr.bf16.mxu0 %v14925_v24  ;;  %v17561_v45 = vpop.f32.mrf.mxu0 }
 0x20e   : > { %v2256_v24 = vadd.f32 %v17493_v37, %v1785_v11  ;;  %v1794_v31 = vadd.f32 %v17480_v49, %v1306_v41  ;;  %v2262_v6 = vadd.f32 %v17529_v52, %v1791_v26 }
 0x20f   : > { %v17563_v61 = vpop.f32.mrf.mxu0 }
 0x210   : > { %4433 = vmatpush2.bf16.msra.mxu0 %v14923_v4  ;;  %v2695_v47 = vadd.f32 %v2628_v17, %v2256_v24  ;;  %v2701_v26 = vadd.f32 %v17563_v61, %v2262_v6 }
 0x211   : > { %4886 = vmatprep.subr.bf16.mxu0 %v14933_v36  ;;  %v17565_v28 = vpop.f32.mrf.mxu0 }
 0x213   : > { %v17567_v7 = vpop.f32.mrf.mxu0 }
 0x236   : > { %v3150_v55 = vpop.f32.mrf.mxu1  ;;  %v3097_v5 = vpop.f32.mrf.mxu0 }
 0x237   : > { %v3167_v36 = vadd.f32 %v3150_v55, %v17430_v15  ;;  %v3165_v14 = vadd.f32 %v3097_v5, %v2694_v8  ;;  %v2261_v5 = vadd.f32 %v17521_v3, %v1790_v2 }
 0x238   : > { %v3152_v42 = vpop.f32.mrf.mxu1  ;;  %v3099_v57 = vpop.f32.mrf.mxu0 }
 0x239   : > { %v2700_v35 = vadd.f32 %v17561_v45, %v2261_v5 }
 0x23a   : > { %v3153_v34 = vpop.f32.mrf.mxu1  ;;  %v3101_v58 = vpop.f32.mrf.mxu0 }
 0x23b   : > { %v3170_v60 = vadd.f32 %v3153_v34, %v17438_v21 }
 0x23c   : > { %v3155_v20 = vpop.f32.mrf.mxu1  ;;  %v3103_v59 = vpop.f32.mrf.mxu0 }
 0x23d   : > { %v2697_v20 = vadd.f32 %v2630_v29, %v2258_v50 }
 0x23e   : > { %v17556_v51 = vpop.f32.mrf.mxu1  ;;  %v17569_v56 = vpop.f32.mrf.mxu0 }
 0x23f   : > { %v3168_v49 = vadd.f32 %v3101_v58, %v2697_v20 }
 0x240   : > { %v3160_v23 = vpop.f32.mrf.mxu1  ;;  %v17571_v39 = vpop.f32.mrf.mxu0 }
 0x241   : > { %v3166_v23 = vadd.f32 %v3099_v57, %v2695_v47 }
 0x242   : > { %v3161_v32 = vpop.f32.mrf.mxu1  ;;  %v17577_v46 = vpop.f32.mrf.mxu0 }
 0x243   : > { %v17559_v63 = vadd.f32 %v3161_v32, %v17454_v27  ;;  %v17573_v27 = vshrl.u32 %v3618_v16, 7 }
 0x244   : > { %v3163_v30 = vpop.f32.mrf.mxu1  ;;  %v17603_v42 = vpop.f32.mrf.mxu0 }
 0x245   : > { %20869 = vst [vmem:[#allocation8_spill] sm:$0xff] %v17573_v27  ;;  %v17580_v9 = vsub.s32 2, %v17573_v27  ;;  %v17589_v4 = vsub.s32 0, %v17573_v27  ;;  %v17597_v44 = vsub.s32 1, %v17573_v27  ;;  %v2259_v30 = vadd.f32 %v17513_v25, %v1788_v40 }
 0x246   : > { %v2265_v25 = vadd.f32 %v17551_v19, %v1794_v31  ;;  %v3171_v31 = vadd.f32 %v17569_v56, %v2700_v35 }
 0x247   : > { %v17606_v1 = vrot.slane %v3616_v38, %v17580_v9  ;;  %v17610_v13 = vrot.slane %v3616_v38, %v17589_v4  ;;  %v17618_v17 = vrot.slane %v3616_v38, %v17597_v44  ;;  %v2698_v11 = vadd.f32 %v2632_v33, %v2259_v30 }
 0x249   : > { %v3169_v19 = vadd.f32 %v3103_v59, %v2698_v11 }
 0x272   : > { %v3589_v37 = vpop.f32.mrf.mxu1  ;;  %v3536_v55 = vpop.f32.mrf.mxu0 }
 0x273   : > { %v3606_v15 = vadd.f32 %v3589_v37, %v3167_v36  ;;  %v3604_v32 = vadd.f32 %v3536_v55, %v3165_v14  ;;  %v3173_v36 = vadd.f32 %v17556_v51, %v17446_v53 }
 0x274   : > { %v3591_v22 = vpop.f32.mrf.mxu1  ;;  %v3538_v0 = vpop.f32.mrf.mxu0 }
 0x275   : > { %v17624_v62 = vadd.f32 %v17606_v1, %v3606_v15  ;;  %v17628_v29 = vadd.f32 %v17610_v13, %v3604_v32  ;;  %v3605_v57 = vadd.f32 %v3538_v0, %v3166_v23  ;;  %v3172_v32 = vadd.f32 %v17571_v39, %v2701_v26 }
 0x276   : > { %v3592_v16 = vpop.f32.mrf.mxu1  ;;  %v3540_v34 = vpop.f32.mrf.mxu0  ;;  %v2703_v39 = vadd.f32 %v17565_v28, %v2264_v18 }
 0x277   : > { %v3647_v3 = vmin.f32 %v17624_v62, 0.0  ;;  %v3609_v21 = vadd.f32 %v3592_v16, %v3170_v60  ;;  %v3645_v12 = vmin.f32 %v17628_v29, 0.0  ;;  %v17636_v52 = vadd.f32 %v17618_v17, %v3605_v57 }
 0x278   : > { %v3607_v58 = vadd.f32 %v3540_v34, %v3168_v49  ;;  %v3594_v38 = vpop.f32.mrf.mxu1  ;;  %v3542_v48 = vpop.f32.mrf.mxu0  ;;  %v2704_v34 = vadd.f32 %v17567_v7, %v2265_v25  ;;  %vm3731_vm14 = vcmp.gt.f32.partialorder %v17624_v62, 0.0  ;;  %vm3729_vm15 = vcmp.gt.f32.partialorder %v17628_v29, 0.0 }
 0x279   : > { %v3659_v43 = vmul.f32 0.5, %v3647_v3  ;;  %v3685_v24 = vmul.f32 1.442695, %v3647_v3  ;;  %v17640_v10 = vadd.f32 %v17606_v1, %v3609_v21  ;;  %v3657_v8 = vmul.f32 0.5, %v3645_v12 }
 0x27a   : > { %v3681_v41 = vmul.f32 1.442695, %v3645_v12  ;;  %v3646_v33 = vmin.f32 %v17636_v52, 0.0  ;;  %v3597_v40 = vpop.f32.mrf.mxu1  ;;  %v17647_v45 = vadd.f32 %v17610_v13, %v3607_v58  ;;  %v3546_v47 = vpop.f32.mrf.mxu0  ;;  %v3608_v2 = vadd.f32 %v3542_v48, %v3169_v19 }
 0x27b   : > { %15785 = vtanh.f32 %v3659_v43  ;;  %v3650_v50 = vmin.f32 %v17640_v10, 0.0  ;;  %v3612_v20 = vadd.f32 %v3597_v40, %v3173_v36  ;;  %v3610_v30 = vadd.f32 %v3546_v47, %v3171_v31 }
 0x27c   : > { %15787 = vpow2.f32 %v3685_v24  ;;  %v3658_v14 = vmul.f32 0.5, %v3646_v33  ;;  %v3683_v37 = vmul.f32 1.442695, %v3646_v33  ;;  %v3599_v59 = vpop.f32.mrf.mxu1  ;;  %v3648_v15 = vmin.f32 %v17647_v45, 0.0  ;;  %v3548_v53 = vpop.f32.mrf.mxu0 }
 0x27d   : > { %15789 = vtanh.f32 %v3657_v8  ;;  %v3691_v51 = vmul.f32 1.442695, %v3650_v50  ;;  %v17653_v55 = vadd.f32 %v17618_v17, %v3608_v2  ;;  %v3662_v22 = vmul.f32 0.5, %v3650_v50 }
 0x27e   : > { %15791 = vpow2.f32 %v3681_v41  ;;  %v3600_v23 = vpop.f32.mrf.mxu1  ;;  %v3687_v61 = vmul.f32 1.442695, %v3648_v15  ;;  %v17658_v5 = vadd.f32 %v17606_v1, %v3612_v20  ;;  %v3550_v60 = vpop.f32.mrf.mxu0  ;;  %v3660_v6 = vmul.f32 0.5, %v3648_v15 }
 0x27f   : > { %15793 = vtanh.f32 %v3658_v14  ;;  %v3649_v56 = vmin.f32 %v17653_v55, 0.0  ;;  %v17661_v49 = vadd.f32 %v17610_v13, %v3610_v30  ;;  %v3611_v57 = vadd.f32 %v3548_v53, %v3172_v32 }
 0x280   : > { %15795 = vpow2.f32 %v3683_v37  ;;  %v3602_v0 = vpop.f32.mrf.mxu1  ;;  %v3615_v16 = vadd.f32 %v3600_v23, %v17559_v63  ;;  %v3653_v21 = vmin.f32 %v17658_v5, 0.0  ;;  %v3174_v58 = vadd.f32 %v17577_v46, %v2703_v39  ;;  %v3552_v63 = vpop.f32.mrf.mxu0 }
 0x281   : > { %15797 = vpow2.f32 %v3691_v51  ;;  %v3689_v3 = vmul.f32 1.442695, %v3649_v56  ;;  %v3661_v11 = vmul.f32 0.5, %v3649_v56  ;;  %v3651_v12 = vmin.f32 %v17661_v49, 0.0 }
 0x282   : > { %15799 = vtanh.f32 %v3662_v22  ;;  %v3697_v38 = vmul.f32 1.442695, %v3653_v21  ;;  %v17670_v35 = vadd.f32 %v17618_v17, %v3611_v57  ;;  %v3175_v28 = vadd.f32 %v17603_v42, %v2704_v34 }
 0x283   : > { %15801 = vpow2.f32 %v3687_v61  ;;  %v3665_v18 = vmul.f32 0.5, %v3653_v21  ;;  %v17674_v43 = vadd.f32 %v17606_v1, %v3615_v16  ;;  %v3693_v7 = vmul.f32 1.442695, %v3651_v12 }
 0x284   : > { %15803 = vtanh.f32 %v3660_v6  ;;  %v3652_v25 = vmin.f32 %v17670_v35, 0.0  ;;  %v3613_v24 = vadd.f32 %v3550_v60, %v3174_v58  ;;  %v3663_v46 = vmul.f32 0.5, %v3651_v12 }
 0x285   : > { %15805 = vpow2.f32 %v3689_v3  ;;  %v3656_v48 = vmin.f32 %v17674_v43, 0.0  ;;  %v3614_v19 = vadd.f32 %v3552_v63, %v3175_v28  ;;  %vm3730_vm0 = vcmp.gt.f32.partialorder %v17636_v52, 0.0  ;;  %v3880_v63 = vld [vmem:[#allocation2 + $0x8] sm:$0xf] }
 0x286   : > { %15807 = vtanh.f32 %v3661_v11  ;;  %v3695_v41 = vmul.f32 1.442695, %v3652_v25  ;;  %v17679_v42 = vadd.f32 %v17610_v13, %v3613_v24  ;;  %v3664_v1 = vmul.f32 0.5, %v3652_v25 }
 0x287   : > { %15809 = vpow2.f32 %v3697_v38  ;;  %v17682_v40 = vadd.f32 %v17618_v17, %v3614_v19  ;;  %v3703_v47 = vmul.f32 1.442695, %v3656_v48  ;;  %v3668_v31 = vmul.f32 0.5, %v3656_v48 }
 0x288   : > { %v15786_v8 = vpop.eup %15785  ;;  %15811 = vtanh.f32 %v3665_v18  ;;  %v3654_v14 = vmin.f32 %v17679_v42, 0.0  ;;  %vm3734_vm7 = vcmp.gt.f32.partialorder %v17640_v10, 0.0  ;;  %vm3733_vm6 = vcmp.gt.f32.partialorder %v17653_v55, 0.0 }
 0x289   : > { %v15788_v33 = vpop.eup %15787  ;;  %15813 = vpow2.f32 %v3693_v7  ;;  %v3655_v13 = vmin.f32 %v17682_v40, 0.0 }
 0x28a   : > { %v15790_v36 = vpop.eup %15789  ;;  %v3707_v50 = vadd.f32 1.0, %v15788_v33  ;;  %15815 = vtanh.f32 %v3663_v46  ;;  %v3699_v15 = vmul.f32 1.442695, %v3654_v14  ;;  %v3666_v30 = vmul.f32 0.5, %v3654_v14 }
 0x28b   : > { %v15792_v37 = vpop.eup %15791  ;;  %15817 = vpow2.f32 %v3695_v41  ;;  %v3701_v53 = vmul.f32 1.442695, %v3655_v13  ;;  %v3667_v0 = vmul.f32 0.5, %v3655_v13 }
 0x28c   : > { %v15794_v2 = vpop.eup %15793  ;;  %v3719_v59 = vmul.f32 %v15786_v8, %v3707_v50  ;;  %v3705_v26 = vadd.f32 1.0, %v15792_v37  ;;  %15819 = vtanh.f32 %v3664_v1 }
 0x28d   : > { %v15796_v17 = vpop.eup %15795  ;;  %15821 = vpow2.f32 %v3703_v47 }
 0x28e   : > { %v3743_v51 = vsel %vm3731_vm14, %v17624_v62, %v3719_v59  ;;  %v3717_v20 = vmul.f32 %v15790_v36, %v3705_v26  ;;  %v3706_v23 = vadd.f32 1.0, %v15796_v17  ;;  %v15798_v32 = vpop.eup %15797  ;;  %15823 = vpow2.f32 %v3699_v15  ;;  %vm17697_vm14 = vmand %vm441_vm8, %vm20848_vm10 }
 0x28f   : > { %v14016_v22 = vpack.c.bf16 %v3743_v51, %v3743_v51  ;;  %v15800_v61 = vpop.eup %15799  ;;  %v3710_v60 = vadd.f32 1.0, %v15798_v32  ;;  %15825 = vtanh.f32 %v3668_v31 }
 0x290   : > { %v3718_v56 = vmul.f32 %v15794_v2, %v3706_v23  ;;  %v15802_v6 = vpop.eup %15801  ;;  %v3741_v62 = vsel %vm3729_vm15, %v17628_v29, %v3717_v20  ;;  %15827 = vpow2.f32 %v3701_v53  ;;  %vm17703_vm15 = vmand %vm3868_vm11, %vm20848_vm10  ;;  %vm3732_vm11 = vcmp.gt.f32.partialorder %v17647_v45, 0.0 }
 0x291   : > { %v3796_v57 = vshrl.u32 %v14016_v22, 16  ;;  %v15804_v16 = vpop.eup %15803  ;;  %v3722_v3 = vmul.f32 %v15800_v61, %v3710_v60  ;;  %v3708_v21 = vadd.f32 1.0, %v15802_v6  ;;  %v3799_v12 = vshll.u32 %v14016_v22, 16 }
 0x292   : > { %v3742_v39 = vsel %vm3730_vm0, %v17636_v52, %v3718_v56  ;;  %v15806_v34 = vpop.eup %15805  ;;  %15829 = vtanh.f32 %v3666_v30  ;;  %vm17713_vm0 = vmand %vm3871_vm12, %vm20837_vm13  ;;  %vm3735_vm12 = vcmp.gt.f32.partialorder %v17661_v49, 0.0 }
 0x293   : > { %v17693_v11 = vrot.slane %v3796_v57, 7  ;;  %v14015_v29 = vpack.c.bf16 %v3742_v39, %v3741_v62  ;;  %v15808_v38 = vpop.eup %15807  ;;  %v3746_v28 = vsel %vm3734_vm7, %v17640_v10, %v3722_v3  ;;  %v3720_v18 = vmul.f32 %v15804_v16, %v3708_v21  ;;  %vm3874_vm13 = vmor %vm17713_vm0, %vm17703_vm15 }
 0x294   : > { %v3709_v7 = vadd.f32 1.0, %v15806_v34  ;;  %15831 = vtanh.f32 %v3667_v0  ;;  %v15810_v25 = vpop.eup %15809  ;;  %v14018_v8 = vpack.c.bf16 %v3746_v28, %v3746_v28  ;;  %vm3737_vm7 = vcmp.gt.f32.partialorder %v17658_v5, 0.0 }
 0x295   : > { %v3801_v24 = vor.u32 %v3799_v12, %v17693_v11  ;;  %v3789_v46 = vshrl.u32 %v14015_v29, 16  ;;  %v15812_v19 = vpop.eup %15811  ;;  %v3713_v41 = vadd.f32 1.0, %v15810_v25  ;;  %v3792_v50 = vshll.u32 %v14015_v29, 16 }
 0x296   : > { %v3721_v10 = vmul.f32 %v15808_v38, %v3709_v7  ;;  %v15814_v33 = vpop.eup %15813  ;;  %v3813_v14 = vshrl.u32 %v14018_v8, 16  ;;  %v3744_v37 = vsel %vm3732_vm11, %v17647_v45, %v3720_v18  ;;  %v3816_v51 = vshll.u32 %v14018_v8, 16 }
 0x297   : > { %v3881_v1 = vsel %vm17697_vm14, %v3801_v24, %v3880_v63  ;;  %v3791_v36 = vrot.slane %v3789_v46, 7  ;;  %v15816_v47 = vpop.eup %15815  ;;  %v3725_v2 = vmul.f32 %v15812_v19, %v3713_v41  ;;  %v3711_v31 = vadd.f32 1.0, %v15814_v33 }
 0x298   : > { %3882 = vst [vmem:[#allocation2 + $0x8] sm:$0xf] %v3881_v1  ;;  %v3745_v13 = vsel %vm3733_vm6, %v17653_v55, %v3721_v10  ;;  %v15818_v59 = vpop.eup %15817  ;;  %vm3736_vm14 = vcmp.gt.f32.partialorder %v17670_v35, 0.0  ;;  %v3815_v53 = vrot.slane %v3813_v14, 7  ;;  %v3811_v32 = vrot.slane %v17693_v11, 4  ;;  %vm17746_vm6 = vmor %vm20847_vm2, %vm3786_vm5 }
 0x299   : > { %v3794_v26 = vor.u32 %v3792_v50, %v3791_v36  ;;  %v14017_v17 = vpack.c.bf16 %v3745_v13, %v3744_v37  ;;  %v15820_v15 = vpop.eup %15819  ;;  %v3749_v20 = vsel %vm3737_vm7, %v17658_v5, %v3725_v2  ;;  %v3712_v23 = vadd.f32 1.0, %v15818_v59  ;;  %v14941_v2 = vld [vmem:[%s20825_s3 + $0x78] ss:$12 sps:$4 sm:$0xff]  }
 0x29a   : > { %v15822_v45 = vpop.eup %15821  ;;  %v14020_v61 = vpack.c.bf16 %v3749_v20, %v3749_v20  ;;  %v3802_v5 = vrot.slane %v3791_v36, 4  ;;  %v3818_v56 = vor.u32 %v3816_v51, %v3815_v53  ;;  %v3723_v60 = vmul.f32 %v15816_v47, %v3711_v31  ;;  %v3900_v31 = vld [vmem:[#allocation2 + $0x38] sm:$0x1]  ;;  %v3895_v20 = vld [vmem:[#allocation2 + $0x30] sm:$0x11] }
 0x29b   : > { %v3876_v55 = vsel %vm3874_vm13, %v3794_v26, %v17506_v54  ;;  %v3804_v30 = vshrl.u32 %v14017_v17, 16  ;;  %v3724_v0 = vmul.f32 %v15820_v15, %v3712_v23  ;;  %vm3889_vm11 = vcmask 1040384   ;;  %v15824_v6 = vpop.eup %15823 }
 0x29c   : > { %3877 = vst [vmem:[#allocation2] sm:$0xff] %v3876_v55  ;;  %v3807_v62 = vshll.u32 %v14017_v17, 16  ;;  %v3831_v16 = vshrl.u32 %v14020_v61, 16  ;;  %v3716_v39 = vadd.f32 1.0, %v15822_v45  ;;  %vm20846_vm13 = vcmask 1044484   ;;  %v15826_v3 = vpop.eup %15825 }
 0x29d   : > { %v3806_v57 = vrot.slane %v3804_v30, 7  ;;  %v3819_v21 = vsel %vm17746_vm6, %v3811_v32, %v3818_v56  ;;  %v3747_v34 = vsel %vm3735_vm12, %v17661_v49, %v3723_v60  ;;  %v3748_v11 = vsel %vm3736_vm14, %v17670_v35, %v3724_v0  ;;  %v15828_v58 = vpop.eup %15827  ;;  %vm17776_vm12 = vmand %vm450_vm9, %vm20847_vm2 }
 0x29e   : > { %v3714_v12 = vadd.f32 1.0, %v15824_v6  ;;  %3884 = vst.msk [vmem:[#allocation2 + $0x14] sm:$0xf] %vm441_vm8, %v3819_v21  ;;  %v3833_v38 = vrot.slane %v3831_v16, 7  ;;  %v3834_v63 = vshll.u32 %v14020_v61, 16  ;;  %v14019_v52 = vpack.c.bf16 %v3748_v11, %v3747_v34  ;;  %vm3890_vm14 = vmand %vm3889_vm11, %vm20847_vm2 }
 0x29f   : > { %v3809_v29 = vor.u32 %v3807_v62, %v3806_v57  ;;  %v15830_v28 = vpop.eup %15829  ;;  %v3829_v18 = vrot.slane %v3815_v53, 4  ;;  %v3728_v7 = vmul.f32 %v15826_v3, %v3716_v39  ;;  %vm3740_vm5 = vcmp.gt.f32.partialorder %v17674_v43, 0.0 }
 0x2a0   : > { %v3715_v25 = vadd.f32 1.0, %v15828_v58  ;;  %v3836_v46 = vor.u32 %v3834_v63, %v3833_v38  ;;  %v3822_v35 = vshrl.u32 %v14019_v52, 16  ;;  %v3726_v48 = vmul.f32 %v15830_v28, %v3714_v12 }
 0x2a1   : > { %v15832_v24 = vpop.eup %15831  ;;  %v3810_v49 = vsel %vm17746_vm6, %v3802_v5, %v3809_v29  ;;  %v3825_v19 = vshll.u32 %v14019_v52, 16  ;;  %v3752_v8 = vsel %vm3740_vm5, %v17674_v43, %v3728_v7  ;;  %vm3739_vm15 = vcmp.gt.f32.partialorder %v17682_v40, 0.0 }
 0x2a2   : > { %3883 = vst [vmem:[#allocation2 + $0xc] sm:$0xff] %v3810_v49  ;;  %v3727_v10 = vmul.f32 %v15832_v24, %v3715_v25  ;;  %v3837_v41 = vsel %vm17746_vm6, %v3829_v18, %v3836_v46  ;;  %v3824_v33 = vrot.slane %v3822_v35, 7  ;;  %v14022_v1 = vpack.c.bf16 %v3752_v8, %v3752_v8 }
 0x2a3   : > { %v17766_v36 = vcombine.low %v3876_v55, %v3810_v49  ;;  %3886 = vst.msk [vmem:[#allocation2 + $0x20] sm:$0xf] %vm441_vm8, %v3837_v41  ;;  %vm3738_vm0 = vcmp.gt.f32.partialorder %v17679_v42, 0.0  ;;  %vm3892_vm7 = vsmask.f32 4352  ;;  %v17771_v47 = vcombine.high %v3876_v55, %v3810_v49 }
 0x2a4   : > { %v3751_v50 = vsel %vm3739_vm15, %v17682_v40, %v3727_v10  ;;  %v3820_v43 = vrot.slane %v3806_v57, 4  ;;  %v3827_v14 = vor.u32 %v3825_v19, %v3824_v33  ;;  %v3849_v37 = vshrl.u32 %v14022_v1, 16  ;;  %vm3893_vm5 = vmand %vm20846_vm13, %vm3892_vm7  ;;  %v14938_v19 = vld [vmem:[%s20825_s3 + $0x94] ss:$12 sps:$4 sm:$0xff]  }
 0x2a5   : > { %v3750_v13 = vsel %vm3738_vm0, %v17679_v42, %v3726_v48  ;;  %v3852_v40 = vshll.u32 %v14022_v1, 16  ;;  %v3847_v42 = vrot.slane %v3833_v38, 4  ;;  %v17786_v32 = vld [vmem:[#allocation2 + $0x8] ss:$12 sps:$4 sm:$0xff]   ;;  %vm17792_vm9 = vmor %vm3893_vm5, %vm3890_vm14  ;;  %v20880_v61 = vmov 0 }
 0x2a6   : > { %v14021_v59 = vpack.c.bf16 %v3751_v50, %v3750_v13  ;;  %v3828_v26 = vsel %vm17746_vm6, %v3820_v43, %v3827_v14  ;;  %v3851_v17 = vrot.slane %v3849_v37, 7  ;;  %v20881_v61 = vsel %vm17792_vm9, 4294967295, %v20880_v61  ;;  %v14931_v38 = vld [vmem:[%s20825_s3 + $0xa8] ss:$12 sps:$4 sm:$0xff]   ;;  %v14936_v1 = vld [vmem:[%s20825_s3 + $0x90] ss:$12 sps:$4 sm:$0xff]  }
 0x2a7   : > { %3885 = vst [vmem:[#allocation2 + $0x18] sm:$0xff] %v3828_v26  ;;  %20882 = vst [vmem:[#allocation9_spill] sm:$0xff] %v20881_v61  ;;  %v4089_v5 = vshll.u32 %v17771_v47, 16  ;;  %v4077_v56 = vshll.u32 %v17766_v36, 16  ;;  %v3838_v60 = vrot.slane %v3824_v33, 4  ;;  %v4101_v16 = vshll.u32 %v17786_v32, 16 }
 0x2a8   : > { %v3840_v15 = vshrl.u32 %v14021_v59, 16  ;;  %v3854_v53 = vor.u32 %v3852_v40, %v3851_v17  ;;  %v3857_v51 = vrot.slane %v3851_v17, 4  ;;  %v3843_v45 = vshll.u32 %v14021_v59, 16  ;;  %v14929_v41 = vld [vmem:[%s20825_s3 + $0x248] ss:$12 sps:$4 sm:$0xff]  }
 0x2a9   : > { %v4091_v21 = vrot.slane %v4089_v5, 1  ;;  %v4079_v34 = vrot.slane %v4077_v56, 1  ;;  %v4087_v11 = vshrl.u32 %v17771_v47, 16  ;;  %v4075_v12 = vshrl.u32 %v17766_v36, 16  ;;  %v14930_v33 = vld [vmem:[%s20825_s3 + $0x2f0] ss:$12 sps:$4 sm:$0xff]  }
 0x2aa   : > { %v3842_v23 = vrot.slane %v3840_v15, 7  ;;  %v3855_v55 = vsel %vm17746_vm6, %v3847_v42, %v3854_v53  ;;  %v3901_v30 = vsel %vm17776_vm12, %v3857_v51, %v3900_v31  ;;  %v4103_v29 = vrot.slane %v4101_v16, 1  ;;  %v14943_v43 = vld [vmem:[%s20825_s3 + $0x7c] ss:$12 sps:$4 sm:$0xff]   ;;  %v14935_v13 = vld [vmem:[%s20825_s3 + $0x2d8] ss:$12 sps:$4 sm:$0xff]  }
 0x2ab   : > { %3888 = vst.msk [vmem:[#allocation2 + $0x2c] sm:$0xf] %vm441_vm8, %v3855_v55  ;;  %3902 = vst [vmem:[#allocation2 + $0x38] sm:$0x1] %v3901_v30  ;;  %v4092_v28 = vor.u32 %v4091_v21, %v4087_v11  ;;  %v4080_v7 = vor.u32 %v4079_v34, %v4075_v12  ;;  %v4099_v24 = vshrl.u32 %v17786_v32, 16  ;;  %vm4395_vm8 = vcmask 130048  }
 0x2ac   : > { %v3845_v0 = vor.u32 %v3843_v45, %v3842_v23  ;;  %v3856_v6 = vrot.slane %v3842_v23, 4  ;;  %v14934_v14 = vld [vmem:[%s20825_s3 + $0x230] ss:$12 sps:$4 sm:$0xff]   ;;  %v14939_v17 = vld [vmem:[%s20825_s3 + $0x218] ss:$12 sps:$4 sm:$0xff]   ;;  %vm458_vm15 = vcmask 253952  }
 0x2ad   : > { %v4104_v8 = vor.u32 %v4103_v29, %v4099_v24  ;;  %v14940_v31 = vld [vmem:[%s20825_s3 + $0x2c0] ss:$12 sps:$4 sm:$0xff]   ;;  %v14945_v51 = vld [vmem:[%s20825_s3 + $0x2a8] ss:$12 sps:$4 sm:$0xff]   ;;  %v14950_v55 = vld [vmem:[%s20825_s3 + $0x290] ss:$12 sps:$4 sm:$0xff]  }
 0x2ae   : > { %v17801_v57 = vsel %vm17746_vm6, %v3838_v60, %v3845_v0  ;;  %v3896_v62 = vsel %vm17792_vm9, %v3856_v6, %v3895_v20  ;;  %v14946_v15 = vld [vmem:[%s20825_s3 + $0x60] ss:$12 sps:$4 sm:$0xff]   ;;  %v14951_v20 = vld [vmem:[%s20825_s3 + $0x48] ss:$12 sps:$4 sm:$0xff]   ;;  %v14956_v30 = vld [vmem:[%s20825_s3 + $0x30] ss:$12 sps:$4 sm:$0xff]  }
 0x2af   : > { %3897 = vst [vmem:[#allocation2 + $0x30] sm:$0x11] %v3896_v62  ;;  %v17807_v39 = vcombine.low %v3828_v26, %v17801_v57  ;;  %v17810_v3 = vcombine.high %v3828_v26, %v17801_v57  ;;  %v14948_v26 = vld [vmem:[%s20825_s3 + $0x64] ss:$12 sps:$4 sm:$0xff]   ;;  %v14953_v42 = vld [vmem:[%s20825_s3 + $0x4c] ss:$12 sps:$4 sm:$0xff]  }
 0x2b0   : > { %v14944_v53 = vld [vmem:[%s20825_s3 + $0x200] ss:$12 sps:$4 sm:$0xff]   ;;  %v14949_v45 = vld [vmem:[%s20825_s3 + $0x1e8] ss:$12 sps:$4 sm:$0xff]   ;;  %v14954_v56 = vld [vmem:[%s20825_s3 + $0x1d0] ss:$12 sps:$4 sm:$0xff]  }
 0x2b1   : > { %v4094_v22 = vshll.u32 %v17810_v3, 16  ;;  %v4082_v58 = vshll.u32 %v17807_v39, 16  ;;  %v4113_v63 = vshrl.u32 %v17810_v3, 16  ;;  %v4110_v37 = vshrl.u32 %v17807_v39, 16  ;;  %v14958_v23 = vld [vmem:[%s20825_s3 + $0x34] ss:$12 sps:$4 sm:$0xff]  }
 0x2b2   : > { %v17820_v52 = vld [vmem:[#allocation2 + $0x20] ss:$12 sps:$4 sm:$0xff]   ;;  %v14963_v5 = vld [vmem:[%s20825_s3 + $0x1c] ss:$12 sps:$4 sm:$0xff]   ;;  %v14955_v60 = vld [vmem:[%s20825_s3 + $0x278] ss:$12 sps:$4 sm:$0xff]  }
 0x2b3   : > { %v4096_v18 = vrot.slane %v4094_v22, 1  ;;  %v4084_v25 = vrot.slane %v4082_v58, 1  ;;  %v4106_v49 = vshll.u32 %v17820_v52, 16  ;;  %v14961_v0 = vld [vmem:[%s20825_s3 + $0x18] ss:$12 sps:$4 sm:$0xff]   ;;  %vm453_vm6 = vcmask 257024  }
 0x2b4   : > { %v14968_v6 = vld [vmem:[%s20825_s3 + $0x4] ss:$12 sps:$4 sm:$0xff]   ;;  %v14960_v16 = vld [vmem:[%s20825_s3 + $0x260] ss:$12 sps:$4 sm:$0xff]   ;;  %v14969_v12 = vld [vmem:[%s20825_s3 + $0x168] ss:$12 sps:$4 sm:$0xff]  }
 0x2b5   : > { %v4097_v46 = vsel %vm20842_vm1, %v4092_v28, %v4096_v18  ;;  %v17826_v35 = vsel %vm20842_vm1, %v4080_v7, %v4084_v25  ;;  %v17828_v48 = vor.u32 %v4113_v63, %v4096_v18  ;;  %v4108_v10 = vrot.slane %v4106_v49, 1  ;;  %v14959_v62 = vld [vmem:[%s20825_s3 + $0x1b8] ss:$12 sps:$4 sm:$0xff]   ;;  %v14966_v21 = vld [vmem:[%s20825_s3] ss:$12 sps:$4 sm:$0xff]  }
 0x2b6   : > { %4434 = vmatprep.mubr.bf16.mxu0 %v4097_v46  ;;  %v17863_v59 = vor.u32 %v4110_v37, %v4084_v25  ;;  %v14971_v34 = vld [vmem:[%s20825_s3 + $0x16c] ss:$12 sps:$4 sm:$0xff]   ;;  %v14974_v58 = vld [vmem:[%s20825_s3 + $0x154] ss:$12 sps:$4 sm:$0xff]   ;;  %v14972_v29 = vld [vmem:[%s20825_s3 + $0x150] ss:$12 sps:$4 sm:$0xff]  }
 0x2b7   : > { %4435 = vmatmul.mubr.bf16.vlgmr.msra.gmra.mxu0 %v17826_v35  ;;  %v17845_v50 = vsel %vm20842_vm1, %v4104_v8, %v4108_v10  ;;  %v14964_v11 = vld [vmem:[%s20825_s3 + $0x1a0] ss:$12 sps:$4 sm:$0xff]   ;;  %v14977_v63 = vld [vmem:[%s20825_s3 + $0x13c] ss:$12 sps:$4 sm:$0xff]   ;;  %v14975_v28 = vld [vmem:[%s20825_s3 + $0x138] ss:$12 sps:$4 sm:$0xff]  }
 0x2b8   : > { %4887 = vmatpush1.bf16.msra.mxu0 %v14931_v38  ;;  %4444 = vmatprep.mubr.bf16.mxu0 %v17828_v48  ;;  %v14965_v22 = vld [vmem:[%s20825_s3 + $0x320] ss:$12 sps:$4 sm:$0xff]   ;;  %v14983_v38 = vld [vmem:[%s20825_s3 + $0x184] ss:$12 sps:$4 sm:$0xff]   ;;  %v14984_v24 = vld [vmem:[%s20825_s3 + $0x108] ss:$12 sps:$4 sm:$0xff]  }
 0x2b9   : > { %4888 = vmatprep.subr.bf16.mxu0 %v14938_v19  ;;  %12716 = vmatmul.mubr.msk.bf16.vlgmr.msra.gmra.mxu1 %vm4395_vm8, %v17845_v50  ;;  %v14980_v18 = vld [vmem:[%s20825_s3 + $0x124] ss:$12 sps:$4 sm:$0xff]   ;;  %v14978_v7 = vld [vmem:[%s20825_s3 + $0x120] ss:$12 sps:$4 sm:$0xff]   ;;  %v14995_v19 = vld [vmem:[%s20825_s3 + $0xdc] ss:$12 sps:$4 sm:$0xff]  }
 0x2ba   : > { %14037 = vmatpush3.bf16.msra.mxu1 %v14929_v41  ;;  %4497 = vmatprep.mubr.bf16.mxu1 %v17506_v54  ;;  %v4116_v54 = vshrl.u32 %v17820_v52, 16  ;;  %v14986_v25 = vld [vmem:[%s20825_s3 + $0x10c] ss:$12 sps:$4 sm:$0xff]   ;;  %v14990_v49 = vld [vmem:[%s20825_s3 + $0xf4] ss:$12 sps:$4 sm:$0xff]   ;;  %vm6542_vm7 = vcmask 254977   ;;  %vm18810_vm1 = vmand %vm458_vm15, %vm20848_vm10 }
 0x2bb   : > { %14038 = vmatprep.subr.bf16.mxu1 %v14930_v33  ;;  %v17993_v8 = vld [vmem:[#allocation3] sm:$0xff]  ;;  %v15000_v41 = vld [vmem:[%s20825_s3 + $0xc4] ss:$12 sps:$4 sm:$0xff]   ;;  %vm20845_vm0 = vsmask.f32 1280  ;;  %vm6580_vm5 = vcmask 256002  }
 0x2bc   : > { %4889 = vmatpush1.bf16.msra.mxu0 %v14936_v1  ;;  %v17873_v40 = vor.u32 %v4116_v54, %v4108_v10  ;;  %v14993_v10 = vld [vmem:[%s20825_s3 + $0xd8] ss:$12 sps:$4 sm:$0xff]   ;;  %v14991_v33 = vld [vmem:[%s20825_s3 + $0xb0] ss:$12 sps:$4 sm:$0xff]   ;;  %v14997_v37 = vld [vmem:[%s20825_s3 + $0x140] ss:$12 sps:$4 sm:$0xff]  }
 0x2bd   : > { %4890 = vmatprep.subr.bf16.mxu0 %v14943_v43  ;;  %v14992_v1 = vld [vmem:[%s20825_s3 + $0x158] ss:$12 sps:$4 sm:$0xff]   ;;  %v15011_v43 = vld [vmem:[%s20825_s3 + $0x4b4] ss:$12 sps:$4 sm:$0xff]   ;;  %456 = vst.msk [vmem:[#allocation3 + $0x14] sm:$0xf] %vm453_vm6, %v17993_v8 }
 0x2be   : > { %14039 = vmatpush3.bf16.msra.mxu1 %v14934_v14  ;;  %v14996_v14 = vld [vmem:[%s20825_s3 + $0x98] ss:$12 sps:$4 sm:$0xff]   ;;  %v15003_v54 = vld [vmem:[%s20825_s3 + $0x68] ss:$12 sps:$4 sm:$0xff]   ;;  %454 = vst.msk [vmem:[#allocation3 + $0x8] sm:$0xf] %vm453_vm6, %v17993_v8 }
 0x2bf   : > { %4445 = vmatmul.mubr.bf16.gmra.mxu0 %v17863_v59  ;;  %14040 = vmatprep.subr.bf16.mxu1 %v14935_v13  ;;  %v15009_v13 = vld [vmem:[%s20825_s3 + $0x4b0] ss:$12 sps:$4 sm:$0xff]   ;;  %459 = vst.msk [vmem:[#allocation3 + $0x20] sm:$0x1] %vm458_vm15, %v17993_v8  ;;  %vm20844_vm14 = vsmask.f32 2304 }
 0x2c0   : > { %4891 = vmatpush1.bf16.msra.mxu0 %v14941_v2  ;;  %4918 = vmatprep.mubr.bf16.mxu0 %v17771_v47  ;;  %v15014_v2 = vld [vmem:[%s20825_s3 + $0x4a0] ss:$12 sps:$4 sm:$0xff]  }
 0x2c1   : > { %4892 = vmatprep.subr.bf16.mxu0 %v14948_v26  ;;  %12717 = vmatmul.mubr.msk.bf16.gmra.mxu1 %vm4395_vm8, %v17873_v40  ;;  %v15002_v26 = vld [vmem:[%s20825_s3 + $0x128] ss:$12 sps:$4 sm:$0xff]  }
 0x2c2   : > { %14041 = vmatpush3.bf16.msra.mxu1 %v14939_v17  ;;  %4540 = vmatprep.mubr.bf16.mxu1 %v4097_v46  ;;  %v14981_v46 = vld [vmem:[%s20825_s3 + $0x180] ss:$12 sps:$4 sm:$0xff]   ;;  %v15004_v17 = vld [vmem:[%s20825_s3 + $0x110] ss:$12 sps:$4 sm:$0xff]  }
 0x2c3   : > { %14042 = vmatprep.subr.bf16.mxu1 %v14940_v31  ;;  %v15005_v31 = vld [vmem:[%s20825_s3 + $0x50] ss:$12 sps:$4 sm:$0xff]  }
 0x2c4   : > { %4893 = vmatpush1.bf16.msra.mxu0 %v14946_v15  ;;  %v18056_v15 = vld [vmem:[#allocation2 + $0x8] ss:$12 sps:$4 sm:$0xfe]  }
 0x2c5   : > { %4894 = vmatprep.subr.bf16.mxu0 %v14953_v42 }
 0x2c6   : > { %14043 = vmatpush3.bf16.msra.mxu1 %v14944_v53  ;;  %v15007_v53 = vld [vmem:[%s20825_s3 + $0x38] ss:$12 sps:$4 sm:$0xff]  }
 0x2c7   : > { %14044 = vmatprep.subr.bf16.mxu1 %v14945_v51  ;;  %v15008_v51 = vld [vmem:[%s20825_s3 + $0xe0] ss:$12 sps:$4 sm:$0xff]  }
 0x2c8   : > { %4895 = vmatpush1.bf16.msra.mxu0 %v14951_v20  ;;  %v5209_v20 = vrot.slane %v18056_v15, 1 }
 0x2c9   : > { %4896 = vmatprep.subr.bf16.mxu0 %v14958_v23  ;;  %v15018_v23 = vld [vmem:[%s20825_s3 + $0x3e0] ss:$12 sps:$4 sm:$0xff]  }
 0x2ca   : > { %14045 = vmatpush3.bf16.msra.mxu1 %v14949_v45  ;;  %v15020_v45 = vld [vmem:[%s20825_s3 + $0x488] ss:$12 sps:$4 sm:$0xff]  }
 0x2cb   : > { %14046 = vmatprep.subr.bf16.mxu1 %v14950_v55  ;;  %v5094_v55 = vld [vmem:[#allocation2 + $0x18] sm:$0xff] }
 0x2cc   : > { %4897 = vmatpush1.bf16.msra.mxu0 %v14956_v30 }
 0x2cd   : > { %4898 = vmatprep.subr.bf16.mxu0 %v14963_v5  ;;  %v18075_v5 = vld [vmem:[#allocation2 + $0x38] ss:$0 sps:$4 sm:$0x11]  }
 0x2ce   : > { %14047 = vmatpush3.bf16.msra.mxu1 %v14954_v56  ;;  %v15012_v56 = vld [vmem:[%s20825_s3 + $0x20] ss:$12 sps:$4 sm:$0xff]  }
 0x2cf   : > { %14048 = vmatprep.subr.bf16.mxu1 %v14955_v60  ;;  %v15013_v60 = vld [vmem:[%s20825_s3 + $0xc8] ss:$12 sps:$4 sm:$0xff]  }
 0x2d0   : > { %4899 = vmatpush1.bf16.msra.mxu0 %v14961_v0  ;;  %v15021_v0 = vld [vmem:[%s20825_s3 + $0x3c8] ss:$12 sps:$4 sm:$0xff]  }
 0x2d1   : > { %4900 = vmatprep.subr.bf16.mxu0 %v14968_v6  ;;  %v18089_v6 = vcombine.high %v5094_v55, %v17801_v57 }
 0x2d2   : > { %14049 = vmatpush3.bf16.msra.mxu1 %v14959_v62  ;;  %v15022_v62 = vld [vmem:[%s20825_s3 + $0x470] ss:$12 sps:$4 sm:$0xff]  }
 0x2d3   : > { %14050 = vmatprep.subr.bf16.mxu1 %v14960_v16  ;;  %v5216_v16 = vrot.slane %v18075_v5, 1 }
 0x2d4   : > { %4901 = vmatpush1.bf16.msra.mxu0 %v14966_v21  ;;  %v18096_v21 = vld [vmem:[#allocation2 + $0x4] ss:$12 sps:$4 sm:$0xfe]  }
 0x2d5   : > { %4902 = vmatprep.subr.bf16.mxu0 %v14971_v34  ;;  %v15015_v34 = vld [vmem:[%s20825_s3 + $0x8] ss:$12 sps:$4 sm:$0xff]  }
 0x2d6   : > { %14051 = vmatpush3.bf16.msra.mxu1 %v14964_v11  ;;  %v15019_v11 = vld [vmem:[%s20825_s3 + $0x188] ss:$12 sps:$4 sm:$0xff]  }
 0x2d7   : > { %14296 = vmatprep.subr.bf16.mxu1 %v14965_v22 }
 0x2d8   : > { %4903 = vmatpush2.bf16.msra.mxu0 %v14969_v12  ;;  %v5207_v12 = vrot.slane %v18089_v6, 1 }
 0x2d9   : > { %4904 = vmatprep.subr.bf16.mxu0 %v14974_v58  ;;  %4541 = vmatmul.mubr.bf16.vlgmr.msra.gmra.mxu1 %v17826_v35  ;;  %v14987_v35 = vld [vmem:[%s20825_s3 + $0x170] ss:$12 sps:$4 sm:$0xff]   ;;  %v15028_v58 = vld [vmem:[%s20825_s3 + $0x458] ss:$12 sps:$4 sm:$0xff]  }
 0x2da   : > { %4548 = vmatprep.mubr.bf16.mxu1 %v17828_v48  ;;  %14297 = vmatpush3.bf16.msra.mxu1 %v14965_v22  ;;  %v14988_v48 = vld [vmem:[%s20825_s3 + $0xf0] ss:$12 sps:$4 sm:$0xff]  }
 0x2db   : > { %4953 = vmatprep.subr.bf16.mxu1 %v14983_v38  ;;  %v15024_v22 = vld [vmem:[%s20825_s3 + $0x3b0] ss:$12 sps:$4 sm:$0xff]   ;;  %v5206_v38 = vrot.slane %v18096_v21, 1 }
 0x2dc   : > { %4905 = vmatpush2.bf16.msra.mxu0 %v14972_v29 }
 0x2dd   : > { %4906 = vmatprep.subr.bf16.mxu0 %v14977_v63  ;;  %v5208_v63 = vsel %vm20841_vm3, %v5206_v38, %v5207_v12 }
 0x2e0   : > { %4907 = vmatpush2.bf16.msra.mxu0 %v14975_v28  ;;  %v15029_v28 = vld [vmem:[%s20825_s3 + $0x398] ss:$12 sps:$4 sm:$0xff]  }
 0x2e1   : > { %4908 = vmatprep.subr.bf16.mxu0 %v14980_v18  ;;  %4549 = vmatmul.mubr.bf16.gmra.mxu1 %v17863_v59  ;;  %v15001_v59 = vld [vmem:[%s20825_s3 + $0x80] ss:$12 sps:$4 sm:$0xff]   ;;  %v15034_v18 = vld [vmem:[%s20825_s3 + $0x3dc] ss:$12 sps:$4 sm:$0xff]  }
 0x2e2   : > { %14298 = vmatprep.mubr.msk.bf16.mxu1 %vm4395_vm8, %v17845_v50  ;;  %v14998_v50 = vld [vmem:[%s20825_s3 + $0xc0] ss:$12 sps:$4 sm:$0xff]  }
 0x2e4   : > { %4909 = vmatpush2.bf16.msra.mxu0 %v14978_v7  ;;  %v15030_v7 = vld [vmem:[%s20825_s3 + $0x440] ss:$12 sps:$4 sm:$0xff]  }
 0x2e5   : > { %4910 = vmatprep.subr.bf16.mxu0 %v14986_v25  ;;  %v15031_v25 = vld [vmem:[%s20825_s3 + $0x380] ss:$12 sps:$4 sm:$0xff]  }
 0x2e8   : > { %4911 = vmatpush2.bf16.msra.mxu0 %v14984_v24  ;;  %v15035_v24 = vld [vmem:[%s20825_s3 + $0x428] ss:$12 sps:$4 sm:$0xff]  }
 0x2e9   : > { %4912 = vmatprep.subr.bf16.mxu0 %v14990_v49  ;;  %14299 = vmatmul.mubr.msk.bf16.vlgmr.msra.gmra.mxu1 %vm4395_vm8, %v17873_v40  ;;  %v18046_v40 = vld [vmem:[#allocation2 + $0x20] ss:$12 sps:$4 sm:$0xff]   ;;  %v15036_v49 = vld [vmem:[%s20825_s3 + $0x368] ss:$12 sps:$4 sm:$0xff]  }
 0x2ea   : > { %4954 = vmatpush1.bf16.msra.mxu1 %v14981_v46  ;;  %4971 = vmatprep.mubr.bf16.mxu1 %v17993_v8  ;;  %v5210_v42 = vrot.slane %v18046_v40, 1  ;;  %v5098_v46 = vld [vmem:[#allocation2 + $0x30] sm:$0x11] }
 0x2eb   : > { %14067 = vmatprep.subr.bf16.mxu1 %v14987_v35  ;;  %v15045_v35 = vld [vmem:[%s20825_s3 + $0x3f8] ss:$12 sps:$4 sm:$0xff]  }
 0x2ec   : > { %4913 = vmatpush2.bf16.msra.mxu0 %v14988_v48  ;;  %v18073_v30 = vsel %vm20841_vm3, %v5209_v20, %v5210_v42  ;;  %v18112_v29 = vsel %vm20841_vm3, %v5210_v42, %v5216_v16  ;;  %v18151_v48 = vcombine.low %v5094_v55, %v17801_v57  ;;  %v15061_v57 = vld [vmem:[%s20825_s3 + $0x4b8] ss:$12 sps:$4 sm:$0xff]   ;;  %v5831_v20 = vshll.u32 %v18046_v40, 16  ;;  %v15068_v55 = vld [vmem:[%s20825_s3 + $0x648] ss:$12 sps:$4 sm:$0xff]  }
 0x2ed   : > { %4914 = vmatprep.subr.bf16.mxu0 %v14995_v19  ;;  %v18159_v19 = vcombine.high %v5098_v46, %v5098_v46  ;;  %v15051_v42 = vld [vmem:[%s20825_s3 + $0x378] ss:$12 sps:$4 sm:$0xff]   ;;  %v15064_v16 = vld [vmem:[%s20825_s3 + $0x334] ss:$12 sps:$4 sm:$0xff]  }
 0x2f0   : > { %4915 = vmatpush2.bf16.msra.mxu0 %v14993_v10  ;;  %v18161_v10 = vld [vmem:[#allocation2] ss:$12 sps:$4 sm:$0xfe]  }
 0x2f1   : > { %4916 = vmatprep.subr.bf16.mxu0 %v15000_v41  ;;  %12771 = vmatmul.mubr.msk.bf16.vlgmr.msra.gmra.mxu1 %vm4395_vm8, %v17786_v32  ;;  %v15046_v41 = vld [vmem:[%s20825_s3 + $0x338] ss:$12 sps:$4 sm:$0xff]  }
 0x2f2   : > { %14068 = vmatpush3.bf16.msra.mxu1 %v14991_v33  ;;  %4981 = vmatprep.mubr.bf16.mxu1 %v17993_v8  ;;  %v5204_v33 = vrot.slane %v18151_v48, 1 }
 0x2f3   : > { %14069 = vmatprep.subr.bf16.mxu1 %v14992_v1  ;;  %v15037_v1 = vld [vmem:[%s20825_s3 + $0x3c0] ss:$12 sps:$4 sm:$0xff]  }
 0x2f4   : > { %4917 = vmatpush2.bf16.msra.mxu0 %v14998_v50  ;;  %v5214_v50 = vrot.slane %v18159_v19, 1 }
 0x2f5   : > { %5567 = vmatprep.subr.bf16.mxu0 %v15011_v43  ;;  %v15044_v43 = vld [vmem:[%s20825_s3 + $0x3ac] ss:$12 sps:$4 sm:$0xff]  }
 0x2f6   : > { %14070 = vmatpush3.bf16.msra.mxu1 %v14996_v14  ;;  %v5203_v14 = vrot.slane %v18161_v10, 1 }
 0x2f7   : > { %4919 = vmatmul.mubr.bf16.vlgmr.msra.gmra.mxu0 %v17766_v36  ;;  %14071 = vmatprep.subr.bf16.mxu1 %v14997_v37  ;;  %v18183_v37 = vcombine.low %v5098_v46, %v5098_v46  ;;  %v15080_v46 = vld [vmem:[%s20825_s3 + $0x560] ss:$12 sps:$4 sm:$0xff]  }
 0x2f8   : > { %4928 = vmatprep.mubr.bf16.mxu0 %v17810_v3  ;;  %5568 = vmatpush1.bf16.msra.mxu0 %v15009_v13  ;;  %v15070_v13 = vld [vmem:[%s20825_s3 + $0x64c] ss:$12 sps:$4 sm:$0xff]  }
 0x2f9   : > { %12772 = vmatmul.mubr.msk.bf16.gmra.mxu1 %vm4395_vm8, %v17820_v52  ;;  %14098 = vmatprep.subr.bf16.mxu0 %v15014_v2  ;;  %v15042_v2 = vld [vmem:[%s20825_s3 + $0x3a8] ss:$12 sps:$4 sm:$0xff]  }
 0x2fa   : > { %14072 = vmatpush3.bf16.msra.mxu1 %v15001_v59  ;;  %5024 = vmatprep.mubr.bf16.mxu1 %v17771_v47  ;;  %v15006_v47 = vld [vmem:[%s20825_s3 + $0xf8] ss:$12 sps:$4 sm:$0xff]   ;;  %v18193_v59 = vsel %vm20841_vm3, %v5207_v12, %v5214_v50  ;;  %v5858_v12 = vshll.u32 %v18075_v5, 16  ;;  %v15085_v50 = vld [vmem:[%s20825_s3 + $0x548] ss:$12 sps:$4 sm:$0xff]  }
 0x2fb   : > { %14073 = vmatprep.subr.bf16.mxu1 %v15002_v26  ;;  %v15049_v26 = vld [vmem:[%s20825_s3 + $0x394] ss:$12 sps:$4 sm:$0xff]  }
 0x2fe   : > { %14074 = vmatpush3.bf16.msra.mxu1 %v15003_v54  ;;  %v5212_v54 = vrot.slane %v18183_v37, 1 }
 0x2ff   : > { %4929 = vmatmul.mubr.bf16.gmra.mxu0 %v17807_v39  ;;  %14075 = vmatprep.subr.bf16.mxu1 %v15004_v17  ;;  %v15047_v17 = vld [vmem:[%s20825_s3 + $0x390] ss:$12 sps:$4 sm:$0xff]  }
 0x300   : > { %5585 = vmatprep.mubr.bf16.mxu0 %v17993_v8 }
 0x302   : > { %14076 = vmatpush3.bf16.msra.mxu1 %v15005_v31  ;;  %v15053_v31 = vld [vmem:[%s20825_s3 + $0x37c] ss:$12 sps:$4 sm:$0xff]  }
 0x303   : > { %14077 = vmatprep.subr.bf16.mxu1 %v15006_v47  ;;  %v18207_v47 = vsel %vm20841_vm3, %v5204_v33, %v5212_v54  ;;  %v15083_v54 = vld [vmem:[%s20825_s3 + $0x454] ss:$12 sps:$4 sm:$0xff]  }
 0x306   : > { %14078 = vmatpush3.bf16.msra.mxu1 %v15007_v53  ;;  %v15056_v53 = vld [vmem:[%s20825_s3 + $0x364] ss:$12 sps:$4 sm:$0xff]  }
 0x307   : > { %12903 = vmatmul.mubr.msk.bf16.vlgmr.msra.gmra.mxu0 %vm4395_vm8, %v18073_v30  ;;  %14079 = vmatprep.subr.bf16.mxu1 %v15008_v51  ;;  %v5828_v51 = vshrl.u32 %v18046_v40, 16  ;;  %v15074_v40 = vld [vmem:[%s20825_s3 + $0x638] ss:$12 sps:$4 sm:$0xff]  }
 0x308   : > { %14099 = vmatpush3.bf16.msra.mxu0 %v15018_v23  ;;  %5595 = vmatprep.mubr.bf16.mxu0 %v17993_v8  ;;  %v15054_v23 = vld [vmem:[%s20825_s3 + $0x360] ss:$12 sps:$4 sm:$0xff]  }
 0x309   : > { %14100 = vmatprep.subr.bf16.mxu0 %v15020_v45  ;;  %v15060_v45 = vld [vmem:[%s20825_s3 + $0x34c] ss:$12 sps:$4 sm:$0xff]  }
 0x30a   : > { %14080 = vmatpush3.bf16.msra.mxu1 %v15012_v56  ;;  %v5823_v56 = vshll.u32 %v18056_v15, 16 }
 0x30b   : > { %14081 = vmatprep.subr.bf16.mxu1 %v15013_v60  ;;  %v5830_v60 = vrot.slane %v5828_v51, 1  ;;  %v15088_v51 = vld [vmem:[%s20825_s3 + $0x43c] ss:$12 sps:$4 sm:$0xff]  }
 0x30c   : > { %14101 = vmatpush3.bf16.msra.mxu0 %v15021_v0  ;;  %v5833_v0 = vrot.slane %v5831_v20, 2  ;;  %v15095_v20 = vld [vmem:[%s20825_s3 + $0x518] ss:$12 sps:$4 sm:$0xff]  }
 0x30d   : > { %14102 = vmatprep.subr.bf16.mxu0 %v15022_v62  ;;  %v15058_v62 = vld [vmem:[%s20825_s3 + $0x348] ss:$12 sps:$4 sm:$0xff]  }
 0x30e   : > { %14082 = vmatpush3.bf16.msra.mxu1 %v15015_v34  ;;  %v5825_v34 = vrot.slane %v5823_v56, 2  ;;  %v15104_v56 = vld [vmem:[%s20825_s3 + $0x5a8] ss:$12 sps:$4 sm:$0xff]  }
 0x30f   : > { %12904 = vmatmul.mubr.msk.bf16.gmra.mxu0 %vm4395_vm8, %v18112_v29  ;;  %14302 = vmatprep.subr.bf16.mxu1 %v15019_v11 }
 0x310   : > { %14103 = vmatpush3.bf16.msra.mxu0 %v15024_v22  ;;  %5638 = vmatprep.mubr.bf16.mxu0 %v5208_v63  ;;  %v5855_v22 = vshrl.u32 %v18075_v5, 16  ;;  %v15079_v5 = vld [vmem:[%s20825_s3 + $0x620] ss:$12 sps:$4 sm:$0xff]  }
 0x311   : > { %14104 = vmatprep.subr.bf16.mxu0 %v15028_v58  ;;  %5025 = vmatmul.mubr.bf16.vlgmr.msra.gmra.mxu1 %v17766_v36  ;;  %v15040_v36 = vld [vmem:[%s20825_s3 + $0x410] ss:$12 sps:$4 sm:$0xff]  }
 0x312   : > { %5032 = vmatprep.mubr.bf16.mxu1 %v17810_v3  ;;  %14303 = vmatpush3.bf16.msra.mxu1 %v15019_v11  ;;  %v15041_v3 = vld [vmem:[%s20825_s3 + $0x350] ss:$12 sps:$4 sm:$0xff]   ;;  %v5834_v11 = vor.u32 %v5833_v0, %v5830_v60  ;;  %v5797_v60 = vshll.u32 %v18151_v48, 16  ;;  %v15091_v0 = vld [vmem:[%s20825_s3 + $0x420] ss:$12 sps:$4 sm:$0xff]  }
 0x313   : > { %5500 = vmatprep.subr.bf16.mxu1 %v15034_v18  ;;  %v15062_v58 = vld [vmem:[%s20825_s3 + $0x330] ss:$12 sps:$4 sm:$0xff]   ;;  %v5814_v18 = vshll.u32 %v18089_v6, 16 }
 0x314   : > { %14105 = vmatpush3.bf16.msra.mxu0 %v15029_v28  ;;  %v5811_v28 = vshrl.u32 %v18089_v6, 16  ;;  %v15073_v6 = vld [vmem:[%s20825_s3 + $0x484] ss:$12 sps:$4 sm:$0xff]  }
 0x315   : > { %14106 = vmatprep.subr.bf16.mxu0 %v15030_v7  ;;  %v5803_v7 = vshrl.u32 %v18096_v21, 16 }
 0x318   : > { %14107 = vmatpush3.bf16.msra.mxu0 %v15031_v25 }
 0x319   : > { %14108 = vmatprep.subr.bf16.mxu0 %v15035_v24  ;;  %5033 = vmatmul.mubr.bf16.gmra.mxu1 %v17807_v39  ;;  %v15032_v39 = vld [vmem:[%s20825_s3 + $0x3d8] ss:$12 sps:$4 sm:$0xff]   ;;  %v5857_v24 = vrot.slane %v5855_v22, 1  ;;  %v15109_v22 = vld [vmem:[%s20825_s3 + $0x590] ss:$12 sps:$4 sm:$0xff]  }
 0x31a   : > { %14304 = vmatprep.mubr.msk.bf16.mxu1 %vm4395_vm8, %v17786_v32  ;;  %v15039_v32 = vld [vmem:[%s20825_s3 + $0x3c4] ss:$12 sps:$4 sm:$0xff]  }
 0x31c   : > { %14109 = vmatpush3.bf16.msra.mxu0 %v15036_v49  ;;  %v5860_v49 = vrot.slane %v5858_v12, 2  ;;  %v5799_v12 = vrot.slane %v5797_v60, 2 }
 0x31d   : > { %14110 = vmatprep.subr.bf16.mxu0 %v15040_v36  ;;  %v5806_v36 = vshll.u32 %v18096_v21, 16  ;;  %v5816_v21 = vrot.slane %v5814_v18, 2 }
 0x320   : > { %14111 = vmatpush3.bf16.msra.mxu0 %v15041_v3  ;;  %v15065_v3 = vld [vmem:[%s20825_s3 + $0x498] ss:$12 sps:$4 sm:$0xff]  }
 0x321   : > { %14112 = vmatprep.subr.bf16.mxu0 %v15045_v35  ;;  %14305 = vmatmul.mubr.msk.bf16.vlgmr.msra.gmra.mxu1 %vm4395_vm8, %v17820_v52  ;;  %v18181_v52 = vsel %vm20841_vm3, %v5203_v14, %v5204_v33  ;;  %v5813_v35 = vrot.slane %v5811_v28, 1  ;;  %v15071_v33 = vld [vmem:[%s20825_s3 + $0x480] ss:$12 sps:$4 sm:$0xff]   ;;  %v15089_v14 = vld [vmem:[%s20825_s3 + $0x5f0] ss:$12 sps:$4 sm:$0xff]   ;;  %vm18798_vm3 = vmand %vm6580_vm5, %vm20844_vm14 }
 0x322   : > { %5501 = vmatpush1.bf16.msra.mxu1 %v15032_v39  ;;  %5532 = vmatprep.mubr.bf16.mxu1 %v5208_v63  ;;  %v15075_v63 = vld [vmem:[%s20825_s3 + $0x578] ss:$12 sps:$4 sm:$0xff]   ;;  %v15084_v39 = vld [vmem:[%s20825_s3 + $0x608] ss:$12 sps:$4 sm:$0xff]  }
 0x323   : > { %5502 = vmatprep.subr.bf16.mxu1 %v15039_v32  ;;  %v5861_v32 = vor.u32 %v5860_v49, %v5857_v24  ;;  %v5837_v24 = vshrl.u32 %v18183_v37, 16  ;;  %v5840_v49 = vshll.u32 %v18183_v37, 16  ;;  %v15106_v37 = vld [vmem:[%s20825_s3 + $0x570] ss:$12 sps:$4 sm:$0xff]  }
 0x324   : > { %14113 = vmatpush3.bf16.msra.mxu0 %v15046_v41  ;;  %v5805_v41 = vrot.slane %v5803_v7, 1 }
 0x325   : > { %14308 = vmatprep.subr.bf16.mxu0 %v15061_v57 }
 0x326   : > { %5503 = vmatpush1.bf16.msra.mxu1 %v15037_v1  ;;  %v15078_v1 = vld [vmem:[%s20825_s3 + $0x46c] ss:$12 sps:$4 sm:$0xff]  }
 0x327   : > { %5639 = vmatmul.mubr.bf16.vlgmr.msra.gmra.mxu0 %v18181_v52  ;;  %5504 = vmatprep.subr.bf16.mxu1 %v15044_v43  ;;  %v18288_v43 = vor.u32 %v5816_v21, %v5813_v35  ;;  %v5839_v21 = vrot.slane %v5837_v24, 1  ;;  %v15148_v24 = vld [vmem:[%s20825_s3 + $0x5b8] ss:$12 sps:$4 sm:$0xff]  }
 0x328   : > { %5646 = vmatprep.mubr.bf16.mxu0 %v18193_v59  ;;  %14309 = vmatpush3.bf16.msra.mxu0 %v15061_v57  ;;  %v5808_v57 = vrot.slane %v5806_v36, 2  ;;  %v15101_v36 = vld [vmem:[%s20825_s3 + $0x3f0] ss:$12 sps:$4 sm:$0xff]  }
 0x329   : > { %6212 = vmatprep.subr.bf16.mxu0 %v15070_v13  ;;  %v18294_v13 = vsel %vm20843_vm4, %v5834_v11, %v5861_v32 }
 0x32a   : > { %5505 = vmatpush1.bf16.msra.mxu1 %v15042_v2  ;;  %v5809_v2 = vor.u32 %v5808_v57, %v5805_v41  ;;  %v15113_v41 = vld [vmem:[%s20825_s3 + $0x55c] ss:$12 sps:$4 sm:$0xff]  }
 0x32b   : > { %5506 = vmatprep.subr.bf16.mxu1 %v15049_v26  ;;  %v15076_v26 = vld [vmem:[%s20825_s3 + $0x468] ss:$12 sps:$4 sm:$0xff]  }
 0x32e   : > { %5507 = vmatpush1.bf16.msra.mxu1 %v15047_v17  ;;  %v18306_v17 = vsel %vm20843_vm4, %v5809_v2, %v18288_v43  ;;  %v15120_v2 = vld [vmem:[%s20825_s3 + $0x510] ss:$12 sps:$4 sm:$0xff]  }
 0x32f   : > { %5647 = vmatmul.mubr.bf16.gmra.mxu0 %v18207_v47  ;;  %5508 = vmatprep.subr.bf16.mxu1 %v15053_v31  ;;  %v15090_v31 = vld [vmem:[%s20825_s3 + $0x530] ss:$12 sps:$4 sm:$0xff]  }
 0x330   : > { %14310 = vmatprep.mubr.msk.bf16.mxu0 %vm4395_vm8, %v18073_v30  ;;  %v5820_v30 = vshrl.u32 %v18056_v15, 16 }
 0x332   : > { %5509 = vmatpush1.bf16.msra.mxu1 %v15051_v42  ;;  %v5822_v15 = vrot.slane %v5820_v30, 1  ;;  %v15094_v42 = vld [vmem:[%s20825_s3 + $0x5d8] ss:$12 sps:$4 sm:$0xff]   ;;  %v15100_v30 = vld [vmem:[%s20825_s3 + $0x500] ss:$12 sps:$4 sm:$0xff]  }
 0x333   : > { %5510 = vmatprep.subr.bf16.mxu1 %v15056_v53  ;;  %v15081_v53 = vld [vmem:[%s20825_s3 + $0x450] ss:$12 sps:$4 sm:$0xff]  }
 0x334   : > { %v5826_v38 = vor.u32 %v5825_v34, %v5822_v15  ;;  %v15098_v15 = vld [vmem:[%s20825_s3 + $0x40c] ss:$12 sps:$4 sm:$0xff]   ;;  %v15105_v34 = vld [vmem:[%s20825_s3 + $0x4e8] ss:$12 sps:$4 sm:$0xff]  }
 0x336   : > { %5511 = vmatpush1.bf16.msra.mxu1 %v15054_v23  ;;  %v18261_v25 = vsel %vm20843_vm4, %v5826_v38, %v5834_v11  ;;  %v15099_v23 = vld [vmem:[%s20825_s3 + $0x5c0] ss:$12 sps:$4 sm:$0xff]   ;;  %v5789_v11 = vshll.u32 %v18161_v10, 16 }
 0x337   : > { %14311 = vmatmul.mubr.msk.bf16.vlgmr.msra.gmra.mxu0 %vm4395_vm8, %v18112_v29  ;;  %5512 = vmatprep.subr.bf16.mxu1 %v15060_v45  ;;  %v15067_v29 = vld [vmem:[%s20825_s3 + $0x49c] ss:$12 sps:$4 sm:$0xff]   ;;  %v15086_v45 = vld [vmem:[%s20825_s3 + $0x438] ss:$12 sps:$4 sm:$0xff]  }
 0x338   : > { %6213 = vmatpush1.bf16.msra.mxu0 %v15068_v55  ;;  %6230 = vmatprep.mubr.bf16.mxu0 %v17993_v8  ;;  %v15093_v55 = vld [vmem:[%s20825_s3 + $0x424] ss:$12 sps:$4 sm:$0xff]   ;;  %v5791_v18 = vrot.slane %v5789_v11, 2 }
 0x339   : > { %14129 = vmatprep.subr.bf16.mxu0 %v15074_v40  ;;  %v5794_v40 = vshrl.u32 %v18151_v48, 16  ;;  %v5786_v48 = vshrl.u32 %v18161_v10, 16  ;;  %v15110_v10 = vld [vmem:[%s20825_s3 + $0x4d0] ss:$12 sps:$4 sm:$0xff]  }
 0x33a   : > { %5513 = vmatpush1.bf16.msra.mxu1 %v15058_v62  ;;  %v5846_v62 = vshrl.u32 %v18159_v19, 16 }
 0x33b   : > { %5514 = vmatprep.subr.bf16.mxu1 %v15064_v16  ;;  %v5849_v16 = vshll.u32 %v18159_v19, 16  ;;  %v5796_v19 = vrot.slane %v5794_v40, 1  ;;  %v5788_v28 = vrot.slane %v5786_v48, 1  ;;  %v15133_v40 = vld [vmem:[%s20825_s3 + $0x630] ss:$12 sps:$4 sm:$0xff]  }
 0x33c   : > { %v15136_v48 = vld [vmem:[%s20825_s3 + $0x618] ss:$12 sps:$4 sm:$0xff]  }
 0x33d   : > { %v5851_v38 = vrot.slane %v5849_v16, 2  ;;  %v5800_v7 = vor.u32 %v5799_v12, %v5796_v19  ;;  %v15138_v16 = vld [vmem:[%s20825_s3 + $0x61c] ss:$12 sps:$4 sm:$0xff]   ;;  %v15141_v19 = vld [vmem:[%s20825_s3 + $0x604] ss:$12 sps:$4 sm:$0xff]  }
 0x33e   : > { %5515 = vmatpush1.bf16.msra.mxu1 %v15062_v58  ;;  %v15096_v58 = vld [vmem:[%s20825_s3 + $0x408] ss:$12 sps:$4 sm:$0xff]  }
 0x33f   : > { %13026 = vmatmul.mubr.msk.bf16.vlgmr.msra.gmra.mxu0 %vm4395_vm8, %v18261_v25  ;;  %5516 = vmatprep.subr.bf16.mxu1 %v15067_v29  ;;  %v5848_v29 = vrot.slane %v5846_v62, 1 }
 0x340   : > { %14130 = vmatpush3.bf16.msra.mxu0 %v15075_v63  ;;  %6240 = vmatprep.mubr.bf16.mxu0 %v17993_v8  ;;  %v15103_v63 = vld [vmem:[%s20825_s3 + $0x3f4] ss:$12 sps:$4 sm:$0xff]  }
 0x341   : > { %14131 = vmatprep.subr.bf16.mxu0 %v15079_v5  ;;  %v15123_v5 = vld [vmem:[%s20825_s3 + $0x650] ss:$12 sps:$4 sm:$0xff]  }
 0x342   : > { %5517 = vmatpush2.bf16.msra.mxu1 %v15065_v3  ;;  %v5852_v3 = vor.u32 %v5851_v38, %v5848_v29  ;;  %v15139_v38 = vld [vmem:[%s20825_s3 + $0x600] ss:$12 sps:$4 sm:$0xff]  }
 0x343   : > { %5518 = vmatprep.subr.bf16.mxu1 %v15073_v6  ;;  %v15108_v6 = vld [vmem:[%s20825_s3 + $0x574] ss:$12 sps:$4 sm:$0xff]  }
 0x344   : > { %14132 = vmatpush3.bf16.msra.mxu0 %v15080_v46  ;;  %v5792_v46 = vor.u32 %v5791_v18, %v5788_v28  ;;  %v18386_v32 = vsel %vm20843_vm4, %v18288_v43, %v5852_v3  ;;  %v15117_v43 = vld [vmem:[%s20825_s3 + $0x528] ss:$12 sps:$4 sm:$0xff]  }
 0x345   : > { %14133 = vmatprep.subr.bf16.mxu0 %v15084_v39  ;;  %v5842_v39 = vrot.slane %v5840_v49, 2  ;;  %v15142_v28 = vld [vmem:[%s20825_s3 + $0x5e8] ss:$12 sps:$4 sm:$0xff]   ;;  %v15153_v49 = vld [vmem:[%s20825_s3 + $0x5a4] ss:$12 sps:$4 sm:$0xff]  }
 0x346   : > { %5519 = vmatpush2.bf16.msra.mxu1 %v15071_v33  ;;  %v18378_v35 = vsel %vm20843_vm4, %v5792_v46, %v5800_v7  ;;  %v15111_v33 = vld [vmem:[%s20825_s3 + $0x558] ss:$12 sps:$4 sm:$0xff]   ;;  %v15147_v18 = vld [vmem:[%s20825_s3 + $0x5d4] ss:$12 sps:$4 sm:$0xff]  }
 0x347   : > { %13027 = vmatmul.mubr.msk.bf16.gmra.mxu0 %vm4395_vm8, %v18294_v13  ;;  %5520 = vmatprep.subr.bf16.mxu1 %v15078_v1  ;;  %v5843_v57 = vor.u32 %v5842_v39, %v5839_v21  ;;  %v15116_v1 = vld [vmem:[%s20825_s3 + $0x544] ss:$12 sps:$4 sm:$0xff]   ;;  %v15154_v21 = vld [vmem:[%s20825_s3 + $0x588] ss:$12 sps:$4 sm:$0xff]  }
 0x348   : > { %14134 = vmatpush3.bf16.msra.mxu0 %v15085_v50  ;;  %6283 = vmatprep.mubr.bf16.mxu0 %v18306_v17 }
 0x349   : > { %14135 = vmatprep.subr.bf16.mxu0 %v15089_v14  ;;  %v18401_v50 = vsel %vm20843_vm4, %v5800_v7, %v5843_v57  ;;  %v15122_v14 = vld [vmem:[%s20825_s3 + $0x514] ss:$12 sps:$4 sm:$0xff]   ;;  %v15150_v7 = vld [vmem:[%s20825_s3 + $0x5bc] ss:$12 sps:$4 sm:$0xff]   ;;  %vm6625_vm4 = vcmask 257027  }
 0x34a   : > { %5521 = vmatpush2.bf16.msra.mxu1 %v15076_v26  ;;  %v15129_v26 = vld [vmem:[%s20825_s3 + $0x4e4] ss:$12 sps:$4 sm:$0xff]  }
 0x34b   : > { %5522 = vmatprep.subr.bf16.mxu1 %v15083_v54 }
 0x34c   : > { %14136 = vmatpush3.bf16.msra.mxu0 %v15090_v31 }
 0x34d   : > { %14137 = vmatprep.subr.bf16.mxu0 %v15094_v42 }
 0x34e   : > { %5523 = vmatpush2.bf16.msra.mxu1 %v15081_v53  ;;  %v15130_v53 = vld [vmem:[%s20825_s3 + $0x4c8] ss:$12 sps:$4 sm:$0xff]  }
 0x34f   : > { %5524 = vmatprep.subr.bf16.mxu1 %v15088_v51 }
 0x350   : > { %14138 = vmatpush3.bf16.msra.mxu0 %v15095_v20 }
 0x351   : > { %14139 = vmatprep.subr.bf16.mxu0 %v15099_v23 }
 0x352   : > { %5525 = vmatpush2.bf16.msra.mxu1 %v15086_v45  ;;  %v15135_v45 = vld [vmem:[%s20825_s3 + $0x634] ss:$12 sps:$4 sm:$0xff]  }
 0x353   : > { %5526 = vmatprep.subr.bf16.mxu1 %v15093_v55 }
 0x354   : > { %14140 = vmatpush3.bf16.msra.mxu0 %v15100_v30 }
 0x355   : > { %14141 = vmatprep.subr.bf16.mxu0 %v15104_v56 }
 0x356   : > { %5527 = vmatpush2.bf16.msra.mxu1 %v15091_v0 }
 0x357   : > { %5528 = vmatprep.subr.bf16.mxu1 %v15098_v15 }
 0x358   : > { %14142 = vmatpush3.bf16.msra.mxu0 %v15105_v34 }
 0x359   : > { %14143 = vmatprep.subr.bf16.mxu0 %v15109_v22 }
 0x35a   : > { %5529 = vmatpush2.bf16.msra.mxu1 %v15096_v58 }
 0x35b   : > { %5530 = vmatprep.subr.bf16.mxu1 %v15103_v63 }
 0x35c   : > { %14144 = vmatpush3.bf16.msra.mxu0 %v15110_v10  ;;  %v15144_v10 = vld [vmem:[%s20825_s3 + $0x5ec] ss:$12 sps:$4 sm:$0xff]  }
 0x35d   : > { %14314 = vmatprep.subr.bf16.mxu0 %v15123_v5 }
 0x35e   : > { %5531 = vmatpush2.bf16.msra.mxu1 %v15101_v36  ;;  %v15151_v36 = vld [vmem:[%s20825_s3 + $0x5a0] ss:$12 sps:$4 sm:$0xff]  }
 0x35f   : > { %6284 = vmatmul.mubr.bf16.vlgmr.msra.gmra.mxu0 %v18378_v35  ;;  %6145 = vmatprep.subr.bf16.mxu1 %v15108_v6  ;;  %v15156_v6 = vld [vmem:[%s20825_s3 + $0x58c] ss:$12 sps:$4 sm:$0xff]  }
 0x360   : > { %6291 = vmatprep.mubr.bf16.mxu0 %v18386_v32  ;;  %14315 = vmatpush3.bf16.msra.mxu0 %v15123_v5  ;;  %v15145_v5 = vld [vmem:[%s20825_s3 + $0x5d0] ss:$12 sps:$4 sm:$0xff]  }
 0x361   : > { %5533 = vmatmul.mubr.bf16.vlgmr.msra.gmra.mxu1 %v18181_v52  ;;  %v15114_v52 = vld [vmem:[%s20825_s3 + $0x540] ss:$12 sps:$4 sm:$0xff]  }
 0x362   : > { %5542 = vmatprep.mubr.bf16.mxu1 %v18193_v59  ;;  %6146 = vmatpush1.bf16.msra.mxu1 %v15106_v37  ;;  %v15119_v59 = vld [vmem:[%s20825_s3 + $0x52c] ss:$12 sps:$4 sm:$0xff]  }
 0x363   : > { %6147 = vmatprep.subr.bf16.mxu1 %v15113_v41 }
 0x366   : > { %6148 = vmatpush1.bf16.msra.mxu1 %v15111_v33 }
 0x367   : > { %6292 = vmatmul.mubr.bf16.gmra.mxu0 %v18401_v50  ;;  %6149 = vmatprep.subr.bf16.mxu1 %v15116_v1 }
 0x368   : > { %14316 = vmatprep.mubr.msk.bf16.mxu0 %vm4395_vm8, %v18261_v25  ;;  %v15124_v25 = vld [vmem:[%s20825_s3 + $0x4f8] ss:$12 sps:$4 sm:$0xff]  }
 0x369   : > { %5543 = vmatmul.mubr.bf16.gmra.mxu1 %v18207_v47  ;;  %v15126_v47 = vld [vmem:[%s20825_s3 + $0x4fc] ss:$12 sps:$4 sm:$0xff]  }
 0x36a   : > { %6150 = vmatpush1.bf16.msra.mxu1 %v15114_v52  ;;  %6177 = vmatprep.mubr.bf16.mxu1 %v18306_v17  ;;  %v15132_v17 = vld [vmem:[%s20825_s3 + $0x4cc] ss:$12 sps:$4 sm:$0xff]  }
 0x36b   : > { %6151 = vmatprep.subr.bf16.mxu1 %v15119_v59 }
 0x36e   : > { %6152 = vmatpush1.bf16.msra.mxu1 %v15117_v43 }
 0x36f   : > { %14317 = vmatmul.mubr.msk.bf16.vlgmr.msra.gmra.mxu0 %vm4395_vm8, %v18294_v13  ;;  %6153 = vmatprep.subr.bf16.mxu1 %v15122_v14  ;;  %v15127_v13 = vld [vmem:[%s20825_s3 + $0x4e0] ss:$12 sps:$4 sm:$0xff]   ;;  %vm18790_vm8 = vmand %vm6542_vm7, %vm20845_vm0 }
 0x370   : > { %vm18827_vm0 = vmand %vm458_vm15, %vm20847_vm2  ;;  %vm20855_vm2 = vcmask 1046534  }
 0x372   : > { %6154 = vmatpush1.bf16.msra.mxu1 %v15120_v2 }
 0x373   : > { %6155 = vmatprep.subr.bf16.mxu1 %v15126_v47 }
 0x376   : > { %6156 = vmatpush1.bf16.msra.mxu1 %v15124_v25 }
 0x377   : > { %v4436_v54 = vpop.f32.mrf.mxu0  ;;  %6157 = vmatprep.subr.bf16.mxu1 %v15129_v26 }
 0x379   : > { %v4438_v31 = vpop.f32.mrf.mxu0  ;;  %v4489_v42 = vpop.f32.mrf.mxu1 }
 0x37a   : > { %6158 = vmatpush1.bf16.msra.mxu1 %v15127_v13  ;;  %v18443_v51 = vadd.f32 %v4489_v42, %v4436_v54 }
 0x37b   : > { %v4440_v20 = vpop.f32.mrf.mxu0  ;;  %6159 = vmatprep.subr.bf16.mxu1 %v15132_v17  ;;  %v4491_v23 = vpop.f32.mrf.mxu1 }
 0x37c   : > { %v18448_v55 = vadd.f32 %v4491_v23, %v4438_v31 }
 0x37d   : > { %v18450_v30 = vpop.f32.mrf.mxu0  ;;  %v4493_v56 = vpop.f32.mrf.mxu1 }
 0x37e   : > { %6160 = vmatpush1.bf16.msra.mxu1 %v15130_v53  ;;  %v18455_v60 = vadd.f32 %v4493_v56, %v4440_v20 }
 0x37f   : > { %v4446_v0 = vpop.f32.mrf.mxu0  ;;  %6161 = vmatprep.subr.bf16.mxu1 %v15135_v45  ;;  %v18457_v62 = vpop.f32.mrf.mxu1 }
 0x380   : > { %v4496_v20 = vadd.f32 %v18457_v62, %v18450_v30 }
 0x381   : > { %v4499_v15 = vpop.f32.mrf.mxu1  ;;  %v4448_v34 = vpop.f32.mrf.mxu0 }
 0x382   : > { %6162 = vmatpush2.bf16.msra.mxu1 %v15133_v40  ;;  %v18465_v11 = vadd.f32 %v4499_v15, %v4446_v0 }
 0x383   : > { %6163 = vmatprep.subr.bf16.mxu1 %v15138_v16  ;;  %v4501_v22 = vpop.f32.mrf.mxu1  ;;  %v4450_v29 = vpop.f32.mrf.mxu0 }
 0x384   : > { %v18470_v12 = vadd.f32 %v4501_v22, %v4448_v34 }
 0x385   : > { %v4503_v58 = vpop.f32.mrf.mxu1  ;;  %v4452_v47 = vpop.f32.mrf.mxu0 }
 0x386   : > { %6164 = vmatpush2.bf16.msra.mxu1 %v15136_v48  ;;  %v18475_v63 = vadd.f32 %v4503_v58, %v4450_v29 }
 0x387   : > { %6165 = vmatprep.subr.bf16.mxu1 %v15141_v19  ;;  %v4505_v3 = vpop.f32.mrf.mxu1 }
 0x388   : > { %v4506_v19 = vadd.f32 %v4505_v3, %v4452_v47 }
 0x38a   : > { %6166 = vmatpush2.bf16.msra.mxu1 %v15139_v38 }
 0x38b   : > { %6167 = vmatprep.subr.bf16.mxu1 %v15144_v10 }
 0x38e   : > { %6168 = vmatpush2.bf16.msra.mxu1 %v15142_v28 }
 0x38f   : > { %6169 = vmatprep.subr.bf16.mxu1 %v15147_v18 }
 0x392   : > { %6170 = vmatpush2.bf16.msra.mxu1 %v15145_v5 }
 0x393   : > { %6171 = vmatprep.subr.bf16.mxu1 %v15150_v7 }
 0x396   : > { %6172 = vmatpush2.bf16.msra.mxu1 %v15148_v24 }
 0x397   : > { %6173 = vmatprep.subr.bf16.mxu1 %v15153_v49 }
 0x399   : > { %v18504_v46 = vpop.f32.mrf.mxu1 }
 0x39a   : > { %6174 = vmatpush2.bf16.msra.mxu1 %v15151_v36 }
 0x39b   : > { %v18509_v39 = vpop.f32.mrf.mxu1  ;;  %6175 = vmatprep.subr.bf16.mxu1 %v15156_v6 }
 0x39d   : > { %v18511_v37 = vpop.f32.mrf.mxu1 }
 0x39e   : > { %6176 = vmatpush2.bf16.msra.mxu1 %v15154_v21 }
 0x39f   : > { %v18513_v41 = vpop.f32.mrf.mxu1 }
 0x3a1   : > { %6178 = vmatmul.mubr.bf16.vlgmr.msra.gmra.mxu1 %v18378_v35  ;;  %v18516_v57 = vpop.f32.mrf.mxu1 }
 0x3a2   : > { %6187 = vmatprep.mubr.bf16.mxu1 %v18386_v32 }
 0x3a3   : > { %v18519_v33 = vpop.f32.mrf.mxu1 }
 0x3a5   : > { %v18521_v1 = vpop.f32.mrf.mxu1 }
 0x3a7   : > { %v18523_v52 = vpop.f32.mrf.mxu1 }
 0x3a9   : > { %6188 = vmatmul.mubr.bf16.gmra.mxu1 %v18401_v50  ;;  %v18526_v59 = vpop.f32.mrf.mxu1 }
 0x3aa   : > { %7318 = vmatprep.mubr.bf16.mxu1 %v17993_v8  ;;  %v15165_v8 = vld [vmem:[%s20827_s5 + $0x34c] ss:$12 sps:$4 sm:$0xff]  }
 0x3ab   : > { %v18529_v43 = vpop.f32.mrf.mxu1  ;;  %7298 = vmatprep.subr.bf16.mxu1 %v15165_v8  ;;  %v15181_v8 = vld [vmem:[%s20827_s5 + $0x1e4] ss:$12 sps:$4 sm:$0xff]  }
 0x3ad   : > { %v18531_v14 = vpop.f32.mrf.mxu1 }
 0x3af   : > { %v18533_v35 = vpop.f32.mrf.mxu1 }
 0x3b1   : > { %v4973_v2 = vpop.f32.mrf.mxu1 }
 0x3b3   : > { %v4975_v32 = vpop.f32.mrf.mxu1 }
 0x3b5   : > { %v4977_v25 = vpop.f32.mrf.mxu1 }
 0x3b7   : > { %v4920_v50 = vpop.f32.mrf.mxu0  ;;  %v4979_v26 = vpop.f32.mrf.mxu1 }
 0x3b8   : > { %v4921_v13 = vadd.f32 %v4920_v50, %v18443_v51 }
 0x3b9   : > { %v4922_v54 = vpop.f32.mrf.mxu0  ;;  %v4983_v42 = vpop.f32.mrf.mxu1 }
 0x3ba   : > { %v18538_v17 = vadd.f32 %v4973_v2, %v4921_v13  ;;  %v4923_v31 = vadd.f32 %v4922_v54, %v18448_v55  ;;  %v15171_v13 = vld [vmem:[%s20827_s5 + $0x334] ss:$12 sps:$4 sm:$0xff]  }
 0x3bb   : > { %v4924_v53 = vpop.f32.mrf.mxu0  ;;  %v4985_v16 = vpop.f32.mrf.mxu1 }
 0x3bc   : > { %v18543_v23 = vadd.f32 %v4975_v32, %v4923_v31  ;;  %v4925_v45 = vadd.f32 %v4924_v53, %v18455_v60  ;;  %v15157_v31 = vld [vmem:[%s20827_s5 + $0x258] ss:$12 sps:$4 sm:$0xff]  }
 0x3bd   : > { %v4926_v56 = vpop.f32.mrf.mxu0  ;;  %v4987_v30 = vpop.f32.mrf.mxu1 }
 0x3be   : > { %v18546_v40 = vadd.f32 %v4977_v25, %v4925_v45  ;;  %v4927_v0 = vadd.f32 %v4926_v56, %v4496_v20  ;;  %v15163_v25 = vld [vmem:[%s20827_s5 + $0x348] ss:$12 sps:$4 sm:$0xff]   ;;  %v15162_v20 = vld [vmem:[%s20827_s5 + $0x244] ss:$12 sps:$4 sm:$0xff]   ;;  %v15160_v56 = vld [vmem:[%s20827_s5 + $0x240] ss:$12 sps:$4 sm:$0xff]  }
 0x3bf   : > { %v4930_v51 = vpop.f32.mrf.mxu0  ;;  %v4989_v28 = vpop.f32.mrf.mxu1  ;;  %7299 = vmatpush1.bf16.msra.mxu1 %v15163_v25  ;;  %v15179_v25 = vld [vmem:[%s20827_s5 + $0x1e0] ss:$12 sps:$4 sm:$0xff]  }
 0x3c0   : > { %v18548_v15 = vadd.f32 %v4979_v26, %v4927_v0  ;;  %v4931_v34 = vadd.f32 %v4930_v51, %v18465_v11  ;;  %v15159_v26 = vld [vmem:[%s20827_s5 + $0x25c] ss:$12 sps:$4 sm:$0xff]   ;;  %7300 = vmatprep.subr.bf16.mxu1 %v15171_v13 }
 0x3c1   : > { %v4932_v55 = vpop.f32.mrf.mxu0  ;;  %7243 = vmatprep.subr.bf16.mxu0 %v15159_v26 }
 0x3c2   : > { %20883 = vst [vmem:[#allocation10_spill] sm:$0xff] %v18548_v15  ;;  %v18551_v48 = vadd.f32 %v4983_v42, %v4931_v34  ;;  %v4933_v22 = vadd.f32 %v4932_v55, %v18470_v12  ;;  %v15169_v42 = vld [vmem:[%s20827_s5 + $0x330] ss:$12 sps:$4 sm:$0xff]   ;;  %7244 = vmatpush1.bf16.msra.mxu0 %v15157_v31  ;;  %v15166_v34 = vld [vmem:[%s20827_s5 + $0x228] ss:$12 sps:$4 sm:$0xff]  }
 0x3c3   : > { %v4934_v62 = vpop.f32.mrf.mxu0  ;;  %7301 = vmatpush1.bf16.msra.mxu1 %v15169_v42  ;;  %7245 = vmatprep.subr.bf16.mxu0 %v15162_v20  ;;  %v15174_v55 = vld [vmem:[%s20827_s5 + $0x214] ss:$12 sps:$4 sm:$0xff]   ;;  %v15184_v31 = vld [vmem:[%s20827_s5 + $0x1cc] ss:$12 sps:$4 sm:$0xff]  }
 0x3c4   : > { %20884 = vst [vmem:[#allocation11_spill] sm:$0xff] %v18551_v48  ;;  %v18554_v58 = vadd.f32 %v4985_v16, %v4933_v22  ;;  %v4935_v60 = vadd.f32 %v4934_v62, %v18475_v63  ;;  %v15168_v16 = vld [vmem:[%s20827_s5 + $0x22c] ss:$12 sps:$4 sm:$0xff]   ;;  %v15182_v42 = vld [vmem:[%s20827_s5 + $0x1c8] ss:$12 sps:$4 sm:$0xff]  }
 0x3c5   : > { %v4936_v29 = vpop.f32.mrf.mxu0 }
 0x3c6   : > { %20885 = vst [vmem:[#allocation12_spill] sm:$0xff] %v18554_v58  ;;  %v18557_v38 = vadd.f32 %v4987_v30, %v4935_v60  ;;  %v4937_v10 = vadd.f32 %v4936_v29, %v4506_v19  ;;  %7246 = vmatpush1.bf16.msra.mxu0 %v15160_v56  ;;  %v15172_v30 = vld [vmem:[%s20827_s5 + $0x210] ss:$12 sps:$4 sm:$0xff]   ;;  %v14054_v58 = vadd.f32 %v18509_v39, %v18504_v46  ;;  %v15213_v46 = vld [vmem:[%s20827_s5 + $0x2a0] ss:$12 sps:$4 sm:$0xff]  }
 0x3c7   : > { %v18561_v11 = vpop.f32.mrf.mxu0  ;;  %7247 = vmatprep.subr.bf16.mxu0 %v15168_v16  ;;  %v15178_v60 = vld [vmem:[%s20827_s5 + $0x1fc] ss:$12 sps:$4 sm:$0xff]   ;;  %v15187_v16 = vld [vmem:[%s20827_s5 + $0x1b4] ss:$12 sps:$4 sm:$0xff]  }
 0x3c8   : > { %20886 = vst [vmem:[#allocation13_spill] sm:$0xff] %v18557_v38  ;;  %v18559_v18 = vadd.f32 %v4989_v28, %v4937_v10  ;;  %v15176_v10 = vld [vmem:[%s20827_s5 + $0x1f8] ss:$12 sps:$4 sm:$0xff]  }
 0x3c9   : > { %v18563_v5 = vpop.f32.mrf.mxu0  ;;  %v15208_v38 = vld [vmem:[%s20827_s5 + $0x2b8] ss:$12 sps:$4 sm:$0xff]  }
 0x3ca   : > { %20887 = vst [vmem:[#allocation14_spill] sm:$0xff] %v18559_v18  ;;  %7248 = vmatpush1.bf16.msra.mxu0 %v15166_v34  ;;  %v15185_v34 = vld [vmem:[%s20827_s5 + $0x1b0] ss:$12 sps:$4 sm:$0xff]   ;;  %v15205_v18 = vld [vmem:[%s20827_s5 + $0x2d4] ss:$12 sps:$4 sm:$0xff]  }
 0x3cb   : > { %v18565_v7 = vpop.f32.mrf.mxu0  ;;  %7249 = vmatprep.subr.bf16.mxu0 %v15174_v55 }
 0x3cd   : > { %v18567_v12 = vpop.f32.mrf.mxu0 }
 0x3ce   : > { %7250 = vmatpush1.bf16.msra.mxu0 %v15172_v30 }
 0x3cf   : > { %v18571_v63 = vpop.f32.mrf.mxu0  ;;  %7251 = vmatprep.subr.bf16.mxu0 %v15178_v60  ;;  %v15190_v60 = vld [vmem:[%s20827_s5 + $0x31c] ss:$12 sps:$4 sm:$0xff]  }
 0x3d1   : > { %v18573_v24 = vpop.f32.mrf.mxu0  ;;  %v14083_v19 = vpop.f32.mrf.mxu1 }
 0x3d2   : > { %7252 = vmatpush1.bf16.msra.mxu0 %v15176_v10  ;;  %v15188_v10 = vld [vmem:[%s20827_s5 + $0x318] ss:$12 sps:$4 sm:$0xff]  }
 0x3d3   : > { %v18575_v49 = vpop.f32.mrf.mxu0  ;;  %v14084_v28 = vpop.f32.mrf.mxu1  ;;  %7253 = vmatprep.subr.bf16.mxu0 %v15181_v8  ;;  %v15191_v8 = vld [vmem:[%s20827_s5 + $0x320] ss:$12 sps:$4 sm:$0xff]  }
 0x3d4   : > { %20888 = vst [vmem:[#allocation15_spill] sm:$0xff] %v18575_v49  ;;  %14160 = vmatprep.subr.bf16.mxu1 %v15191_v8  ;;  %v14085_v48 = vadd.f32 %v14084_v28, %v14083_v19 }
 0x3d5   : > { %v18577_v36 = vpop.f32.mrf.mxu0  ;;  %v18659_v13 = vpop.f32.mrf.mxu1 }
 0x3d6   : > { %20889 = vst [vmem:[#allocation16_spill] sm:$0xff] %v18577_v36  ;;  %7254 = vmatpush1.bf16.msra.mxu0 %v15179_v25 }
 0x3d7   : > { %7255 = vmatprep.subr.bf16.mxu0 %v15184_v31  ;;  %v18669_v56 = vpop.f32.mrf.mxu1 }
 0x3d9   : > { %v14089_v30 = vpop.f32.mrf.mxu1 }
 0x3da   : > { %7256 = vmatpush1.bf16.msra.mxu0 %v15182_v42  ;;  %v15195_v42 = vld [vmem:[%s20827_s5 + $0x304] ss:$12 sps:$4 sm:$0xff]  }
 0x3db   : > { %7257 = vmatprep.subr.bf16.mxu0 %v15187_v16  ;;  %v14090_v31 = vpop.f32.mrf.mxu1  ;;  %v15193_v16 = vld [vmem:[%s20827_s5 + $0x300] ss:$12 sps:$4 sm:$0xff]  }
 0x3dd   : > { %v14092_v27 = vpop.f32.mrf.mxu1 }
 0x3de   : > { %7258 = vmatpush1.bf16.msra.mxu0 %v15185_v34 }
 0x3df   : > { %7259 = vmatprep.subr.bf16.mxu0 %v15190_v60  ;;  %v15200_v60 = vld [vmem:[%s20827_s5 + $0x2ec] ss:$12 sps:$4 sm:$0xff]  }
 0x3e2   : > { %7260 = vmatpush2.bf16.msra.mxu0 %v15188_v10  ;;  %v15198_v10 = vld [vmem:[%s20827_s5 + $0x2e8] ss:$12 sps:$4 sm:$0xff]  }
 0x3e3   : > { %7261 = vmatprep.subr.bf16.mxu0 %v15195_v42  ;;  %v15203_v42 = vld [vmem:[%s20827_s5 + $0x2d0] ss:$12 sps:$4 sm:$0xff]  }
 0x3e6   : > { %7262 = vmatpush2.bf16.msra.mxu0 %v15193_v16  ;;  %v15210_v16 = vld [vmem:[%s20827_s5 + $0x2bc] ss:$12 sps:$4 sm:$0xff]  }
 0x3e7   : > { %v18579_v3 = vpop.f32.mrf.mxu0  ;;  %7263 = vmatprep.subr.bf16.mxu0 %v15200_v60 }
 0x3e9   : > { %v18581_v6 = vpop.f32.mrf.mxu0 }
 0x3ea   : > { %7264 = vmatpush2.bf16.msra.mxu0 %v15198_v10  ;;  %v14060_v10 = vadd.f32 %v18519_v33, %v18516_v57  ;;  %v14063_v57 = vadd.f32 %v18523_v52, %v18521_v1  ;;  %v4592_v33 = vadd.f32 %v14054_v58, %v18529_v43  ;;  %v14057_v1 = vadd.f32 %v18513_v41, %v18511_v37  ;;  %v15218_v41 = vld [vmem:[%s20827_s5 + $0x288] ss:$12 sps:$4 sm:$0xff]  }
 0x3eb   : > { %v18583_v21 = vpop.f32.mrf.mxu0  ;;  %7265 = vmatprep.subr.bf16.mxu0 %v15205_v18  ;;  %v15215_v18 = vld [vmem:[%s20827_s5 + $0x2a4] ss:$12 sps:$4 sm:$0xff]  }
 0x3ec   : > { %v4603_v52 = vadd.f32 %v18531_v14, %v14063_v57  ;;  %v5027_v43 = vadd.f32 %v14085_v48, %v4592_v33 }
 0x3ed   : > { %v18585_v2 = vpop.f32.mrf.mxu0 }
 0x3ee   : > { %7266 = vmatpush2.bf16.msra.mxu0 %v15203_v42  ;;  %v4600_v42 = vadd.f32 %v18526_v59, %v14060_v10  ;;  %v14116_v59 = vadd.f32 %v18581_v6, %v18579_v3 }
 0x3ef   : > { %v18587_v32 = vpop.f32.mrf.mxu0  ;;  %7267 = vmatprep.subr.bf16.mxu0 %v15210_v16 }
 0x3f1   : > { %v18592_v47 = vpop.f32.mrf.mxu0 }
 0x3f2   : > { %v14122_v49 = vadd.f32 %v18592_v47, %v18587_v32  ;;  %7268 = vmatpush2.bf16.msra.mxu0 %v15208_v38  ;;  %v18742_v32 = vld [vmem:[%s20826_s4] sm:$0x7] }
 0x3f3   : > { %v18597_v50 = vpop.f32.mrf.mxu0  ;;  %7269 = vmatprep.subr.bf16.mxu0 %v15215_v18  ;;  %v6374_v37 = vrot.slane %v18742_v32, %v17580_v9 }
 0x3f5   : > { %v18605_v54 = vpop.f32.mrf.mxu0 }
 0x3f6   : > { %7270 = vmatpush2.bf16.msra.mxu0 %v15213_v46 }
 0x3f7   : > { %v18613_v53 = vpop.f32.mrf.mxu0 }
 0x3f8   : > { %v5698_v19 = vadd.f32 %v18613_v53, %v14122_v49  ;;  %v14125_v49 = vadd.f32 %v18605_v54, %v18597_v50  ;;  %v14088_v53 = vadd.f32 %v18669_v56, %v18659_v13 }
 0x3f9   : > { %v18618_v45 = vpop.f32.mrf.mxu0 }
 0x3fa   : > { %v5690_v6 = vadd.f32 %v14116_v59, %v18618_v45 }
 0x3fb   : > { %v18623_v0 = vpop.f32.mrf.mxu0 }
 0x3fc   : > { %v5701_v48 = vadd.f32 %v18623_v0, %v14125_v49 }
 0x3fd   : > { %v18628_v51 = vpop.f32.mrf.mxu0 }
 0x3ff   : > { %v18636_v22 = vpop.f32.mrf.mxu0 }
 0x401   : > { %v18641_v62 = vpop.f32.mrf.mxu0 }
 0x403   : > { %v18646_v29 = vpop.f32.mrf.mxu0 }
 0x405   : > { %v18657_v26 = vpop.f32.mrf.mxu0 }
 0x406   : > { %20890 = vst [vmem:[#allocation17_spill] sm:$0xff] %v18657_v26 }
 0x407   : > { %v18667_v20 = vpop.f32.mrf.mxu0 }
 0x408   : > { %20891 = vst [vmem:[#allocation18_spill] sm:$0xff] %v18667_v20  ;;  %v14091_v20 = vadd.f32 %v14090_v31, %v14089_v30 }
 0x409   : > { %v18677_v55 = vpop.f32.mrf.mxu0 }
 0x40a   : > { %20892 = vst [vmem:[#allocation19_spill] sm:$0xff] %v18677_v55  ;;  %v5035_v39 = vadd.f32 %v14091_v20, %v4600_v42  ;;  %v15223_v42 = vld [vmem:[%s20827_s5 + $0x270] ss:$12 sps:$4 sm:$0xff]  }
 0x40b   : > { %v18688_v25 = vpop.f32.mrf.mxu0 }
 0x40c   : > { %20893 = vst [vmem:[#allocation20_spill] sm:$0xff] %v18688_v25  ;;  %v14093_v25 = vpop.f32.mrf.mxu1 }
 0x40d   : > { %v18696_v34 = vpop.f32.mrf.mxu0  ;;  %v14094_v30 = vadd.f32 %v14093_v25, %v14092_v27  ;;  %v15220_v27 = vld [vmem:[%s20827_s5 + $0x28c] ss:$12 sps:$4 sm:$0xff]  }
 0x40e   : > { %20894 = vst [vmem:[#allocation21_spill] sm:$0xff] %v18696_v34  ;;  %v14306_v60 = vpop.f32.mrf.mxu1  ;;  %7271 = vmatprep.subr.bf16.mxu0 %v15220_v27 }
 0x40f   : > { %v5084_v38 = vadd.f32 %v14306_v60, %v5035_v39  ;;  %v5038_v20 = vadd.f32 %v14094_v30, %v4603_v52  ;;  %7272 = vmatpush2.bf16.msra.mxu0 %v15218_v41 }
 0x410   : > { %v5075_v15 = vpop.f32.mrf.mxu1 }
 0x411   : > { %v5076_v28 = vadd.f32 %v5075_v15, %v5027_v43  ;;  %v5712_v14 = vadd.f32 %v5698_v19, %v5084_v38  ;;  %v15225_v15 = vld [vmem:[%s20827_s5 + $0x274] ss:$12 sps:$4 sm:$0xff]  }
 0x412   : > { %v14307_v3 = vpop.f32.mrf.mxu1  ;;  %7273 = vmatprep.subr.bf16.mxu0 %v15225_v15 }
 0x413   : > { %v5087_v45 = vadd.f32 %v14307_v3, %v5038_v20  ;;  %v5706_v16 = vadd.f32 %v5690_v6, %v5076_v28  ;;  %7274 = vmatpush2.bf16.msra.mxu0 %v15223_v42 }
 0x414   : > { %v5078_v56 = vpop.f32.mrf.mxu1 }
 0x41f   : > { %v14145_v61 = vpop.f32.mrf.mxu0 }
 0x421   : > { %v14146_v8 = vpop.f32.mrf.mxu0 }
 0x422   : > { %v14147_v50 = vadd.f32 %v14146_v8, %v14145_v61 }
 0x423   : > { %v18707_v34 = vpop.f32.mrf.mxu0 }
 0x425   : > { %v18715_v55 = vpop.f32.mrf.mxu0 }
 0x427   : > { %v14151_v36 = vpop.f32.mrf.mxu0 }
 0x429   : > { %v14152_v26 = vpop.f32.mrf.mxu0 }
 0x42a   : > { %v14153_v47 = vadd.f32 %v14152_v26, %v14151_v36  ;;  %v4595_v36 = vadd.f32 %v14057_v1, %v18533_v35  ;;  %v14119_v26 = vadd.f32 %v18585_v2, %v18583_v21  ;;  %v5715_v35 = vadd.f32 %v5701_v48, %v5087_v45  ;;  %v15232_v21 = vld [vmem:[%s20827_s5 + $0x19c] ss:$12 sps:$4 sm:$0xff]  }
 0x42b   : > { %v14154_v31 = vpop.f32.mrf.mxu0  ;;  %7758 = vmatprep.subr.bf16.mxu0 %v15232_v21 }
 0x42c   : > { %v5030_v0 = vadd.f32 %v14088_v53, %v4595_v36  ;;  %v5693_v61 = vadd.f32 %v14119_v26, %v18628_v51 }
 0x42d   : > { %v14155_v58 = vpop.f32.mrf.mxu0 }
 0x42e   : > { %v14156_v60 = vadd.f32 %v14155_v58, %v14154_v31  ;;  %v5079_v2 = vadd.f32 %v5078_v56, %v5030_v0  ;;  %v14150_v31 = vadd.f32 %v18715_v55, %v18707_v34 }
 0x42f   : > { %v14318_v25 = vpop.f32.mrf.mxu0 }
 0x430   : > { %v6343_v54 = vadd.f32 %v14318_v25, %v14153_v47  ;;  %v5709_v19 = vadd.f32 %v5693_v61, %v5079_v2  ;;  %v18782_v25 = vpop.f32.mrf.mxu1  ;;  %v6627_v61 = vld [vmem:[#allocation3 + $0x8] sm:$0x8] }
 0x431   : > { %v6334_v13 = vpop.f32.mrf.mxu0 }
 0x432   : > { %v6357_v10 = vadd.f32 %v6343_v54, %v5712_v14  ;;  %v6335_v18 = vadd.f32 %v14147_v50, %v6334_v13  ;;  %v18784_v14 = vpop.f32.mrf.mxu1 }
 0x433   : > { %v14319_v8 = vpop.f32.mrf.mxu0 }
 0x434   : > { %v6386_v57 = vadd.f32 %v6374_v37, %v6357_v10  ;;  %v6351_v33 = vadd.f32 %v6335_v18, %v5706_v16  ;;  %v6346_v30 = vadd.f32 %v14319_v8, %v14156_v60  ;;  %v18786_v45 = vpop.f32.mrf.mxu1  ;;  %v6686_v16 = vld [vmem:[#allocation3 + $0x14] sm:$0x2]  ;;  %v6710_v8 = vld [vmem:[#allocation3 + $0x14] sm:$0x4] }
 0x435   : > { %v6337_v51 = vpop.f32.mrf.mxu0 }
 0x436   : > { %v6398_v46 = vmin.f32 %v6386_v57, 0.0  ;;  %v6380_v39 = vadd.f32 %v6374_v37, %v6351_v33  ;;  %v6360_v59 = vadd.f32 %v6346_v30, %v5715_v35  ;;  %v6338_v27 = vadd.f32 %v14150_v31, %v6337_v51  ;;  %v6544_v35 = vld [vmem:[#allocation3 + $0x8] sm:$0x2]  ;;  %v18802_v33 = vpop.f32.mrf.mxu1  ;;  %v6528_v51 = vld [vmem:[#allocation3 + $0x8] sm:$0x1] }
 0x437   : > { %vm6482_vm12 = vcmp.gt.f32.partialorder %v6386_v57, 0.0 }
 0x438   : > { %v6410_v1 = vmul.f32 0.5, %v6398_v46  ;;  %v6442_v52 = vmul.f32 1.442695, %v6398_v46  ;;  %v6392_v43 = vmin.f32 %v6380_v39, 0.0  ;;  %v18776_v58 = vadd.f32 %v6374_v37, %v6360_v59 }
 0x439   : > { %v6354_v38 = vadd.f32 %v6338_v27, %v5709_v19  ;;  %vm6476_vm6 = vcmp.gt.f32.partialorder %v6380_v39, 0.0 }
 0x43a   : > { %v6430_v3 = vmul.f32 1.442695, %v6392_v43  ;;  %15833 = vpow2.f32 %v6442_v52  ;;  %v6404_v49 = vmul.f32 0.5, %v6392_v43  ;;  %v6401_v6 = vmin.f32 %v18776_v58, 0.0  ;;  %v6582_v52 = vld [vmem:[#allocation3 + $0x8] sm:$0x4] }
 0x43b   : > { %v18779_v55 = vadd.f32 %v6374_v37, %v6354_v38  ;;  %15835 = vtanh.f32 %v6410_v1  ;;  %vm6485_vm14 = vcmp.gt.f32.partialorder %v18776_v58, 0.0 }
 0x43c   : > { %15837 = vpow2.f32 %v6430_v3  ;;  %v6448_v34 = vmul.f32 1.442695, %v6401_v6  ;;  %v6413_v53 = vmul.f32 0.5, %v6401_v6  ;;  %v18821_v6 = vpop.f32.mrf.mxu1 }
 0x43d   : > { %v6395_v47 = vmin.f32 %v18779_v55, 0.0  ;;  %15839 = vtanh.f32 %v6404_v49 }
 0x43e   : > { %15841 = vpow2.f32 %v6448_v34 }
 0x43f   : > { %v6436_v28 = vmul.f32 1.442695, %v6395_v47  ;;  %v6407_v20 = vmul.f32 0.5, %v6395_v47  ;;  %v5590_v47 = vadd.f32 %v18563_v5, %v18784_v14 }
 0x441   : > { %15843 = vpow2.f32 %v6436_v28 }
 0x442   : > { %15845 = vtanh.f32 %v6413_v53 }
 0x443   : > { %15847 = vtanh.f32 %v6407_v20  ;;  %v6741_v20 = vld [vmem:[#allocation3 + $0x14] sm:$0x8] }
 0x447   : > { %v15834_v41 = vpop.eup %15833 }
 0x448   : > { %v15836_v37 = vpop.eup %15835  ;;  %v6458_v48 = vadd.f32 1.0, %v15834_v41  ;;  %v6763_v41 = vld [vmem:[#allocation3 + $0x20] sm:$0x1] }
 0x449   : > { %v15838_v50 = vpop.eup %15837 }
 0x44a   : > { %v6470_v54 = vmul.f32 %v15836_v37, %v6458_v48  ;;  %v6452_v15 = vadd.f32 1.0, %v15838_v50  ;;  %v15840_v36 = vpop.eup %15839 }
 0x44b   : > { %v15842_v26 = vpop.eup %15841 }
 0x44c   : > { %v6494_v13 = vsel %vm6482_vm12, %v6386_v57, %v6470_v54  ;;  %v6464_v60 = vmul.f32 %v15840_v36, %v6452_v15  ;;  %v6461_v18 = vadd.f32 1.0, %v15842_v26  ;;  %vm20854_vm12 = vsmask.f32 7942 }
 0x44d   : > { %v18794_v10 = vpack.c.bf16 %v6494_v13, %v6494_v13  ;;  %vm18843_vm15 = vmand %vm6542_vm7, %vm20854_vm12  ;;  %v18849_v13 = vpop.f32.mrf.mxu1  ;;  %vm20850_vm7 = vsmask.f32 7950 }
 0x44e   : > { %v15844_v0 = vpop.eup %15843  ;;  %v6488_v42 = vsel %vm6476_vm6, %v6380_v39, %v6464_v60  ;;  %vm20852_vm6 = vsmask.f32 3328 }
 0x44f   : > { %v15846_v57 = vpop.eup %15845  ;;  %v6687_v30 = vsel %vm18790_vm8, %v18794_v10, %v6686_v16  ;;  %v13045_v21 = vrot.slane %v18794_v10, 9  ;;  %v14024_v2 = vpack.c.bf16 %v6488_v42, %v6488_v42  ;;  %v6455_v39 = vadd.f32 1.0, %v15844_v0  ;;  %vm18836_vm13 = vmand %vm6625_vm4, %vm20852_vm6 }
 0x450   : > { %6688 = vst [vmem:[#allocation3 + $0x14] sm:$0x2] %v6687_v30  ;;  %v6473_v46 = vmul.f32 %v15846_v57, %v6461_v18  ;;  %v15848_v59 = vpop.eup %15847  ;;  %v6671_v43 = vshll.u32 %v18794_v10, 16  ;;  %v6656_v30 = vld [vmem:[#allocation3 + $0x14] sm:$0x1] }
 0x451   : > { %v6711_v19 = vsel %vm18798_vm3, %v13045_v21, %v6710_v8  ;;  %v6516_v27 = vshll.u32 %v14024_v2, 16  ;;  %v6545_v1 = vsel %vm18790_vm8, %v14024_v2, %v6544_v35  ;;  %v13035_v38 = vrot.slane %v14024_v2, 9 }
 0x452   : > { %6712 = vst [vmem:[#allocation3 + $0x14] sm:$0x4] %v6711_v19  ;;  %6546 = vst [vmem:[#allocation3 + $0x8] sm:$0x2] %v6545_v1  ;;  %v6497_v3 = vsel %vm6485_vm14, %v18776_v58, %v6473_v46  ;;  %v6467_v49 = vmul.f32 %v15848_v59, %v6455_v39  ;;  %vm6479_vm8 = vcmp.gt.f32.partialorder %v18779_v55, 0.0  ;;  %v13043_v26 = vrot.slane %v6671_v43, 9  ;;  %v5548_v59 = vpop.f32.mrf.mxu1 }
 0x453   : > { %v6529_v34 = vsel %vm18810_vm1, %v6516_v27, %v6528_v51  ;;  %v14030_v53 = vpack.c.bf16 %v6497_v3, %v6497_v3  ;;  %v6583_v28 = vsel %vm18798_vm3, %v13035_v38, %v6582_v52  ;;  %vm20851_vm14 = vsmask.f32 7946 }
 0x454   : > { %6530 = vst [vmem:[#allocation3 + $0x8] sm:$0x1] %v6529_v34  ;;  %v6491_v37 = vsel %vm6479_vm8, %v18779_v55, %v6467_v49  ;;  %6584 = vst [vmem:[#allocation3 + $0x8] sm:$0x4] %v6583_v28  ;;  %v13033_v16 = vrot.slane %v6516_v27, 9  ;;  %v5588_v3 = vadd.f32 %v18561_v11, %v18782_v25  ;;  %v5550_v34 = vpop.f32.mrf.mxu1  ;;  %v5592_v58 = vadd.f32 %v18565_v7, %v18786_v45  ;;  %v20912_v55 = vld [vmem:[#allocation10_spill] sm:$0xff] }
 0x455   : > { %v6723_v50 = vshll.u32 %v14030_v53, 16  ;;  %v6735_v54 = vrot.slane %v14030_v53, 6  ;;  %v13049_v15 = vrot.slane %v14030_v53, 11  ;;  %v14026_v36 = vpack.c.bf16 %v6491_v37, %v6491_v37  ;;  %vm18853_vm3 = vmand %vm6580_vm5, %vm20851_vm14 }
 0x456   : > { %vm18873_vm5 = vmand %vm6625_vm4, %vm20850_vm7  ;;  %v5704_v37 = vadd.f32 %v5588_v3, %v18538_v17  ;;  %v18891_v25 = vrot.slane %v18742_v32, %v17589_v4  ;;  %v18897_v7 = vrot.slane %v18742_v32, %v17597_v44  ;;  %v5705_v45 = vadd.f32 %v5590_v47, %v18543_v23 }
 0x457   : > { %v6698_v56 = vld [vmem:[#allocation3 + $0x14] sm:$0x2]  ;;  %v6725_v60 = vrot.slane %v6723_v50, 6  ;;  %v6742_v18 = vsel %vm18836_vm13, %v6735_v54, %v6741_v20  ;;  %v6764_v0 = vsel %vm18827_vm0, %v13049_v15, %v6763_v41  ;;  %v6595_v42 = vshll.u32 %v14026_v36, 16 }
 0x458   : > { %v6699_v8 = vsel %vm18843_vm15, %v13043_v26, %v6698_v56  ;;  %6743 = vst [vmem:[#allocation3 + $0x14] sm:$0x8] %v6742_v18  ;;  %6765 = vst [vmem:[#allocation3 + $0x20] sm:$0x1] %v6764_v0  ;;  %v6613_v35 = vrot.slane %v14026_v36, 6  ;;  %v13039_v57 = vrot.slane %v14026_v36, 11  ;;  %v5707_v15 = vadd.f32 %v5592_v58, %v18546_v40 }
 0x459   : > { %6700 = vst [vmem:[#allocation3 + $0x14] sm:$0x2] %v6699_v8  ;;  %v6562_v21 = vld [vmem:[#allocation3 + $0x8] sm:$0x2]  ;;  %v6731_v2 = vld [vmem:[#allocation3 + $0x14] sm:$0x4]  ;;  %v5594_v36 = vadd.f32 %v18567_v12, %v18802_v33  ;;  %v5598_v32 = vadd.f32 %v18571_v63, %v18821_v6 }
 0x45a   : > { %v6563_v51 = vsel %vm18843_vm15, %v13033_v16, %v6562_v21  ;;  %v6732_v46 = vsel %vm18853_vm3, %v6725_v60, %v6731_v2  ;;  %v6628_v39 = vsel %vm18836_vm13, %v6613_v35, %v6627_v61  ;;  %v6597_v19 = vrot.slane %v6595_v42, 6  ;;  %v20911_v56 = vld [vmem:[#allocation15_spill] sm:$0xff]  ;;  %v20913_v6 = vld [vmem:[#allocation17_spill] sm:$0xff] }
 0x45b   : > { %6564 = vst [vmem:[#allocation3 + $0x8] sm:$0x2] %v6563_v51  ;;  %6733 = vst [vmem:[#allocation3 + $0x14] sm:$0x4] %v6732_v46  ;;  %v6657_v27 = vsel %vm18827_vm0, %v13039_v57, %v6656_v30  ;;  %v6609_v1 = vld [vmem:[#allocation3 + $0x8] sm:$0x4]  ;;  %v5602_v40 = vadd.f32 %v20911_v56, %v5548_v59  ;;  %v5708_v63 = vadd.f32 %v5594_v36, %v20912_v55 }
 0x45c   : > { %6629 = vst [vmem:[#allocation3 + $0x8] sm:$0x8] %v6628_v39  ;;  %6658 = vst [vmem:[#allocation3 + $0x14] sm:$0x1] %v6657_v27  ;;  %v6610_v38 = vsel %vm18853_vm3, %v6597_v19, %v6609_v1  ;;  %v6745_v49 = vrot.slane %v6723_v50, 7  ;;  %v6631_v20 = vrot.slane %v6595_v42, 7 }
 0x45d   : > { %6611 = vst [vmem:[#allocation3 + $0x8] sm:$0x4] %v6610_v38  ;;  %v20914_v0 = vld [vmem:[#allocation11_spill] sm:$0xff]  ;;  %v20916_v30 = vld [vmem:[#allocation18_spill] sm:$0xff]  ;;  %v20917_v51 = vld [vmem:[#allocation13_spill] sm:$0xff]  ;;  %vm20926_vm13 = vcmask 1044484  }
 0x45e   : > { %v5710_v61 = vadd.f32 %v5598_v32, %v20914_v0  ;;  %v5713_v46 = vadd.f32 %v5602_v40, %v20917_v51  ;;  %v20918_v39 = vld [vmem:[#allocation16_spill] sm:$0xff]  ;;  %v20919_v27 = vld [vmem:[#allocation19_spill] sm:$0xff]  ;;  %vm20925_vm4 = vsmask.f32 7954  ;;  %vm20849_vm8 = vcmask 261120  }
 0x45f   : > { %v6751_v53 = vld [vmem:[#allocation3 + $0x14] sm:$0x8]  ;;  %v5604_v59 = vadd.f32 %v20918_v39, %v5550_v34  ;;  %vm18969_vm0 = vmand %vm20926_vm13, %vm20925_vm4  ;;  %v15192_v0 = vld [vmem:[%s20827_s5 + $0x260] ss:$12 sps:$4 sm:$0xff]   ;;  %vm6536_vm15 = vcmask 1045509  }
 0x460   : > { %v6752_v28 = vsel %vm18873_vm5, %v6745_v49, %v6751_v53  ;;  %vm20931_vm4 = vsmask.f32 1280  ;;  %v15197_v39 = vld [vmem:[%s20827_s5 + $0x248] ss:$12 sps:$4 sm:$0xff]   ;;  %vm20940_vm14 = vsmask.f32 6400 }
 0x461   : > { %6753 = vst [vmem:[#allocation3 + $0x14] sm:$0x8] %v6752_v28  ;;  %v6179_v41 = vpop.f32.mrf.mxu1  ;;  %v20920_v28 = vld [vmem:[#allocation20_spill] sm:$0xff]  ;;  %vm19019_vm6 = vmand %vm20855_vm2, %vm20940_vm14 }
 0x462   : > { %v6233_v11 = vadd.f32 %v18636_v22, %v6179_v41 }
 0x463   : > { %v6643_v48 = vld [vmem:[#allocation3 + $0x8] sm:$0x8]  ;;  %v6678_v14 = vld [vmem:[#allocation3 + $0x14] sm:$0x1]  ;;  %v6181_v50 = vpop.f32.mrf.mxu1 }
 0x464   : > { %v6644_v5 = vsel %vm18873_vm5, %v6631_v20, %v6643_v48  ;;  %v6679_v17 = vsel %vm18810_vm1, %v6671_v43, %v6678_v14  ;;  %v6349_v22 = vadd.f32 %v6233_v11, %v5704_v37  ;;  %v6235_v54 = vadd.f32 %v18641_v62, %v6181_v50  ;;  %v20921_v37 = vld [vmem:[#allocation14_spill] sm:$0xff]  ;;  %vm18962_vm1 = vmand %vm3889_vm11, %vm20848_vm10 }
 0x465   : > { %6645 = vst [vmem:[#allocation3 + $0x8] sm:$0x8] %v6644_v5  ;;  %6680 = vst [vmem:[#allocation3 + $0x14] sm:$0x1] %v6679_v17  ;;  %v6183_v26 = vpop.f32.mrf.mxu1  ;;  %v5600_v43 = vadd.f32 %v18573_v24, %v18849_v13  ;;  %v20915_v13 = vld [vmem:[#allocation12_spill] sm:$0xff]  ;;  %v5714_v48 = vadd.f32 %v5604_v59, %v20921_v37  ;;  %v20922_v17 = vld [vmem:[#allocation21_spill] sm:$0xff] }
 0x466   : > { %v18911_v23 = vadd.f32 %v18891_v25, %v6349_v22  ;;  %v6350_v10 = vadd.f32 %v6235_v54, %v5705_v45  ;;  %v6237_v31 = vadd.f32 %v18646_v29, %v6183_v26  ;;  %vm6533_vm11 = vcmask 1041409   ;;  %vm18985_vm3 = vmor %vm18969_vm0, %vm18962_vm1 }
 0x467   : > { %v6185_v62 = vpop.f32.mrf.mxu1  ;;  %v5711_v42 = vadd.f32 %v5600_v43, %v20915_v13  ;;  %vm20853_vm5 = vcmask 1042434   ;;  %vm18993_vm13 = vmand %vm6533_vm11, %vm20931_vm4  ;;  %vm20934_vm0 = vsmask.f32 5376  ;;  %vm20937_vm4 = vsmask.f32 2304 }
 0x468   : > { %v6390_v16 = vmin.f32 %v18911_v23, 0.0  ;;  %v18919_v12 = vadd.f32 %v18897_v7, %v6350_v10  ;;  %v6352_v33 = vadd.f32 %v6237_v31, %v5707_v15  ;;  %v6239_v60 = vadd.f32 %v20913_v6, %v6185_v62  ;;  %vm19002_vm10 = vmand %vm6536_vm15, %vm20934_vm0 }
 0x469   : > { %v6189_v18 = vpop.f32.mrf.mxu1  ;;  %vm6474_vm0 = vcmp.gt.f32.partialorder %v18911_v23, 0.0  ;;  %vm19038_vm14 = vmand %vm6533_vm11, %vm20854_vm12  ;;  %vm20861_vm11 = vcmask 1047559   ;;  %vm20951_vm12 = vsmask.f32 3328 }
 0x46a   : > { %v6402_v29 = vmul.f32 0.5, %v6390_v16  ;;  %v6426_v8 = vmul.f32 1.442695, %v6390_v16  ;;  %v6391_v24 = vmin.f32 %v18919_v12, 0.0  ;;  %v18927_v35 = vadd.f32 %v18891_v25, %v6352_v33 }
 0x46b   : > { %v6353_v57 = vadd.f32 %v6239_v60, %v5708_v63  ;;  %v6243_v21 = vadd.f32 %v20916_v30, %v6189_v18  ;;  %v6191_v2 = vpop.f32.mrf.mxu1  ;;  %v20923_v63 = vmov 0  ;;  %vm6475_vm7 = vcmp.gt.f32.partialorder %v18919_v12, 0.0 }
 0x46c   : > { %v6428_v19 = vmul.f32 1.442695, %v6391_v24  ;;  %v6245_v1 = vadd.f32 %v20919_v27, %v6191_v2  ;;  %15849 = vpow2.f32 %v6426_v8  ;;  %v6403_v52 = vmul.f32 0.5, %v6391_v24  ;;  %v18949_v26 = vld [vmem:[#allocation3 + $0x8] ss:$12 sps:$4 sm:$0xff]  }
 0x46d   : > { %v6393_v38 = vmin.f32 %v18927_v35, 0.0  ;;  %v18935_v3 = vadd.f32 %v18897_v7, %v6353_v57  ;;  %v6193_v49 = vpop.f32.mrf.mxu1  ;;  %15851 = vtanh.f32 %v6402_v29  ;;  %v6355_v53 = vadd.f32 %v6243_v21, %v5710_v61  ;;  %v15196_v24 = vld [vmem:[%s20827_s5 + $0x308] ss:$12 sps:$4 sm:$0xff]   ;;  %v15201_v27 = vld [vmem:[%s20827_s5 + $0x2f0] ss:$12 sps:$4 sm:$0xff]  }
 0x46e   : > { %v6356_v47 = vadd.f32 %v6245_v1, %v5711_v42  ;;  %v6247_v58 = vadd.f32 %v20920_v28, %v6193_v49  ;;  %15853 = vpow2.f32 %v6428_v19  ;;  %v6945_v33 = vshll.u32 %v18949_v26, 16  ;;  %v15212_v19 = vld [vmem:[%s20827_s5 + $0x200] ss:$12 sps:$4 sm:$0xff]  }
 0x46f   : > { %v6432_v20 = vmul.f32 1.442695, %v6393_v38  ;;  %v6394_v34 = vmin.f32 %v18935_v3, 0.0  ;;  %v6195_v41 = vpop.f32.mrf.mxu1  ;;  %v18941_v11 = vadd.f32 %v18891_v25, %v6355_v53  ;;  %15855 = vtanh.f32 %v6403_v52  ;;  %v15503_v21 = vld [vmem:[%s20829_s7 + $0x60] ss:$8 sps:$4 sm:$0xff]  }
 0x470   : > { %v18944_v5 = vadd.f32 %v18897_v7, %v6356_v47  ;;  %v6358_v14 = vadd.f32 %v6247_v58, %v5713_v46  ;;  %v6405_v50 = vmul.f32 0.5, %v6393_v38  ;;  %v6249_v22 = vadd.f32 %v20922_v17, %v6195_v41  ;;  %v15202_v41 = vld [vmem:[%s20827_s5 + $0x230] ss:$12 sps:$4 sm:$0xff]  }
 0x471   : > { %v6434_v45 = vmul.f32 1.442695, %v6394_v34  ;;  %15857 = vpow2.f32 %v6432_v20  ;;  %v6406_v54 = vmul.f32 0.5, %v6394_v34  ;;  %v6396_v15 = vmin.f32 %v18941_v11, 0.0  ;;  %v6539_v34 = vld [vmem:[#allocation3] sm:$0x22] }
 0x472   : > { %v6397_v36 = vmin.f32 %v18944_v5, 0.0  ;;  %v18952_v32 = vadd.f32 %v18891_v25, %v6358_v14  ;;  %v6359_v10 = vadd.f32 %v6249_v22, %v5714_v48  ;;  %v20924_v63 = vsel %vm18962_vm1, 4294967295, %v20923_v63  ;;  %v15206_v14 = vld [vmem:[%s20827_s5 + $0x2d8] ss:$12 sps:$4 sm:$0xff]   ;;  %v6577_v22 = vld [vmem:[#allocation3] sm:$0x44] }
 0x473   : > { %15859 = vpow2.f32 %v6434_v45  ;;  %v6408_v31 = vmul.f32 0.5, %v6396_v15  ;;  %v6438_v43 = vmul.f32 1.442695, %v6396_v15  ;;  %v6943_v6 = vshrl.u32 %v18949_v26, 16  ;;  %v6523_v45 = vld [vmem:[#allocation3] sm:$0x11] }
 0x474   : > { %15861 = vtanh.f32 %v6405_v50  ;;  %v6440_v62 = vmul.f32 1.442695, %v6397_v36  ;;  %v6399_v56 = vmin.f32 %v18952_v32, 0.0  ;;  %v18956_v40 = vadd.f32 %v18897_v7, %v6359_v10 }
 0x475   : > { %15863 = vtanh.f32 %v6406_v54  ;;  %v6409_v16 = vmul.f32 0.5, %v6397_v36  ;;  %v6947_v60 = vrot.slane %v6945_v33, 1  ;;  %v20932_v46 = vmov 0 }
 0x476   : > { %15865 = vpow2.f32 %v6438_v43  ;;  %v6444_v55 = vmul.f32 1.442695, %v6399_v56  ;;  %v6400_v25 = vmin.f32 %v18956_v40, 0.0  ;;  %v6411_v29 = vmul.f32 0.5, %v6399_v56 }
 0x477   : > { %15867 = vtanh.f32 %v6408_v31  ;;  %v18976_v8 = vor.u32 %v6947_v60, %v6943_v6  ;;  %v20933_v46 = vsel %vm18993_vm13, 4294967295, %v20932_v46  ;;  %v20938_v38 = vmov 0  ;;  %v6707_v31 = vld [vmem:[#allocation3 + $0xc] sm:$0x44] }
 0x478   : > { %15869 = vpow2.f32 %v6440_v62  ;;  %v6446_v18 = vmul.f32 1.442695, %v6400_v25  ;;  %v6412_v57 = vmul.f32 0.5, %v6400_v25 }
 0x479   : > { %v15850_v61 = vpop.eup %15849  ;;  %15871 = vtanh.f32 %v6409_v16  ;;  %13179 = vmatmul.mubr.msk.bf16.vlgmr.msra.gmra.mxu1 %vm20849_vm8, %v18976_v8  ;;  %vm19011_vm8 = vmand %vm20853_vm5, %vm20937_vm4  ;;  %vm20856_vm5 = vsmask.f32 7958  ;;  %v15221_v16 = vld [vmem:[%s20827_s5 + $0x290] ss:$12 sps:$4 sm:$0xff]  }
 0x47a   : > { %v15852_v13 = vpop.eup %15851  ;;  %v6450_v42 = vadd.f32 1.0, %v15850_v61  ;;  %15873 = vpow2.f32 %v6444_v55  ;;  %14161 = vmatpush3.bf16.msra.mxu1 %v15192_v0  ;;  %v20939_v38 = vsel %vm19011_vm8, 4294967295, %v20938_v38  ;;  %vm19029_vm4 = vmor %vm19002_vm10, %vm18993_vm13  ;;  %vm20857_vm10 = vcmask 1043459   ;;  %v15207_v55 = vld [vmem:[%s20827_s5 + $0x218] ss:$12 sps:$4 sm:$0xff]  }
 0x47b   : > { %v15854_v30 = vpop.eup %15853  ;;  %15875 = vpow2.f32 %v6446_v18  ;;  %14162 = vmatprep.subr.bf16.mxu1 %v15196_v24  ;;  %vm19063_vm2 = vmand %vm20857_vm10, %vm20951_vm12  ;;  %vm6478_vm12 = vcmp.gt.f32.partialorder %v18935_v3, 0.0  ;;  %v15211_v18 = vld [vmem:[%s20827_s5 + $0x2c0] ss:$12 sps:$4 sm:$0xff]  }
 0x47c   : > { %v6462_v2 = vmul.f32 %v15852_v13, %v6450_v42  ;;  %v6451_v51 = vadd.f32 1.0, %v15854_v30  ;;  %v15856_v59 = vpop.eup %15855  ;;  %15877 = vtanh.f32 %v6411_v29 }
 0x47d   : > { %15879 = vtanh.f32 %v6412_v57 }
 0x47e   : > { %v15858_v1 = vpop.eup %15857  ;;  %v6463_v52 = vmul.f32 %v15856_v59, %v6451_v51  ;;  %v6486_v28 = vsel %vm6474_vm0, %v18911_v23, %v6462_v2  ;;  %14163 = vmatpush3.bf16.msra.mxu1 %v15197_v39  ;;  %v20945_v23 = vmov 0  ;;  %vm19057_vm0 = vmand %vm6536_vm15, %vm20856_vm5  ;;  %vm6477_vm15 = vcmp.gt.f32.partialorder %v18927_v35, 0.0  ;;  %v6622_v2 = vld [vmem:[#allocation3] sm:$0x88]  ;;  %v6652_v51 = vld [vmem:[#allocation3 + $0xc] sm:$0x11] }
 0x47f   : > { %v6453_v53 = vadd.f32 1.0, %v15858_v1  ;;  %v20946_v23 = vsel %vm19038_vm14, 4294967295, %v20945_v23  ;;  %14164 = vmatprep.subr.bf16.mxu1 %v15201_v27  ;;  %vm20954_vm5 = vsmask.f32 7424  ;;  %v15523_v1 = vld [vmem:[%s20829_s7 + $0x34] ss:$8 sps:$4 sm:$0xff]  }
 0x480   : > { %v15860_v47 = vpop.eup %15859  ;;  %v6487_v58 = vsel %vm6475_vm7, %v18919_v12, %v6463_v52  ;;  %vm19049_vm7 = vmor %vm19019_vm6, %vm19011_vm8  ;;  %vm20957_vm6 = vsmask.f32 7946  ;;  %vm20958_vm8 = vcmask 1042434  }
 0x481   : > { %v15862_v37 = vpop.eup %15861  ;;  %v14023_v48 = vpack.c.bf16 %v6487_v58, %v6486_v28  ;;  %v6454_v12 = vadd.f32 1.0, %v15860_v47  ;;  %vm19078_vm10 = vmand %vm20861_vm11, %vm20954_vm5  ;;  %vm20961_vm5 = vsmask.f32 7962  ;;  %vm20962_vm11 = vcmask 1046534   ;;  %v15216_v47 = vld [vmem:[%s20827_s5 + $0x2a8] ss:$12 sps:$4 sm:$0xff]  }
 0x482   : > { %v15864_v50 = vpop.eup %15863  ;;  %v6465_v54 = vmul.f32 %v15862_v37, %v6453_v53  ;;  %14165 = vmatpush3.bf16.msra.mxu1 %v15202_v41  ;;  %vm19089_vm1 = vmand %vm20958_vm8, %vm20957_vm6 }
 0x483   : > { %v15866_v15 = vpop.eup %15865  ;;  %v6513_v36 = vshll.u32 %v14023_v48, 16  ;;  %v6540_v10 = vsel %vm19029_vm4, %v14023_v48, %v6539_v34  ;;  %v13034_v43 = vrot.slane %v14023_v48, 9  ;;  %v6466_v56 = vmul.f32 %v15864_v50, %v6454_v12  ;;  %14166 = vmatprep.subr.bf16.mxu1 %v15206_v14  ;;  %vm19097_vm13 = vmand %vm20962_vm11, %vm20961_vm5  ;;  %v15521_v50 = vld [vmem:[%s20829_s7 + $0x30] ss:$8 sps:$4 sm:$0xff]  }
 0x484   : > { %v15868_v62 = vpop.eup %15867  ;;  %6541 = vst [vmem:[#allocation3] sm:$0x22] %v6540_v10  ;;  %v6456_v33 = vadd.f32 1.0, %v15866_v15  ;;  %v6489_v61 = vsel %vm6477_vm15, %v18927_v35, %v6465_v54  ;;  %vm6636_vm15 = vsmask.f32 7966  ;;  %vm19105_vm8 = vmor %vm19078_vm10, %vm19063_vm2  ;;  %vm6481_vm2 = vcmp.gt.f32.partialorder %v18944_v5, 0.0 }
 0x485   : > { %v15870_v25 = vpop.eup %15869  ;;  %v6524_v6 = vsel %vm18985_vm3, %v6513_v36, %v6523_v45  ;;  %v6578_v60 = vsel %vm19049_vm7, %v13034_v43, %v6577_v22  ;;  %v6490_v29 = vsel %vm6478_vm12, %v18935_v3, %v6466_v56  ;;  %vm19116_vm11 = vmor %vm19057_vm0, %vm19038_vm14  ;;  %v13032_v58 = vrot.slane %v6513_v36, 9  ;;  %v15515_v3 = vld [vmem:[%s20829_s7 + $0x40] ss:$8 sps:$4 sm:$0xff]  }
 0x486   : > { %v15872_v0 = vpop.eup %15871  ;;  %6525 = vst [vmem:[#allocation3] sm:$0x11] %v6524_v6  ;;  %6579 = vst [vmem:[#allocation3] sm:$0x44] %v6578_v60  ;;  %v6457_v13 = vadd.f32 1.0, %v15870_v25  ;;  %v19093_v57 = vpack.c.bf16 %v6490_v29, %v6489_v61  ;;  %v6468_v35 = vmul.f32 %v15868_v62, %v6456_v33  ;;  %14167 = vmatpush3.bf16.msra.mxu1 %v15207_v55  ;;  %vm6480_vm10 = vcmp.gt.f32.partialorder %v18941_v11, 0.0 }
 0x487   : > { %v15874_v42 = vpop.eup %15873  ;;  %14168 = vmatprep.subr.bf16.mxu1 %v15211_v18  ;;  %vm19133_vm0 = vmor %vm19097_vm13, %vm19089_vm1  ;;  %v15217_v62 = vld [vmem:[%s20827_s5 + $0x1e8] ss:$12 sps:$4 sm:$0xff]   ;;  %vm20972_vm1 = vsmask.f32 7950  ;;  %vm20973_vm13 = vcmask 1043459   ;;  %vm6483_vm12 = vcmp.gt.f32.partialorder %v18952_v32, 0.0 }
 0x488   : > { %v6469_v39 = vmul.f32 %v15872_v0, %v6457_v13  ;;  %v6459_v59 = vadd.f32 1.0, %v15874_v42  ;;  %v15876_v27 = vpop.eup %15875  ;;  %v6591_v52 = vshll.u32 %v19093_v57, 16  ;;  %v6612_v49 = vrot.slane %v19093_v57, 6  ;;  %vm19149_vm6 = vmand %vm20973_vm13, %vm20972_vm1  ;;  %v15222_v0 = vld [vmem:[%s20827_s5 + $0x1d0] ss:$12 sps:$4 sm:$0xff]  }
 0x489   : > { %v13038_v53 = vrot.slane %v19093_v57, 11  ;;  %v15878_v28 = vpop.eup %15877  ;;  %v6460_v41 = vadd.f32 1.0, %v15876_v27  ;;  %v6492_v22 = vsel %vm6480_vm10, %v18941_v11, %v6468_v35  ;;  %vm20976_vm5 = vcmask 1047559   ;;  %v6760_v57 = vld [vmem:[#allocation3 + $0x18] sm:$0x11] }
 0x48a   : > { %v6493_v34 = vsel %vm6481_vm2, %v18944_v5, %v6469_v39  ;;  %v15880_v37 = vpop.eup %15879  ;;  %v6623_v14 = vsel %vm19105_vm8, %v6612_v49, %v6622_v2  ;;  %v6683_v5 = vld [vmem:[#allocation3 + $0xc] sm:$0x22]  ;;  %v6471_v54 = vmul.f32 %v15878_v28, %v6459_v59  ;;  %v6593_v36 = vrot.slane %v6591_v52, 6  ;;  %14169 = vmatpush3.bf16.msra.mxu1 %v15212_v19  ;;  %vm6637_vm2 = vmand %vm20976_vm5, %vm6636_vm15  ;;  %v15227_v19 = vld [vmem:[%s20827_s5 + $0x1b8] ss:$12 sps:$4 sm:$0xff]  }
 0x48b   : > { %v6558_v48 = vld [vmem:[#allocation3] sm:$0x22]  ;;  %v6653_v45 = vsel %vm17792_vm9, %v13038_v53, %v6652_v51  ;;  %6624 = vst [vmem:[#allocation3] sm:$0x88] %v6623_v14  ;;  %v14027_v10 = vpack.c.bf16 %v6493_v34, %v6492_v22  ;;  %v6472_v43 = vmul.f32 %v15880_v37, %v6460_v41  ;;  %14170 = vmatprep.subr.bf16.mxu1 %v15216_v47  ;;  %vm6484_vm10 = vcmp.gt.f32.partialorder %v18956_v40, 0.0  ;;  %vm19173_vm15 = vmor %vm6637_vm2, %vm19149_vm6 }
 0x48c   : > { %v6559_v15 = vsel %vm19116_vm11, %v13032_v58, %v6558_v48  ;;  %6654 = vst [vmem:[#allocation3 + $0xc] sm:$0x11] %v6653_v45  ;;  %v6495_v6 = vsel %vm6483_vm12, %v18952_v32, %v6471_v54  ;;  %v20977_v61 = vmov 0  ;;  %v6738_v32 = vld [vmem:[#allocation3 + $0xc] sm:$0x88]  ;;  %v6630_v24 = vrot.slane %v6591_v52, 7 }
 0x48d   : > { %6560 = vst [vmem:[#allocation3] sm:$0x22] %v6559_v15  ;;  %v6605_v56 = vld [vmem:[#allocation3] sm:$0x44]  ;;  %v6684_v55 = vsel %vm19029_vm4, %v14027_v10, %v6683_v5  ;;  %v13044_v25 = vrot.slane %v14027_v10, 9  ;;  %v6496_v60 = vsel %vm6484_vm10, %v18956_v40, %v6472_v43  ;;  %v20978_v61 = vsel %vm19173_vm15, 4294967295, %v20977_v61 }
 0x48e   : > { %v6606_v33 = vsel %vm19133_vm0, %v6593_v36, %v6605_v56  ;;  %6685 = vst [vmem:[#allocation3 + $0xc] sm:$0x22] %v6684_v55  ;;  %v14029_v18 = vpack.c.bf16 %v6496_v60, %v6495_v6  ;;  %14171 = vmatpush3.bf16.msra.mxu1 %v15217_v62  ;;  %v6668_v29 = vshll.u32 %v14027_v10, 16  ;;  %v15226_v40 = vld [vmem:[%s20827_s5 + $0x278] ss:$12 sps:$4 sm:$0xff]   ;;  %v15943_v34 = vmov 0.0  }
 0x48f   : > { %6607 = vst [vmem:[#allocation3] sm:$0x44] %v6606_v33  ;;  %v6708_v7 = vsel %vm19049_vm7, %v13044_v25, %v6707_v31  ;;  %14172 = vmatprep.subr.bf16.mxu1 %v15221_v16  ;;  %vm20979_vm1 = vsmask.f32 6400  ;;  %vm20864_vm13 = vmmov 0   ;;  %vm20980_vm6 = vcmask 261120  }
 0x490   : > { %6709 = vst [vmem:[#allocation3 + $0xc] sm:$0x44] %v6708_v7  ;;  %v6734_v13 = vrot.slane %v14029_v18, 6  ;;  %v13048_v42 = vrot.slane %v14029_v18, 11  ;;  %v6719_v35 = vshll.u32 %v14029_v18, 16  ;;  %v13042_v27 = vrot.slane %v6668_v29, 9  ;;  %vm20981_vm12 = vmmov %vm20980_vm6 }
 0x491   : > { %vm20982_vm5 = vmmov %vm20980_vm6  ;;  %vm20983_vm2 = vcmask 1046528  }
 0x492   : > { %v6639_v30 = vld [vmem:[#allocation3] sm:$0x88]  ;;  %v6739_v59 = vsel %vm19105_vm8, %v6734_v13, %v6738_v32  ;;  %14173 = vmatpush3.bf16.msra.mxu1 %v15222_v0  ;;  %v6761_v52 = vsel %vm17792_vm9, %v13048_v42, %v6760_v57  ;;  %v6721_v47 = vrot.slane %v6719_v35, 6  ;;  %v6744_v41 = vrot.slane %v6719_v35, 7  ;;  %v15230_v32 = vld [vmem:[%s20827_s5 + $0x198] ss:$12 sps:$4 sm:$0xff]   ;;  %vm20984_vm10 = vmmov %vm20983_vm2 }
 0x493   : > { %v6675_v2 = vld [vmem:[#allocation3 + $0xc] sm:$0x11]  ;;  %v6640_v51 = vsel %vm19173_vm15, %v6630_v24, %v6639_v30  ;;  %6740 = vst [vmem:[#allocation3 + $0xc] sm:$0x88] %v6739_v59  ;;  %14174 = vmatprep.subr.bf16.mxu1 %v15226_v40  ;;  %6762 = vst [vmem:[#allocation3 + $0x18] sm:$0x11] %v6761_v52 }
 0x494   : > { %v6676_v39 = vsel %vm18985_vm3, %v6668_v29, %v6675_v2  ;;  %6641 = vst [vmem:[#allocation3] sm:$0x88] %v6640_v51  ;;  %v15233_v24 = vld [vmem:[%s20827_s5 + $0x350] ss:$12 sps:$4 sm:$0xff]   ;;  %v15234_v2 = vld [vmem:[%s20827_s5 + $0x180] ss:$12 sps:$4 sm:$0xff]  }
 0x495   : > { %6677 = vst [vmem:[#allocation3 + $0xc] sm:$0x11] %v6676_v39  ;;  %v6695_v49 = vld [vmem:[#allocation3 + $0xc] sm:$0x22]  ;;  %v15236_v13 = vld [vmem:[%s20827_s5 + $0x184] ss:$12 sps:$4 sm:$0xff]  }
 0x496   : > { %v6696_v53 = vsel %vm19116_vm11, %v13042_v27, %v6695_v49  ;;  %14175 = vmatpush3.bf16.msra.mxu1 %v15227_v19  ;;  %v15237_v35 = vld [vmem:[%s20827_s5 + $0x338] ss:$12 sps:$4 sm:$0xff]   ;;  %v15241_v39 = vld [vmem:[%s20827_s5 + $0x170] ss:$12 sps:$4 sm:$0xff]   ;;  %v15238_v19 = vld [vmem:[%s20827_s5 + $0xa8] ss:$12 sps:$4 sm:$0xff]  }
 0x497   : > { %6697 = vst [vmem:[#allocation3 + $0xc] sm:$0x22] %v6696_v53  ;;  %v6728_v28 = vld [vmem:[#allocation3 + $0xc] sm:$0x44]  ;;  %14320 = vmatprep.subr.bf16.mxu1 %v15943_v34  ;;  %v19249_v59 = vld [vmem:[#allocation4] sm:$0xff] }
 0x498   : > { %v6729_v58 = vsel %vm19133_vm0, %v6721_v47, %v6728_v28  ;;  %v15240_v51 = vld [vmem:[%s20827_s5 + $0xac] ss:$12 sps:$4 sm:$0xff]   ;;  %v15242_v27 = vld [vmem:[%s20827_s5 + $0xb0] ss:$12 sps:$4 sm:$0xff]   ;;  %v15245_v52 = vld [vmem:[%s20827_s5 + $0x94] ss:$12 sps:$4 sm:$0xff]  }
 0x499   : > { %6730 = vst [vmem:[#allocation3 + $0xc] sm:$0x44] %v6729_v58  ;;  %v15246_v49 = vld [vmem:[%s20827_s5 + $0x158] ss:$12 sps:$4 sm:$0xff]   ;;  %v15243_v53 = vld [vmem:[%s20827_s5 + $0x90] ss:$12 sps:$4 sm:$0xff]  }
 0x49a   : > { %v6748_v37 = vld [vmem:[#allocation3 + $0xc] sm:$0x88]  ;;  %v19198_v14 = vld [vmem:[#allocation3 + $0x18] sm:$0x11] }
 0x49b   : > { %v6749_v48 = vsel %vm19173_vm15, %v6744_v41, %v6748_v37  ;;  %v19202_v45 = vcombine.high %v19198_v14, %v19198_v14  ;;  %v6766_v22 = vld [vmem:[#allocation3] sm:$0xff]  ;;  %v15247_v47 = vld [vmem:[%s20827_s5 + $0x98] ss:$12 sps:$4 sm:$0xff]   ;;  %vm9208_vm15 = vcmask 519171  }
 0x49c   : > { %6750 = vst [vmem:[#allocation3 + $0xc] sm:$0x88] %v6749_v48  ;;  %v19206_v54 = vld [vmem:[#allocation3] sm:$0xee]  ;;  %v15248_v58 = vld [vmem:[%s20827_s5 + $0x78] ss:$12 sps:$4 sm:$0xff]  }
 0x49d   : > { %v8546_v15 = vshrl.u32 %v19202_v45, 16  ;;  %v8549_v36 = vshll.u32 %v19202_v45, 16  ;;  %v15250_v28 = vld [vmem:[%s20827_s5 + $0x7c] ss:$12 sps:$4 sm:$0xff]   ;;  %v15252_v41 = vld [vmem:[%s20827_s5 + $0x80] ss:$12 sps:$4 sm:$0xff]  }
 0x49e   : > { %v15255_v37 = vld [vmem:[%s20827_s5 + $0x64] ss:$12 sps:$4 sm:$0xff]   ;;  %v15256_v48 = vld [vmem:[%s20827_s5 + $0x128] ss:$12 sps:$4 sm:$0xff]  }
 0x49f   : > { %v8548_v33 = vrot.slane %v8546_v15, 1  ;;  %v8551_v55 = vrot.slane %v8549_v36, 2  ;;  %v15257_v15 = vld [vmem:[%s20827_s5 + $0x68] ss:$12 sps:$4 sm:$0xff]   ;;  %v15260_v36 = vld [vmem:[%s20827_s5 + $0x4c] ss:$12 sps:$4 sm:$0xff]  }
 0x4a1   : > { %v8552_v57 = vor.u32 %v8551_v55, %v8548_v33  ;;  %v15263_v33 = vld [vmem:[%s20827_s5 + $0x30] ss:$12 sps:$4 sm:$0xff]   ;;  %v15267_v55 = vld [vmem:[%s20827_s5 + $0x38] ss:$12 sps:$4 sm:$0xff]  }
 0x4a3   : > { %v19204_v5 = vld [vmem:[#allocation3 + $0xc] sm:$0xff] }
 0x4a4   : > { %v19211_v10 = vcombine.low %v6766_v22, %v19204_v5  ;;  %v13123_v31 = vcombine.high %v6766_v22, %v19204_v5  ;;  %v19216_v43 = vcombine.high %v19206_v54, %v19204_v5  ;;  %v15253_v22 = vld [vmem:[%s20827_s5 + $0x60] ss:$12 sps:$4 sm:$0xff]  }
 0x4a6   : > { %v6938_v62 = vshll.u32 %v13123_v31, 16  ;;  %v6931_v56 = vshll.u32 %v19211_v10, 16  ;;  %v8538_v11 = vshrl.u32 %v19216_v43, 16  ;;  %v8541_v16 = vshll.u32 %v19216_v43, 16 }
 0x4a7   : > { %v6936_v25 = vshrl.u32 %v13123_v31, 16  ;;  %v6929_v60 = vshrl.u32 %v19211_v10, 16 }
 0x4a8   : > { %v6940_v6 = vrot.slane %v6938_v62, 1  ;;  %v6933_v7 = vrot.slane %v6931_v56, 1  ;;  %v8540_v18 = vrot.slane %v8538_v11, 1  ;;  %v8543_v0 = vrot.slane %v8541_v16, 2  ;;  %v15258_v62 = vld [vmem:[%s20827_s5 + $0x48] ss:$12 sps:$4 sm:$0xff]  }
 0x4a9   : > { %v15262_v56 = vld [vmem:[%s20827_s5 + $0x50] ss:$12 sps:$4 sm:$0xff]   ;;  %v15265_v11 = vld [vmem:[%s20827_s5 + $0x34] ss:$12 sps:$4 sm:$0xff]   ;;  %v15266_v16 = vld [vmem:[%s20827_s5 + $0xf8] ss:$12 sps:$4 sm:$0xff]  }
 0x4aa   : > { %v6941_v29 = vor.u32 %v6940_v6, %v6936_v25  ;;  %v6934_v40 = vor.u32 %v6933_v7, %v6929_v60  ;;  %v8544_v42 = vor.u32 %v8543_v0, %v8540_v18  ;;  %v15270_v25 = vld [vmem:[%s20827_s5 + $0x1c] ss:$12 sps:$4 sm:$0xff]   ;;  %v15271_v6 = vld [vmem:[%s20827_s5 + $0xe0] ss:$12 sps:$4 sm:$0xff]   ;;  %v15268_v60 = vld [vmem:[%s20827_s5 + $0x18] ss:$12 sps:$4 sm:$0xff]  }
 0x4ab   : > { %v15272_v7 = vld [vmem:[%s20827_s5 + $0x20] ss:$12 sps:$4 sm:$0xff]   ;;  %v15275_v18 = vld [vmem:[%s20827_s5 + $0x4] ss:$12 sps:$4 sm:$0xff]   ;;  %v15276_v0 = vld [vmem:[%s20827_s5 + $0xc8] ss:$12 sps:$4 sm:$0xff]  }
 0x4ac   : > { %7275 = vmatprep.mubr.bf16.mxu0 %v6941_v29  ;;  %7361 = vmatprep.mubr.bf16.mxu1 %v6941_v29  ;;  %v19232_v30 = vsel %vm20979_vm1, %v8544_v42, %v8552_v57  ;;  %v15273_v29 = vld [vmem:[%s20827_s5] ss:$12 sps:$4 sm:$0xff]   ;;  %v15282_v57 = vld [vmem:[%s20827_s5 + $0x150] ss:$12 sps:$4 sm:$0xff]   ;;  %vm20985_vm1 = vmmov %vm20982_vm5 }
 0x4ad   : > { %7276 = vmatmul.mubr.bf16.vlgmr.msra.gmra.mxu0 %v6934_v40  ;;  %7362 = vmatmul.mubr.bf16.vlgmr.msra.gmra.mxu1 %v6934_v40  ;;  %v15280_v40 = vld [vmem:[%s20827_s5 + $0x16c] ss:$12 sps:$4 sm:$0xff]   ;;  %v15284_v42 = vld [vmem:[%s20827_s5 + $0x154] ss:$12 sps:$4 sm:$0xff]  }
 0x4ae   : > { %14321 = vmatpush3.bf16.msra.mxu1 %v15233_v24  ;;  %7759 = vmatpush1.bf16.msra.mxu0 %v15230_v32  ;;  %v15277_v32 = vld [vmem:[%s20827_s5 + $0x8] ss:$12 sps:$4 sm:$0xff]  }
 0x4af   : > { %14322 = vmatprep.subr.bf16.mxu1 %v15943_v34  ;;  %7760 = vmatprep.subr.bf16.mxu0 %v15236_v13  ;;  %v15278_v24 = vld [vmem:[%s20827_s5 + $0x168] ss:$12 sps:$4 sm:$0xff]   ;;  %v15281_v13 = vld [vmem:[%s20827_s5 + $0x1a0] ss:$12 sps:$4 sm:$0xff]  }
 0x4b0   : > { %14324 = vmatprep.mubr.msk.bf16.mxu1 %vm20864_vm13, %v15943_v34  ;;  %7778 = vmatprep.mubr.bf16.mxu0 %v19249_v59 }
 0x4b2   : > { %14323 = vmatpush3.bf16.msra.mxu1 %v15237_v35  ;;  %7761 = vmatpush1.bf16.msra.mxu0 %v15234_v2  ;;  %v15285_v2 = vld [vmem:[%s20827_s5 + $0x188] ss:$12 sps:$4 sm:$0xff]  }
 0x4b3   : > { %7703 = vmatprep.subr.bf16.mxu1 %v15240_v51  ;;  %14185 = vmatprep.subr.bf16.mxu0 %v15241_v39  ;;  %v15288_v35 = vld [vmem:[%s20827_s5 + $0x13c] ss:$12 sps:$4 sm:$0xff]   ;;  %v15291_v51 = vld [vmem:[%s20827_s5 + $0x40c] ss:$12 sps:$4 sm:$0xff]  }
 0x4b4   : > { %v15286_v39 = vld [vmem:[%s20827_s5 + $0x138] ss:$12 sps:$4 sm:$0xff]  }
 0x4b5   : > { %14325 = vmatmul.mubr.msk.bf16.vlgmr.msra.gmra.mxu1 %vm20980_vm6, %v18976_v8  ;;  %13235 = vmatmul.mubr.msk.bf16.vlgmr.msra.gmra.mxu0 %vm20981_vm12, %v18949_v26  ;;  %v15251_v8 = vld [vmem:[%s20827_s5 + $0x140] ss:$12 sps:$4 sm:$0xff]   ;;  %vm20986_vm6 = vmmov %vm20983_vm2  ;;  %vm20987_vm12 = vsmask.f32 6400 }
 0x4b6   : > { %7704 = vmatpush1.bf16.msra.mxu1 %v15238_v19  ;;  %14186 = vmatpush3.bf16.msra.mxu0 %v15242_v27  ;;  %v15289_v19 = vld [vmem:[%s20827_s5 + $0x408] ss:$12 sps:$4 sm:$0xff]   ;;  %v7974_v27 = vrot.slane %v19216_v43, 1  ;;  %v15296_v43 = vld [vmem:[%s20827_s5 + $0x120] ss:$12 sps:$4 sm:$0xff]  }
 0x4b7   : > { %7735 = vmatprep.mubr.bf16.mxu1 %v13123_v31  ;;  %7821 = vmatprep.mubr.bf16.mxu0 %v13123_v31  ;;  %v15261_v31 = vld [vmem:[%s20827_s5 + $0x110] ss:$12 sps:$4 sm:$0xff]  }
 0x4b8   : > { %7705 = vmatprep.subr.bf16.mxu1 %v15245_v52  ;;  %14187 = vmatprep.subr.bf16.mxu0 %v15246_v49  ;;  %v15298_v52 = vld [vmem:[%s20827_s5 + $0x124] ss:$12 sps:$4 sm:$0xff]   ;;  %v7975_v49 = vrot.slane %v19202_v45, 1 }
 0x4b9   : > { %v15299_v45 = vld [vmem:[%s20827_s5 + $0x3f0] ss:$12 sps:$4 sm:$0xff]  }
 0x4ba   : > { %7706 = vmatpush1.bf16.msra.mxu1 %v15243_v53  ;;  %14188 = vmatpush3.bf16.msra.mxu0 %v15247_v47  ;;  %v15301_v53 = vld [vmem:[%s20827_s5 + $0x3f4] ss:$12 sps:$4 sm:$0xff]   ;;  %v19392_v47 = vsel %vm20983_vm2, %v7974_v27, %v7975_v49  ;;  %v15349_v27 = vld [vmem:[%s20827_s5 + $0x3f8] ss:$12 sps:$4 sm:$0xff]   ;;  %vm20989_vm2 = vmmov %vm20985_vm1 }
 0x4bb   : > { %7707 = vmatprep.subr.bf16.mxu1 %v15250_v28  ;;  %14189 = vmatprep.subr.bf16.mxu0 %v15251_v8  ;;  %v15307_v28 = vld [vmem:[%s20827_s5 + $0x3dc] ss:$12 sps:$4 sm:$0xff]   ;;  %v15353_v49 = vld [vmem:[%s20827_s5 + $0x4a0] ss:$12 sps:$4 sm:$0xff]  }
 0x4bc   : > { %v15302_v8 = vld [vmem:[%s20827_s5 + $0x108] ss:$12 sps:$4 sm:$0xff]  }
 0x4be   : > { %7708 = vmatpush1.bf16.msra.mxu1 %v15248_v58  ;;  %14190 = vmatpush3.bf16.msra.mxu0 %v15252_v41  ;;  %v15305_v58 = vld [vmem:[%s20827_s5 + $0x3d8] ss:$12 sps:$4 sm:$0xff]   ;;  %v15310_v41 = vld [vmem:[%s20827_s5 + $0xf4] ss:$12 sps:$4 sm:$0xff]  }
 0x4bf   : > { %7709 = vmatprep.subr.bf16.mxu1 %v15255_v37  ;;  %14191 = vmatprep.subr.bf16.mxu0 %v15256_v48  ;;  %v15313_v37 = vld [vmem:[%s20827_s5 + $0x3c4] ss:$12 sps:$4 sm:$0xff]  }
 0x4c0   : > { %v15308_v48 = vld [vmem:[%s20827_s5 + $0xf0] ss:$12 sps:$4 sm:$0xff]  }
 0x4c2   : > { %7710 = vmatpush1.bf16.msra.mxu1 %v15253_v22  ;;  %14192 = vmatpush3.bf16.msra.mxu0 %v15257_v15  ;;  %v15311_v22 = vld [vmem:[%s20827_s5 + $0x3c0] ss:$12 sps:$4 sm:$0xff]   ;;  %v15316_v15 = vld [vmem:[%s20827_s5 + $0xdc] ss:$12 sps:$4 sm:$0xff]  }
 0x4c3   : > { %7711 = vmatprep.subr.bf16.mxu1 %v15260_v36  ;;  %14193 = vmatprep.subr.bf16.mxu0 %v15261_v31  ;;  %v15319_v36 = vld [vmem:[%s20827_s5 + $0x3ac] ss:$12 sps:$4 sm:$0xff]  }
 0x4c4   : > { %v15314_v31 = vld [vmem:[%s20827_s5 + $0xd8] ss:$12 sps:$4 sm:$0xff]  }
 0x4c6   : > { %7712 = vmatpush1.bf16.msra.mxu1 %v15258_v62  ;;  %14194 = vmatpush3.bf16.msra.mxu0 %v15262_v56  ;;  %v15317_v62 = vld [vmem:[%s20827_s5 + $0x3a8] ss:$12 sps:$4 sm:$0xff]   ;;  %v15322_v56 = vld [vmem:[%s20827_s5 + $0xc4] ss:$12 sps:$4 sm:$0xff]  }
 0x4c7   : > { %7713 = vmatprep.subr.bf16.mxu1 %v15265_v11  ;;  %14195 = vmatprep.subr.bf16.mxu0 %v15266_v16  ;;  %v15325_v11 = vld [vmem:[%s20827_s5 + $0x394] ss:$12 sps:$4 sm:$0xff]  }
 0x4c8   : > { %v15320_v16 = vld [vmem:[%s20827_s5 + $0xc0] ss:$12 sps:$4 sm:$0xff]  }
 0x4ca   : > { %7714 = vmatpush1.bf16.msra.mxu1 %v15263_v33  ;;  %14196 = vmatpush3.bf16.msra.mxu0 %v15267_v55  ;;  %v15323_v33 = vld [vmem:[%s20827_s5 + $0x390] ss:$12 sps:$4 sm:$0xff]  }
 0x4cb   : > { %7715 = vmatprep.subr.bf16.mxu1 %v15270_v25  ;;  %14197 = vmatprep.subr.bf16.mxu0 %v15271_v6  ;;  %v15328_v55 = vld [vmem:[%s20827_s5 + $0x37c] ss:$12 sps:$4 sm:$0xff]   ;;  %v15326_v6 = vld [vmem:[%s20827_s5 + $0x378] ss:$12 sps:$4 sm:$0xff]  }
 0x4cc   : > { %v15331_v25 = vld [vmem:[%s20827_s5 + $0x4fc] ss:$12 sps:$4 sm:$0xff]  }
 0x4ce   : > { %7716 = vmatpush1.bf16.msra.mxu1 %v15268_v60  ;;  %14198 = vmatpush3.bf16.msra.mxu0 %v15272_v7  ;;  %v15329_v60 = vld [vmem:[%s20827_s5 + $0x4f8] ss:$12 sps:$4 sm:$0xff]  }
 0x4cf   : > { %7717 = vmatprep.subr.bf16.mxu1 %v15275_v18  ;;  %14199 = vmatprep.subr.bf16.mxu0 %v15276_v0  ;;  %v15334_v7 = vld [vmem:[%s20827_s5 + $0x364] ss:$12 sps:$4 sm:$0xff]  }
 0x4d0   : > { %v15337_v18 = vld [vmem:[%s20827_s5 + $0x4e4] ss:$12 sps:$4 sm:$0xff]  }
 0x4d1   : > { %v19467_v0 = vld [vmem:[#allocation3 + $0x8] ss:$12 sps:$4 sm:$0xfe]  }
 0x4d2   : > { %7718 = vmatpush1.bf16.msra.mxu1 %v15273_v29  ;;  %14200 = vmatpush3.bf16.msra.mxu0 %v15277_v32  ;;  %v19470_v29 = vld [vmem:[#allocation3 + $0x20] ss:$0 sps:$4 sm:$0x11]   ;;  %v15332_v32 = vld [vmem:[%s20827_s5 + $0x360] ss:$12 sps:$4 sm:$0xff]  }
 0x4d3   : > { %7719 = vmatprep.subr.bf16.mxu1 %v15280_v40  ;;  %14328 = vmatprep.subr.bf16.mxu0 %v15943_v34  ;;  %v15335_v40 = vld [vmem:[%s20827_s5 + $0x4e0] ss:$12 sps:$4 sm:$0xff]  }
 0x4d5   : > { %7822 = vmatmul.mubr.bf16.vlgmr.msra.gmra.mxu0 %v19211_v10 }
 0x4d6   : > { %7720 = vmatpush2.bf16.msra.mxu1 %v15278_v24  ;;  %14329 = vmatpush3.bf16.msra.mxu0 %v15281_v13  ;;  %v15340_v24 = vld [vmem:[%s20827_s5 + $0x4cc] ss:$12 sps:$4 sm:$0xff]   ;;  %v7977_v13 = vrot.slane %v19467_v0, 1 }
 0x4d7   : > { %7721 = vmatprep.subr.bf16.mxu1 %v15284_v42  ;;  %14330 = vmatprep.subr.bf16.mxu0 %v15943_v34  ;;  %v15338_v42 = vld [vmem:[%s20827_s5 + $0x4c8] ss:$12 sps:$4 sm:$0xff]  }
 0x4d8   : > { %14332 = vmatprep.mubr.msk.bf16.mxu0 %vm20864_vm13, %v15943_v34 }
 0x4da   : > { %7722 = vmatpush2.bf16.msra.mxu1 %v15282_v57  ;;  %14331 = vmatpush3.bf16.msra.mxu0 %v15285_v2  ;;  %v7978_v57 = vrot.slane %v19470_v29, 1  ;;  %v15344_v2 = vld [vmem:[%s20827_s5 + $0x410] ss:$12 sps:$4 sm:$0xff]  }
 0x4db   : > { %7723 = vmatprep.subr.bf16.mxu1 %v15288_v35  ;;  %8273 = vmatprep.subr.bf16.mxu0 %v15291_v51  ;;  %v15347_v35 = vld [vmem:[%s20827_s5 + $0x4b4] ss:$12 sps:$4 sm:$0xff]  }
 0x4dc   : > { %v19497_v51 = vsel %vm20984_vm10, %v7977_v13, %v7978_v57  ;;  %vm20990_vm10 = vmmov %vm20987_vm12 }
 0x4dd   : > { %14333 = vmatmul.mubr.msk.bf16.vlgmr.msra.gmra.mxu0 %vm20982_vm5, %v18949_v26  ;;  %v15304_v26 = vld [vmem:[%s20827_s5 + $0x10c] ss:$12 sps:$4 sm:$0xff]   ;;  %vm20988_vm5 = vmmov %vm20985_vm1 }
 0x4de   : > { %7724 = vmatpush2.bf16.msra.mxu1 %v15286_v39  ;;  %8274 = vmatpush1.bf16.msra.mxu0 %v15289_v19  ;;  %v15348_v39 = vld [vmem:[%s20827_s5 + $0x4b8] ss:$12 sps:$4 sm:$0xff]   ;;  %v15345_v19 = vld [vmem:[%s20827_s5 + $0x4b0] ss:$12 sps:$4 sm:$0xff]  }
 0x4df   : > { %8305 = vmatprep.mubr.bf16.mxu0 %v19392_v47  ;;  %7725 = vmatprep.subr.bf16.mxu1 %v15298_v52  ;;  %v15352_v52 = vld [vmem:[%s20827_s5 + $0x49c] ss:$12 sps:$4 sm:$0xff]  }
 0x4e0   : > { %8275 = vmatprep.subr.bf16.mxu0 %v15301_v53  ;;  %v15350_v53 = vld [vmem:[%s20827_s5 + $0x498] ss:$12 sps:$4 sm:$0xff]  }
 0x4e2   : > { %7726 = vmatpush2.bf16.msra.mxu1 %v15296_v43  ;;  %8276 = vmatpush1.bf16.msra.mxu0 %v15299_v45  ;;  %v15357_v43 = vld [vmem:[%s20827_s5 + $0x484] ss:$12 sps:$4 sm:$0xff]   ;;  %v15358_v45 = vld [vmem:[%s20827_s5 + $0x488] ss:$12 sps:$4 sm:$0xff]  }
 0x4e3   : > { %7727 = vmatprep.subr.bf16.mxu1 %v15304_v26  ;;  %8277 = vmatprep.subr.bf16.mxu0 %v15307_v28  ;;  %v15355_v26 = vld [vmem:[%s20827_s5 + $0x480] ss:$12 sps:$4 sm:$0xff]   ;;  %v15359_v28 = vld [vmem:[%s20827_s5 + $0x3c8] ss:$12 sps:$4 sm:$0xff]  }
 0x4e6   : > { %7728 = vmatpush2.bf16.msra.mxu1 %v15302_v8  ;;  %8278 = vmatpush1.bf16.msra.mxu0 %v15305_v58  ;;  %v15362_v8 = vld [vmem:[%s20827_s5 + $0x46c] ss:$12 sps:$4 sm:$0xff]   ;;  %v15363_v58 = vld [vmem:[%s20827_s5 + $0x470] ss:$12 sps:$4 sm:$0xff]  }
 0x4e7   : > { %7729 = vmatprep.subr.bf16.mxu1 %v15310_v41  ;;  %8279 = vmatprep.subr.bf16.mxu0 %v15313_v37  ;;  %v15360_v41 = vld [vmem:[%s20827_s5 + $0x468] ss:$12 sps:$4 sm:$0xff]   ;;  %v15364_v37 = vld [vmem:[%s20827_s5 + $0x3b0] ss:$12 sps:$4 sm:$0xff]  }
 0x4ea   : > { %7730 = vmatpush2.bf16.msra.mxu1 %v15308_v48  ;;  %8280 = vmatpush1.bf16.msra.mxu0 %v15311_v22  ;;  %v15367_v48 = vld [vmem:[%s20827_s5 + $0x454] ss:$12 sps:$4 sm:$0xff]   ;;  %v15368_v22 = vld [vmem:[%s20827_s5 + $0x458] ss:$12 sps:$4 sm:$0xff]  }
 0x4eb   : > { %7731 = vmatprep.subr.bf16.mxu1 %v15316_v15  ;;  %8281 = vmatprep.subr.bf16.mxu0 %v15319_v36  ;;  %v15365_v15 = vld [vmem:[%s20827_s5 + $0x450] ss:$12 sps:$4 sm:$0xff]   ;;  %v15369_v36 = vld [vmem:[%s20827_s5 + $0x398] ss:$12 sps:$4 sm:$0xff]  }
 0x4ee   : > { %7732 = vmatpush2.bf16.msra.mxu1 %v15314_v31  ;;  %8282 = vmatpush1.bf16.msra.mxu0 %v15317_v62  ;;  %v15372_v31 = vld [vmem:[%s20827_s5 + $0x43c] ss:$12 sps:$4 sm:$0xff]   ;;  %v15373_v62 = vld [vmem:[%s20827_s5 + $0x440] ss:$12 sps:$4 sm:$0xff]  }
 0x4ef   : > { %7733 = vmatprep.subr.bf16.mxu1 %v15322_v56  ;;  %8283 = vmatprep.subr.bf16.mxu0 %v15325_v11  ;;  %v15370_v56 = vld [vmem:[%s20827_s5 + $0x438] ss:$12 sps:$4 sm:$0xff]   ;;  %v15374_v11 = vld [vmem:[%s20827_s5 + $0x380] ss:$12 sps:$4 sm:$0xff]  }
 0x4f2   : > { %7734 = vmatpush2.bf16.msra.mxu1 %v15320_v16  ;;  %8284 = vmatpush1.bf16.msra.mxu0 %v15323_v33  ;;  %v15377_v16 = vld [vmem:[%s20827_s5 + $0x424] ss:$12 sps:$4 sm:$0xff]   ;;  %v15378_v33 = vld [vmem:[%s20827_s5 + $0x428] ss:$12 sps:$4 sm:$0xff]  }
 0x4f3   : > { %8285 = vmatprep.subr.bf16.mxu0 %v15328_v55  ;;  %8328 = vmatprep.subr.bf16.mxu1 %v15331_v25  ;;  %v19579_v55 = vcombine.low %v19206_v54, %v19204_v5  ;;  %v19583_v25 = vcombine.low %v19198_v14, %v19198_v14  ;;  %v15382_v5 = vld [vmem:[%s20827_s5 + $0x6ac] ss:$12 sps:$4 sm:$0xff]   ;;  %v8555_v14 = vshrl.u32 %v19467_v0, 16 }
 0x4f5   : > { %7736 = vmatmul.mubr.bf16.vlgmr.msra.gmra.mxu1 %v19211_v10  ;;  %v15343_v10 = vld [vmem:[%s20827_s5 + $0x4d0] ss:$12 sps:$4 sm:$0xff]   ;;  %v7971_v54 = vrot.slane %v19579_v55, 1 }
 0x4f6   : > { %8286 = vmatpush1.bf16.msra.mxu0 %v15326_v6  ;;  %8329 = vmatpush1.bf16.msra.mxu1 %v15329_v60  ;;  %v15375_v6 = vld [vmem:[%s20827_s5 + $0x420] ss:$12 sps:$4 sm:$0xff]   ;;  %v15379_v60 = vld [vmem:[%s20827_s5 + $0x368] ss:$12 sps:$4 sm:$0xff]  }
 0x4f7   : > { %8287 = vmatprep.subr.bf16.mxu0 %v15334_v7  ;;  %8330 = vmatprep.subr.bf16.mxu1 %v15337_v18  ;;  %v8558_v7 = vshll.u32 %v19467_v0, 16  ;;  %v8563_v18 = vshrl.u32 %v19470_v29, 16  ;;  %v15386_v0 = vld [vmem:[%s20827_s5 + $0x694] ss:$12 sps:$4 sm:$0xff]  }
 0x4f8   : > { %8348 = vmatprep.mubr.bf16.mxu1 %v19249_v59 }
 0x4f9   : > { %v8560_v57 = vrot.slane %v8558_v7, 2  ;;  %v15418_v7 = vld [vmem:[%s20827_s5 + $0x528] ss:$12 sps:$4 sm:$0xff]  }
 0x4fa   : > { %8288 = vmatpush1.bf16.msra.mxu0 %v15332_v32  ;;  %8331 = vmatpush1.bf16.msra.mxu1 %v15335_v40  ;;  %v7972_v32 = vrot.slane %v19583_v25, 1  ;;  %v15380_v40 = vld [vmem:[%s20827_s5 + $0x6a8] ss:$12 sps:$4 sm:$0xff]  }
 0x4fb   : > { %8289 = vmatprep.subr.bf16.mxu0 %v15340_v24  ;;  %14210 = vmatprep.subr.bf16.mxu1 %v15343_v10  ;;  %v15383_v24 = vld [vmem:[%s20827_s5 + $0x500] ss:$12 sps:$4 sm:$0xff]   ;;  %v8566_v10 = vshll.u32 %v19470_v29, 16  ;;  %v15387_v29 = vld [vmem:[%s20827_s5 + $0x4e8] ss:$12 sps:$4 sm:$0xff]  }
 0x4fc   : > { %v7973_v13 = vsel %vm20986_vm6, %v7971_v54, %v7972_v32  ;;  %v8521_v54 = vshrl.u32 %v19579_v55, 16  ;;  %v15425_v32 = vld [vmem:[%s20827_s5 + $0x514] ss:$12 sps:$4 sm:$0xff]   ;;  %vm461_vm6 = vcmask 519168  }
 0x4fd   : > { %13369 = vmatmul.mubr.msk.bf16.vlgmr.msra.gmra.mxu1 %vm20985_vm1, %v19497_v51  ;;  %462 = vst.msk [vmem:[#allocation4 + $0x8] sm:$0xf] %vm461_vm6, %v19249_v59 }
 0x4fe   : > { %8290 = vmatpush2.bf16.msra.mxu0 %v15338_v42  ;;  %14211 = vmatpush3.bf16.msra.mxu1 %v15344_v2  ;;  %v8557_v42 = vrot.slane %v8555_v14, 1  ;;  %v15384_v2 = vld [vmem:[%s20827_s5 + $0x690] ss:$12 sps:$4 sm:$0xff]   ;;  %v8524_v14 = vshll.u32 %v19579_v55, 16  ;;  %v15426_v55 = vld [vmem:[%s20827_s5 + $0x5d8] ss:$12 sps:$4 sm:$0xff]  }
 0x4ff   : > { %8391 = vmatprep.mubr.bf16.mxu1 %v19392_v47  ;;  %8291 = vmatprep.subr.bf16.mxu0 %v15347_v35  ;;  %v15354_v47 = vld [vmem:[%s20827_s5 + $0x3e0] ss:$12 sps:$4 sm:$0xff]   ;;  %v8565_v35 = vrot.slane %v8563_v18, 1  ;;  %v15422_v18 = vld [vmem:[%s20827_s5 + $0x530] ss:$12 sps:$4 sm:$0xff]  }
 0x500   : > { %14212 = vmatprep.subr.bf16.mxu1 %v15348_v39  ;;  %v8568_v39 = vrot.slane %v8566_v10, 2  ;;  %v8523_v10 = vrot.slane %v8521_v54, 1 }
 0x502   : > { %8292 = vmatpush2.bf16.msra.mxu0 %v15345_v19  ;;  %14213 = vmatpush3.bf16.msra.mxu1 %v15349_v27  ;;  %v15390_v19 = vld [vmem:[%s20827_s5 + $0x5bc] ss:$12 sps:$4 sm:$0xff]   ;;  %v15391_v27 = vld [vmem:[%s20827_s5 + $0x680] ss:$12 sps:$4 sm:$0xff]  }
 0x503   : > { %8293 = vmatprep.subr.bf16.mxu0 %v15352_v52  ;;  %14214 = vmatprep.subr.bf16.mxu1 %v15353_v49  ;;  %v8561_v52 = vor.u32 %v8560_v57, %v8557_v42  ;;  %v15388_v49 = vld [vmem:[%s20827_s5 + $0x5b8] ss:$12 sps:$4 sm:$0xff]  }
 0x504   : > { %v15427_v42 = vld [vmem:[%s20827_s5 + $0x518] ss:$12 sps:$4 sm:$0xff]  }
 0x506   : > { %8294 = vmatpush2.bf16.msra.mxu0 %v15350_v53  ;;  %14215 = vmatpush3.bf16.msra.mxu1 %v15354_v47  ;;  %v8569_v53 = vor.u32 %v8568_v39, %v8565_v35  ;;  %v15392_v47 = vld [vmem:[%s20827_s5 + $0x5c0] ss:$12 sps:$4 sm:$0xff]   ;;  %v15428_v35 = vld [vmem:[%s20827_s5 + $0x678] ss:$12 sps:$4 sm:$0xff]  }
 0x507   : > { %8295 = vmatprep.subr.bf16.mxu0 %v15357_v43  ;;  %14216 = vmatprep.subr.bf16.mxu1 %v15358_v45  ;;  %v15395_v45 = vld [vmem:[%s20827_s5 + $0x5a4] ss:$12 sps:$4 sm:$0xff]  }
 0x508   : > { %v19634_v43 = vsel %vm20987_vm12, %v8561_v52, %v8569_v53  ;;  %v15435_v53 = vld [vmem:[%s20827_s5 + $0x698] ss:$12 sps:$4 sm:$0xff]   ;;  %vm464_vm12 = vcmask 516096  }
 0x509   : > { %465 = vst.msk [vmem:[#allocation4 + $0x14] sm:$0x1] %vm464_vm12, %v19249_v59 }
 0x50a   : > { %8296 = vmatpush2.bf16.msra.mxu0 %v15355_v26  ;;  %14217 = vmatpush3.bf16.msra.mxu1 %v15359_v28  ;;  %v15396_v26 = vld [vmem:[%s20827_s5 + $0x668] ss:$12 sps:$4 sm:$0xff]   ;;  %v15393_v28 = vld [vmem:[%s20827_s5 + $0x5a0] ss:$12 sps:$4 sm:$0xff]  }
 0x50b   : > { %8297 = vmatprep.subr.bf16.mxu0 %v15362_v8  ;;  %14218 = vmatprep.subr.bf16.mxu1 %v15363_v58  ;;  %v15397_v8 = vld [vmem:[%s20827_s5 + $0x5a8] ss:$12 sps:$4 sm:$0xff]   ;;  %v15401_v58 = vld [vmem:[%s20827_s5 + $0x650] ss:$12 sps:$4 sm:$0xff]  }
 0x50e   : > { %8298 = vmatpush2.bf16.msra.mxu0 %v15360_v41  ;;  %14219 = vmatpush3.bf16.msra.mxu1 %v15364_v37  ;;  %v15398_v41 = vld [vmem:[%s20827_s5 + $0x588] ss:$12 sps:$4 sm:$0xff]  }
 0x50f   : > { %8299 = vmatprep.subr.bf16.mxu0 %v15367_v48  ;;  %14220 = vmatprep.subr.bf16.mxu1 %v15368_v22  ;;  %v15405_v37 = vld [vmem:[%s20827_s5 + $0x574] ss:$12 sps:$4 sm:$0xff]   ;;  %v15406_v48 = vld [vmem:[%s20827_s5 + $0x638] ss:$12 sps:$4 sm:$0xff]   ;;  %v15403_v22 = vld [vmem:[%s20827_s5 + $0x570] ss:$12 sps:$4 sm:$0xff]  }
 0x512   : > { %8300 = vmatpush2.bf16.msra.mxu0 %v15365_v15  ;;  %14221 = vmatpush3.bf16.msra.mxu1 %v15369_v36  ;;  %v15407_v15 = vld [vmem:[%s20827_s5 + $0x578] ss:$12 sps:$4 sm:$0xff]   ;;  %v15410_v36 = vld [vmem:[%s20827_s5 + $0x55c] ss:$12 sps:$4 sm:$0xff]  }
 0x513   : > { %8301 = vmatprep.subr.bf16.mxu0 %v15372_v31  ;;  %14222 = vmatprep.subr.bf16.mxu1 %v15373_v62  ;;  %v15411_v31 = vld [vmem:[%s20827_s5 + $0x620] ss:$12 sps:$4 sm:$0xff]   ;;  %v15408_v62 = vld [vmem:[%s20827_s5 + $0x558] ss:$12 sps:$4 sm:$0xff]  }
 0x516   : > { %8302 = vmatpush2.bf16.msra.mxu0 %v15370_v56  ;;  %14223 = vmatpush3.bf16.msra.mxu1 %v15374_v11  ;;  %v15412_v56 = vld [vmem:[%s20827_s5 + $0x560] ss:$12 sps:$4 sm:$0xff]   ;;  %v15415_v11 = vld [vmem:[%s20827_s5 + $0x544] ss:$12 sps:$4 sm:$0xff]  }
 0x517   : > { %8303 = vmatprep.subr.bf16.mxu0 %v15377_v16  ;;  %14224 = vmatprep.subr.bf16.mxu1 %v15378_v33  ;;  %v15416_v16 = vld [vmem:[%s20827_s5 + $0x608] ss:$12 sps:$4 sm:$0xff]   ;;  %v15413_v33 = vld [vmem:[%s20827_s5 + $0x540] ss:$12 sps:$4 sm:$0xff]  }
 0x51a   : > { %8304 = vmatpush2.bf16.msra.mxu0 %v15375_v6  ;;  %14225 = vmatpush3.bf16.msra.mxu1 %v15379_v60  ;;  %v15417_v6 = vld [vmem:[%s20827_s5 + $0x548] ss:$12 sps:$4 sm:$0xff]   ;;  %v15420_v60 = vld [vmem:[%s20827_s5 + $0x52c] ss:$12 sps:$4 sm:$0xff]  }
 0x51b   : > { %14336 = vmatprep.subr.bf16.mxu1 %v15943_v34  ;;  %8919 = vmatprep.subr.bf16.mxu0 %v15382_v5  ;;  %v15421_v5 = vld [vmem:[%s20827_s5 + $0x5f0] ss:$12 sps:$4 sm:$0xff]  }
 0x51d   : > { %8306 = vmatmul.mubr.bf16.vlgmr.msra.gmra.mxu0 %v7973_v13  ;;  %8392 = vmatmul.mubr.bf16.vlgmr.msra.gmra.mxu1 %v7973_v13  ;;  %v15423_v13 = vld [vmem:[%s20827_s5 + $0x510] ss:$12 sps:$4 sm:$0xff]  }
 0x51e   : > { %14337 = vmatpush3.bf16.msra.mxu1 %v15383_v24  ;;  %8920 = vmatpush1.bf16.msra.mxu0 %v15380_v40  ;;  %v8529_v40 = vshrl.u32 %v19583_v25, 16  ;;  %v8532_v24 = vshll.u32 %v19583_v25, 16  ;;  %v15430_v25 = vld [vmem:[%s20827_s5 + $0x67c] ss:$12 sps:$4 sm:$0xff]  }
 0x51f   : > { %14338 = vmatprep.subr.bf16.mxu1 %v15943_v34  ;;  %8921 = vmatprep.subr.bf16.mxu0 %v15386_v0  ;;  %v8526_v0 = vrot.slane %v8524_v14, 2 }
 0x520   : > { %14340 = vmatprep.mubr.msk.bf16.mxu1 %vm20864_vm13, %v15943_v34  ;;  %8939 = vmatprep.mubr.bf16.mxu0 %v19249_v59  ;;  %v8531_v57 = vrot.slane %v8529_v40, 1 }
 0x522   : > { %14339 = vmatpush3.bf16.msra.mxu1 %v15387_v29  ;;  %8922 = vmatpush1.bf16.msra.mxu0 %v15384_v2  ;;  %v8534_v2 = vrot.slane %v8532_v24, 2  ;;  %v8527_v29 = vor.u32 %v8526_v0, %v8523_v10 }
 0x523   : > { %8864 = vmatprep.subr.bf16.mxu1 %v15390_v19  ;;  %14235 = vmatprep.subr.bf16.mxu0 %v15391_v27  ;;  %v15431_v19 = vld [vmem:[%s20827_s5 + $0x6b0] ss:$12 sps:$4 sm:$0xff]  }
 0x524   : > { %v8535_v39 = vor.u32 %v8534_v2, %v8531_v57  ;;  %v15434_v27 = vld [vmem:[%s20827_s5 + $0x664] ss:$12 sps:$4 sm:$0xff]  }
 0x525   : > { %14341 = vmatmul.mubr.msk.bf16.vlgmr.msra.gmra.mxu1 %vm20988_vm5, %v19497_v51  ;;  %13497 = vmatmul.mubr.msk.bf16.vlgmr.msra.gmra.mxu0 %vm20989_vm2, %v19634_v43  ;;  %v15400_v51 = vld [vmem:[%s20827_s5 + $0x58c] ss:$12 sps:$4 sm:$0xff]   ;;  %vm20867_vm5 = vcmask 517121  }
 0x526   : > { %8865 = vmatpush1.bf16.msra.mxu1 %v15388_v49  ;;  %8896 = vmatprep.mubr.bf16.mxu1 %v19232_v30  ;;  %v8536_v52 = vsel %vm20990_vm10, %v8527_v29, %v8535_v39  ;;  %v15432_v49 = vld [vmem:[%s20827_s5 + $0x660] ss:$12 sps:$4 sm:$0xff]   ;;  %vm9174_vm10 = vcmask 518146  }
 0x527   : > { %14236 = vmatpush3.bf16.msra.mxu0 %v15392_v47  ;;  %8982 = vmatprep.mubr.bf16.mxu0 %v19232_v30  ;;  %v15402_v30 = vld [vmem:[%s20827_s5 + $0x590] ss:$12 sps:$4 sm:$0xff]   ;;  %v15438_v47 = vld [vmem:[%s20827_s5 + $0x64c] ss:$12 sps:$4 sm:$0xff]  }
 0x528   : > { %8866 = vmatprep.subr.bf16.mxu1 %v15395_v45  ;;  %14237 = vmatprep.subr.bf16.mxu0 %v15396_v26  ;;  %v15436_v45 = vld [vmem:[%s20827_s5 + $0x648] ss:$12 sps:$4 sm:$0xff]  }
 0x529   : > { %v15441_v26 = vld [vmem:[%s20827_s5 + $0x634] ss:$12 sps:$4 sm:$0xff]  }
 0x52a   : > { %8867 = vmatpush1.bf16.msra.mxu1 %v15393_v28  ;;  %v15439_v28 = vld [vmem:[%s20827_s5 + $0x630] ss:$12 sps:$4 sm:$0xff]  }
 0x52b   : > { %14238 = vmatpush3.bf16.msra.mxu0 %v15397_v8  ;;  %8868 = vmatprep.subr.bf16.mxu1 %v15400_v51  ;;  %v15444_v8 = vld [vmem:[%s20827_s5 + $0x61c] ss:$12 sps:$4 sm:$0xff]   ;;  %v15442_v51 = vld [vmem:[%s20827_s5 + $0x618] ss:$12 sps:$4 sm:$0xff]  }
 0x52c   : > { %14239 = vmatprep.subr.bf16.mxu0 %v15401_v58  ;;  %v15445_v58 = vld [vmem:[%s20827_s5 + $0x600] ss:$12 sps:$4 sm:$0xff]  }
 0x52e   : > { %8869 = vmatpush1.bf16.msra.mxu1 %v15398_v41  ;;  %v15450_v41 = vld [vmem:[%s20827_s5 + $0x5ec] ss:$12 sps:$4 sm:$0xff]  }
 0x52f   : > { %14240 = vmatpush3.bf16.msra.mxu0 %v15402_v30  ;;  %8870 = vmatprep.subr.bf16.mxu1 %v15405_v37  ;;  %v15448_v30 = vld [vmem:[%s20827_s5 + $0x5e8] ss:$12 sps:$4 sm:$0xff]  }
 0x530   : > { %14241 = vmatprep.subr.bf16.mxu0 %v15406_v48  ;;  %v15453_v37 = vld [vmem:[%s20827_s5 + $0x5d4] ss:$12 sps:$4 sm:$0xff]   ;;  %v15451_v48 = vld [vmem:[%s20827_s5 + $0x5d0] ss:$12 sps:$4 sm:$0xff]  }
 0x532   : > { %8871 = vmatpush1.bf16.msra.mxu1 %v15403_v22 }
 0x533   : > { %14242 = vmatpush3.bf16.msra.mxu0 %v15407_v15  ;;  %8872 = vmatprep.subr.bf16.mxu1 %v15410_v36 }
 0x534   : > { %14243 = vmatprep.subr.bf16.mxu0 %v15411_v31 }
 0x536   : > { %8873 = vmatpush1.bf16.msra.mxu1 %v15408_v62 }
 0x537   : > { %14244 = vmatpush3.bf16.msra.mxu0 %v15412_v56  ;;  %8874 = vmatprep.subr.bf16.mxu1 %v15415_v11 }
 0x538   : > { %14245 = vmatprep.subr.bf16.mxu0 %v15416_v16 }
 0x539   : > { %v7320_v22 = vpop.f32.mrf.mxu1 }
 0x53a   : > { %8875 = vmatpush1.bf16.msra.mxu1 %v15413_v33 }
 0x53b   : > { %14246 = vmatpush3.bf16.msra.mxu0 %v15417_v6  ;;  %8876 = vmatprep.subr.bf16.mxu1 %v15420_v60  ;;  %v7322_v15 = vpop.f32.mrf.mxu1 }
 0x53c   : > { %14247 = vmatprep.subr.bf16.mxu0 %v15421_v5 }
 0x53d   : > { %v7324_v36 = vpop.f32.mrf.mxu1 }
 0x53e   : > { %8877 = vmatpush1.bf16.msra.mxu1 %v15418_v7 }
 0x53f   : > { %14248 = vmatpush3.bf16.msra.mxu0 %v15422_v18  ;;  %8878 = vmatprep.subr.bf16.mxu1 %v15425_v32  ;;  %v7326_v31 = vpop.f32.mrf.mxu1 }
 0x540   : > { %14249 = vmatprep.subr.bf16.mxu0 %v15426_v55 }
 0x542   : > { %8879 = vmatpush1.bf16.msra.mxu1 %v15423_v13 }
 0x543   : > { %14250 = vmatpush3.bf16.msra.mxu0 %v15427_v42  ;;  %8880 = vmatprep.subr.bf16.mxu1 %v15430_v25 }
 0x544   : > { %14344 = vmatprep.subr.bf16.mxu0 %v15943_v34 }
 0x546   : > { %8983 = vmatmul.mubr.bf16.vlgmr.msra.gmra.mxu0 %v8536_v52  ;;  %8881 = vmatpush2.bf16.msra.mxu1 %v15428_v35 }
 0x547   : > { %14345 = vmatpush3.bf16.msra.mxu0 %v15431_v19  ;;  %8882 = vmatprep.subr.bf16.mxu1 %v15434_v27 }
 0x548   : > { %14346 = vmatprep.subr.bf16.mxu0 %v15943_v34  ;;  %14348 = vmatprep.mubr.msk.bf16.mxu0 %vm20864_vm13, %v15943_v34  ;;  %vm20994_vm13 = vsmask.f32 7938 }
 0x549   : > { %vm19977_vm14 = vmand %vm464_vm12, %vm20994_vm13  ;;  %vm20998_vm13 = vsmask.f32 3328 }
 0x54a   : > { %8883 = vmatpush2.bf16.msra.mxu1 %v15432_v49 }
 0x54b   : > { %14347 = vmatpush3.bf16.msra.mxu0 %v15435_v53  ;;  %8884 = vmatprep.subr.bf16.mxu1 %v15438_v47 }
 0x54e   : > { %14349 = vmatmul.mubr.msk.bf16.vlgmr.msra.gmra.mxu0 %vm20985_vm1, %v19634_v43  ;;  %8885 = vmatpush2.bf16.msra.mxu1 %v15436_v45  ;;  %v15447_v43 = vld [vmem:[%s20827_s5 + $0x604] ss:$12 sps:$4 sm:$0xff]   ;;  %vm20991_vm1 = vsmask.f32 1280 }
 0x54f   : > { %8886 = vmatprep.subr.bf16.mxu1 %v15441_v26  ;;  %vm19970_vm6 = vmand %vm20867_vm5, %vm20991_vm1 }
 0x552   : > { %8887 = vmatpush2.bf16.msra.mxu1 %v15439_v28 }
 0x553   : > { %8888 = vmatprep.subr.bf16.mxu1 %v15444_v8 }
 0x556   : > { %8889 = vmatpush2.bf16.msra.mxu1 %v15442_v51 }
 0x557   : > { %8890 = vmatprep.subr.bf16.mxu1 %v15447_v43 }
 0x55a   : > { %8891 = vmatpush2.bf16.msra.mxu1 %v15445_v58  ;;  %v15456_v58 = vld [vmem:[%s20829_s7 + $0x1b4] ss:$8 sps:$4 sm:$0xff]  }
 0x55b   : > { %8892 = vmatprep.subr.bf16.mxu1 %v15450_v41  ;;  %v15454_v41 = vld [vmem:[%s20829_s7 + $0x1b0] ss:$8 sps:$4 sm:$0xff]   ;;  %9555 = vmatprep.subr.bf16.mxu0 %v15456_v58  ;;  %v15502_v58 = vld [vmem:[%s20829_s7 + $0x214] ss:$8 sps:$4 sm:$0xff]  }
 0x55c   : > { %9556 = vmatpush1.bf16.msra.mxu0 %v15454_v41  ;;  %v15500_v41 = vld [vmem:[%s20829_s7 + $0x210] ss:$8 sps:$4 sm:$0xff]  }
 0x55e   : > { %8893 = vmatpush2.bf16.msra.mxu1 %v15448_v30 }
 0x55f   : > { %8894 = vmatprep.subr.bf16.mxu1 %v15453_v37 }
 0x562   : > { %8895 = vmatpush2.bf16.msra.mxu1 %v15451_v48 }
 0x565   : > { %8897 = vmatmul.mubr.bf16.vlgmr.msra.gmra.mxu1 %v8536_v52 }
 0x566   : > { %9628 = vmatprep.mubr.bf16.mxu1 %v19249_v59 }
 0x56d   : > { %v7277_v62 = vpop.f32.mrf.mxu0  ;;  %v14176_v56 = vpop.f32.mrf.mxu1 }
 0x56e   : > { %v7321_v11 = vadd.f32 %v7320_v22, %v7277_v62  ;;  %v15459_v22 = vld [vmem:[%s20829_s7 + $0x1a4] ss:$8 sps:$4 sm:$0xff]  }
 0x56f   : > { %v7279_v16 = vpop.f32.mrf.mxu0  ;;  %v14177_v33 = vpop.f32.mrf.mxu1  ;;  %9557 = vmatprep.subr.bf16.mxu0 %v15459_v22 }
 0x570   : > { %v7323_v6 = vadd.f32 %v7322_v15, %v7279_v16  ;;  %v14178_v60 = vadd.f32 %v14177_v33, %v14176_v56  ;;  %v15460_v33 = vld [vmem:[%s20829_s7 + $0x190] ss:$8 sps:$4 sm:$0xff]  }
 0x571   : > { %v7281_v5 = vpop.f32.mrf.mxu0  ;;  %v14179_v54 = vpop.f32.mrf.mxu1 }
 0x572   : > { %v7325_v14 = vadd.f32 %v7324_v36, %v7281_v5  ;;  %v15457_v36 = vld [vmem:[%s20829_s7 + $0x1a0] ss:$8 sps:$4 sm:$0xff]  }
 0x573   : > { %v7283_v7 = vpop.f32.mrf.mxu0  ;;  %v14180_v18 = vpop.f32.mrf.mxu1  ;;  %9558 = vmatpush1.bf16.msra.mxu0 %v15457_v36  ;;  %v15463_v5 = vld [vmem:[%s20829_s7 + $0x180] ss:$8 sps:$4 sm:$0xff]  }
 0x574   : > { %v7327_v32 = vadd.f32 %v7326_v31, %v7283_v7  ;;  %v14181_v40 = vadd.f32 %v14180_v18, %v14179_v54  ;;  %v15468_v54 = vld [vmem:[%s20829_s7 + $0x174] ss:$8 sps:$4 sm:$0xff]   ;;  %v15471_v7 = vld [vmem:[%s20829_s7 + $0x164] ss:$8 sps:$4 sm:$0xff]  }
 0x575   : > { %v7404_v24 = vpop.f32.mrf.mxu1  ;;  %v19792_v25 = vpop.f32.mrf.mxu0  ;;  %v15474_v18 = vld [vmem:[%s20829_s7 + $0x274] ss:$8 sps:$4 sm:$0xff]  }
 0x576   : > { %v7405_v55 = vadd.f32 %v14178_v60, %v7404_v24  ;;  %v15465_v60 = vld [vmem:[%s20829_s7 + $0x184] ss:$8 sps:$4 sm:$0xff]   ;;  %9604 = vmatprep.subr.bf16.mxu1 %v15474_v18  ;;  %v15477_v24 = vld [vmem:[%s20829_s7 + $0x154] ss:$8 sps:$4 sm:$0xff]  }
 0x577   : > { %v14326_v10 = vpop.f32.mrf.mxu1  ;;  %v19794_v57 = vpop.f32.mrf.mxu0 }
 0x578   : > { %v15475_v10 = vld [vmem:[%s20829_s7 + $0x150] ss:$8 sps:$4 sm:$0xff]  }
 0x579   : > { %v7407_v0 = vpop.f32.mrf.mxu1  ;;  %v19799_v2 = vpop.f32.mrf.mxu0 }
 0x57a   : > { %v7408_v13 = vadd.f32 %v14181_v40, %v7407_v0  ;;  %v15472_v40 = vld [vmem:[%s20829_s7 + $0x270] ss:$8 sps:$4 sm:$0xff]   ;;  %v15478_v0 = vld [vmem:[%s20829_s7 + $0x260] ss:$8 sps:$4 sm:$0xff]  }
 0x57b   : > { %v14327_v42 = vpop.f32.mrf.mxu1  ;;  %v7786_v29 = vpop.f32.mrf.mxu0  ;;  %9605 = vmatpush1.bf16.msra.mxu1 %v15472_v40 }
 0x57c   : > { %v15483_v42 = vld [vmem:[%s20829_s7 + $0x144] ss:$8 sps:$4 sm:$0xff]  }
 0x595   : > { %v14201_v35 = vpop.f32.mrf.mxu0 }
 0x597   : > { %v14202_v39 = vpop.f32.mrf.mxu0 }
 0x598   : > { %v14203_v19 = vadd.f32 %v14202_v39, %v14201_v35  ;;  %v15481_v35 = vld [vmem:[%s20829_s7 + $0x140] ss:$8 sps:$4 sm:$0xff]   ;;  %v15484_v39 = vld [vmem:[%s20829_s7 + $0x250] ss:$8 sps:$4 sm:$0xff]  }
 0x599   : > { %v14204_v27 = vpop.f32.mrf.mxu0 }
 0x59a   : > { %v7824_v52 = vadd.f32 %v14203_v19, %v7405_v55  ;;  %v15480_v55 = vld [vmem:[%s20829_s7 + $0x264] ss:$8 sps:$4 sm:$0xff]  }
 0x59b   : > { %v14205_v49 = vpop.f32.mrf.mxu0  ;;  %9606 = vmatprep.subr.bf16.mxu1 %v15480_v55 }
 0x59c   : > { %v14206_v53 = vadd.f32 %v14205_v49, %v14204_v27  ;;  %9607 = vmatpush1.bf16.msra.mxu1 %v15478_v0  ;;  %v15489_v27 = vld [vmem:[%s20829_s7 + $0x234] ss:$8 sps:$4 sm:$0xff]   ;;  %v15487_v49 = vld [vmem:[%s20829_s7 + $0x230] ss:$8 sps:$4 sm:$0xff]  }
 0x59d   : > { %v7864_v47 = vpop.f32.mrf.mxu0 }
 0x59e   : > { %v19801_v45 = vadd.f32 %v7864_v47, %v7824_v52  ;;  %v7827_v26 = vadd.f32 %v14206_v53, %v7408_v13  ;;  %v15492_v52 = vld [vmem:[%s20829_s7 + $0x244] ss:$8 sps:$4 sm:$0xff]   ;;  %v15490_v53 = vld [vmem:[%s20829_s7 + $0x240] ss:$8 sps:$4 sm:$0xff]  }
 0x59f   : > { %v14334_v28 = vpop.f32.mrf.mxu0 }
 0x5a0   : > { %v15498_v28 = vld [vmem:[%s20829_s7 + $0x74] ss:$8 sps:$4 sm:$0xff]  }
 0x5a1   : > { %v7867_v8 = vpop.f32.mrf.mxu0 }
 0x5a2   : > { %v19803_v51 = vadd.f32 %v7867_v8, %v7827_v26  ;;  %v15495_v26 = vld [vmem:[%s20829_s7 + $0x224] ss:$8 sps:$4 sm:$0xff]   ;;  %v15493_v8 = vld [vmem:[%s20829_s7 + $0x220] ss:$8 sps:$4 sm:$0xff]  }
 0x5a3   : > { %v14335_v43 = vpop.f32.mrf.mxu0 }
 0x5b5   : > { %v7737_v30 = vpop.f32.mrf.mxu1 }
 0x5b6   : > { %v19811_v37 = vadd.f32 %v7737_v30, %v7321_v11  ;;  %v15462_v11 = vld [vmem:[%s20829_s7 + $0x194] ss:$8 sps:$4 sm:$0xff]  }
 0x5b7   : > { %v7739_v48 = vpop.f32.mrf.mxu1  ;;  %9559 = vmatprep.subr.bf16.mxu0 %v15462_v11 }
 0x5b8   : > { %v19816_v15 = vadd.f32 %v7739_v48, %v7323_v6  ;;  %9560 = vmatpush1.bf16.msra.mxu0 %v15460_v33  ;;  %v7781_v22 = vadd.f32 %v19792_v25, %v19811_v37  ;;  %v15514_v33 = vld [vmem:[%s20829_s7 + $0x1f4] ss:$8 sps:$4 sm:$0xff]  }
 0x5b9   : > { %v7741_v31 = vpop.f32.mrf.mxu1  ;;  %9561 = vmatprep.subr.bf16.mxu0 %v15465_v60 }
 0x5ba   : > { %v19821_v62 = vadd.f32 %v7741_v31, %v7325_v14  ;;  %v15466_v14 = vld [vmem:[%s20829_s7 + $0x170] ss:$8 sps:$4 sm:$0xff]   ;;  %v15506_v31 = vld [vmem:[%s20829_s7 + $0x200] ss:$8 sps:$4 sm:$0xff]   ;;  %v7783_v60 = vadd.f32 %v19794_v57, %v19816_v15  ;;  %v15520_v57 = vld [vmem:[%s20829_s7 + $0x1e4] ss:$8 sps:$4 sm:$0xff]  }
 0x5bb   : > { %v7743_v56 = vpop.f32.mrf.mxu1 }
 0x5bc   : > { %v7744_v16 = vadd.f32 %v7743_v56, %v7327_v32  ;;  %9562 = vmatpush1.bf16.msra.mxu0 %v15463_v5  ;;  %v15469_v32 = vld [vmem:[%s20829_s7 + $0x160] ss:$8 sps:$4 sm:$0xff]   ;;  %v15508_v56 = vld [vmem:[%s20829_s7 + $0x204] ss:$8 sps:$4 sm:$0xff]  }
 0x5bd   : > { %9563 = vmatprep.subr.bf16.mxu0 %v15468_v54  ;;  %v8350_v13 = vpop.f32.mrf.mxu1 }
 0x5be   : > { %v19829_v6 = vadd.f32 %v7786_v29, %v7744_v16  ;;  %v15486_v29 = vld [vmem:[%s20829_s7 + $0x254] ss:$8 sps:$4 sm:$0xff]  }
 0x5bf   : > { %9608 = vmatprep.subr.bf16.mxu1 %v15486_v29  ;;  %v8352_v19 = vpop.f32.mrf.mxu1  ;;  %v15524_v29 = vld [vmem:[%s20829_s7 + $0x1d0] ss:$8 sps:$4 sm:$0xff]  }
 0x5c0   : > { %9564 = vmatpush1.bf16.msra.mxu0 %v15466_v14  ;;  %9609 = vmatpush1.bf16.msra.mxu1 %v15484_v39  ;;  %v7785_v14 = vadd.f32 %v19799_v2, %v19821_v62  ;;  %v15518_v62 = vld [vmem:[%s20829_s7 + $0x1e0] ss:$8 sps:$4 sm:$0xff]  }
 0x5c1   : > { %9565 = vmatprep.subr.bf16.mxu0 %v15471_v7  ;;  %9610 = vmatprep.subr.bf16.mxu1 %v15492_v52  ;;  %v8354_v47 = vpop.f32.mrf.mxu1  ;;  %v15532_v39 = vld [vmem:[%s20829_s7 + $0x1c0] ss:$8 sps:$4 sm:$0xff]  }
 0x5c3   : > { %v8356_v43 = vpop.f32.mrf.mxu1 }
 0x5c4   : > { %9566 = vmatpush1.bf16.msra.mxu0 %v15469_v32  ;;  %9611 = vmatpush1.bf16.msra.mxu1 %v15490_v53  ;;  %v15512_v32 = vld [vmem:[%s20829_s7 + $0x1f0] ss:$8 sps:$4 sm:$0xff]  }
 0x5c5   : > { %9567 = vmatprep.subr.bf16.mxu0 %v15477_v24  ;;  %9841 = vmatprep.subr.bf16.mxu1 %v15498_v28 }
 0x5c8   : > { %9568 = vmatpush1.bf16.msra.mxu0 %v15475_v10 }
 0x5c9   : > { %9569 = vmatprep.subr.bf16.mxu0 %v15483_v42 }
 0x5cc   : > { %9570 = vmatpush1.bf16.msra.mxu0 %v15481_v35 }
 0x5cd   : > { %9571 = vmatprep.subr.bf16.mxu0 %v15489_v27 }
 0x5d0   : > { %9572 = vmatpush2.bf16.msra.mxu0 %v15487_v49 }
 0x5d1   : > { %9573 = vmatprep.subr.bf16.mxu0 %v15495_v26 }
 0x5d4   : > { %9574 = vmatpush2.bf16.msra.mxu0 %v15493_v8 }
 0x5d5   : > { %9575 = vmatprep.subr.bf16.mxu0 %v15502_v58 }
 0x5d8   : > { %9576 = vmatpush2.bf16.msra.mxu0 %v15500_v41  ;;  %v9038_v41 = vld [vmem:[%s20828_s6] sm:$0x7] }
 0x5d9   : > { %9577 = vmatprep.subr.bf16.mxu0 %v15508_v56 }
 0x5dc   : > { %9578 = vmatpush2.bf16.msra.mxu0 %v15506_v31 }
 0x5dd   : > { %v8307_v30 = vpop.f32.mrf.mxu0  ;;  %v14226_v48 = vpop.f32.mrf.mxu1  ;;  %9579 = vmatprep.subr.bf16.mxu0 %v15514_v33  ;;  %v9051_v33 = vrot.slane %v9038_v41, %v17580_v9 }
 0x5de   : > { %v8351_v36 = vadd.f32 %v8350_v13, %v8307_v30  ;;  %v15526_v13 = vld [vmem:[%s20829_s7 + $0x1d4] ss:$8 sps:$4 sm:$0xff]  }
 0x5df   : > { %v8309_v11 = vpop.f32.mrf.mxu0  ;;  %v14227_v16 = vpop.f32.mrf.mxu1 }
 0x5e0   : > { %v19919_v25 = vadd.f32 %v8351_v36, %v7781_v22  ;;  %v8353_v37 = vadd.f32 %v8352_v19, %v8309_v11  ;;  %9580 = vmatpush2.bf16.msra.mxu0 %v15512_v32  ;;  %v15540_v19 = vld [vmem:[%s20829_s7 + $0x134] ss:$8 sps:$4 sm:$0xff]   ;;  %v14228_v28 = vadd.f32 %v14227_v16, %v14226_v48 }
 0x5e1   : > { %v8311_v5 = vpop.f32.mrf.mxu0  ;;  %v14229_v54 = vpop.f32.mrf.mxu1  ;;  %9581 = vmatprep.subr.bf16.mxu0 %v15520_v57 }
 0x5e2   : > { %v19923_v7 = vadd.f32 %v8353_v37, %v7783_v60  ;;  %v8355_v18 = vadd.f32 %v8354_v47, %v8311_v5 }
 0x5e3   : > { %v8313_v40 = vpop.f32.mrf.mxu0  ;;  %v14230_v24 = vpop.f32.mrf.mxu1 }
 0x5e4   : > { %v19931_v15 = vadd.f32 %v8355_v18, %v7785_v14  ;;  %v8357_v55 = vadd.f32 %v8356_v43, %v8313_v40  ;;  %9582 = vmatpush2.bf16.msra.mxu0 %v15518_v62  ;;  %v14231_v30 = vadd.f32 %v14230_v24, %v14229_v54 }
 0x5e5   : > { %v8434_v10 = vpop.f32.mrf.mxu1  ;;  %9583 = vmatprep.subr.bf16.mxu0 %v15526_v13  ;;  %v8941_v27 = vpop.f32.mrf.mxu0  ;;  %v9043_v13 = vrot.slane %v9038_v41, %v17589_v4 }
 0x5e6   : > { %v19934_v2 = vadd.f32 %v8357_v55, %v19829_v6  ;;  %v15534_v6 = vld [vmem:[%s20829_s7 + $0x1c4] ss:$8 sps:$4 sm:$0xff]   ;;  %v8435_v43 = vadd.f32 %v14228_v28, %v8434_v10 }
 0x5e7   : > { %v14342_v0 = vpop.f32.mrf.mxu1  ;;  %v8943_v52 = vpop.f32.mrf.mxu0 }
 0x5e8   : > { %9584 = vmatpush2.bf16.msra.mxu0 %v15524_v29  ;;  %v8443_v31 = vadd.f32 %v8435_v43, %v19801_v45 }
 0x5e9   : > { %v8437_v42 = vpop.f32.mrf.mxu1  ;;  %9585 = vmatprep.subr.bf16.mxu0 %v15534_v6  ;;  %v8945_v49 = vpop.f32.mrf.mxu0 }
 0x5ea   : > { %v8438_v56 = vadd.f32 %v14231_v30, %v8437_v42 }
 0x5eb   : > { %v14343_v35 = vpop.f32.mrf.mxu1  ;;  %v19954_v53 = vpop.f32.mrf.mxu0 }
 0x5ec   : > { %9586 = vmatpush2.bf16.msra.mxu0 %v15532_v39  ;;  %v8446_v16 = vadd.f32 %v8438_v56, %v19803_v51 }
 0x5ed   : > { %9890 = vmatprep.subr.bf16.mxu0 %v15540_v19  ;;  %v9047_v19 = vrot.slane %v9038_v41, %v17597_v44 }
 0x606   : > { %v14251_v47 = vpop.f32.mrf.mxu0 }
 0x608   : > { %v14252_v26 = vpop.f32.mrf.mxu0 }
 0x609   : > { %v14253_v22 = vadd.f32 %v14252_v26, %v14251_v47 }
 0x60a   : > { %v14254_v8 = vpop.f32.mrf.mxu0 }
 0x60c   : > { %v14255_v58 = vpop.f32.mrf.mxu0 }
 0x60d   : > { %v14256_v37 = vadd.f32 %v14255_v58, %v14254_v8 }
 0x60e   : > { %v9025_v36 = vpop.f32.mrf.mxu0 }
 0x60f   : > { %v9026_v11 = vadd.f32 %v14253_v22, %v9025_v36 }
 0x610   : > { %v14350_v60 = vpop.f32.mrf.mxu0 }
 0x611   : > { %v9034_v5 = vadd.f32 %v9026_v11, %v8443_v31 }
 0x612   : > { %v9028_v48 = vpop.f32.mrf.mxu0 }
 0x613   : > { %v9057_v14 = vadd.f32 %v9051_v33, %v9034_v5  ;;  %v9029_v18 = vadd.f32 %v14256_v37, %v9028_v48 }
 0x614   : > { %v14351_v32 = vpop.f32.mrf.mxu0 }
 0x615   : > { %v9063_v40 = vmin.f32 %v9057_v14, 0.0  ;;  %v9037_v57 = vadd.f32 %v9029_v18, %v8446_v16  ;;  %vm9105_vm2 = vcmp.gt.f32.partialorder %v9057_v14, 0.0 }
 0x617   : > { %v9083_v54 = vmul.f32 1.442695, %v9063_v40  ;;  %v9060_v24 = vadd.f32 %v9051_v33, %v9037_v57  ;;  %v9069_v55 = vmul.f32 0.5, %v9063_v40  ;;  %v9176_v33 = vld [vmem:[#allocation4 + $0x8] sm:$0x4] }
 0x619   : > { %v9066_v10 = vmin.f32 %v9060_v24, 0.0  ;;  %15881 = vpow2.f32 %v9083_v54  ;;  %vm9108_vm5 = vcmp.gt.f32.partialorder %v9060_v24, 0.0 }
 0x61a   : > { %15883 = vtanh.f32 %v9069_v55 }
 0x61b   : > { %v9089_v45 = vmul.f32 1.442695, %v9066_v10  ;;  %v9072_v62 = vmul.f32 0.5, %v9066_v10  ;;  %v9210_v10 = vld [vmem:[#allocation4 + $0x8] sm:$0x8] }
 0x61d   : > { %15885 = vpow2.f32 %v9089_v45 }
 0x61e   : > { %15887 = vtanh.f32 %v9072_v62 }
 0x625   : > { %v8898_v9 = vpop.f32.mrf.mxu1 }
 0x626   : > { %v8942_v0 = vadd.f32 %v8941_v27, %v8898_v9  ;;  %v15882_v51 = vpop.eup %15881 }
 0x627   : > { %v8900_v42 = vpop.f32.mrf.mxu1  ;;  %v9093_v29 = vadd.f32 1.0, %v15882_v51  ;;  %v15884_v39 = vpop.eup %15883 }
 0x628   : > { %v9032_v35 = vadd.f32 %v8942_v0, %v19919_v25  ;;  %v8944_v6 = vadd.f32 %v8943_v52, %v8900_v42  ;;  %v9149_v52 = vld [vmem:[#allocation4 + $0x8] sm:$0x2] }
 0x629   : > { %v8902_v47 = vpop.f32.mrf.mxu1  ;;  %v9099_v26 = vmul.f32 %v15884_v39, %v9093_v29 }
 0x62a   : > { %v19965_v28 = vadd.f32 %v9043_v13, %v9032_v35  ;;  %v9033_v8 = vadd.f32 %v8944_v6, %v19923_v7  ;;  %v8946_v43 = vadd.f32 %v8945_v49, %v8902_v47  ;;  %v15886_v27 = vpop.eup %15885  ;;  %v9139_v49 = vld [vmem:[#allocation4 + $0x8] sm:$0x1]  ;;  %v15505_v35 = vld [vmem:[%s20829_s7 + $0x64] ss:$8 sps:$4 sm:$0xff]  }
 0x62b   : > { %v9111_v58 = vsel %vm9105_vm2, %v9057_v14, %v9099_v26  ;;  %v9096_v30 = vadd.f32 1.0, %v15886_v27  ;;  %v15888_v22 = vpop.eup %15887  ;;  %v8904_v11 = vpop.f32.mrf.mxu1  ;;  %vm20997_vm2 = vsmask.f32 2304 }
 0x62c   : > { %v9061_v41 = vmin.f32 %v19965_v28, 0.0  ;;  %v14032_v36 = vpack.c.bf16 %v9111_v58, %v9111_v58  ;;  %v19981_v31 = vadd.f32 %v9047_v19, %v9033_v8  ;;  %v9035_v56 = vadd.f32 %v8946_v43, %v19931_v15  ;;  %vm9175_vm1 = vmand %vm9174_vm10, %vm20997_vm2 }
 0x62d   : > { %v9102_v60 = vmul.f32 %v15888_v22, %v9096_v30  ;;  %v8948_v15 = vadd.f32 %v19954_v53, %v8904_v11  ;;  %vm19996_vm2 = vmand %vm9208_vm15, %vm20998_vm13 }
 0x62e   : > { %v9079_v37 = vmul.f32 1.442695, %v9061_v41  ;;  %v9130_v5 = vshll.u32 %v14032_v36, 16  ;;  %v9150_v48 = vsel %vm19970_vm6, %v14032_v36, %v9149_v52  ;;  %v13504_v16 = vrot.slane %v14032_v36, 9 }
 0x62f   : > { %v9062_v14 = vmin.f32 %v19981_v31, 0.0  ;;  %9151 = vst [vmem:[#allocation4 + $0x8] sm:$0x2] %v9150_v48  ;;  %v9114_v18 = vsel %vm9108_vm5, %v9060_v24, %v9102_v60  ;;  %v19989_v32 = vadd.f32 %v9043_v13, %v9035_v56  ;;  %v9067_v45 = vmul.f32 0.5, %v9061_v41  ;;  %v9234_v24 = vld [vmem:[#allocation4 + $0x14] sm:$0x1] }
 0x630   : > { %v9140_v40 = vsel %vm19977_vm14, %v9130_v5, %v9139_v49  ;;  %v9177_v57 = vsel %vm9175_vm1, %v13504_v16, %v9176_v33  ;;  %v14034_v54 = vpack.c.bf16 %v9114_v18, %v9114_v18  ;;  %vm21001_vm5 = vsmask.f32 256 }
 0x631   : > { %9141 = vst [vmem:[#allocation4 + $0x8] sm:$0x1] %v9140_v40  ;;  %9178 = vst [vmem:[#allocation4 + $0x8] sm:$0x4] %v9177_v57  ;;  %15889 = vpow2.f32 %v9079_v37  ;;  %v9081_v53 = vmul.f32 1.442695, %v9062_v14  ;;  %v9036_v29 = vadd.f32 %v8948_v15, %v19934_v2 }
 0x632   : > { %vm9233_vm6 = vmand %vm464_vm12, %vm21001_vm5  ;;  %v9064_v62 = vmin.f32 %v19989_v32, 0.0  ;;  %v9202_v9 = vrot.slane %v14034_v54, 6  ;;  %v13508_v0 = vrot.slane %v14034_v54, 11  ;;  %v9068_v13 = vmul.f32 0.5, %v9062_v14  ;;  %v9144_v40 = vld [vmem:[#allocation4] sm:$0x22] }
 0x633   : > { %v9189_v51 = vshll.u32 %v14034_v54, 16  ;;  %vm21002_vm14 = vsmask.f32 7942  ;;  %vm21003_vm1 = vcmask 517121   ;;  %15891 = vtanh.f32 %v9067_v45 }
 0x634   : > { %v9085_v42 = vmul.f32 1.442695, %v9064_v62  ;;  %vm20006_vm13 = vmand %vm21003_vm1, %vm21002_vm14  ;;  %v9211_v6 = vsel %vm19996_vm2, %v9202_v9, %v9210_v10  ;;  %v9235_v39 = vsel %vm9233_vm6, %v13508_v0, %v9234_v24  ;;  %v13502_v47 = vrot.slane %v9130_v5, 9  ;;  %v9134_v10 = vld [vmem:[#allocation4] sm:$0x11] }
 0x635   : > { %9212 = vst [vmem:[#allocation4 + $0x8] sm:$0x8] %v9211_v6  ;;  %9236 = vst [vmem:[#allocation4 + $0x14] sm:$0x1] %v9235_v39  ;;  %15893 = vpow2.f32 %v9081_v53  ;;  %v20012_v26 = vadd.f32 %v9047_v19, %v9036_v29  ;;  %vm21006_vm12 = vsmask.f32 7946 }
 0x636   : > { %v9162_v8 = vld [vmem:[#allocation4 + $0x8] sm:$0x2]  ;;  %vm9197_vm5 = vmand %vm9174_vm10, %vm21006_vm12  ;;  %15895 = vtanh.f32 %v9068_v13  ;;  %v9070_v2 = vmul.f32 0.5, %v9064_v62  ;;  %v9191_v27 = vrot.slane %v9189_v51, 6  ;;  %vm21007_vm2 = vsmask.f32 7950 }
 0x637   : > { %v9163_v43 = vsel %vm20006_vm13, %v13502_v47, %v9162_v8  ;;  %15897 = vpow2.f32 %v9085_v42  ;;  %v9065_v58 = vmin.f32 %v20012_v26, 0.0  ;;  %vm9220_vm6 = vmand %vm9208_vm15, %vm21007_vm2  ;;  %v9214_v41 = vrot.slane %v9189_v51, 7  ;;  %v9171_v24 = vld [vmem:[#allocation4] sm:$0x44] }
 0x638   : > { %9164 = vst [vmem:[#allocation4 + $0x8] sm:$0x2] %v9163_v43  ;;  %v9198_v25 = vld [vmem:[#allocation4 + $0x8] sm:$0x4]  ;;  %15899 = vtanh.f32 %v9070_v2  ;;  %v20021_v14 = vld [vmem:[#allocation4 + $0x8] ss:$0 sps:$4 sm:$0xff]  }
 0x639   : > { %v9199_v52 = vsel %vm9197_vm5, %v9191_v27, %v9198_v25  ;;  %v9087_v30 = vmul.f32 1.442695, %v9065_v58  ;;  %v9071_v19 = vmul.f32 0.5, %v9065_v58  ;;  %vm9103_vm15 = vcmp.gt.f32.partialorder %v19965_v28, 0.0  ;;  %v15511_v2 = vld [vmem:[%s20829_s7 + $0x54] ss:$8 sps:$4 sm:$0xff]  }
 0x63a   : > { %9200 = vst [vmem:[#allocation4 + $0x8] sm:$0x4] %v9199_v52  ;;  %vm9104_vm10 = vcmp.gt.f32.partialorder %v19981_v31, 0.0  ;;  %v9345_v57 = vshll.u32 %v20021_v14, 16  ;;  %v9343_v62 = vshrl.u32 %v20021_v14, 16  ;;  %vm9551_vm14 = vcmask 523264  }
 0x63b   : > { %15901 = vpow2.f32 %v9087_v30  ;;  %vm9107_vm1 = vcmp.gt.f32.partialorder %v20012_v26, 0.0  ;;  %v9205_v43 = vld [vmem:[#allocation4] sm:$0x88]  ;;  %v9230_v30 = vld [vmem:[#allocation4 + $0xc] sm:$0x11]  ;;  %vm10694_vm13 = vcmask 522246  }
 0x63c   : > { %v9221_v22 = vld [vmem:[#allocation4 + $0x8] sm:$0x8]  ;;  %15903 = vtanh.f32 %v9071_v19  ;;  %v9347_v9 = vrot.slane %v9345_v57, 1  ;;  %vm21009_vm12 = vsmask.f32 5376 }
 0x63d   : > { %v9222_v36 = vsel %vm9220_vm6, %v9214_v41, %v9221_v22  ;;  %vm21012_vm2 = vsmask.f32 7954 }
 0x63e   : > { %v15890_v7 = vpop.eup %15889  ;;  %9223 = vst [vmem:[#allocation4 + $0x8] sm:$0x8] %v9222_v36  ;;  %v9348_v29 = vor.u32 %v9347_v9, %v9343_v62  ;;  %v15517_v36 = vld [vmem:[%s20829_s7 + $0x44] ss:$8 sps:$4 sm:$0xff]   ;;  %v15547_v62 = vld [vmem:[%s20829_s7 + $0xf0] ss:$8 sps:$4 sm:$0xff]  }
 0x63f   : > { %v9091_v49 = vadd.f32 1.0, %v15890_v7 }
 0x640   : > { %v15892_v56 = vpop.eup %15891  ;;  %13592 = vmatmul.mubr.msk.bf16.vlgmr.msra.gmra.mxu1 %vm9551_vm14, %v9348_v29  ;;  %v15561_v29 = vld [vmem:[%s20829_s7 + $0xd4] ss:$8 sps:$4 sm:$0xff]  }
 0x641   : > { %v9097_v60 = vmul.f32 %v15892_v56, %v9091_v49 }
 0x642   : > { %v15894_v11 = vpop.eup %15893 }
 0x643   : > { %v15896_v33 = vpop.eup %15895  ;;  %v9092_v37 = vadd.f32 1.0, %v15894_v11  ;;  %v9109_v18 = vsel %vm9103_vm15, %v19965_v28, %v9097_v60 }
 0x644   : > { %v15898_v5 = vpop.eup %15897 }
 0x645   : > { %v9098_v48 = vmul.f32 %v15896_v33, %v9092_v37  ;;  %v9094_v16 = vadd.f32 1.0, %v15898_v5  ;;  %v15900_v54 = vpop.eup %15899  ;;  %v15529_v33 = vld [vmem:[%s20829_s7 + $0x24] ss:$8 sps:$4 sm:$0xff]   ;;  %v15527_v37 = vld [vmem:[%s20829_s7 + $0x20] ss:$8 sps:$4 sm:$0xff]  }
 0x646   : > { %v15537_v5 = vld [vmem:[%s20829_s7 + $0x14] ss:$8 sps:$4 sm:$0xff]  }
 0x647   : > { %v9110_v15 = vsel %vm9104_vm10, %v19981_v31, %v9098_v48  ;;  %v9100_v53 = vmul.f32 %v15900_v54, %v9094_v16  ;;  %v15496_v31 = vld [vmem:[%s20829_s7 + $0x70] ss:$8 sps:$4 sm:$0xff]  }
 0x648   : > { %v14031_v55 = vpack.c.bf16 %v9110_v15, %v9109_v18  ;;  %v15902_v45 = vpop.eup %15901  ;;  %9842 = vmatpush1.bf16.msra.mxu1 %v15496_v31  ;;  %v15535_v48 = vld [vmem:[%s20829_s7 + $0x10] ss:$8 sps:$4 sm:$0xff]   ;;  %v15553_v31 = vld [vmem:[%s20829_s7 + $0xe0] ss:$8 sps:$4 sm:$0xff]  }
 0x649   : > { %v9095_v51 = vadd.f32 1.0, %v15902_v45  ;;  %v15904_v42 = vpop.eup %15903  ;;  %9843 = vmatprep.subr.bf16.mxu1 %v15505_v35  ;;  %v15552_v35 = vld [vmem:[%s20829_s7 + $0x114] ss:$8 sps:$4 sm:$0xff]  }
 0x64a   : > { %v9127_v0 = vshll.u32 %v14031_v55, 16  ;;  %v9145_v13 = vsel %vm19029_vm4, %v14031_v55, %v9144_v40  ;;  %v13503_v28 = vrot.slane %v14031_v55, 9  ;;  %vm9106_vm4 = vcmp.gt.f32.partialorder %v19989_v32, 0.0  ;;  %v15541_v40 = vld [vmem:[%s20829_s7] ss:$8 sps:$4 sm:$0xff]  }
 0x64b   : > { %9146 = vst [vmem:[#allocation4] sm:$0x22] %v9145_v13  ;;  %v9101_v39 = vmul.f32 %v15904_v42, %v9095_v51  ;;  %v9112_v47 = vsel %vm9106_vm4, %v19989_v32, %v9100_v53  ;;  %v15549_v55 = vld [vmem:[%s20829_s7 + $0xf4] ss:$8 sps:$4 sm:$0xff]   ;;  %v15546_v51 = vld [vmem:[%s20829_s7 + $0x124] ss:$8 sps:$4 sm:$0xff]  }
 0x64c   : > { %v9135_v6 = vsel %vm18985_vm3, %v9127_v0, %v9134_v10  ;;  %v9172_v20 = vsel %vm19049_vm7, %v13503_v28, %v9171_v24  ;;  %v13501_v27 = vrot.slane %v9127_v0, 9  ;;  %9844 = vmatpush1.bf16.msra.mxu1 %v15503_v21  ;;  %v15538_v0 = vld [vmem:[%s20829_s7 + $0x130] ss:$8 sps:$4 sm:$0xff]   ;;  %v15555_v28 = vld [vmem:[%s20829_s7 + $0xe4] ss:$8 sps:$4 sm:$0xff]   ;;  %vm466_vm3 = vcmask 1042432  }
 0x64d   : > { %9136 = vst [vmem:[#allocation4] sm:$0x11] %v9135_v6  ;;  %9173 = vst [vmem:[#allocation4] sm:$0x44] %v9172_v20  ;;  %v9113_v8 = vsel %vm9107_vm1, %v20012_v26, %v9101_v39  ;;  %v15509_v26 = vld [vmem:[%s20829_s7 + $0x50] ss:$8 sps:$4 sm:$0xff]   ;;  %9845 = vmatprep.subr.bf16.mxu1 %v15511_v2 }
 0x64e   : > { %v14033_v17 = vpack.c.bf16 %v9113_v8, %v9112_v47  ;;  %v15544_v42 = vld [vmem:[%s20829_s7 + $0x120] ss:$8 sps:$4 sm:$0xff]   ;;  %v15559_v6 = vld [vmem:[%s20829_s7 + $0xd0] ss:$8 sps:$4 sm:$0xff]   ;;  %v15567_v39 = vld [vmem:[%s20829_s7 + $0xc4] ss:$8 sps:$4 sm:$0xff]  }
 0x64f   : > { %v15550_v20 = vld [vmem:[%s20829_s7 + $0x110] ss:$8 sps:$4 sm:$0xff]   ;;  %v15558_v47 = vld [vmem:[%s20829_s7 + $0x104] ss:$8 sps:$4 sm:$0xff]   ;;  %v15565_v8 = vld [vmem:[%s20829_s7 + $0xc0] ss:$8 sps:$4 sm:$0xff]  }
 0x650   : > { %v9185_v58 = vshll.u32 %v14033_v17, 16  ;;  %v9201_v25 = vrot.slane %v14033_v17, 6  ;;  %v13507_v52 = vrot.slane %v14033_v17, 11  ;;  %9846 = vmatpush1.bf16.msra.mxu1 %v15509_v26  ;;  %v15556_v21 = vld [vmem:[%s20829_s7 + $0x100] ss:$8 sps:$4 sm:$0xff]   ;;  %vm467_vm7 = vcmask 522244  }
 0x651   : > { %9847 = vmatprep.subr.bf16.mxu1 %v15517_v36  ;;  %v15576_v17 = vld [vmem:[%s20829_s7 + $0xb4] ss:$8 sps:$4 sm:$0xff]   ;;  %v15571_v26 = vld [vmem:[%s20829_s7 + $0x2e0] ss:$8 sps:$4 sm:$0xff]   ;;  %v15594_v36 = vld [vmem:[%s20829_s7 + $0x84] ss:$8 sps:$4 sm:$0xff]  }
 0x652   : > { %v9158_v32 = vld [vmem:[#allocation4] sm:$0x22]  ;;  %v9187_v41 = vrot.slane %v9185_v58, 6  ;;  %v9206_v22 = vsel %vm19105_vm8, %v9201_v25, %v9205_v43  ;;  %v9231_v49 = vsel %vm17792_vm9, %v13507_v52, %v9230_v30  ;;  %v9213_v11 = vrot.slane %v9185_v58, 7  ;;  %v15564_v2 = vld [vmem:[%s20829_s7 + $0x2f4] ss:$8 sps:$4 sm:$0xff]   ;;  %vm468_vm8 = vmor %vm467_vm7, %vm466_vm3 }
 0x653   : > { %v9159_v19 = vsel %vm19116_vm11, %v13501_v27, %v9158_v32  ;;  %9207 = vst [vmem:[#allocation4] sm:$0x88] %v9206_v22  ;;  %9232 = vst [vmem:[#allocation4 + $0xc] sm:$0x11] %v9231_v49  ;;  %vm21008_vm9 = vnez %v20978_v61  ;;  %v15543_v61 = vld [vmem:[%s20829_s7 + $0x4] ss:$8 sps:$4 sm:$0xff]   ;;  %vm21019_vm7 = vnez %v20924_v63 }
 0x654   : > { %9160 = vst [vmem:[#allocation4] sm:$0x22] %v9159_v19  ;;  %v9194_v7 = vld [vmem:[#allocation4] sm:$0x44]  ;;  %9848 = vmatpush1.bf16.msra.mxu1 %v15515_v3  ;;  %v15574_v27 = vld [vmem:[%s20829_s7 + $0xb0] ss:$8 sps:$4 sm:$0xff]  }
 0x655   : > { %v9195_v56 = vsel %vm19133_vm0, %v9187_v41, %v9194_v7  ;;  %9849 = vmatprep.subr.bf16.mxu1 %v15523_v1  ;;  %v15562_v58 = vld [vmem:[%s20829_s7 + $0x2f0] ss:$8 sps:$4 sm:$0xff]   ;;  %v15573_v25 = vld [vmem:[%s20829_s7 + $0x2e4] ss:$8 sps:$4 sm:$0xff]   ;;  %v15580_v32 = vld [vmem:[%s20829_s7 + $0xa0] ss:$8 sps:$4 sm:$0xff]  }
 0x656   : > { %9196 = vst [vmem:[#allocation4] sm:$0x44] %v9195_v56  ;;  %v15582_v52 = vld [vmem:[%s20829_s7 + $0xa4] ss:$8 sps:$4 sm:$0xff]   ;;  %v15588_v19 = vld [vmem:[%s20829_s7 + $0x94] ss:$8 sps:$4 sm:$0xff]  }
 0x657   : > { %v15586_v41 = vld [vmem:[%s20829_s7 + $0x90] ss:$8 sps:$4 sm:$0xff]   ;;  %v15585_v7 = vld [vmem:[%s20829_s7 + $0x2c4] ss:$8 sps:$4 sm:$0xff]   ;;  %v15592_v49 = vld [vmem:[%s20829_s7 + $0x80] ss:$8 sps:$4 sm:$0xff]  }
 0x658   : > { %9850 = vmatpush1.bf16.msra.mxu1 %v15521_v50  ;;  %v15577_v22 = vld [vmem:[%s20829_s7 + $0x2d0] ss:$8 sps:$4 sm:$0xff]   ;;  %v15583_v56 = vld [vmem:[%s20829_s7 + $0x2c0] ss:$8 sps:$4 sm:$0xff]   ;;  %v15600_v3 = vld [vmem:[%s20829_s7 + $0x3b4] ss:$8 sps:$4 sm:$0xff]  }
 0x659   : > { %9851 = vmatprep.subr.bf16.mxu1 %v15529_v33  ;;  %v15591_v1 = vld [vmem:[%s20829_s7 + $0x2b4] ss:$8 sps:$4 sm:$0xff]   ;;  %v15589_v50 = vld [vmem:[%s20829_s7 + $0x2b0] ss:$8 sps:$4 sm:$0xff]   ;;  %v15597_v33 = vld [vmem:[%s20829_s7 + $0x2a4] ss:$8 sps:$4 sm:$0xff]  }
 0x65a   : > { %v9217_v12 = vld [vmem:[#allocation4] sm:$0x88]  ;;  %469 = vst.msk [vmem:[#allocation5] sm:$0x77] %vm468_vm8, %v19249_v59  ;;  %vm10677_vm11 = vcmask 521221   ;;  %vm10670_vm0 = vcmask 520196  }
 0x65b   : > { %v9218_v60 = vsel %vm21008_vm9, %v9213_v11, %v9217_v12  ;;  %v15598_v11 = vld [vmem:[%s20829_s7 + $0x3b0] ss:$8 sps:$4 sm:$0xff]   ;;  %v15606_v12 = vld [vmem:[%s20829_s7 + $0x3a4] ss:$8 sps:$4 sm:$0xff]   ;;  %vm20537_vm5 = vmand %vm10677_vm11, %vm21009_vm12  ;;  %vm21015_vm4 = vsmask.f32 6400  ;;  %vm21018_vm9 = vnez %v20933_v46 }
 0x65c   : > { %9219 = vst [vmem:[#allocation4] sm:$0x88] %v9218_v60  ;;  %9852 = vmatpush1.bf16.msra.mxu1 %v15527_v37  ;;  %v15604_v60 = vld [vmem:[%s20829_s7 + $0x3a0] ss:$8 sps:$4 sm:$0xff]   ;;  %vm20542_vm6 = vmand %vm10670_vm0, %vm21012_vm2  ;;  %vm21020_vm0 = vnez %v20939_v38  ;;  %vm21021_vm12 = vsmask.f32 7958  ;;  %vm21022_vm2 = vnez %v20946_v23 }
 0x65d   : > { %9853 = vmatprep.subr.bf16.mxu1 %v15537_v5  ;;  %v15595_v37 = vld [vmem:[%s20829_s7 + $0x2a0] ss:$8 sps:$4 sm:$0xff]   ;;  %v15612_v5 = vld [vmem:[%s20829_s7 + $0x394] ss:$8 sps:$4 sm:$0xff]   ;;  %vm20547_vm1 = vmand %vm10694_vm13, %vm21015_vm4 }
 0x65e   : > { %vm10679_vm3 = vmor %vm20537_vm5, %vm21018_vm9  ;;  %v15770_v46 = vld [vmem:[%s20833_s11 + $0xb8] sm:$0xff]  }
 0x65f   : > { %vm10672_vm8 = vmor %vm20542_vm6, %vm21019_vm7 }
 0x660   : > { %9854 = vmatpush1.bf16.msra.mxu1 %v15535_v48  ;;  %v15603_v48 = vld [vmem:[%s20829_s7 + $0x294] ss:$8 sps:$4 sm:$0xff]   ;;  %vm10696_vm13 = vmor %vm20547_vm1, %vm21020_vm0 }
 0x661   : > { %9855 = vmatprep.subr.bf16.mxu1 %v15543_v61  ;;  %v15610_v61 = vld [vmem:[%s20829_s7 + $0x390] ss:$8 sps:$4 sm:$0xff]   ;;  %vm10686_vm5 = vmand %vm10677_vm11, %vm21021_vm12 }
 0x662   : > { %vm10687_vm6 = vmor %vm10686_vm5, %vm21022_vm2 }
 0x663   : > { %v9237_v16 = vld [vmem:[#allocation4] sm:$0xff] }
 0x664   : > { %v20092_v18 = vcombine.low %v9237_v16, %v9237_v16  ;;  %v13550_v15 = vcombine.high %v9237_v16, %v9237_v16  ;;  %9856 = vmatpush1.bf16.msra.mxu1 %v15541_v40  ;;  %v20151_v43 = vld [vmem:[#allocation4 + $0x4] ss:$12 sps:$4 sm:$0x1e]  }
 0x665   : > { %9857 = vmatprep.subr.bf16.mxu1 %v15549_v55  ;;  %v9982_v30 = vrot.slane %v20151_v43, 1  ;;  %v15601_v16 = vld [vmem:[%s20829_s7 + $0x290] ss:$8 sps:$4 sm:$0xff]   ;;  %v10323_v40 = vshrl.u32 %v20151_v43, 16  ;;  %v15616_v55 = vld [vmem:[%s20829_s7 + $0x380] ss:$8 sps:$4 sm:$0xff]  }
 0x666   : > { %v9331_v57 = vshll.u32 %v20092_v18, 16  ;;  %9873 = vmatprep.mubr.bf16.mxu1 %v13550_v15  ;;  %v9338_v54 = vshll.u32 %v13550_v15, 16  ;;  %v9329_v10 = vshrl.u32 %v20092_v18, 16  ;;  %v9336_v24 = vshrl.u32 %v13550_v15, 16  ;;  %v15609_v15 = vld [vmem:[%s20829_s7 + $0x284] ss:$8 sps:$4 sm:$0xff]  }
 0x668   : > { %v9333_v45 = vrot.slane %v9331_v57, 1  ;;  %v9340_v53 = vrot.slane %v9338_v54, 1  ;;  %9858 = vmatpush2.bf16.msra.mxu1 %v15547_v62  ;;  %v10326_v57 = vshll.u32 %v20151_v43, 16  ;;  %v15607_v54 = vld [vmem:[%s20829_s7 + $0x280] ss:$8 sps:$4 sm:$0xff]  }
 0x669   : > { %9859 = vmatprep.subr.bf16.mxu1 %v15555_v28  ;;  %v15631_v28 = vld [vmem:[%s20829_s7 + $0x424] ss:$8 sps:$4 sm:$0xff]   ;;  %v15640_v43 = vld [vmem:[%s20829_s7 + $0x334] ss:$8 sps:$4 sm:$0xff]  }
 0x66a   : > { %v9341_v9 = vor.u32 %v9340_v53, %v9336_v24  ;;  %v9334_v13 = vor.u32 %v9333_v45, %v9329_v10  ;;  %v20250_v10 = vld [vmem:[#allocation4 + $0x8] ss:$12 sps:$4 sm:$0x1e]   ;;  %v10325_v53 = vrot.slane %v10323_v40, 1  ;;  %v10328_v62 = vrot.slane %v10326_v57, 2 }
 0x66b   : > { %v15625_v45 = vld [vmem:[%s20829_s7 + $0x434] ss:$8 sps:$4 sm:$0xff]   ;;  %v15682_v40 = vld [vmem:[%s20829_s7 + $0x4c4] ss:$8 sps:$4 sm:$0xff]   ;;  %v10331_v57 = vshrl.u32 %v20250_v10, 16 }
 0x66c   : > { %9587 = vmatprep.mubr.bf16.mxu0 %v9341_v9  ;;  %9860 = vmatpush2.bf16.msra.mxu1 %v15553_v31  ;;  %v15615_v24 = vld [vmem:[%s20829_s7 + $0x374] ss:$8 sps:$4 sm:$0xff]   ;;  %v15623_v9 = vld [vmem:[%s20829_s7 + $0x430] ss:$8 sps:$4 sm:$0xff]   ;;  %v10329_v31 = vor.u32 %v10328_v62, %v10325_v53 }
 0x66d   : > { %9588 = vmatmul.mubr.bf16.vlgmr.msra.gmra.mxu0 %v9334_v13  ;;  %9861 = vmatprep.subr.bf16.mxu1 %v15561_v29  ;;  %v9983_v13 = vrot.slane %v20250_v10, 1  ;;  %v15619_v29 = vld [vmem:[%s20829_s7 + $0x360] ss:$8 sps:$4 sm:$0xff]   ;;  %v10333_v53 = vrot.slane %v10331_v57, 1 }
 0x66e   : > { %9891 = vmatpush1.bf16.msra.mxu0 %v15538_v0  ;;  %9914 = vmatprep.mubr.bf16.mxu0 %v19249_v59  ;;  %v15613_v0 = vld [vmem:[%s20829_s7 + $0x370] ss:$8 sps:$4 sm:$0xff]  }
 0x66f   : > { %9892 = vmatprep.subr.bf16.mxu0 %v15546_v51  ;;  %v15621_v51 = vld [vmem:[%s20829_s7 + $0x364] ss:$8 sps:$4 sm:$0xff]  }
 0x670   : > { %9862 = vmatpush2.bf16.msra.mxu1 %v15559_v6  ;;  %v15628_v6 = vld [vmem:[%s20829_s7 + $0x354] ss:$8 sps:$4 sm:$0xff]  }
 0x671   : > { %9863 = vmatprep.subr.bf16.mxu1 %v15567_v39  ;;  %v15626_v39 = vld [vmem:[%s20829_s7 + $0x350] ss:$8 sps:$4 sm:$0xff]  }
 0x672   : > { %9893 = vmatpush1.bf16.msra.mxu0 %v15544_v42  ;;  %v15629_v42 = vld [vmem:[%s20829_s7 + $0x420] ss:$8 sps:$4 sm:$0xff]  }
 0x673   : > { %9894 = vmatprep.subr.bf16.mxu0 %v15552_v35  ;;  %v15637_v35 = vld [vmem:[%s20829_s7 + $0x414] ss:$8 sps:$4 sm:$0xff]  }
 0x674   : > { %9864 = vmatpush2.bf16.msra.mxu1 %v15565_v8  ;;  %v15634_v8 = vld [vmem:[%s20829_s7 + $0x344] ss:$8 sps:$4 sm:$0xff]  }
 0x675   : > { %9865 = vmatprep.subr.bf16.mxu1 %v15576_v17  ;;  %v15632_v17 = vld [vmem:[%s20829_s7 + $0x340] ss:$8 sps:$4 sm:$0xff]  }
 0x676   : > { %9895 = vmatpush1.bf16.msra.mxu0 %v15550_v20  ;;  %v15635_v20 = vld [vmem:[%s20829_s7 + $0x410] ss:$8 sps:$4 sm:$0xff]  }
 0x677   : > { %9896 = vmatprep.subr.bf16.mxu0 %v15558_v47  ;;  %v15643_v47 = vld [vmem:[%s20829_s7 + $0x404] ss:$8 sps:$4 sm:$0xff]  }
 0x678   : > { %9866 = vmatpush2.bf16.msra.mxu1 %v15574_v27  ;;  %v15647_v27 = vld [vmem:[%s20829_s7 + $0x3f0] ss:$8 sps:$4 sm:$0xff]  }
 0x679   : > { %9867 = vmatprep.subr.bf16.mxu1 %v15582_v52  ;;  %v15646_v52 = vld [vmem:[%s20829_s7 + $0x324] ss:$8 sps:$4 sm:$0xff]  }
 0x67a   : > { %9897 = vmatpush1.bf16.msra.mxu0 %v15556_v21  ;;  %v15641_v21 = vld [vmem:[%s20829_s7 + $0x400] ss:$8 sps:$4 sm:$0xff]  }
 0x67b   : > { %10189 = vmatprep.subr.bf16.mxu0 %v15564_v2  ;;  %v15649_v2 = vld [vmem:[%s20829_s7 + $0x3f4] ss:$8 sps:$4 sm:$0xff]  }
 0x67c   : > { %9868 = vmatpush2.bf16.msra.mxu1 %v15580_v32  ;;  %v15644_v32 = vld [vmem:[%s20829_s7 + $0x320] ss:$8 sps:$4 sm:$0xff]  }
 0x67d   : > { %13633 = vmatmul.mubr.msk.bf16.vlgmr.msra.gmra.mxu0 %vm9551_vm14, %v20021_v14  ;;  %v15579_v14 = vld [vmem:[%s20829_s7 + $0x2d4] ss:$8 sps:$4 sm:$0xff]   ;;  %9869 = vmatprep.subr.bf16.mxu1 %v15588_v19 }
 0x67e   : > { %10190 = vmatpush1.bf16.msra.mxu0 %v15562_v58  ;;  %10221 = vmatprep.mubr.bf16.mxu0 %v9982_v30  ;;  %v15638_v58 = vld [vmem:[%s20829_s7 + $0x330] ss:$8 sps:$4 sm:$0xff]   ;;  %v15653_v30 = vld [vmem:[%s20829_s7 + $0x3e0] ss:$8 sps:$4 sm:$0xff]   ;;  %v15652_v19 = vld [vmem:[%s20829_s7 + $0x314] ss:$8 sps:$4 sm:$0xff]  }
 0x67f   : > { %10191 = vmatprep.subr.bf16.mxu0 %v15573_v25  ;;  %v15655_v25 = vld [vmem:[%s20829_s7 + $0x3e4] ss:$8 sps:$4 sm:$0xff]  }
 0x680   : > { %9870 = vmatpush2.bf16.msra.mxu1 %v15586_v41  ;;  %v15650_v41 = vld [vmem:[%s20829_s7 + $0x310] ss:$8 sps:$4 sm:$0xff]  }
 0x681   : > { %9871 = vmatprep.subr.bf16.mxu1 %v15594_v36  ;;  %v15658_v36 = vld [vmem:[%s20829_s7 + $0x304] ss:$8 sps:$4 sm:$0xff]  }
 0x682   : > { %10192 = vmatpush1.bf16.msra.mxu0 %v15571_v26  ;;  %v15661_v26 = vld [vmem:[%s20829_s7 + $0x3d4] ss:$8 sps:$4 sm:$0xff]  }
 0x683   : > { %10193 = vmatprep.subr.bf16.mxu0 %v15579_v14  ;;  %v15659_v14 = vld [vmem:[%s20829_s7 + $0x3d0] ss:$8 sps:$4 sm:$0xff]  }
 0x684   : > { %9872 = vmatpush2.bf16.msra.mxu1 %v15592_v49  ;;  %v15656_v49 = vld [vmem:[%s20829_s7 + $0x300] ss:$8 sps:$4 sm:$0xff]  }
 0x685   : > { %10238 = vmatprep.subr.bf16.mxu1 %v15600_v3  ;;  %v20353_v3 = vld [vmem:[#allocation4] ss:$12 sps:$4 sm:$0x1e]  }
 0x686   : > { %10194 = vmatpush1.bf16.msra.mxu0 %v15577_v22  ;;  %v15667_v22 = vld [vmem:[%s20829_s7 + $0x3c4] ss:$8 sps:$4 sm:$0xff]  }
 0x687   : > { %10195 = vmatprep.subr.bf16.mxu0 %v15585_v7  ;;  %9874 = vmatmul.mubr.bf16.vlgmr.msra.gmra.mxu1 %v20092_v18  ;;  %v15618_v18 = vld [vmem:[%s20829_s7 + $0x384] ss:$8 sps:$4 sm:$0xff]   ;;  %v15665_v7 = vld [vmem:[%s20829_s7 + $0x3c0] ss:$8 sps:$4 sm:$0xff]  }
 0x688   : > { %10239 = vmatpush1.bf16.msra.mxu1 %v15598_v11  ;;  %10262 = vmatprep.mubr.bf16.mxu1 %v19249_v59  ;;  %v15671_v11 = vld [vmem:[%s20829_s7 + $0x4b0] ss:$8 sps:$4 sm:$0xff]  }
 0x689   : > { %10240 = vmatprep.subr.bf16.mxu1 %v15606_v12  ;;  %v15679_v12 = vld [vmem:[%s20829_s7 + $0x4a4] ss:$8 sps:$4 sm:$0xff]  }
 0x68a   : > { %10196 = vmatpush1.bf16.msra.mxu0 %v15583_v56  ;;  %v15673_v56 = vld [vmem:[%s20829_s7 + $0x4b4] ss:$8 sps:$4 sm:$0xff]  }
 0x68b   : > { %10197 = vmatprep.subr.bf16.mxu0 %v15591_v1  ;;  %v15664_v1 = vld [vmem:[%s20829_s7 + $0x4f4] ss:$8 sps:$4 sm:$0xff]  }
 0x68c   : > { %10241 = vmatpush1.bf16.msra.mxu1 %v15604_v60  ;;  %v15670_v60 = vld [vmem:[%s20829_s7 + $0x4e4] ss:$8 sps:$4 sm:$0xff]  }
 0x68d   : > { %10242 = vmatprep.subr.bf16.mxu1 %v15612_v5  ;;  %v15668_v5 = vld [vmem:[%s20829_s7 + $0x4e0] ss:$8 sps:$4 sm:$0xff]  }
 0x68e   : > { %10198 = vmatpush1.bf16.msra.mxu0 %v15589_v50  ;;  %v15662_v50 = vld [vmem:[%s20829_s7 + $0x4f0] ss:$8 sps:$4 sm:$0xff]  }
 0x68f   : > { %10199 = vmatprep.subr.bf16.mxu0 %v15597_v33  ;;  %v9981_v33 = vrot.slane %v20353_v3, 1 }
 0x690   : > { %10243 = vmatpush1.bf16.msra.mxu1 %v15610_v61  ;;  %v15676_v61 = vld [vmem:[%s20829_s7 + $0x4d4] ss:$8 sps:$4 sm:$0xff]  }
 0x691   : > { %10244 = vmatprep.subr.bf16.mxu1 %v15618_v18  ;;  %v15674_v18 = vld [vmem:[%s20829_s7 + $0x4d0] ss:$8 sps:$4 sm:$0xff]  }
 0x692   : > { %10200 = vmatpush1.bf16.msra.mxu0 %v15595_v37  ;;  %v15677_v37 = vld [vmem:[%s20829_s7 + $0x4a0] ss:$8 sps:$4 sm:$0xff]  }
 0x693   : > { %10201 = vmatprep.subr.bf16.mxu0 %v15603_v48  ;;  %v15685_v48 = vld [vmem:[%s20829_s7 + $0x494] ss:$8 sps:$4 sm:$0xff]  }
 0x694   : > { %10245 = vmatpush1.bf16.msra.mxu1 %v15616_v55  ;;  %v15686_v55 = vld [vmem:[%s20829_s7 + $0x480] ss:$8 sps:$4 sm:$0xff]  }
 0x695   : > { %10543 = vmatprep.subr.bf16.mxu1 %v15625_v45  ;;  %v15680_v45 = vld [vmem:[%s20829_s7 + $0x4c0] ss:$8 sps:$4 sm:$0xff]  }
 0x696   : > { %10202 = vmatpush1.bf16.msra.mxu0 %v15601_v16  ;;  %v15683_v16 = vld [vmem:[%s20829_s7 + $0x490] ss:$8 sps:$4 sm:$0xff]  }
 0x697   : > { %10203 = vmatprep.subr.bf16.mxu0 %v15609_v15  ;;  %13717 = vmatmul.mubr.msk.bf16.vlgmr.msra.gmra.mxu1 %vm9551_vm14, %v9983_v13  ;;  %v15688_v15 = vld [vmem:[%s20829_s7 + $0x484] ss:$8 sps:$4 sm:$0xff]   ;;  %v15692_v13 = vld [vmem:[%s20829_s7 + $0x460] ss:$8 sps:$4 sm:$0xff]  }
 0x698   : > { %10544 = vmatpush1.bf16.msra.mxu1 %v15623_v9  ;;  %10575 = vmatprep.mubr.bf16.mxu1 %v10329_v31  ;;  %v15694_v9 = vld [vmem:[%s20829_s7 + $0x464] ss:$8 sps:$4 sm:$0xff]  }
 0x699   : > { %10545 = vmatprep.subr.bf16.mxu1 %v15631_v28  ;;  %v15697_v28 = vld [vmem:[%s20829_s7 + $0x454] ss:$8 sps:$4 sm:$0xff]   ;;  %v15700_v31 = vld [vmem:[%s20829_s7 + $0x444] ss:$8 sps:$4 sm:$0xff]  }
 0x69a   : > { %10204 = vmatpush1.bf16.msra.mxu0 %v15607_v54  ;;  %v10334_v54 = vshll.u32 %v20250_v10, 16  ;;  %v15689_v10 = vld [vmem:[%s20829_s7 + $0x470] ss:$8 sps:$4 sm:$0xff]  }
 0x69b   : > { %10205 = vmatprep.subr.bf16.mxu0 %v15615_v24  ;;  %v15691_v24 = vld [vmem:[%s20829_s7 + $0x474] ss:$8 sps:$4 sm:$0xff]  }
 0x69c   : > { %10546 = vmatpush1.bf16.msra.mxu1 %v15629_v42  ;;  %v10336_v62 = vrot.slane %v10334_v54, 2  ;;  %v10315_v42 = vshrl.u32 %v20353_v3, 16 }
 0x69d   : > { %10547 = vmatprep.subr.bf16.mxu1 %v15637_v35  ;;  %v15698_v35 = vld [vmem:[%s20829_s7 + $0x440] ss:$8 sps:$4 sm:$0xff]  }
 0x69e   : > { %10206 = vmatpush2.bf16.msra.mxu0 %v15613_v0  ;;  %v10337_v0 = vor.u32 %v10336_v62, %v10333_v53  ;;  %v15720_v53 = vld [vmem:[%s20831_s9 + $0x48] sm:$0xff]   ;;  %v15721_v62 = vld [vmem:[%s20831_s9 + $0xb0] sm:$0xff]  }
 0x69f   : > { %10207 = vmatprep.subr.bf16.mxu0 %v15621_v51  ;;  %v15695_v51 = vld [vmem:[%s20829_s7 + $0x450] ss:$8 sps:$4 sm:$0xff]  }
 0x6a0   : > { %10548 = vmatpush1.bf16.msra.mxu1 %v15635_v20 }
 0x6a1   : > { %10549 = vmatprep.subr.bf16.mxu1 %v15643_v47 }
 0x6a2   : > { %10208 = vmatpush2.bf16.msra.mxu0 %v15619_v29  ;;  %v10318_v29 = vshll.u32 %v20353_v3, 16  ;;  %v15710_v3 = vld [vmem:[%s20831_s9 + $0x10] sm:$0xff]  }
 0x6a3   : > { %10209 = vmatprep.subr.bf16.mxu0 %v15628_v6  ;;  %v10317_v6 = vrot.slane %v10315_v42, 1 }
 0x6a4   : > { %10550 = vmatpush1.bf16.msra.mxu1 %v15641_v21  ;;  %v10320_v20 = vrot.slane %v10318_v29, 2 }
 0x6a5   : > { %10551 = vmatprep.subr.bf16.mxu1 %v15649_v2  ;;  %v15701_v2 = vld [vmem:[%s20831_s9 + $0x38] sm:$0xff]  }
 0x6a6   : > { %10210 = vmatpush2.bf16.msra.mxu0 %v15626_v39  ;;  %v10321_v39 = vor.u32 %v10320_v20, %v10317_v6 }
 0x6a7   : > { %10211 = vmatprep.subr.bf16.mxu0 %v15634_v8 }
 0x6a8   : > { %10552 = vmatpush1.bf16.msra.mxu1 %v15647_v27 }
 0x6a9   : > { %10553 = vmatprep.subr.bf16.mxu1 %v15655_v25 }
 0x6aa   : > { %10212 = vmatpush2.bf16.msra.mxu0 %v15632_v17 }
 0x6ab   : > { %10213 = vmatprep.subr.bf16.mxu0 %v15640_v43 }
 0x6ac   : > { %10554 = vmatpush1.bf16.msra.mxu1 %v15653_v30 }
 0x6ad   : > { %10555 = vmatprep.subr.bf16.mxu1 %v15661_v26 }
 0x6ae   : > { %10214 = vmatpush2.bf16.msra.mxu0 %v15638_v58 }
 0x6af   : > { %10215 = vmatprep.subr.bf16.mxu0 %v15646_v52  ;;  %v15702_v52 = vld [vmem:[%s20831_s9 + $0x30] sm:$0xff]  }
 0x6b0   : > { %10556 = vmatpush1.bf16.msra.mxu1 %v15659_v14  ;;  %v15705_v14 = vld [vmem:[%s20831_s9 + $0x90] sm:$0xff]  }
 0x6b1   : > { %10557 = vmatprep.subr.bf16.mxu1 %v15667_v22  ;;  %v15707_v22 = vld [vmem:[%s20831_s9 + $0x88] sm:$0xff]  }
 0x6b2   : > { %10216 = vmatpush2.bf16.msra.mxu0 %v15644_v32  ;;  %v15703_v32 = vld [vmem:[%s20831_s9 + $0x98] sm:$0xff]  }
 0x6b3   : > { %10217 = vmatprep.subr.bf16.mxu0 %v15652_v19  ;;  %v15704_v19 = vld [vmem:[%s20831_s9 + $0x28] sm:$0xff]  }
 0x6b4   : > { %10558 = vmatpush1.bf16.msra.mxu1 %v15665_v7 }
 0x6b5   : > { %10559 = vmatprep.subr.bf16.mxu1 %v15673_v56 }
 0x6b6   : > { %10218 = vmatpush2.bf16.msra.mxu0 %v15650_v41  ;;  %v15706_v41 = vld [vmem:[%s20831_s9 + $0x20] sm:$0xff]  }
 0x6b7   : > { %10219 = vmatprep.subr.bf16.mxu0 %v15658_v36  ;;  %v15708_v36 = vld [vmem:[%s20831_s9 + $0x18] sm:$0xff]  }
 0x6b8   : > { %10560 = vmatpush2.bf16.msra.mxu1 %v15671_v11  ;;  %v15711_v11 = vld [vmem:[%s20831_s9 + $0x78] sm:$0xff]  }
 0x6b9   : > { %10561 = vmatprep.subr.bf16.mxu1 %v15679_v12  ;;  %v15712_v12 = vld [vmem:[%s20831_s9 + $0x8] sm:$0xff]  }
 0x6ba   : > { %10220 = vmatpush2.bf16.msra.mxu0 %v15656_v49  ;;  %v15709_v49 = vld [vmem:[%s20831_s9 + $0x80] sm:$0xff]  }
 0x6bb   : > { %10592 = vmatprep.subr.bf16.mxu0 %v15664_v1 }
 0x6bc   : > { %10562 = vmatpush2.bf16.msra.mxu1 %v15677_v37  ;;  %v15715_v37 = vld [vmem:[%s20831_s9 + $0x68] sm:$0xff]  }
 0x6bd   : > { %10222 = vmatmul.mubr.bf16.vlgmr.msra.gmra.mxu0 %v9981_v33  ;;  %10563 = vmatprep.subr.bf16.mxu1 %v15685_v48  ;;  %v15713_v33 = vld [vmem:[%s20831_s9 + $0x70] sm:$0xff]  }
 0x6be   : > { %10593 = vmatpush1.bf16.msra.mxu0 %v15662_v50  ;;  %10616 = vmatprep.mubr.bf16.mxu0 %v19249_v59 }
 0x6bf   : > { %10594 = vmatprep.subr.bf16.mxu0 %v15670_v60  ;;  %v15714_v60 = vld [vmem:[%s20831_s9] sm:$0xff]  }
 0x6c0   : > { %10564 = vmatpush2.bf16.msra.mxu1 %v15683_v16 }
 0x6c1   : > { %10565 = vmatprep.subr.bf16.mxu1 %v15688_v15  ;;  %v15718_v15 = vld [vmem:[%s20831_s9 + $0x50] sm:$0xff]  }
 0x6c2   : > { %10595 = vmatpush1.bf16.msra.mxu0 %v15668_v5  ;;  %v15716_v5 = vld [vmem:[%s20831_s9 + $0x58] sm:$0xff]  }
 0x6c3   : > { %10596 = vmatprep.subr.bf16.mxu0 %v15676_v61  ;;  %v15717_v61 = vld [vmem:[%s20831_s9 + $0x60] sm:$0xff]  }
 0x6c4   : > { %10566 = vmatpush2.bf16.msra.mxu1 %v15686_v55  ;;  %v15719_v55 = vld [vmem:[%s20831_s9 + $0xb8] sm:$0xff]  }
 0x6c5   : > { %10567 = vmatprep.subr.bf16.mxu1 %v15691_v24 }
 0x6c6   : > { %10597 = vmatpush1.bf16.msra.mxu0 %v15674_v18 }
 0x6c7   : > { %10598 = vmatprep.subr.bf16.mxu0 %v15682_v40 }
 0x6c8   : > { %10568 = vmatpush2.bf16.msra.mxu1 %v15689_v10  ;;  %v15722_v10 = vld [vmem:[%s20831_s9 + $0x40] sm:$0xff]  }
 0x6c9   : > { %10569 = vmatprep.subr.bf16.mxu1 %v15694_v9  ;;  %v15723_v9 = vld [vmem:[%s20831_s9 + $0xa8] sm:$0xff]  }
 0x6ca   : > { %10599 = vmatpush1.bf16.msra.mxu0 %v15680_v45 }
 0x6cb   : > { %10845 = vmatprep.subr.bf16.mxu0 %v19249_v59 }
 0x6cc   : > { %10570 = vmatpush2.bf16.msra.mxu1 %v15692_v13  ;;  %v15727_v13 = vld [vmem:[%s20831_s9 + $0xa0] sm:$0xff]  }
 0x6cd   : > { %13798 = vmatmul.mubr.msk.bf16.vlgmr.msra.gmra.mxu0 %vm9551_vm14, %v10337_v0  ;;  %10571 = vmatprep.subr.bf16.mxu1 %v15697_v28 }
 0x6ce   : > { %10846 = vmatpush1.bf16.msra.mxu0 %v15703_v32 }
 0x6cf   : > { %10847 = vmatprep.subr.bf16.mxu0 %v19249_v59 }
 0x6d0   : > { %10572 = vmatpush2.bf16.msra.mxu1 %v15695_v51 }
 0x6d1   : > { %10573 = vmatprep.subr.bf16.mxu1 %v15700_v31 }
 0x6d2   : > { %10848 = vmatpush1.bf16.msra.mxu0 %v15705_v14 }
 0x6d3   : > { %10849 = vmatprep.subr.bf16.mxu0 %v19249_v59 }
 0x6d4   : > { %10574 = vmatpush2.bf16.msra.mxu1 %v15698_v35 }
 0x6d5   : > { %10960 = vmatprep.subr.bf16.mxu1 %v19249_v59 }
 0x6d6   : > { %10850 = vmatpush1.bf16.msra.mxu0 %v15707_v22 }
 0x6d7   : > { %10576 = vmatmul.mubr.bf16.vlgmr.msra.gmra.mxu1 %v10321_v39  ;;  %10851 = vmatprep.subr.bf16.mxu0 %v19249_v59 }
 0x6d8   : > { %10961 = vmatpush1.bf16.msra.mxu1 %v15701_v2  ;;  %v10627_v2 = vld [vmem:[%s20830_s8] sm:$0x3] }
 0x6d9   : > { %10962 = vmatprep.subr.bf16.mxu1 %v19249_v59 }
 0x6da   : > { %10852 = vmatpush1.bf16.msra.mxu0 %v15709_v49 }
 0x6db   : > { %10853 = vmatprep.subr.bf16.mxu0 %v19249_v59 }
 0x6dc   : > { %10963 = vmatpush1.bf16.msra.mxu1 %v15702_v52 }
 0x6dd   : > { %10964 = vmatprep.subr.bf16.mxu1 %v19249_v59 }
 0x6de   : > { %10854 = vmatpush1.bf16.msra.mxu0 %v15711_v11 }
 0x6df   : > { %10855 = vmatprep.subr.bf16.mxu0 %v19249_v59 }
 0x6e0   : > { %10965 = vmatpush1.bf16.msra.mxu1 %v15704_v19  ;;  %v10636_v19 = vrot.slane %v10627_v2, %v17597_v44 }
 0x6e1   : > { %10966 = vmatprep.subr.bf16.mxu1 %v19249_v59 }
 0x6e2   : > { %10856 = vmatpush1.bf16.msra.mxu0 %v15713_v33 }
 0x6e3   : > { %10857 = vmatprep.subr.bf16.mxu0 %v19249_v59 }
 0x6e4   : > { %10967 = vmatpush1.bf16.msra.mxu1 %v15706_v41 }
 0x6e5   : > { %10968 = vmatprep.subr.bf16.mxu1 %v19249_v59 }
 0x6e6   : > { %10858 = vmatpush1.bf16.msra.mxu0 %v15715_v37 }
 0x6e7   : > { %10859 = vmatprep.subr.bf16.mxu0 %v19249_v59 }
 0x6e8   : > { %10969 = vmatpush1.bf16.msra.mxu1 %v15708_v36 }
 0x6e9   : > { %10970 = vmatprep.subr.bf16.mxu1 %v19249_v59 }
 0x6ea   : > { %10860 = vmatpush1.bf16.msra.mxu0 %v15717_v61 }
 0x6eb   : > { %10869 = vmatprep.subr.bf16.mxu0 %v19249_v59 }
 0x6ec   : > { %10971 = vmatpush1.bf16.msra.mxu1 %v15710_v3 }
 0x6ed   : > { %10972 = vmatprep.subr.bf16.mxu1 %v19249_v59 }
 0x6ee   : > { %10870 = vmatpush2.bf16.msra.mxu0 %v15719_v55  ;;  %v10673_v55 = vld [vmem:[#allocation5] sm:$0x11] }
 0x6ef   : > { %10871 = vmatprep.subr.bf16.mxu0 %v19249_v59 }
 0x6f0   : > { %10973 = vmatpush1.bf16.msra.mxu1 %v15712_v12 }
 0x6f1   : > { %10974 = vmatprep.subr.bf16.mxu1 %v19249_v59 }
 0x6f2   : > { %10872 = vmatpush2.bf16.msra.mxu0 %v15721_v62 }
 0x6f3   : > { %10873 = vmatprep.subr.bf16.mxu0 %v19249_v59 }
 0x6f4   : > { %10975 = vmatpush1.bf16.msra.mxu1 %v15714_v60 }
 0x6f5   : > { %10984 = vmatprep.subr.bf16.mxu1 %v19249_v59 }
 0x6f6   : > { %10874 = vmatpush2.bf16.msra.mxu0 %v15723_v9 }
 0x6f7   : > { %10875 = vmatprep.subr.bf16.mxu0 %v19249_v59 }
 0x6f8   : > { %10985 = vmatpush2.bf16.msra.mxu1 %v15716_v5 }
 0x6f9   : > { %10986 = vmatprep.subr.bf16.mxu1 %v19249_v59 }
 0x6fa   : > { %10876 = vmatpush2.bf16.msra.mxu0 %v15727_v13 }
 0x6fb   : > { %11109 = vmatprep.subr.bf16.mxu0 %v19249_v59 }
 0x6fc   : > { %10987 = vmatpush2.bf16.msra.mxu1 %v15718_v15 }
 0x6fd   : > { %10988 = vmatprep.subr.bf16.mxu1 %v19249_v59 }
 0x700   : > { %v9630_v47 = vpop.f32.mrf.mxu1  ;;  %10989 = vmatpush2.bf16.msra.mxu1 %v15720_v53 }
 0x701   : > { %10990 = vmatprep.subr.bf16.mxu1 %v19249_v59 }
 0x702   : > { %v9632_v8 = vpop.f32.mrf.mxu1 }
 0x704   : > { %v9634_v21 = vpop.f32.mrf.mxu1  ;;  %10991 = vmatpush2.bf16.msra.mxu1 %v15722_v10 }
 0x705   : > { %11267 = vmatprep.subr.bf16.mxu1 %v19249_v59 }
 0x706   : > { %v9635_v17 = vpop.f32.mrf.mxu1 }
 0x72d   : > { %v9589_v43 = vpop.f32.mrf.mxu0 }
 0x72e   : > { %v9631_v27 = vadd.f32 %v9630_v47, %v9589_v43 }
 0x72f   : > { %v9591_v58 = vpop.f32.mrf.mxu0 }
 0x730   : > { %v9633_v25 = vadd.f32 %v9632_v8, %v9591_v58 }
 0x731   : > { %v9593_v30 = vpop.f32.mrf.mxu0 }
 0x733   : > { %v9594_v26 = vpop.f32.mrf.mxu0 }
 0x73d   : > { %v9916_v7 = vpop.f32.mrf.mxu0 }
 0x73f   : > { %v9918_v56 = vpop.f32.mrf.mxu0 }
 0x741   : > { %v9920_v1 = vpop.f32.mrf.mxu0 }
 0x743   : > { %v9921_v50 = vpop.f32.mrf.mxu0 }
 0x747   : > { %v9875_v48 = vpop.f32.mrf.mxu1 }
 0x748   : > { %v9876_v16 = vadd.f32 %v9875_v48, %v9631_v27  ;;  %v15749_v48 = vld [vmem:[%s20831_s9 + $0x110] sm:$0xff]  }
 0x749   : > { %v9877_v18 = vpop.f32.mrf.mxu1 }
 0x74a   : > { %v9917_v40 = vadd.f32 %v9916_v7, %v9876_v16  ;;  %v9878_v57 = vadd.f32 %v9877_v18, %v9633_v25  ;;  %v10632_v25 = vrot.slane %v10627_v2, %v17589_v4 }
 0x74b   : > { %v9879_v54 = vpop.f32.mrf.mxu1 }
 0x74c   : > { %v9919_v45 = vadd.f32 %v9918_v56, %v9878_v57  ;;  %v10680_v57 = vld [vmem:[#allocation5] sm:$0x22] }
 0x74d   : > { %v9880_v24 = vpop.f32.mrf.mxu1 }
 0x757   : > { %v10264_v0 = vpop.f32.mrf.mxu1 }
 0x759   : > { %v10266_v28 = vpop.f32.mrf.mxu1 }
 0x75b   : > { %v10268_v51 = vpop.f32.mrf.mxu1 }
 0x75d   : > { %v10269_v31 = vpop.f32.mrf.mxu1 }
 0x77d   : > { %v10223_v42 = vpop.f32.mrf.mxu0 }
 0x77e   : > { %v10265_v29 = vadd.f32 %v10264_v0, %v10223_v42 }
 0x77f   : > { %v10225_v35 = vpop.f32.mrf.mxu0 }
 0x780   : > { %v10271_v6 = vadd.f32 %v10265_v29, %v9917_v40  ;;  %v10267_v43 = vadd.f32 %v10266_v28, %v10225_v35  ;;  %v15726_v29 = vld [vmem:[%s20831_s9 + $0x158] sm:$0xff]  }
 0x781   : > { %v10227_v20 = vpop.f32.mrf.mxu0 }
 0x782   : > { %v10272_v30 = vadd.f32 %v10267_v43, %v9919_v45  ;;  %v10697_v45 = vld [vmem:[#allocation5] sm:$0x44] }
 0x783   : > { %v10228_v39 = vpop.f32.mrf.mxu0 }
 0x78d   : > { %v10618_v47 = vpop.f32.mrf.mxu0 }
 0x78f   : > { %v10620_v8 = vpop.f32.mrf.mxu0 }
 0x791   : > { %v10622_v21 = vpop.f32.mrf.mxu0 }
 0x793   : > { %v10623_v17 = vpop.f32.mrf.mxu0 }
 0x797   : > { %v10577_v27 = vpop.f32.mrf.mxu1 }
 0x798   : > { %v10619_v58 = vadd.f32 %v10618_v47, %v10577_v27 }
 0x799   : > { %v10579_v52 = vpop.f32.mrf.mxu1 }
 0x79a   : > { %v10625_v32 = vadd.f32 %v10619_v58, %v10271_v6  ;;  %v10621_v26 = vadd.f32 %v10620_v8, %v10579_v52  ;;  %v15728_v8 = vld [vmem:[%s20831_s9 + $0x150] sm:$0xff]   ;;  %v15731_v52 = vld [vmem:[%s20831_s9 + $0xf8] sm:$0xff]  }
 0x79b   : > { %v10581_v14 = vpop.f32.mrf.mxu1 }
 0x79c   : > { %v10639_v41 = vadd.f32 %v10632_v25, %v10625_v32  ;;  %v10626_v22 = vadd.f32 %v10621_v26, %v10272_v30  ;;  %v15732_v26 = vld [vmem:[%s20831_s9 + $0x148] sm:$0xff]   ;;  %v15734_v14 = vld [vmem:[%s20831_s9 + $0x140] sm:$0xff]  }
 0x79d   : > { %v10582_v36 = vpop.f32.mrf.mxu1 }
 0x79e   : > { %v10641_v7 = vmin.f32 %v10639_v41, 0.0  ;;  %v10640_v49 = vadd.f32 %v10636_v19, %v10626_v22  ;;  %vm10655_vm15 = vcmp.gt.f32.partialorder %v10639_v41, 0.0  ;;  %v15733_v19 = vld [vmem:[%s20831_s9 + $0xf0] sm:$0xff]   ;;  %v15736_v22 = vld [vmem:[%s20831_s9 + $0x138] sm:$0xff]   ;;  %v15737_v36 = vld [vmem:[%s20831_s9 + $0xe0] sm:$0xff]  }
 0x7a0   : > { %v10643_v56 = vmul.f32 0.5, %v10641_v7  ;;  %v10647_v3 = vmul.f32 1.442695, %v10641_v7  ;;  %v10642_v1 = vmin.f32 %v10640_v49, 0.0  ;;  %vm10656_vm10 = vcmp.gt.f32.partialorder %v10640_v49, 0.0  ;;  %v15738_v7 = vld [vmem:[%s20831_s9 + $0x130] sm:$0xff]  }
 0x7a2   : > { %v10649_v11 = vmul.f32 1.442695, %v10642_v1  ;;  %15905 = vpow2.f32 %v10647_v3  ;;  %v10644_v50 = vmul.f32 0.5, %v10642_v1  ;;  %v15741_v3 = vld [vmem:[%s20831_s9 + $0xd0] sm:$0xff]   ;;  %v15742_v1 = vld [vmem:[%s20831_s9 + $0x120] sm:$0xff]  }
 0x7a3   : > { %15907 = vtanh.f32 %v10643_v56  ;;  %v15740_v56 = vld [vmem:[%s20831_s9 + $0x128] sm:$0xff]  }
 0x7a4   : > { %15909 = vpow2.f32 %v10649_v11  ;;  %v15743_v11 = vld [vmem:[%s20831_s9 + $0xc8] sm:$0xff]  }
 0x7a5   : > { %15911 = vtanh.f32 %v10644_v50  ;;  %v15744_v50 = vld [vmem:[%s20831_s9 + $0x178] sm:$0xff]  }
 0x7af   : > { %v15906_v4 = vpop.eup %15905 }
 0x7b0   : > { %v15908_v12 = vpop.eup %15907  ;;  %v10651_v33 = vadd.f32 1.0, %v15906_v4  ;;  %v15745_v4 = vld [vmem:[%s20831_s9 + $0xc0] sm:$0xff]  }
 0x7b1   : > { %v15910_v44 = vpop.eup %15909 }
 0x7b2   : > { %v10653_v60 = vmul.f32 %v15908_v12, %v10651_v33  ;;  %v10652_v37 = vadd.f32 1.0, %v15910_v44  ;;  %v15912_v5 = vpop.eup %15911  ;;  %v15746_v12 = vld [vmem:[%s20831_s9 + $0x170] sm:$0xff]   ;;  %v15747_v44 = vld [vmem:[%s20831_s9 + $0x118] sm:$0xff]  }
 0x7b4   : > { %v10654_v61 = vmul.f32 %v15912_v5, %v10652_v37  ;;  %v10657_v15 = vsel %vm10655_vm15, %v10639_v41, %v10653_v60  ;;  %v15735_v41 = vld [vmem:[%s20831_s9 + $0xe8] sm:$0xff]   ;;  %vm11814_vm15 = vcmask 0  }
 0x7b5   : > { %v15748_v60 = vld [vmem:[%s20831_s9 + $0x168] sm:$0xff]  }
 0x7b6   : > { %v10658_v40 = vsel %vm10656_vm10, %v10640_v49, %v10654_v61  ;;  %v15739_v49 = vld [vmem:[%s20831_s9 + $0xd8] sm:$0xff]   ;;  %v15750_v61 = vld [vmem:[%s20831_s9 + $0x160] sm:$0xff]  }
 0x7b7   : > { %v14035_v54 = vpack.c.bf16 %v10658_v40, %v10657_v15  ;;  %v15751_v15 = vld [vmem:[%s20831_s9 + $0x108] sm:$0xff]  }
 0x7b9   : > { %v10667_v24 = vshll.u32 %v14035_v54, 16  ;;  %v10681_v53 = vsel %vm10679_vm3, %v14035_v54, %v10680_v57  ;;  %v13801_v62 = vrot.slane %v14035_v54, 9  ;;  %v15752_v57 = vld [vmem:[%s20831_s9 + $0x100] sm:$0xff]  }
 0x7ba   : > { %10682 = vst [vmem:[#allocation5] sm:$0x22] %v10681_v53  ;;  %v15757_v53 = vld [vmem:[%s20833_s11 + $0x28] sm:$0xff]  }
 0x7bb   : > { %v10674_v10 = vsel %vm10672_vm8, %v10667_v24, %v10673_v55  ;;  %v10698_v9 = vsel %vm10696_vm13, %v13801_v62, %v10697_v45  ;;  %v13800_v0 = vrot.slane %v10667_v24, 9  ;;  %v15753_v55 = vld [vmem:[%s20833_s11 + $0x38] sm:$0xff]   ;;  %v15755_v45 = vld [vmem:[%s20833_s11 + $0x30] sm:$0xff]   ;;  %v15758_v62 = vld [vmem:[%s20833_s11 + $0x68] sm:$0xff]  }
 0x7bc   : > { %10675 = vst [vmem:[#allocation5] sm:$0x11] %v10674_v10  ;;  %10699 = vst [vmem:[#allocation5] sm:$0x44] %v10698_v9  ;;  %v15756_v24 = vld [vmem:[%s20833_s11 + $0x70] sm:$0xff]   ;;  %v15759_v10 = vld [vmem:[%s20833_s11 + $0x20] sm:$0xff]  }
 0x7bd   : > { %v15760_v9 = vld [vmem:[%s20833_s11 + $0x60] sm:$0xff]  }
 0x7c1   : > { %v10688_v38 = vld [vmem:[#allocation5] sm:$0x22] }
 0x7c2   : > { %v10689_v13 = vsel %vm10687_vm6, %v13800_v0, %v10688_v38  ;;  %v15761_v0 = vld [vmem:[%s20833_s11 + $0x18] sm:$0xff]  }
 0x7c3   : > { %10690 = vst [vmem:[#allocation5] sm:$0x22] %v10689_v13  ;;  %v15762_v38 = vld [vmem:[%s20833_s11 + $0x58] sm:$0xff]   ;;  %v15763_v13 = vld [vmem:[%s20833_s11 + $0x10] sm:$0xff]  }
 0x7ca   : > { %v10700_v28 = vld [vmem:[#allocation5] sm:$0x33] }
 0x7cb   : > { %v20567_v51 = vld [vmem:[#allocation5] sm:$0x66]  ;;  %v13826_v31 = vcombine.low %v10700_v28, %v10700_v28  ;;  %v13827_v42 = vcombine.high %v10700_v28, %v10700_v28  ;;  %v15764_v28 = vld [vmem:[%s20833_s11 + $0x50] sm:$0xff]  }
 0x7cc   : > { %v13879_v35 = vcombine.high %v20567_v51, %v20567_v51  ;;  %v13878_v33 = vcombine.low %v20567_v51, %v20567_v51  ;;  %v15765_v51 = vld [vmem:[%s20833_s11 + $0x8] sm:$0xff]  }
 0x7cd   : > { %v10758_v6 = vshll.u32 %v13826_v31, 16  ;;  %13853 = vmatprep.mubr.msk.bf16.mxu1 %vm9551_vm14, %v13827_v42  ;;  %v10765_v23 = vshll.u32 %v13827_v42, 16  ;;  %v10763_v39 = vshrl.u32 %v13827_v42, 16  ;;  %v10756_v2 = vshrl.u32 %v13826_v31, 16  ;;  %v15767_v42 = vld [vmem:[%s20833_s11] sm:$0xff]  }
 0x7ce   : > { %v11184_v20 = vshrl.u32 %v13879_v35, 16  ;;  %10993 = vmatmul.mubr.bf16.vlgmr.msra.gmra.mxu1 %v13826_v31  ;;  %v11187_v47 = vshll.u32 %v13879_v35, 16  ;;  %v11032_v32 = vrot.slane %v13879_v35, 1  ;;  %v11176_v37 = vshrl.u32 %v13878_v33, 16  ;;  %v15766_v31 = vld [vmem:[%s20833_s11 + $0x48] sm:$0xff]  }
 0x7cf   : > { %11268 = vmatpush1.bf16.msra.mxu1 %v15726_v29  ;;  %v10767_v21 = vrot.slane %v10765_v23, 1  ;;  %v10760_v43 = vrot.slane %v10758_v6, 1  ;;  %v11179_v5 = vshll.u32 %v13878_v33, 16  ;;  %v11031_v54 = vrot.slane %v13878_v33, 1  ;;  %v15768_v29 = vld [vmem:[%s20833_s11 + $0x40] sm:$0xff]  }
 0x7d0   : > { %v11186_v17 = vrot.slane %v11184_v20, 1  ;;  %11269 = vmatprep.subr.bf16.mxu1 %v19249_v59  ;;  %v11189_v27 = vrot.slane %v11187_v47, 2  ;;  %v11178_v16 = vrot.slane %v11176_v37, 1 }
 0x7d1   : > { %v10768_v58 = vor.u32 %v10767_v21, %v10763_v39  ;;  %v10761_v25 = vor.u32 %v10760_v43, %v10756_v2  ;;  %v11181_v18 = vrot.slane %v11179_v5, 2 }
 0x7d2   : > { %v11190_v30 = vor.u32 %v11189_v27, %v11186_v17 }
 0x7d3   : > { %11270 = vmatpush1.bf16.msra.mxu1 %v15728_v8  ;;  %13840 = vmatprep.mubr.msk.bf16.mxu0 %vm9551_vm14, %v10768_v58  ;;  %v11182_v40 = vor.u32 %v11181_v18, %v11178_v16 }
 0x7d4   : > { %13929 = vmatprep.mubr.msk.bf16.mxu1 %vm9551_vm14, %v11190_v30  ;;  %10878 = vmatmul.mubr.bf16.vlgmr.msra.gmra.mxu0 %v10761_v25  ;;  %v13930_v30 = vld [vmem:[%s20832_s10] ss:$0 sm:$0xff] }
 0x7d5   : > { %11110 = vmatpush1.bf16.msra.mxu0 %v15731_v52  ;;  %13892 = vmatprep.mubr.msk.bf16.mxu0 %vm9551_vm14, %v11032_v32  ;;  %vm21023_vm14 = vmmov 0  }
 0x7d6   : > { %11271 = vmatprep.subr.bf16.mxu1 %v19249_v59  ;;  %11111 = vmatprep.subr.bf16.mxu0 %v19249_v59 }
 0x7d7   : > { %11272 = vmatpush1.bf16.msra.mxu1 %v15732_v26 }
 0x7d8   : > { %11273 = vmatprep.subr.bf16.mxu1 %v19249_v59 }
 0x7d9   : > { %11112 = vmatpush1.bf16.msra.mxu0 %v15733_v19 }
 0x7da   : > { %11113 = vmatprep.subr.bf16.mxu0 %v19249_v59 }
 0x7db   : > { %11274 = vmatpush1.bf16.msra.mxu1 %v15734_v14 }
 0x7dc   : > { %11275 = vmatprep.subr.bf16.mxu1 %v19249_v59 }
 0x7dd   : > { %11114 = vmatpush1.bf16.msra.mxu0 %v15735_v41 }
 0x7de   : > { %11115 = vmatprep.subr.bf16.mxu0 %v19249_v59 }
 0x7df   : > { %11276 = vmatpush1.bf16.msra.mxu1 %v15736_v22 }
 0x7e0   : > { %11277 = vmatprep.subr.bf16.mxu1 %v19249_v59 }
 0x7e1   : > { %11116 = vmatpush1.bf16.msra.mxu0 %v15737_v36 }
 0x7e2   : > { %11117 = vmatprep.subr.bf16.mxu0 %v19249_v59 }
 0x7e3   : > { %11278 = vmatpush1.bf16.msra.mxu1 %v15738_v7 }
 0x7e4   : > { %11279 = vmatprep.subr.bf16.mxu1 %v19249_v59 }
 0x7e5   : > { %11118 = vmatpush1.bf16.msra.mxu0 %v15739_v49  ;;  %v15945_v49 = vmov 1983009808  }
 0x7e6   : > { %11119 = vmatprep.subr.bf16.mxu0 %v19249_v59 }
 0x7e7   : > { %11280 = vmatpush1.bf16.msra.mxu1 %v15740_v56  ;;  %v11328_v56 = vunpack.c.l.s4 %v15945_v49 }
 0x7e8   : > { %11281 = vmatprep.subr.bf16.mxu1 %v19249_v59 }
 0x7e9   : > { %11120 = vmatpush1.bf16.msra.mxu0 %v15741_v3 }
 0x7ea   : > { %11121 = vmatprep.subr.bf16.mxu0 %v19249_v59 }
 0x7eb   : > { %11282 = vmatpush1.bf16.msra.mxu1 %v15742_v1  ;;  %v11329_v1 = vunpack.c.0.s8 %v11328_v56 }
 0x7ec   : > { %11291 = vmatprep.subr.bf16.mxu1 %v19249_v59 }
 0x7ed   : > { %11122 = vmatpush1.bf16.msra.mxu0 %v15743_v11 }
 0x7ee   : > { %11123 = vmatprep.subr.bf16.mxu0 %v19249_v59 }
 0x7ef   : > { %11292 = vmatpush2.bf16.msra.mxu1 %v15744_v50 }
 0x7f0   : > { %11293 = vmatprep.subr.bf16.mxu1 %v19249_v59 }
 0x7f1   : > { %11124 = vmatpush1.bf16.msra.mxu0 %v15745_v4 }
 0x7f2   : > { %11133 = vmatprep.subr.bf16.mxu0 %v19249_v59 }
 0x7f3   : > { %11294 = vmatpush2.bf16.msra.mxu1 %v15746_v12  ;;  %v21024_v12 = vld [vmem:[#allocation8_spill] sm:$0xff] }
 0x7f4   : > { %11295 = vmatprep.subr.bf16.mxu1 %v19249_v59  ;;  %v11332_v33 = vsub.s32 %v11329_v1, %v21024_v12 }
 0x7f5   : > { %11134 = vmatpush2.bf16.msra.mxu0 %v15747_v44 }
 0x7f6   : > { %11135 = vmatprep.subr.bf16.mxu0 %v19249_v59 }
 0x7f7   : > { %11296 = vmatpush2.bf16.msra.mxu1 %v15748_v60  ;;  %v11341_v60 = vld [vmem:[#allocation6] sm:$0x2] }
 0x7f8   : > { %11297 = vmatprep.subr.bf16.mxu1 %v19249_v59 }
 0x7f9   : > { %11136 = vmatpush2.bf16.msra.mxu0 %v15749_v48 }
 0x7fa   : > { %11137 = vmatprep.subr.bf16.mxu0 %v19249_v59 }
 0x7fb   : > { %11298 = vmatpush2.bf16.msra.mxu1 %v15750_v61  ;;  %v11338_v61 = vld [vmem:[#allocation6] sm:$0x1] }
 0x7fc   : > { %14372 = vmatprep.subr.bf16.mxu1 %v15943_v34 }
 0x7fd   : > { %11138 = vmatpush2.bf16.msra.mxu0 %v15751_v15  ;;  %v15769_v15 = vld [vmem:[%s20833_s11 + $0xf8] sm:$0xff]  }
 0x7fe   : > { %11300 = vmatmul.mubr.bf16.vlgmr.msra.gmra.mxu1 %v11182_v40  ;;  %11139 = vmatprep.subr.bf16.mxu0 %v19249_v59  ;;  %v15754_v59 = vld [vmem:[%s20833_s11 + $0x78] sm:$0xff]  }
 0x7ff   : > { %14388 = vmatprep.mubr.msk.bf16.mxu1 %vm21023_vm14, %v15943_v34  ;;  %14373 = vmatpush3.bf16.msra.mxu1 %v15753_v55  ;;  %v15772_v55 = vld [vmem:[%s20833_s11 + $0xb0] sm:$0xff]  }
 0x800   : > { %14374 = vmatprep.subr.bf16.mxu1 %v15943_v34 }
 0x801   : > { %11140 = vmatpush2.bf16.msra.mxu0 %v15752_v57 }
 0x802   : > { %14352 = vmatprep.subr.bf16.mxu0 %v15943_v34 }
 0x803   : > { %14375 = vmatpush3.bf16.msra.mxu1 %v15755_v45  ;;  %v15774_v45 = vld [vmem:[%s20833_s11 + $0xa8] sm:$0xff]  }
 0x804   : > { %11142 = vmatmul.mubr.bf16.vlgmr.msra.gmra.mxu0 %v11031_v54  ;;  %14376 = vmatprep.subr.bf16.mxu1 %v15943_v34  ;;  %v15771_v54 = vld [vmem:[%s20833_s11 + $0xf0] sm:$0xff]  }
 0x805   : > { %14368 = vmatprep.mubr.msk.bf16.mxu0 %vm21023_vm14, %v15943_v34  ;;  %14353 = vmatpush3.bf16.msra.mxu0 %v15754_v59  ;;  %v15773_v59 = vld [vmem:[%s20833_s11 + $0xe8] sm:$0xff]  }
 0x806   : > { %14354 = vmatprep.subr.bf16.mxu0 %v15943_v34 }
 0x807   : > { %14377 = vmatpush3.bf16.msra.mxu1 %v15757_v53  ;;  %v15776_v53 = vld [vmem:[%s20833_s11 + $0xa0] sm:$0xff]  }
 0x808   : > { %14378 = vmatprep.subr.bf16.mxu1 %v15943_v34 }
 0x809   : > { %14355 = vmatpush3.bf16.msra.mxu0 %v15756_v24  ;;  %v15775_v24 = vld [vmem:[%s20833_s11 + $0xe0] sm:$0xff]  }
 0x80a   : > { %14356 = vmatprep.subr.bf16.mxu0 %v15943_v34 }
 0x80b   : > { %14379 = vmatpush3.bf16.msra.mxu1 %v15759_v10  ;;  %v15778_v10 = vld [vmem:[%s20833_s11 + $0x98] sm:$0xff]  }
 0x80c   : > { %14380 = vmatprep.subr.bf16.mxu1 %v15943_v34 }
 0x80d   : > { %14357 = vmatpush3.bf16.msra.mxu0 %v15758_v62  ;;  %v15777_v62 = vld [vmem:[%s20833_s11 + $0xd8] sm:$0xff]  }
 0x80e   : > { %14358 = vmatprep.subr.bf16.mxu0 %v15943_v34 }
 0x80f   : > { %14381 = vmatpush3.bf16.msra.mxu1 %v15761_v0  ;;  %v15780_v0 = vld [vmem:[%s20833_s11 + $0x90] sm:$0xff]  }
 0x810   : > { %14382 = vmatprep.subr.bf16.mxu1 %v15943_v34 }
 0x811   : > { %14359 = vmatpush3.bf16.msra.mxu0 %v15760_v9  ;;  %v15779_v9 = vld [vmem:[%s20833_s11 + $0xd0] sm:$0xff]  }
 0x812   : > { %14360 = vmatprep.subr.bf16.mxu0 %v15943_v34 }
 0x813   : > { %14383 = vmatpush3.bf16.msra.mxu1 %v15763_v13 }
 0x814   : > { %14384 = vmatprep.subr.bf16.mxu1 %v15943_v34 }
 0x815   : > { %14361 = vmatpush3.bf16.msra.mxu0 %v15762_v38  ;;  %v15781_v38 = vld [vmem:[%s20833_s11 + $0xc8] sm:$0xff]  }
 0x816   : > { %14362 = vmatprep.subr.bf16.mxu0 %v15943_v34 }
 0x817   : > { %14385 = vmatpush3.bf16.msra.mxu1 %v15765_v51  ;;  %v15783_v51 = vld [vmem:[%s20833_s11 + $0xc0] sm:$0xff]  }
 0x818   : > { %14386 = vmatprep.subr.bf16.mxu1 %v15943_v34 }
 0x819   : > { %14363 = vmatpush3.bf16.msra.mxu0 %v15764_v28  ;;  %v15782_v28 = vld [vmem:[%s20833_s11 + $0x88] sm:$0xff]  }
 0x81a   : > { %14364 = vmatprep.subr.bf16.mxu0 %v15943_v34 }
 0x81b   : > { %14387 = vmatpush3.bf16.msra.mxu1 %v15767_v42  ;;  %v15784_v42 = vld [vmem:[%s20833_s11 + $0x80] sm:$0xff]  }
 0x81c   : > { %14412 = vmatprep.subr.bf16.mxu1 %v15943_v34 }
 0x81d   : > { %14365 = vmatpush3.bf16.msra.mxu0 %v15766_v31 }
 0x81e   : > { %14366 = vmatprep.subr.bf16.mxu0 %v15943_v34 }
 0x821   : > { %14367 = vmatpush3.bf16.msra.mxu0 %v15768_v29 }
 0x822   : > { %14392 = vmatprep.subr.bf16.mxu0 %v15943_v34 }
 0x88e   : > { %v10994_v35 = vpop.f32.mrf.mxu1 }
 0x890   : > { %v10996_v6 = vpop.f32.mrf.mxu1 }
 0x892   : > { %v10997_v23 = vpop.f32.mrf.mxu1 }
 0x894   : > { %v10879_v20 = vpop.f32.mrf.mxu0  ;;  %v10998_v39 = vpop.f32.mrf.mxu1 }
 0x895   : > { %v10995_v27 = vadd.f32 %v10994_v35, %v10879_v20 }
 0x896   : > { %v10881_v47 = vpop.f32.mrf.mxu0 }
 0x898   : > { %v10882_v8 = vpop.f32.mrf.mxu0 }
 0x89a   : > { %v10883_v21 = vpop.f32.mrf.mxu0 }
 0x8be   : > { %v11301_v17 = vpop.f32.mrf.mxu1 }
 0x8c0   : > { %v11303_v2 = vpop.f32.mrf.mxu1 }
 0x8c2   : > { %v11304_v43 = vpop.f32.mrf.mxu1 }
 0x8c4   : > { %v11143_v58 = vpop.f32.mrf.mxu0  ;;  %v11305_v25 = vpop.f32.mrf.mxu1 }
 0x8c5   : > { %v11149_v52 = vadd.f32 %v11143_v58, %v10995_v27 }
 0x8c6   : > { %v11145_v32 = vpop.f32.mrf.mxu0 }
 0x8c7   : > { %v11307_v26 = vadd.f32 %v11301_v17, %v11149_v52 }
 0x8c8   : > { %v11146_v19 = vpop.f32.mrf.mxu0 }
 0x8c9   : > { %v11315_v14 = vadd.f32 %v13930_v30, %v11307_v26 }
 0x8ca   : > { %v11147_v41 = vpop.f32.mrf.mxu0 }
 0x8cb   : > { %v11316_v22 = vmin.f32 %v11315_v14, 0.0  ;;  %vm11323_vm11 = vcmp.gt.f32.partialorder %v11315_v14, 0.0 }
 0x8cd   : > { %v11319_v36 = vmul.f32 1.442695, %v11316_v22  ;;  %v11317_v7 = vmul.f32 0.5, %v11316_v22 }
 0x8cf   : > { %15913 = vpow2.f32 %v11319_v36 }
 0x8d0   : > { %15915 = vtanh.f32 %v11317_v7 }
 0x8dc   : > { %v15914_v3 = vpop.eup %15913 }
 0x8dd   : > { %v11321_v11 = vadd.f32 1.0, %v15914_v3  ;;  %v15916_v50 = vpop.eup %15915 }
 0x8df   : > { %v11322_v4 = vmul.f32 %v15916_v50, %v11321_v11 }
 0x8e1   : > { %v11324_v44 = vsel %vm11323_vm11, %v11315_v14, %v11322_v4 }
 0x8e2   : > { %v11325_v37 = vpack.c.bf16 %v11324_v44, %v11324_v44 }
 0x8e4   : > { %v11342_v5 = vsel %vm21018_vm9, %v11325_v37, %v11341_v60  ;;  %v11333_v48 = vrot.slane %v11325_v37, %v11332_v33 }
 0x8e5   : > { %11343 = vst [vmem:[#allocation6] sm:$0x2] %v11342_v5 }
 0x8e6   : > { %v11335_v16 = vshll.u32 %v11333_v48, 16 }
 0x8e8   : > { %v11339_v18 = vsel %vm21019_vm7, %v11335_v16, %v11338_v61 }
 0x8e9   : > { %11340 = vst [vmem:[#allocation6] sm:$0x1] %v11339_v18 }
 0x8ec   : > { %v14004_v13 = vld.sshfl [vmem:[#allocation6] sm:$0x2 pattern:$0x76325410] }
 0x8ed   : > { %v11710_v31 = vshrl.u32 %v14004_v13, 16  ;;  %v11592_v35 = vrot.slane %v14004_v13, 1 }
 0x8ef   : > { %v11712_v29 = vrot.slane %v11710_v31, 1 }
 0x8f0   : > { %v11344_v40 = vld [vmem:[#allocation6] sm:$0x1] }
 0x8f1   : > { %v11385_v57 = vrot.slane %v11344_v40, %v11332_v33  ;;  %14389 = vmatmul.mubr.bf16.vlgmr.msra.gmra.mxu1 %v11344_v40 }
 0x8f2   : > { %14413 = vmatpush3.bf16.msra.mxu1 %v15769_v15  ;;  %14428 = vmatprep.mubr.msk.bf16.mxu1 %vm21023_vm14, %v15943_v34 }
 0x8f3   : > { %v11387_v63 = vshrl.u32 %v11385_v57, 16  ;;  %14414 = vmatprep.subr.bf16.mxu1 %v15943_v34 }
 0x8f5   : > { %14369 = vmatmul.mubr.bf16.vlgmr.msra.gmra.mxu0 %v11387_v63 }
 0x8f6   : > { %14393 = vmatpush3.bf16.msra.mxu0 %v15770_v46  ;;  %14415 = vmatpush3.bf16.msra.mxu1 %v15771_v54 }
 0x8f7   : > { %14394 = vmatprep.subr.bf16.mxu0 %v15943_v34  ;;  %14416 = vmatprep.subr.bf16.mxu1 %v15943_v34 }
 0x8f8   : > { %14408 = vmatprep.mubr.msk.bf16.mxu0 %vm21023_vm14, %v15943_v34 }
 0x8fa   : > { %14395 = vmatpush3.bf16.msra.mxu0 %v15772_v55  ;;  %14417 = vmatpush3.bf16.msra.mxu1 %v15773_v59 }
 0x8fb   : > { %14396 = vmatprep.subr.bf16.mxu0 %v15943_v34  ;;  %14418 = vmatprep.subr.bf16.mxu1 %v15943_v34 }
 0x8fe   : > { %14397 = vmatpush3.bf16.msra.mxu0 %v15774_v45  ;;  %14419 = vmatpush3.bf16.msra.mxu1 %v15775_v24 }
 0x8ff   : > { %14398 = vmatprep.subr.bf16.mxu0 %v15943_v34  ;;  %14420 = vmatprep.subr.bf16.mxu1 %v15943_v34 }
 0x902   : > { %14399 = vmatpush3.bf16.msra.mxu0 %v15776_v53  ;;  %14421 = vmatpush3.bf16.msra.mxu1 %v15777_v62 }
 0x903   : > { %14400 = vmatprep.subr.bf16.mxu0 %v15943_v34  ;;  %14422 = vmatprep.subr.bf16.mxu1 %v15943_v34 }
 0x906   : > { %14401 = vmatpush3.bf16.msra.mxu0 %v15778_v10  ;;  %14423 = vmatpush3.bf16.msra.mxu1 %v15779_v9 }
 0x907   : > { %14402 = vmatprep.subr.bf16.mxu0 %v15943_v34  ;;  %14424 = vmatprep.subr.bf16.mxu1 %v15943_v34 }
 0x90a   : > { %14403 = vmatpush3.bf16.msra.mxu0 %v15780_v0  ;;  %14425 = vmatpush3.bf16.msra.mxu1 %v15781_v38 }
 0x90b   : > { %14404 = vmatprep.subr.bf16.mxu0 %v15943_v34  ;;  %14426 = vmatprep.subr.bf16.mxu1 %v15943_v34 }
 0x90e   : > { %14405 = vmatpush3.bf16.msra.mxu0 %v15782_v28  ;;  %14427 = vmatpush3.bf16.msra.mxu1 %v15783_v51 }
 0x90f   : > { %14406 = vmatprep.subr.bf16.mxu0 %v15943_v34  ;;  %v11803_v34 = vld [vmem:[#allocation7] sm:$0x1] }
 0x911   : > { %14429 = vmatmul.mubr.bf16.vlgmr.msra.gmra.mxu1 %v11712_v29 }
 0x912   : > { %14407 = vmatpush3.bf16.msra.mxu0 %v15784_v42 }
 0x915   : > { %14409 = vmatmul.mubr.bf16.vlgmr.msra.gmra.mxu0 %v11592_v35 }
 0x9b1   : > { %v11560_v6 = vpop.f32.mrf.mxu1 }
 0x9b3   : > { %v14390_v23 = vpop.f32.mrf.mxu1 }
 0x9b5   : > { %v11472_v20 = vpop.f32.mrf.mxu0  ;;  %v11563_v39 = vpop.f32.mrf.mxu1 }
 0x9b6   : > { %v11561_v27 = vadd.f32 %v11560_v6, %v11472_v20 }
 0x9b7   : > { %v14370_v47 = vpop.f32.mrf.mxu0  ;;  %v14391_v8 = vpop.f32.mrf.mxu1 }
 0x9b9   : > { %v11475_v21 = vpop.f32.mrf.mxu0 }
 0x9bb   : > { %v14371_v17 = vpop.f32.mrf.mxu0 }
 0x9d1   : > { %v11796_v2 = vpop.f32.mrf.mxu1 }
 0x9d3   : > { %v14430_v43 = vpop.f32.mrf.mxu1 }
 0x9d5   : > { %v11676_v58 = vpop.f32.mrf.mxu0  ;;  %v11799_v25 = vpop.f32.mrf.mxu1 }
 0x9d6   : > { %v11682_v52 = vadd.f32 %v11676_v58, %v11561_v27 }
 0x9d7   : > { %v14410_v30 = vpop.f32.mrf.mxu0  ;;  %v14431_v32 = vpop.f32.mrf.mxu1 }
 0x9d8   : > { %v11802_v26 = vadd.f32 %v11796_v2, %v11682_v52 }
 0x9d9   : > { %v11679_v19 = vpop.f32.mrf.mxu0 }
 0x9da   : > { %v11804_v14 = vadd.f32 %v11803_v34, %v11802_v26 }
 0x9db   : > { %v14411_v41 = vpop.f32.mrf.mxu0 }
 0x9dc   : > { %v11805_v22 = vmin.f32 %v11804_v14, 0.0  ;;  %vm11812_vm10 = vcmp.gt.f32.partialorder %v11804_v14, 0.0 }
 0x9de   : > { %v11808_v36 = vmul.f32 1.442695, %v11805_v22  ;;  %v11806_v7 = vmul.f32 0.5, %v11805_v22 }
 0x9e0   : > { %15917 = vpow2.f32 %v11808_v36 }
 0x9e1   : > { %15919 = vtanh.f32 %v11806_v7 }
 0x9ed   : > { %v15918_v49 = vpop.eup %15917 }
 0x9ee   : > { %v11810_v56 = vadd.f32 1.0, %v15918_v49  ;;  %v15920_v3 = vpop.eup %15919 }
 0x9f0   : > { %v11811_v1 = vmul.f32 %v15920_v3, %v11810_v56 }
 0x9f2   : > { %v11813_v11 = vsel %vm11812_vm10, %v11804_v14, %v11811_v1 }
 0x9f3   : > { %11815 = vst.msk [vmem:[%s438_s15] sm:$0x1] %vm11814_vm15, %v11813_v11 }
 0x9f4 PF: > { %s25_s27 = sadd.s32 1, %s15940_s27  }
 0x9f5   : > { %p22_p4 = scmp.ge.s32.totalorder %s25_s27, 4  }
 0x9f7   :  { %24 = sbr.rel (!%p22_p4) target bundleno = 3 (0x3), region = 123 }

</bundles_post_ra>
